<compile_context>
chip_gen: v7x
topology: tpu7x:2x2x1
jax: 0.10.0
libtpu: 0.0.40
codegen_flags: <defaults>
</compile_context>

<pallas_src>
import math

import jax
import jax.numpy as jnp
from jax import lax
from jax.experimental import pallas as pl
from jax.experimental.pallas import tpu as pltpu


_BN_EPS = 1e-5
_PAD3 = 8           # the 3 input coordinates are zero-padded to 8 lanes
_MAX_TILE_N = 1024  # N-tile cap; (TN,1024) f32 intermediate = 4 MiB at TN=1024,
                    # fits the default scoped VMEM on v5e/v6e/v7x.


def _round_up(v, m):
    return ((v + m - 1) // m) * m


# ---------------------------------------------------------------------------
# Generic fused kernel: chain of 1x1 convs (per-point matmuls) + MaxPool1d(N)
# ---------------------------------------------------------------------------

def _make_chain_maxpool_kernel(per_batch, tn, n_inner, n_valid, needs_mask):
    """Builds a kernel computing relu(..relu(x@W0+b0)..@W_{L-1}) max-pooled over N.

    per_batch[i]: True if layer i's weight ref is (1, Cin, Cout) (per-batch,
    folded bmm), else (Cin, Cout) shared.  The LAST layer's bias+ReLU is
    deferred until after the max (exact for a per-channel bias).
    Ref order: x, (w0, b0), ..., (w_{L-1}, b_{L-1}), out.
    """
    n_layers = len(per_batch)

    def kernel(*refs):
        x_ref = refs[0]
        o_ref = refs[-1]
        b_last_ref = refs[2 * n_layers]
        j = pl.program_id(2)

        @pl.when(j == 0)
        def _init():
            o_ref[...] = jnp.full_like(o_ref, -jnp.inf)

        h = x_ref[0]                                  # (TN, C0) bf16
        for li in range(n_layers):
            w_ref = refs[1 + 2 * li]
            b_ref = refs[2 + 2 * li]
            w = w_ref[0] if per_batch[li] else w_ref[...]
            h = jnp.dot(h, w, preferred_element_type=jnp.float32)
            if li < n_layers - 1:                     # last layer: raw matmul only
                h = jnp.maximum(h + b_ref[...], 0.0).astype(jnp.bfloat16)

        if needs_mask:  # padded tail rows must not contribute to the max
            row = ((pl.program_id(1) * n_inner + j) * tn
                   + lax.broadcasted_iota(jnp.int32, h.shape, 0))
            h = jnp.where(row < n_valid, h, -jnp.inf)

        o_ref[0] = jnp.maximum(o_ref[0], jnp.max(h, axis=0, keepdims=True))

        @pl.when(j == pl.num_programs(2) - 1)
        def _finalize():                              # deferred bias + ReLU, once
            o_ref[0] = jnp.maximum(o_ref[0] + b_last_ref[...], 0.0)

    return kernel


def chain_maxpool(x, layers, per_batch):
    """Fused conv-chain + MaxPool1d(N).

    x: (B, N, C0) bf16.  layers[i] = {"w": (Cin,Cout) or (B,Cin,Cout) bf16,
    "b": (1,Cout) f32}.  Returns (B, C_last) f32.
    """
    B, N, C0 = x.shape
    Cout = layers[-1]["w"].shape[-1]

    TN = _round_up(N, 8) if N <= _MAX_TILE_N else _MAX_TILE_N
    n_tiles = -(-N // TN)
    # Use both v7x TensorCores when the batch axis alone cannot (B == 1).
    n_par = 2 if (B == 1 and n_tiles >= 2) else 1
    n_inner = -(-n_tiles // n_par)
    N_pad = n_par * n_inner * TN
    if N_pad != N:
        x = jnp.pad(x, ((0, 0), (0, N_pad - N), (0, 0)))
    needs_mask = N_pad != N

    in_specs = [pl.BlockSpec((1, TN, C0),
                             lambda b, p, j, _ni=n_inner: (b, p * _ni + j, 0))]
    args = [x]
    for flag, layer in zip(per_batch, layers):
        w, bias = layer["w"], layer["b"]
        if flag:
            in_specs.append(pl.BlockSpec((1,) + w.shape[1:],
                                         lambda b, p, j: (b, 0, 0)))
        else:
            in_specs.append(pl.BlockSpec(w.shape, lambda b, p, j: (0, 0)))
        in_specs.append(pl.BlockSpec(bias.shape, lambda b, p, j: (0, 0)))
        args += [w, bias]

    kernel = _make_chain_maxpool_kernel(tuple(per_batch), TN, n_inner, N,
                                        needs_mask)
    out = pl.pallas_call(
        kernel,
        out_shape=jax.ShapeDtypeStruct((B * n_par, 1, Cout), jnp.float32),
        grid=(B, n_par, n_inner),
        in_specs=in_specs,
        out_specs=pl.BlockSpec((1, 1, Cout),
                               lambda b, p, j, _np=n_par: (b * _np + p, 0, 0)),
        compiler_params=pltpu.CompilerParams(
            dimension_semantics=("parallel", "parallel", "arbitrary")),
    )(*args)
    # combine the (at most 2) per-core partial maxes; exact since ReLU is monotone
    return jnp.max(out.reshape(B, n_par, Cout), axis=1)


# ---------------------------------------------------------------------------
# Fused FC head (fc1+relu -> fc2+relu -> fc3) on a small (padded) batch
# ---------------------------------------------------------------------------

def _fc_head_kernel(x_ref, w1_ref, b1_ref, w2_ref, b2_ref, w3_ref, b3_ref, o_ref):
    h = jnp.dot(x_ref[...].astype(jnp.bfloat16), w1_ref[...],
                preferred_element_type=jnp.float32)
    h = jnp.maximum(h + b1_ref[...], 0.0).astype(jnp.bfloat16)
    h = jnp.dot(h, w2_ref[...], preferred_element_type=jnp.float32)
    h = jnp.maximum(h + b2_ref[...], 0.0).astype(jnp.bfloat16)
    y = jnp.dot(h, w3_ref[...], preferred_element_type=jnp.float32)
    o_ref[...] = (y + b3_ref[...]).astype(o_ref.dtype)


def fc_head(x, l1, l2, l3):
    """x: (B, Din) f32 -> (B, Dout) f32, single fused pallas_call."""
    B, Din = x.shape
    D3 = l3["w"].shape[1]
    Bp = max(8, ((B + 7) // 8) * 8)  # keep the matmul at least one sublane tall
    if Bp != B:
        x = jnp.concatenate([x, jnp.zeros((Bp - B, Din), x.dtype)], axis=0)
    out = pl.pallas_call(
        _fc_head_kernel,
        out_shape=jax.ShapeDtypeStruct((Bp, D3), jnp.float32),
    )(x, l1["w"], l1["b"], l2["w"], l2["b"], l3["w"], l3["b"])
    return out[:B]


# ---------------------------------------------------------------------------
# Parameter init (deterministic, PyTorch-like uniform init; BN folded, bf16 W)
# ---------------------------------------------------------------------------

def _uniform_linear(key, din, dout):
    k1, k2 = jax.random.split(key)
    bound = 1.0 / math.sqrt(din)
    w = jax.random.uniform(k1, (din, dout), jnp.float32, -bound, bound)
    b = jax.random.uniform(k2, (dout,), jnp.float32, -bound, bound)
    return w, b


def _pack(w, b):
    # kernel-ready layout: bf16 weights for the MXU, f32 row-vector bias
    return {"w": w.astype(jnp.bfloat16), "b": b.reshape(1, -1).astype(jnp.float32)}


def _init_plain(key, din, dout):
    return _pack(*_uniform_linear(key, din, dout))


def _init_with_bn(key, din, dout):
    """Conv1d(k=1)/Linear followed by BatchNorm1d (eval mode), folded into w/b."""
    k1, k2 = jax.random.split(key)
    w, b = _uniform_linear(k1, din, dout)
    k3, k4 = jax.random.split(k2)
    gamma = 1.0 + 0.1 * jax.random.normal(k3, (dout,), jnp.float32)
    beta = 0.1 * jax.random.normal(k4, (dout,), jnp.float32)
    running_mean = jnp.zeros((dout,), jnp.float32)
    running_var = jnp.ones((dout,), jnp.float32)
    scale = gamma / jnp.sqrt(running_var + _BN_EPS)
    return _pack(w * scale[None, :], (b - running_mean) * scale + beta)


def init_tnet(key, k, filters=(64, 128, 1024), linear_layers=(512, 256)):
    ks = jax.random.split(key, 6)
    conv1 = _init_with_bn(ks[0], k, filters[0])
    if k == 3:
        # TNet(3) consumes the zero-padded (B, N, 8) coordinates.
        conv1 = {"w": jnp.pad(conv1["w"], ((0, _PAD3 - 3), (0, 0))),
                 "b": conv1["b"]}
    return {
        "conv1": conv1,
        "conv2": _init_with_bn(ks[1], filters[0], filters[1]),
        "conv3": _init_with_bn(ks[2], filters[1], filters[2]),
        "fc1": _init_plain(ks[3], filters[2], linear_layers[0]),
        "fc2": _init_plain(ks[4], linear_layers[0], linear_layers[1]),
        "fc3": _init_plain(ks[5], linear_layers[1], k * k),
    }


def init_transformer(key, filters=(64, 128, 1024)):
    ks = jax.random.split(key, 5)
    return {
        "input_transform": init_tnet(ks[0], 3),
        "feature_transform": init_tnet(ks[1], 64),
        "conv_1": _init_with_bn(ks[2], 3, filters[0]),
        "conv_2a": _init_with_bn(ks[3], filters[0], filters[1]),
        "conv_2b": _init_with_bn(ks[4], filters[1], filters[2]),
    }


def init_pointnet(key, filters=(1024, 512, 256), latent=100):
    ks = jax.random.split(key, 4)
    return {
        "transform": init_transformer(ks[0]),
        "fc1": _init_with_bn(ks[1], filters[0], filters[1]),   # fc1 + bn1 folded
        "fc2": _init_with_bn(ks[2], filters[1], filters[2]),   # fc2 + bn2 folded
        "fc3": _init_plain(ks[3], filters[2], latent),
    }


# ---------------------------------------------------------------------------
# Forward passes (tiny glue in plain JAX, hot path in fused Pallas kernels)
# ---------------------------------------------------------------------------

def tnet3_forward(pts8, p):
    """Input TNet: pts8 (B, N, 8) bf16 -> (B, 3, 3) f32."""
    pooled = chain_maxpool(pts8, [p["conv1"], p["conv2"], p["conv3"]],
                           (False, False, False))
    m = fc_head(pooled, p["fc1"], p["fc2"], p["fc3"])
    return m.reshape(-1, 3, 3) + jnp.eye(3, dtype=m.dtype)[None]


def transformer_forward(x, p):
    # x: (B, 1, N, 3) -> channel-last points (B, N, 3)
    pts = jnp.squeeze(x, axis=1)
    # zero-pad the 3 coordinates to 8 lanes once; matching weight rows are zero
    pts8 = jnp.pad(pts, ((0, 0), (0, 0), (0, _PAD3 - 3))).astype(jnp.bfloat16)

    matrix3x3 = tnet3_forward(pts8, p["input_transform"])          # (B, 3, 3)

    # fold torch.bmm(pts, matrix3x3) into conv_1: W_eff1[b] = matrix3x3[b] @ W
    w_eff1 = jnp.einsum("bij,jk->bik", matrix3x3,
                        p["conv_1"]["w"].astype(jnp.float32))       # (B, 3, 64)
    w_eff1 = jnp.pad(w_eff1, ((0, 0), (0, _PAD3 - 3), (0, 0))).astype(jnp.bfloat16)
    conv1_eff = {"w": w_eff1, "b": p["conv_1"]["b"]}

    # feature TNet with conv_1 recomputed inside (no (B,N,64) HBM intermediate)
    ft = p["feature_transform"]
    pooled64 = chain_maxpool(
        pts8, [conv1_eff, ft["conv1"], ft["conv2"], ft["conv3"]],
        (True, False, False, False))
    m64 = fc_head(pooled64, ft["fc1"], ft["fc2"], ft["fc3"])
    matrix64x64 = m64.reshape(-1, 64, 64) + jnp.eye(64, dtype=m64.dtype)[None]

    # fold torch.bmm(h, matrix64x64) into conv_2a; conv_1 recomputed again,
    # conv_2b bias/ReLU deferred past the max-pool inside the kernel.
    w_eff2a = jnp.einsum("bij,jk->bik", matrix64x64,
                         p["conv_2a"]["w"].astype(jnp.float32)
                         ).astype(jnp.bfloat16)                     # (B, 64, 128)
    conv2a_eff = {"w": w_eff2a, "b": p["conv_2a"]["b"]}
    feat = chain_maxpool(pts8, [conv1_eff, conv2a_eff, p["conv_2b"]],
                         (True, True, False))                       # (B, 1024)
    return feat, matrix3x3, matrix64x64


def pointnet_forward(x, p):
    feat, _m3, _m64 = transformer_forward(x, p["transform"])
    # fc1+bn1+relu -> dropout(identity) -> fc2+bn2+relu -> fc3, one fused kernel
    return fc_head(feat, p["fc1"], p["fc2"], p["fc3"])


# ---------------------------------------------------------------------------
# Main
# ---------------------------------------------------------------------------

if __name__ == "__main__":
    key = jax.random.PRNGKey(0)
    k_param, k_input = jax.random.split(key)

    B, N = 2, 64  # small demo point cloud: 2 clouds of 64 points, 3 coords each
    params = init_pointnet(k_param)
    x = jax.random.normal(k_input, (B, 1, N, 3), jnp.float32)

    fwd = jax.jit(pointnet_forward)
    out = jax.block_until_ready(fwd(x, params))

    assert out.shape == (B, 100), out.shape
    assert out.dtype == jnp.float32
    assert bool(jnp.all(jnp.isfinite(out)))
    print("KERNEL_OK")
</pallas_src>

<mosaic_0001>
module attributes {stable_mosaic.version = 11 : i64} {
  func.func @kernel(%arg0: i32, %arg1: i32, %arg2: i32, %arg3: memref<1x64x8xbf16, #tpu.memory_space<vmem>>, %arg4: memref<8x64xbf16, #tpu.memory_space<vmem>>, %arg5: memref<1x64xf32, #tpu.memory_space<vmem>>, %arg6: memref<64x128xbf16, #tpu.memory_space<vmem>>, %arg7: memref<1x128xf32, #tpu.memory_space<vmem>>, %arg8: memref<128x1024xbf16, #tpu.memory_space<vmem>>, %arg9: memref<1x1024xf32, #tpu.memory_space<vmem>>, %arg10: memref<1x1x1024xf32, #tpu.memory_space<vmem>>) attributes {dimension_semantics = [#tpu.dimension_semantics<parallel>, #tpu.dimension_semantics<parallel>, #tpu.dimension_semantics<arbitrary>], iteration_bounds = array<i64: 2, 1, 1>, scalar_prefetch = 0 : i64, scratch_operands = 0 : i64, tpu.core_type = #tpu.core_type<tc>, window_params = [{transform_indices = @transform_0, window_bounds = array<i64: 1, 64, 8>}, {pipeline_mode = #tpu.pipeline_mode<synchronous>, transform_indices = @transform_1, window_bounds = array<i64: 8, 64>}, {pipeline_mode = #tpu.pipeline_mode<synchronous>, transform_indices = @transform_2, window_bounds = array<i64: 1, 64>}, {pipeline_mode = #tpu.pipeline_mode<synchronous>, transform_indices = @transform_3, window_bounds = array<i64: 64, 128>}, {pipeline_mode = #tpu.pipeline_mode<synchronous>, transform_indices = @transform_4, window_bounds = array<i64: 1, 128>}, {pipeline_mode = #tpu.pipeline_mode<synchronous>, transform_indices = @transform_5, window_bounds = array<i64: 128, 1024>}, {pipeline_mode = #tpu.pipeline_mode<synchronous>, transform_indices = @transform_6, window_bounds = array<i64: 1, 1024>}, {transform_indices = @transform_7, window_bounds = array<i64: 1, 1, 1024>}]} {
    %c0_i32 = arith.constant 0 : i32
    %0 = arith.cmpi eq, %arg2, %c0_i32 : i32
    %1 = arith.extui %0 : i1 to i32
    %c0_i32_0 = arith.constant 0 : i32
    %2 = arith.cmpi ne, %1, %c0_i32_0 : i32
    scf.if %2 {
      %cst_26 = arith.constant 0xFF800000 : f32
      %34 = vector.broadcast %cst_26 : f32 to vector<1x1x1024xf32>
      %c0_27 = arith.constant 0 : index
      %c0_28 = arith.constant 0 : index
      %c0_29 = arith.constant 0 : index
      %35 = vector.load %arg10[%c0_27, %c0_28, %c0_29] : memref<1x1x1024xf32, #tpu.memory_space<vmem>>, vector<1x1x1024xf32>
      tpu.vector_store %arg10[%c0_27, %c0_28, %c0_29], %34 {strides = array<i32>} : memref<1x1x1024xf32, #tpu.memory_space<vmem>>, vector<1x1x1024xf32>,
    } else {
    }
    %c0 = arith.constant 0 : index
    %c0_1 = arith.constant 0 : index
    %c0_2 = arith.constant 0 : index
    %3 = vector.load %arg3[%c0, %c0_1, %c0_2] : memref<1x64x8xbf16, #tpu.memory_space<vmem>>, vector<1x64x8xbf16>
    %4 = vector.shape_cast %3 : vector<1x64x8xbf16> to vector<64x8xbf16>
    %c0_3 = arith.constant 0 : index
    %c0_4 = arith.constant 0 : index
    %5 = vector.load %arg4[%c0_3, %c0_4] : memref<8x64xbf16, #tpu.memory_space<vmem>>, vector<8x64xbf16>
    %cst = arith.constant dense<0.000000e+00> : vector<64x64xf32>
    %6 = tpu.matmul %4, %5, %cst {dimension_numbers = #tpu.dot_dimension_numbers<[1], [0], [0], [1], [0, 0, 1, 1], [], []>} : vector<64x8xbf16>, vector<8x64xbf16>, vector<64x64xf32> -> vector<64x64xf32>
    %c0_5 = arith.constant 0 : index
    %c0_6 = arith.constant 0 : index
    %7 = vector.load %arg5[%c0_5, %c0_6] : memref<1x64xf32, #tpu.memory_space<vmem>>, vector<1x64xf32>
    %8 = vector.broadcast %7 : vector<1x64xf32> to vector<64x64xf32>
    %9 = arith.addf %6, %8 : vector<64x64xf32>
    %cst_7 = arith.constant 0.000000e+00 : f32
    %10 = vector.broadcast %cst_7 : f32 to vector<64x64xf32>
    %11 = arith.maximumf %9, %10 : vector<64x64xf32>
    %12 = arith.truncf %11 : vector<64x64xf32> to vector<64x64xbf16>
    %c0_8 = arith.constant 0 : index
    %c0_9 = arith.constant 0 : index
    %13 = vector.load %arg6[%c0_8, %c0_9] : memref<64x128xbf16, #tpu.memory_space<vmem>>, vector<64x128xbf16>
    %cst_10 = arith.constant dense<0.000000e+00> : vector<64x128xf32>
    %14 = tpu.matmul %12, %13, %cst_10 {dimension_numbers = #tpu.dot_dimension_numbers<[1], [0], [0], [1], [0, 0, 1, 1], [], []>} : vector<64x64xbf16>, vector<64x128xbf16>, vector<64x128xf32> -> vector<64x128xf32>
    %c0_11 = arith.constant 0 : index
    %c0_12 = arith.constant 0 : index
    %15 = vector.load %arg7[%c0_11, %c0_12] : memref<1x128xf32, #tpu.memory_space<vmem>>, vector<1x128xf32>
    %16 = vector.broadcast %15 : vector<1x128xf32> to vector<64x128xf32>
    %17 = arith.addf %14, %16 : vector<64x128xf32>
    %cst_13 = arith.constant 0.000000e+00 : f32
    %18 = vector.broadcast %cst_13 : f32 to vector<64x128xf32>
    %19 = arith.maximumf %17, %18 : vector<64x128xf32>
    %20 = arith.truncf %19 : vector<64x128xf32> to vector<64x128xbf16>
    %c0_14 = arith.constant 0 : index
    %c0_15 = arith.constant 0 : index
    %21 = vector.load %arg8[%c0_14, %c0_15] : memref<128x1024xbf16, #tpu.memory_space<vmem>>, vector<128x1024xbf16>
    %cst_16 = arith.constant dense<0.000000e+00> : vector<64x1024xf32>
    %22 = tpu.matmul %20, %21, %cst_16 {dimension_numbers = #tpu.dot_dimension_numbers<[1], [0], [0], [1], [0, 0, 1, 1], [], []>} : vector<64x128xbf16>, vector<128x1024xbf16>, vector<64x1024xf32> -> vector<64x1024xf32>
    %c0_17 = arith.constant 0 : index
    %c0_18 = arith.constant 0 : index
    %c0_19 = arith.constant 0 : index
    %23 = vector.load %arg10[%c0_17, %c0_18, %c0_19] : memref<1x1x1024xf32, #tpu.memory_space<vmem>>, vector<1x1x1024xf32>
    %24 = vector.shape_cast %23 : vector<1x1x1024xf32> to vector<1x1024xf32>
    %cst_20 = arith.constant dense<0xFF800000> : vector<1024xf32>
    %25 = vector.multi_reduction <maximumf>, %22, %cst_20 [0] : vector<64x1024xf32> to vector<1024xf32>
    %26 = vector.shape_cast %25 : vector<1024xf32> to vector<1x1024xf32>
    %27 = arith.maximumf %24, %26 : vector<1x1024xf32>
    %c0_21 = arith.constant 0 : index
    %c0_22 = arith.constant 0 : index
    %c0_23 = arith.constant 0 : index
    %28 = vector.load %arg10[%c0_21, %c0_22, %c0_23] : memref<1x1x1024xf32, #tpu.memory_space<vmem>>, vector<1x1x1024xf32>
    %29 = vector.shape_cast %28 : vector<1x1x1024xf32> to vector<1x1024xf32>
    %30 = vector.shape_cast %27 : vector<1x1024xf32> to vector<1x1x1024xf32>
    tpu.vector_store %arg10[%c0_21, %c0_22, %c0_23], %30 {strides = array<i32>} : memref<1x1x1024xf32, #tpu.memory_space<vmem>>, vector<1x1x1024xf32>,
    %c0_i32_24 = arith.constant 0 : i32
    %31 = arith.cmpi eq, %arg2, %c0_i32_24 : i32
    %32 = arith.extui %31 : i1 to i32
    %c0_i32_25 = arith.constant 0 : i32
    %33 = arith.cmpi ne, %32, %c0_i32_25 : i32
    scf.if %33 {
      %c0_26 = arith.constant 0 : index
      %c0_27 = arith.constant 0 : index
      %c0_28 = arith.constant 0 : index
      %34 = vector.load %arg10[%c0_26, %c0_27, %c0_28] : memref<1x1x1024xf32, #tpu.memory_space<vmem>>, vector<1x1x1024xf32>
      %35 = vector.shape_cast %34 : vector<1x1x1024xf32> to vector<1x1024xf32>
      %c0_29 = arith.constant 0 : index
      %c0_30 = arith.constant 0 : index
      %36 = vector.load %arg9[%c0_29, %c0_30] : memref<1x1024xf32, #tpu.memory_space<vmem>>, vector<1x1024xf32>
      %37 = arith.addf %35, %36 : vector<1x1024xf32>
      %cst_31 = arith.constant 0.000000e+00 : f32
      %38 = vector.broadcast %cst_31 : f32 to vector<1x1024xf32>
      %39 = arith.maximumf %37, %38 : vector<1x1024xf32>
      %c0_32 = arith.constant 0 : index
      %c0_33 = arith.constant 0 : index
      %c0_34 = arith.constant 0 : index
      %40 = vector.load %arg10[%c0_32, %c0_33, %c0_34] : memref<1x1x1024xf32, #tpu.memory_space<vmem>>, vector<1x1x1024xf32>
      %41 = vector.shape_cast %40 : vector<1x1x1024xf32> to vector<1x1024xf32>
      %42 = vector.shape_cast %39 : vector<1x1024xf32> to vector<1x1x1024xf32>
      tpu.vector_store %arg10[%c0_32, %c0_33, %c0_34], %42 {strides = array<i32>} : memref<1x1x1024xf32, #tpu.memory_space<vmem>>, vector<1x1x1024xf32>,
    } else {
    }
    return
  }
  func.func @transform_0(%arg0: i32, %arg1: i32, %arg2: i32) -> (i32, i32, i32) {
    %c1_i32 = arith.constant 1 : i32
    %0 = arith.muli %arg1, %c1_i32 : i32
    %1 = arith.addi %0, %arg2 : i32
    %c0_i32 = arith.constant 0 : i32
    %c0_i32_0 = arith.constant 0 : i32
    return %arg0, %1, %c0_i32 : i32, i32, i32
  }
  func.func @transform_1(%arg0: i32, %arg1: i32, %arg2: i32) -> (i32, i32) {
    %c0_i32 = arith.constant 0 : i32
    %c0_i32_0 = arith.constant 0 : i32
    %c0_i32_1 = arith.constant 0 : i32
    return %c0_i32, %c0_i32_0 : i32, i32
  }
  func.func @transform_2(%arg0: i32, %arg1: i32, %arg2: i32) -> (i32, i32) {
    %c0_i32 = arith.constant 0 : i32
    %c0_i32_0 = arith.constant 0 : i32
    %c0_i32_1 = arith.constant 0 : i32
    return %c0_i32, %c0_i32_0 : i32, i32
  }
  func.func @transform_3(%arg0: i32, %arg1: i32, %arg2: i32) -> (i32, i32) {
    %c0_i32 = arith.constant 0 : i32
    %c0_i32_0 = arith.constant 0 : i32
    %c0_i32_1 = arith.constant 0 : i32
    return %c0_i32, %c0_i32_0 : i32, i32
  }
  func.func @transform_4(%arg0: i32, %arg1: i32, %arg2: i32) -> (i32, i32) {
    %c0_i32 = arith.constant 0 : i32
    %c0_i32_0 = arith.constant 0 : i32
    %c0_i32_1 = arith.constant 0 : i32
    return %c0_i32, %c0_i32_0 : i32, i32
  }
  func.func @transform_5(%arg0: i32, %arg1: i32, %arg2: i32) -> (i32, i32) {
    %c0_i32 = arith.constant 0 : i32
    %c0_i32_0 = arith.constant 0 : i32
    %c0_i32_1 = arith.constant 0 : i32
    return %c0_i32, %c0_i32_0 : i32, i32
  }
  func.func @transform_6(%arg0: i32, %arg1: i32, %arg2: i32) -> (i32, i32) {
    %c0_i32 = arith.constant 0 : i32
    %c0_i32_0 = arith.constant 0 : i32
    %c0_i32_1 = arith.constant 0 : i32
    return %c0_i32, %c0_i32_0 : i32, i32
  }
  func.func @transform_7(%arg0: i32, %arg1: i32, %arg2: i32) -> (i32, i32, i32) {
    %c1_i32 = arith.constant 1 : i32
    %0 = arith.muli %arg0, %c1_i32 : i32
    %1 = arith.addi %0, %arg1 : i32
    %c0_i32 = arith.constant 0 : i32
    %c0_i32_0 = arith.constant 0 : i32
    %c0_i32_1 = arith.constant 0 : i32
    return %1, %c0_i32, %c0_i32_0 : i32, i32, i32
  }
}

module attributes {stable_mosaic.version = 11 : i64} {
  func.func @_fc_head_kernel(%arg0: memref<8x1024xf32, #tpu.memory_space<vmem>>, %arg1: memref<1024x512xbf16, #tpu.memory_space<vmem>>, %arg2: memref<1x512xf32, #tpu.memory_space<vmem>>, %arg3: memref<512x256xbf16, #tpu.memory_space<vmem>>, %arg4: memref<1x256xf32, #tpu.memory_space<vmem>>, %arg5: memref<256x9xbf16, #tpu.memory_space<vmem>>, %arg6: memref<1x9xf32, #tpu.memory_space<vmem>>, %arg7: memref<8x9xf32, #tpu.memory_space<vmem>>) attributes {dimension_semantics = [], scalar_prefetch = 0 : i64, scratch_operands = 0 : i64, tpu.core_type = #tpu.core_type<tc>} {
    %c0 = arith.constant 0 : index
    %c0_0 = arith.constant 0 : index
    %0 = vector.load %arg0[%c0, %c0_0] : memref<8x1024xf32, #tpu.memory_space<vmem>>, vector<8x1024xf32>
    %1 = arith.truncf %0 : vector<8x1024xf32> to vector<8x1024xbf16>
    %c0_1 = arith.constant 0 : index
    %c0_2 = arith.constant 0 : index
    %2 = vector.load %arg1[%c0_1, %c0_2] : memref<1024x512xbf16, #tpu.memory_space<vmem>>, vector<1024x512xbf16>
    %cst = arith.constant dense<0.000000e+00> : vector<8x512xf32>
    %3 = tpu.matmul %1, %2, %cst {dimension_numbers = #tpu.dot_dimension_numbers<[1], [0], [0], [1], [0, 0, 1, 1], [], []>} : vector<8x1024xbf16>, vector<1024x512xbf16>, vector<8x512xf32> -> vector<8x512xf32>
    %c0_3 = arith.constant 0 : index
    %c0_4 = arith.constant 0 : index
    %4 = vector.load %arg2[%c0_3, %c0_4] : memref<1x512xf32, #tpu.memory_space<vmem>>, vector<1x512xf32>
    %5 = vector.broadcast %4 : vector<1x512xf32> to vector<8x512xf32>
    %6 = arith.addf %3, %5 : vector<8x512xf32>
    %cst_5 = arith.constant 0.000000e+00 : f32
    %7 = vector.broadcast %cst_5 : f32 to vector<8x512xf32>
    %8 = arith.maximumf %6, %7 : vector<8x512xf32>
    %9 = arith.truncf %8 : vector<8x512xf32> to vector<8x512xbf16>
    %c0_6 = arith.constant 0 : index
    %c0_7 = arith.constant 0 : index
    %10 = vector.load %arg3[%c0_6, %c0_7] : memref<512x256xbf16, #tpu.memory_space<vmem>>, vector<512x256xbf16>
    %cst_8 = arith.constant dense<0.000000e+00> : vector<8x256xf32>
    %11 = tpu.matmul %9, %10, %cst_8 {dimension_numbers = #tpu.dot_dimension_numbers<[1], [0], [0], [1], [0, 0, 1, 1], [], []>} : vector<8x512xbf16>, vector<512x256xbf16>, vector<8x256xf32> -> vector<8x256xf32>
    %c0_9 = arith.constant 0 : index
    %c0_10 = arith.constant 0 : index
    %12 = vector.load %arg4[%c0_9, %c0_10] : memref<1x256xf32, #tpu.memory_space<vmem>>, vector<1x256xf32>
    %13 = vector.broadcast %12 : vector<1x256xf32> to vector<8x256xf32>
    %14 = arith.addf %11, %13 : vector<8x256xf32>
    %cst_11 = arith.constant 0.000000e+00 : f32
    %15 = vector.broadcast %cst_11 : f32 to vector<8x256xf32>
    %16 = arith.maximumf %14, %15 : vector<8x256xf32>
    %17 = arith.truncf %16 : vector<8x256xf32> to vector<8x256xbf16>
    %c0_12 = arith.constant 0 : index
    %c0_13 = arith.constant 0 : index
    %18 = vector.load %arg5[%c0_12, %c0_13] : memref<256x9xbf16, #tpu.memory_space<vmem>>, vector<256x9xbf16>
    %cst_14 = arith.constant dense<0.000000e+00> : vector<8x9xf32>
    %19 = tpu.matmul %17, %18, %cst_14 {dimension_numbers = #tpu.dot_dimension_numbers<[1], [0], [0], [1], [0, 0, 1, 1], [], []>} : vector<8x256xbf16>, vector<256x9xbf16>, vector<8x9xf32> -> vector<8x9xf32>
    %c0_15 = arith.constant 0 : index
    %c0_16 = arith.constant 0 : index
    %20 = vector.load %arg6[%c0_15, %c0_16] : memref<1x9xf32, #tpu.memory_space<vmem>>, vector<1x9xf32>
    %21 = vector.broadcast %20 : vector<1x9xf32> to vector<8x9xf32>
    %22 = arith.addf %19, %21 : vector<8x9xf32>
    %c0_17 = arith.constant 0 : index
    %c0_18 = arith.constant 0 : index
    %23 = vector.load %arg7[%c0_17, %c0_18] : memref<8x9xf32, #tpu.memory_space<vmem>>, vector<8x9xf32>
    tpu.vector_store %arg7[%c0_17, %c0_18], %22 {strides = array<i32>} : memref<8x9xf32, #tpu.memory_space<vmem>>, vector<8x9xf32>,
    return
  }
}

module attributes {stable_mosaic.version = 11 : i64} {
  func.func @kernel(%arg0: i32, %arg1: i32, %arg2: i32, %arg3: memref<1x64x8xbf16, #tpu.memory_space<vmem>>, %arg4: memref<1x8x64xbf16, #tpu.memory_space<vmem>>, %arg5: memref<1x64xf32, #tpu.memory_space<vmem>>, %arg6: memref<64x64xbf16, #tpu.memory_space<vmem>>, %arg7: memref<1x64xf32, #tpu.memory_space<vmem>>, %arg8: memref<64x128xbf16, #tpu.memory_space<vmem>>, %arg9: memref<1x128xf32, #tpu.memory_space<vmem>>, %arg10: memref<128x1024xbf16, #tpu.memory_space<vmem>>, %arg11: memref<1x1024xf32, #tpu.memory_space<vmem>>, %arg12: memref<1x1x1024xf32, #tpu.memory_space<vmem>>) attributes {dimension_semantics = [#tpu.dimension_semantics<parallel>, #tpu.dimension_semantics<parallel>, #tpu.dimension_semantics<arbitrary>], iteration_bounds = array<i64: 2, 1, 1>, scalar_prefetch = 0 : i64, scratch_operands = 0 : i64, tpu.core_type = #tpu.core_type<tc>, window_params = [{transform_indices = @transform_0, window_bounds = array<i64: 1, 64, 8>}, {transform_indices = @transform_1, window_bounds = array<i64: 1, 8, 64>}, {pipeline_mode = #tpu.pipeline_mode<synchronous>, transform_indices = @transform_2, window_bounds = array<i64: 1, 64>}, {pipeline_mode = #tpu.pipeline_mode<synchronous>, transform_indices = @transform_3, window_bounds = array<i64: 64, 64>}, {pipeline_mode = #tpu.pipeline_mode<synchronous>, transform_indices = @transform_4, window_bounds = array<i64: 1, 64>}, {pipeline_mode = #tpu.pipeline_mode<synchronous>, transform_indices = @transform_5, window_bounds = array<i64: 64, 128>}, {pipeline_mode = #tpu.pipeline_mode<synchronous>, transform_indices = @transform_6, window_bounds = array<i64: 1, 128>}, {pipeline_mode = #tpu.pipeline_mode<synchronous>, transform_indices = @transform_7, window_bounds = array<i64: 128, 1024>}, {pipeline_mode = #tpu.pipeline_mode<synchronous>, transform_indices = @transform_8, window_bounds = array<i64: 1, 1024>}, {transform_indices = @transform_9, window_bounds = array<i64: 1, 1, 1024>}]} {
    %c0_i32 = arith.constant 0 : i32
    %0 = arith.cmpi eq, %arg2, %c0_i32 : i32
    %1 = arith.extui %0 : i1 to i32
    %c0_i32_0 = arith.constant 0 : i32
    %2 = arith.cmpi ne, %1, %c0_i32_0 : i32
    scf.if %2 {
      %cst_33 = arith.constant 0xFF800000 : f32
      %43 = vector.broadcast %cst_33 : f32 to vector<1x1x1024xf32>
      %c0_34 = arith.constant 0 : index
      %c0_35 = arith.constant 0 : index
      %c0_36 = arith.constant 0 : index
      %44 = vector.load %arg12[%c0_34, %c0_35, %c0_36] : memref<1x1x1024xf32, #tpu.memory_space<vmem>>, vector<1x1x1024xf32>
      tpu.vector_store %arg12[%c0_34, %c0_35, %c0_36], %43 {strides = array<i32>} : memref<1x1x1024xf32, #tpu.memory_space<vmem>>, vector<1x1x1024xf32>,
    } else {
    }
    %c0 = arith.constant 0 : index
    %c0_1 = arith.constant 0 : index
    %c0_2 = arith.constant 0 : index
    %3 = vector.load %arg3[%c0, %c0_1, %c0_2] : memref<1x64x8xbf16, #tpu.memory_space<vmem>>, vector<1x64x8xbf16>
    %4 = vector.shape_cast %3 : vector<1x64x8xbf16> to vector<64x8xbf16>
    %c0_3 = arith.constant 0 : index
    %c0_4 = arith.constant 0 : index
    %c0_5 = arith.constant 0 : index
    %5 = vector.load %arg4[%c0_3, %c0_4, %c0_5] : memref<1x8x64xbf16, #tpu.memory_space<vmem>>, vector<1x8x64xbf16>
    %6 = vector.shape_cast %5 : vector<1x8x64xbf16> to vector<8x64xbf16>
    %cst = arith.constant dense<0.000000e+00> : vector<64x64xf32>
    %7 = tpu.matmul %4, %6, %cst {dimension_numbers = #tpu.dot_dimension_numbers<[1], [0], [0], [1], [0, 0, 1, 1], [], []>} : vector<64x8xbf16>, vector<8x64xbf16>, vector<64x64xf32> -> vector<64x64xf32>
    %c0_6 = arith.constant 0 : index
    %c0_7 = arith.constant 0 : index
    %8 = vector.load %arg5[%c0_6, %c0_7] : memref<1x64xf32, #tpu.memory_space<vmem>>, vector<1x64xf32>
    %9 = vector.broadcast %8 : vector<1x64xf32> to vector<64x64xf32>
    %10 = arith.addf %7, %9 : vector<64x64xf32>
    %cst_8 = arith.constant 0.000000e+00 : f32
    %11 = vector.broadcast %cst_8 : f32 to vector<64x64xf32>
    %12 = arith.maximumf %10, %11 : vector<64x64xf32>
    %13 = arith.truncf %12 : vector<64x64xf32> to vector<64x64xbf16>
    %c0_9 = arith.constant 0 : index
    %c0_10 = arith.constant 0 : index
    %14 = vector.load %arg6[%c0_9, %c0_10] : memref<64x64xbf16, #tpu.memory_space<vmem>>, vector<64x64xbf16>
    %cst_11 = arith.constant dense<0.000000e+00> : vector<64x64xf32>
    %15 = tpu.matmul %13, %14, %cst_11 {dimension_numbers = #tpu.dot_dimension_numbers<[1], [0], [0], [1], [0, 0, 1, 1], [], []>} : vector<64x64xbf16>, vector<64x64xbf16>, vector<64x64xf32> -> vector<64x64xf32>
    %c0_12 = arith.constant 0 : index
    %c0_13 = arith.constant 0 : index
    %16 = vector.load %arg7[%c0_12, %c0_13] : memref<1x64xf32, #tpu.memory_space<vmem>>, vector<1x64xf32>
    %17 = vector.broadcast %16 : vector<1x64xf32> to vector<64x64xf32>
    %18 = arith.addf %15, %17 : vector<64x64xf32>
    %cst_14 = arith.constant 0.000000e+00 : f32
    %19 = vector.broadcast %cst_14 : f32 to vector<64x64xf32>
    %20 = arith.maximumf %18, %19 : vector<64x64xf32>
    %21 = arith.truncf %20 : vector<64x64xf32> to vector<64x64xbf16>
    %c0_15 = arith.constant 0 : index
    %c0_16 = arith.constant 0 : index
    %22 = vector.load %arg8[%c0_15, %c0_16] : memref<64x128xbf16, #tpu.memory_space<vmem>>, vector<64x128xbf16>
    %cst_17 = arith.constant dense<0.000000e+00> : vector<64x128xf32>
    %23 = tpu.matmul %21, %22, %cst_17 {dimension_numbers = #tpu.dot_dimension_numbers<[1], [0], [0], [1], [0, 0, 1, 1], [], []>} : vector<64x64xbf16>, vector<64x128xbf16>, vector<64x128xf32> -> vector<64x128xf32>
    %c0_18 = arith.constant 0 : index
    %c0_19 = arith.constant 0 : index
    %24 = vector.load %arg9[%c0_18, %c0_19] : memref<1x128xf32, #tpu.memory_space<vmem>>, vector<1x128xf32>
    %25 = vector.broadcast %24 : vector<1x128xf32> to vector<64x128xf32>
    %26 = arith.addf %23, %25 : vector<64x128xf32>
    %cst_20 = arith.constant 0.000000e+00 : f32
    %27 = vector.broadcast %cst_20 : f32 to vector<64x128xf32>
    %28 = arith.maximumf %26, %27 : vector<64x128xf32>
    %29 = arith.truncf %28 : vector<64x128xf32> to vector<64x128xbf16>
    %c0_21 = arith.constant 0 : index
    %c0_22 = arith.constant 0 : index
    %30 = vector.load %arg10[%c0_21, %c0_22] : memref<128x1024xbf16, #tpu.memory_space<vmem>>, vector<128x1024xbf16>
    %cst_23 = arith.constant dense<0.000000e+00> : vector<64x1024xf32>
    %31 = tpu.matmul %29, %30, %cst_23 {dimension_numbers = #tpu.dot_dimension_numbers<[1], [0], [0], [1], [0, 0, 1, 1], [], []>} : vector<64x128xbf16>, vector<128x1024xbf16>, vector<64x1024xf32> -> vector<64x1024xf32>
    %c0_24 = arith.constant 0 : index
    %c0_25 = arith.constant 0 : index
    %c0_26 = arith.constant 0 : index
    %32 = vector.load %arg12[%c0_24, %c0_25, %c0_26] : memref<1x1x1024xf32, #tpu.memory_space<vmem>>, vector<1x1x1024xf32>
    %33 = vector.shape_cast %32 : vector<1x1x1024xf32> to vector<1x1024xf32>
    %cst_27 = arith.constant dense<0xFF800000> : vector<1024xf32>
    %34 = vector.multi_reduction <maximumf>, %31, %cst_27 [0] : vector<64x1024xf32> to vector<1024xf32>
    %35 = vector.shape_cast %34 : vector<1024xf32> to vector<1x1024xf32>
    %36 = arith.maximumf %33, %35 : vector<1x1024xf32>
    %c0_28 = arith.constant 0 : index
    %c0_29 = arith.constant 0 : index
    %c0_30 = arith.constant 0 : index
    %37 = vector.load %arg12[%c0_28, %c0_29, %c0_30] : memref<1x1x1024xf32, #tpu.memory_space<vmem>>, vector<1x1x1024xf32>
    %38 = vector.shape_cast %37 : vector<1x1x1024xf32> to vector<1x1024xf32>
    %39 = vector.shape_cast %36 : vector<1x1024xf32> to vector<1x1x1024xf32>
    tpu.vector_store %arg12[%c0_28, %c0_29, %c0_30], %39 {strides = array<i32>} : memref<1x1x1024xf32, #tpu.memory_space<vmem>>, vector<1x1x1024xf32>,
    %c0_i32_31 = arith.constant 0 : i32
    %40 = arith.cmpi eq, %arg2, %c0_i32_31 : i32
    %41 = arith.extui %40 : i1 to i32
    %c0_i32_32 = arith.constant 0 : i32
    %42 = arith.cmpi ne, %41, %c0_i32_32 : i32
    scf.if %42 {
      %c0_33 = arith.constant 0 : index
      %c0_34 = arith.constant 0 : index
      %c0_35 = arith.constant 0 : index
      %43 = vector.load %arg12[%c0_33, %c0_34, %c0_35] : memref<1x1x1024xf32, #tpu.memory_space<vmem>>, vector<1x1x1024xf32>
      %44 = vector.shape_cast %43 : vector<1x1x1024xf32> to vector<1x1024xf32>
      %c0_36 = arith.constant 0 : index
      %c0_37 = arith.constant 0 : index
      %45 = vector.load %arg11[%c0_36, %c0_37] : memref<1x1024xf32, #tpu.memory_space<vmem>>, vector<1x1024xf32>
      %46 = arith.addf %44, %45 : vector<1x1024xf32>
      %cst_38 = arith.constant 0.000000e+00 : f32
      %47 = vector.broadcast %cst_38 : f32 to vector<1x1024xf32>
      %48 = arith.maximumf %46, %47 : vector<1x1024xf32>
      %c0_39 = arith.constant 0 : index
      %c0_40 = arith.constant 0 : index
      %c0_41 = arith.constant 0 : index
      %49 = vector.load %arg12[%c0_39, %c0_40, %c0_41] : memref<1x1x1024xf32, #tpu.memory_space<vmem>>, vector<1x1x1024xf32>
      %50 = vector.shape_cast %49 : vector<1x1x1024xf32> to vector<1x1024xf32>
      %51 = vector.shape_cast %48 : vector<1x1024xf32> to vector<1x1x1024xf32>
      tpu.vector_store %arg12[%c0_39, %c0_40, %c0_41], %51 {strides = array<i32>} : memref<1x1x1024xf32, #tpu.memory_space<vmem>>, vector<1x1x1024xf32>,
    } else {
    }
    return
  }
  func.func @transform_0(%arg0: i32, %arg1: i32, %arg2: i32) -> (i32, i32, i32) {
    %c1_i32 = arith.constant 1 : i32
    %0 = arith.muli %arg1, %c1_i32 : i32
    %1 = arith.addi %0, %arg2 : i32
    %c0_i32 = arith.constant 0 : i32
    %c0_i32_0 = arith.constant 0 : i32
    return %arg0, %1, %c0_i32 : i32, i32, i32
  }
  func.func @transform_1(%arg0: i32, %arg1: i32, %arg2: i32) -> (i32, i32, i32) {
    %c0_i32 = arith.constant 0 : i32
    %c0_i32_0 = arith.constant 0 : i32
    %c0_i32_1 = arith.constant 0 : i32
    return %arg0, %c0_i32, %c0_i32_0 : i32, i32, i32
  }
  func.func @transform_2(%arg0: i32, %arg1: i32, %arg2: i32) -> (i32, i32) {
    %c0_i32 = arith.constant 0 : i32
    %c0_i32_0 = arith.constant 0 : i32
    %c0_i32_1 = arith.constant 0 : i32
    return %c0_i32, %c0_i32_0 : i32, i32
  }
  func.func @transform_3(%arg0: i32, %arg1: i32, %arg2: i32) -> (i32, i32) {
    %c0_i32 = arith.constant 0 : i32
    %c0_i32_0 = arith.constant 0 : i32
    %c0_i32_1 = arith.constant 0 : i32
    return %c0_i32, %c0_i32_0 : i32, i32
  }
  func.func @transform_4(%arg0: i32, %arg1: i32, %arg2: i32) -> (i32, i32) {
    %c0_i32 = arith.constant 0 : i32
    %c0_i32_0 = arith.constant 0 : i32
    %c0_i32_1 = arith.constant 0 : i32
    return %c0_i32, %c0_i32_0 : i32, i32
  }
  func.func @transform_5(%arg0: i32, %arg1: i32, %arg2: i32) -> (i32, i32) {
    %c0_i32 = arith.constant 0 : i32
    %c0_i32_0 = arith.constant 0 : i32
    %c0_i32_1 = arith.constant 0 : i32
    return %c0_i32, %c0_i32_0 : i32, i32
  }
  func.func @transform_6(%arg0: i32, %arg1: i32, %arg2: i32) -> (i32, i32) {
    %c0_i32 = arith.constant 0 : i32
    %c0_i32_0 = arith.constant 0 : i32
    %c0_i32_1 = arith.constant 0 : i32
    return %c0_i32, %c0_i32_0 : i32, i32
  }
  func.func @transform_7(%arg0: i32, %arg1: i32, %arg2: i32) -> (i32, i32) {
    %c0_i32 = arith.constant 0 : i32
    %c0_i32_0 = arith.constant 0 : i32
    %c0_i32_1 = arith.constant 0 : i32
    return %c0_i32, %c0_i32_0 : i32, i32
  }
  func.func @transform_8(%arg0: i32, %arg1: i32, %arg2: i32) -> (i32, i32) {
    %c0_i32 = arith.constant 0 : i32
    %c0_i32_0 = arith.constant 0 : i32
    %c0_i32_1 = arith.constant 0 : i32
    return %c0_i32, %c0_i32_0 : i32, i32
  }
  func.func @transform_9(%arg0: i32, %arg1: i32, %arg2: i32) -> (i32, i32, i32) {
    %c1_i32 = arith.constant 1 : i32
    %0 = arith.muli %arg0, %c1_i32 : i32
    %1 = arith.addi %0, %arg1 : i32
    %c0_i32 = arith.constant 0 : i32
    %c0_i32_0 = arith.constant 0 : i32
    %c0_i32_1 = arith.constant 0 : i32
    return %1, %c0_i32, %c0_i32_0 : i32, i32, i32
  }
}

module attributes {stable_mosaic.version = 11 : i64} {
  func.func @_fc_head_kernel(%arg0: memref<8x1024xf32, #tpu.memory_space<vmem>>, %arg1: memref<1024x512xbf16, #tpu.memory_space<vmem>>, %arg2: memref<1x512xf32, #tpu.memory_space<vmem>>, %arg3: memref<512x256xbf16, #tpu.memory_space<vmem>>, %arg4: memref<1x256xf32, #tpu.memory_space<vmem>>, %arg5: memref<256x4096xbf16, #tpu.memory_space<vmem>>, %arg6: memref<1x4096xf32, #tpu.memory_space<vmem>>, %arg7: memref<8x4096xf32, #tpu.memory_space<vmem>>) attributes {dimension_semantics = [], scalar_prefetch = 0 : i64, scratch_operands = 0 : i64, tpu.core_type = #tpu.core_type<tc>} {
    %c0 = arith.constant 0 : index
    %c0_0 = arith.constant 0 : index
    %0 = vector.load %arg0[%c0, %c0_0] : memref<8x1024xf32, #tpu.memory_space<vmem>>, vector<8x1024xf32>
    %1 = arith.truncf %0 : vector<8x1024xf32> to vector<8x1024xbf16>
    %c0_1 = arith.constant 0 : index
    %c0_2 = arith.constant 0 : index
    %2 = vector.load %arg1[%c0_1, %c0_2] : memref<1024x512xbf16, #tpu.memory_space<vmem>>, vector<1024x512xbf16>
    %cst = arith.constant dense<0.000000e+00> : vector<8x512xf32>
    %3 = tpu.matmul %1, %2, %cst {dimension_numbers = #tpu.dot_dimension_numbers<[1], [0], [0], [1], [0, 0, 1, 1], [], []>} : vector<8x1024xbf16>, vector<1024x512xbf16>, vector<8x512xf32> -> vector<8x512xf32>
    %c0_3 = arith.constant 0 : index
    %c0_4 = arith.constant 0 : index
    %4 = vector.load %arg2[%c0_3, %c0_4] : memref<1x512xf32, #tpu.memory_space<vmem>>, vector<1x512xf32>
    %5 = vector.broadcast %4 : vector<1x512xf32> to vector<8x512xf32>
    %6 = arith.addf %3, %5 : vector<8x512xf32>
    %cst_5 = arith.constant 0.000000e+00 : f32
    %7 = vector.broadcast %cst_5 : f32 to vector<8x512xf32>
    %8 = arith.maximumf %6, %7 : vector<8x512xf32>
    %9 = arith.truncf %8 : vector<8x512xf32> to vector<8x512xbf16>
    %c0_6 = arith.constant 0 : index
    %c0_7 = arith.constant 0 : index
    %10 = vector.load %arg3[%c0_6, %c0_7] : memref<512x256xbf16, #tpu.memory_space<vmem>>, vector<512x256xbf16>
    %cst_8 = arith.constant dense<0.000000e+00> : vector<8x256xf32>
    %11 = tpu.matmul %9, %10, %cst_8 {dimension_numbers = #tpu.dot_dimension_numbers<[1], [0], [0], [1], [0, 0, 1, 1], [], []>} : vector<8x512xbf16>, vector<512x256xbf16>, vector<8x256xf32> -> vector<8x256xf32>
    %c0_9 = arith.constant 0 : index
    %c0_10 = arith.constant 0 : index
    %12 = vector.load %arg4[%c0_9, %c0_10] : memref<1x256xf32, #tpu.memory_space<vmem>>, vector<1x256xf32>
    %13 = vector.broadcast %12 : vector<1x256xf32> to vector<8x256xf32>
    %14 = arith.addf %11, %13 : vector<8x256xf32>
    %cst_11 = arith.constant 0.000000e+00 : f32
    %15 = vector.broadcast %cst_11 : f32 to vector<8x256xf32>
    %16 = arith.maximumf %14, %15 : vector<8x256xf32>
    %17 = arith.truncf %16 : vector<8x256xf32> to vector<8x256xbf16>
    %c0_12 = arith.constant 0 : index
    %c0_13 = arith.constant 0 : index
    %18 = vector.load %arg5[%c0_12, %c0_13] : memref<256x4096xbf16, #tpu.memory_space<vmem>>, vector<256x4096xbf16>
    %cst_14 = arith.constant dense<0.000000e+00> : vector<8x4096xf32>
    %19 = tpu.matmul %17, %18, %cst_14 {dimension_numbers = #tpu.dot_dimension_numbers<[1], [0], [0], [1], [0, 0, 1, 1], [], []>} : vector<8x256xbf16>, vector<256x4096xbf16>, vector<8x4096xf32> -> vector<8x4096xf32>
    %c0_15 = arith.constant 0 : index
    %c0_16 = arith.constant 0 : index
    %20 = vector.load %arg6[%c0_15, %c0_16] : memref<1x4096xf32, #tpu.memory_space<vmem>>, vector<1x4096xf32>
    %21 = vector.broadcast %20 : vector<1x4096xf32> to vector<8x4096xf32>
    %22 = arith.addf %19, %21 : vector<8x4096xf32>
    %c0_17 = arith.constant 0 : index
    %c0_18 = arith.constant 0 : index
    %23 = vector.load %arg7[%c0_17, %c0_18] : memref<8x4096xf32, #tpu.memory_space<vmem>>, vector<8x4096xf32>
    tpu.vector_store %arg7[%c0_17, %c0_18], %22 {strides = array<i32>} : memref<8x4096xf32, #tpu.memory_space<vmem>>, vector<8x4096xf32>,
    return
  }
}

module attributes {stable_mosaic.version = 11 : i64} {
  func.func @kernel(%arg0: i32, %arg1: i32, %arg2: i32, %arg3: memref<1x64x8xbf16, #tpu.memory_space<vmem>>, %arg4: memref<1x8x64xbf16, #tpu.memory_space<vmem>>, %arg5: memref<1x64xf32, #tpu.memory_space<vmem>>, %arg6: memref<1x64x128xbf16, #tpu.memory_space<vmem>>, %arg7: memref<1x128xf32, #tpu.memory_space<vmem>>, %arg8: memref<128x1024xbf16, #tpu.memory_space<vmem>>, %arg9: memref<1x1024xf32, #tpu.memory_space<vmem>>, %arg10: memref<1x1x1024xf32, #tpu.memory_space<vmem>>) attributes {dimension_semantics = [#tpu.dimension_semantics<parallel>, #tpu.dimension_semantics<parallel>, #tpu.dimension_semantics<arbitrary>], iteration_bounds = array<i64: 2, 1, 1>, scalar_prefetch = 0 : i64, scratch_operands = 0 : i64, tpu.core_type = #tpu.core_type<tc>, window_params = [{transform_indices = @transform_0, window_bounds = array<i64: 1, 64, 8>}, {transform_indices = @transform_1, window_bounds = array<i64: 1, 8, 64>}, {pipeline_mode = #tpu.pipeline_mode<synchronous>, transform_indices = @transform_2, window_bounds = array<i64: 1, 64>}, {transform_indices = @transform_3, window_bounds = array<i64: 1, 64, 128>}, {pipeline_mode = #tpu.pipeline_mode<synchronous>, transform_indices = @transform_4, window_bounds = array<i64: 1, 128>}, {pipeline_mode = #tpu.pipeline_mode<synchronous>, transform_indices = @transform_5, window_bounds = array<i64: 128, 1024>}, {pipeline_mode = #tpu.pipeline_mode<synchronous>, transform_indices = @transform_6, window_bounds = array<i64: 1, 1024>}, {transform_indices = @transform_7, window_bounds = array<i64: 1, 1, 1024>}]} {
    %c0_i32 = arith.constant 0 : i32
    %0 = arith.cmpi eq, %arg2, %c0_i32 : i32
    %1 = arith.extui %0 : i1 to i32
    %c0_i32_0 = arith.constant 0 : i32
    %2 = arith.cmpi ne, %1, %c0_i32_0 : i32
    scf.if %2 {
      %cst_28 = arith.constant 0xFF800000 : f32
      %36 = vector.broadcast %cst_28 : f32 to vector<1x1x1024xf32>
      %c0_29 = arith.constant 0 : index
      %c0_30 = arith.constant 0 : index
      %c0_31 = arith.constant 0 : index
      %37 = vector.load %arg10[%c0_29, %c0_30, %c0_31] : memref<1x1x1024xf32, #tpu.memory_space<vmem>>, vector<1x1x1024xf32>
      tpu.vector_store %arg10[%c0_29, %c0_30, %c0_31], %36 {strides = array<i32>} : memref<1x1x1024xf32, #tpu.memory_space<vmem>>, vector<1x1x1024xf32>,
    } else {
    }
    %c0 = arith.constant 0 : index
    %c0_1 = arith.constant 0 : index
    %c0_2 = arith.constant 0 : index
    %3 = vector.load %arg3[%c0, %c0_1, %c0_2] : memref<1x64x8xbf16, #tpu.memory_space<vmem>>, vector<1x64x8xbf16>
    %4 = vector.shape_cast %3 : vector<1x64x8xbf16> to vector<64x8xbf16>
    %c0_3 = arith.constant 0 : index
    %c0_4 = arith.constant 0 : index
    %c0_5 = arith.constant 0 : index
    %5 = vector.load %arg4[%c0_3, %c0_4, %c0_5] : memref<1x8x64xbf16, #tpu.memory_space<vmem>>, vector<1x8x64xbf16>
    %6 = vector.shape_cast %5 : vector<1x8x64xbf16> to vector<8x64xbf16>
    %cst = arith.constant dense<0.000000e+00> : vector<64x64xf32>
    %7 = tpu.matmul %4, %6, %cst {dimension_numbers = #tpu.dot_dimension_numbers<[1], [0], [0], [1], [0, 0, 1, 1], [], []>} : vector<64x8xbf16>, vector<8x64xbf16>, vector<64x64xf32> -> vector<64x64xf32>
    %c0_6 = arith.constant 0 : index
    %c0_7 = arith.constant 0 : index
    %8 = vector.load %arg5[%c0_6, %c0_7] : memref<1x64xf32, #tpu.memory_space<vmem>>, vector<1x64xf32>
    %9 = vector.broadcast %8 : vector<1x64xf32> to vector<64x64xf32>
    %10 = arith.addf %7, %9 : vector<64x64xf32>
    %cst_8 = arith.constant 0.000000e+00 : f32
    %11 = vector.broadcast %cst_8 : f32 to vector<64x64xf32>
    %12 = arith.maximumf %10, %11 : vector<64x64xf32>
    %13 = arith.truncf %12 : vector<64x64xf32> to vector<64x64xbf16>
    %c0_9 = arith.constant 0 : index
    %c0_10 = arith.constant 0 : index
    %c0_11 = arith.constant 0 : index
    %14 = vector.load %arg6[%c0_9, %c0_10, %c0_11] : memref<1x64x128xbf16, #tpu.memory_space<vmem>>, vector<1x64x128xbf16>
    %15 = vector.shape_cast %14 : vector<1x64x128xbf16> to vector<64x128xbf16>
    %cst_12 = arith.constant dense<0.000000e+00> : vector<64x128xf32>
    %16 = tpu.matmul %13, %15, %cst_12 {dimension_numbers = #tpu.dot_dimension_numbers<[1], [0], [0], [1], [0, 0, 1, 1], [], []>} : vector<64x64xbf16>, vector<64x128xbf16>, vector<64x128xf32> -> vector<64x128xf32>
    %c0_13 = arith.constant 0 : index
    %c0_14 = arith.constant 0 : index
    %17 = vector.load %arg7[%c0_13, %c0_14] : memref<1x128xf32, #tpu.memory_space<vmem>>, vector<1x128xf32>
    %18 = vector.broadcast %17 : vector<1x128xf32> to vector<64x128xf32>
    %19 = arith.addf %16, %18 : vector<64x128xf32>
    %cst_15 = arith.constant 0.000000e+00 : f32
    %20 = vector.broadcast %cst_15 : f32 to vector<64x128xf32>
    %21 = arith.maximumf %19, %20 : vector<64x128xf32>
    %22 = arith.truncf %21 : vector<64x128xf32> to vector<64x128xbf16>
    %c0_16 = arith.constant 0 : index
    %c0_17 = arith.constant 0 : index
    %23 = vector.load %arg8[%c0_16, %c0_17] : memref<128x1024xbf16, #tpu.memory_space<vmem>>, vector<128x1024xbf16>
    %cst_18 = arith.constant dense<0.000000e+00> : vector<64x1024xf32>
    %24 = tpu.matmul %22, %23, %cst_18 {dimension_numbers = #tpu.dot_dimension_numbers<[1], [0], [0], [1], [0, 0, 1, 1], [], []>} : vector<64x128xbf16>, vector<128x1024xbf16>, vector<64x1024xf32> -> vector<64x1024xf32>
    %c0_19 = arith.constant 0 : index
    %c0_20 = arith.constant 0 : index
    %c0_21 = arith.constant 0 : index
    %25 = vector.load %arg10[%c0_19, %c0_20, %c0_21] : memref<1x1x1024xf32, #tpu.memory_space<vmem>>, vector<1x1x1024xf32>
    %26 = vector.shape_cast %25 : vector<1x1x1024xf32> to vector<1x1024xf32>
    %cst_22 = arith.constant dense<0xFF800000> : vector<1024xf32>
    %27 = vector.multi_reduction <maximumf>, %24, %cst_22 [0] : vector<64x1024xf32> to vector<1024xf32>
    %28 = vector.shape_cast %27 : vector<1024xf32> to vector<1x1024xf32>
    %29 = arith.maximumf %26, %28 : vector<1x1024xf32>
    %c0_23 = arith.constant 0 : index
    %c0_24 = arith.constant 0 : index
    %c0_25 = arith.constant 0 : index
    %30 = vector.load %arg10[%c0_23, %c0_24, %c0_25] : memref<1x1x1024xf32, #tpu.memory_space<vmem>>, vector<1x1x1024xf32>
    %31 = vector.shape_cast %30 : vector<1x1x1024xf32> to vector<1x1024xf32>
    %32 = vector.shape_cast %29 : vector<1x1024xf32> to vector<1x1x1024xf32>
    tpu.vector_store %arg10[%c0_23, %c0_24, %c0_25], %32 {strides = array<i32>} : memref<1x1x1024xf32, #tpu.memory_space<vmem>>, vector<1x1x1024xf32>,
    %c0_i32_26 = arith.constant 0 : i32
    %33 = arith.cmpi eq, %arg2, %c0_i32_26 : i32
    %34 = arith.extui %33 : i1 to i32
    %c0_i32_27 = arith.constant 0 : i32
    %35 = arith.cmpi ne, %34, %c0_i32_27 : i32
    scf.if %35 {
      %c0_28 = arith.constant 0 : index
      %c0_29 = arith.constant 0 : index
      %c0_30 = arith.constant 0 : index
      %36 = vector.load %arg10[%c0_28, %c0_29, %c0_30] : memref<1x1x1024xf32, #tpu.memory_space<vmem>>, vector<1x1x1024xf32>
      %37 = vector.shape_cast %36 : vector<1x1x1024xf32> to vector<1x1024xf32>
      %c0_31 = arith.constant 0 : index
      %c0_32 = arith.constant 0 : index
      %38 = vector.load %arg9[%c0_31, %c0_32] : memref<1x1024xf32, #tpu.memory_space<vmem>>, vector<1x1024xf32>
      %39 = arith.addf %37, %38 : vector<1x1024xf32>
      %cst_33 = arith.constant 0.000000e+00 : f32
      %40 = vector.broadcast %cst_33 : f32 to vector<1x1024xf32>
      %41 = arith.maximumf %39, %40 : vector<1x1024xf32>
      %c0_34 = arith.constant 0 : index
      %c0_35 = arith.constant 0 : index
      %c0_36 = arith.constant 0 : index
      %42 = vector.load %arg10[%c0_34, %c0_35, %c0_36] : memref<1x1x1024xf32, #tpu.memory_space<vmem>>, vector<1x1x1024xf32>
      %43 = vector.shape_cast %42 : vector<1x1x1024xf32> to vector<1x1024xf32>
      %44 = vector.shape_cast %41 : vector<1x1024xf32> to vector<1x1x1024xf32>
      tpu.vector_store %arg10[%c0_34, %c0_35, %c0_36], %44 {strides = array<i32>} : memref<1x1x1024xf32, #tpu.memory_space<vmem>>, vector<1x1x1024xf32>,
    } else {
    }
    return
  }
  func.func @transform_0(%arg0: i32, %arg1: i32, %arg2: i32) -> (i32, i32, i32) {
    %c1_i32 = arith.constant 1 : i32
    %0 = arith.muli %arg1, %c1_i32 : i32
    %1 = arith.addi %0, %arg2 : i32
    %c0_i32 = arith.constant 0 : i32
    %c0_i32_0 = arith.constant 0 : i32
    return %arg0, %1, %c0_i32 : i32, i32, i32
  }
  func.func @transform_1(%arg0: i32, %arg1: i32, %arg2: i32) -> (i32, i32, i32) {
    %c0_i32 = arith.constant 0 : i32
    %c0_i32_0 = arith.constant 0 : i32
    %c0_i32_1 = arith.constant 0 : i32
    return %arg0, %c0_i32, %c0_i32_0 : i32, i32, i32
  }
  func.func @transform_2(%arg0: i32, %arg1: i32, %arg2: i32) -> (i32, i32) {
    %c0_i32 = arith.constant 0 : i32
    %c0_i32_0 = arith.constant 0 : i32
    %c0_i32_1 = arith.constant 0 : i32
    return %c0_i32, %c0_i32_0 : i32, i32
  }
  func.func @transform_3(%arg0: i32, %arg1: i32, %arg2: i32) -> (i32, i32, i32) {
    %c0_i32 = arith.constant 0 : i32
    %c0_i32_0 = arith.constant 0 : i32
    %c0_i32_1 = arith.constant 0 : i32
    return %arg0, %c0_i32, %c0_i32_0 : i32, i32, i32
  }
  func.func @transform_4(%arg0: i32, %arg1: i32, %arg2: i32) -> (i32, i32) {
    %c0_i32 = arith.constant 0 : i32
    %c0_i32_0 = arith.constant 0 : i32
    %c0_i32_1 = arith.constant 0 : i32
    return %c0_i32, %c0_i32_0 : i32, i32
  }
  func.func @transform_5(%arg0: i32, %arg1: i32, %arg2: i32) -> (i32, i32) {
    %c0_i32 = arith.constant 0 : i32
    %c0_i32_0 = arith.constant 0 : i32
    %c0_i32_1 = arith.constant 0 : i32
    return %c0_i32, %c0_i32_0 : i32, i32
  }
  func.func @transform_6(%arg0: i32, %arg1: i32, %arg2: i32) -> (i32, i32) {
    %c0_i32 = arith.constant 0 : i32
    %c0_i32_0 = arith.constant 0 : i32
    %c0_i32_1 = arith.constant 0 : i32
    return %c0_i32, %c0_i32_0 : i32, i32
  }
  func.func @transform_7(%arg0: i32, %arg1: i32, %arg2: i32) -> (i32, i32, i32) {
    %c1_i32 = arith.constant 1 : i32
    %0 = arith.muli %arg0, %c1_i32 : i32
    %1 = arith.addi %0, %arg1 : i32
    %c0_i32 = arith.constant 0 : i32
    %c0_i32_0 = arith.constant 0 : i32
    %c0_i32_1 = arith.constant 0 : i32
    return %1, %c0_i32, %c0_i32_0 : i32, i32, i32
  }
}

module attributes {stable_mosaic.version = 11 : i64} {
  func.func @_fc_head_kernel(%arg0: memref<8x1024xf32, #tpu.memory_space<vmem>>, %arg1: memref<1024x512xbf16, #tpu.memory_space<vmem>>, %arg2: memref<1x512xf32, #tpu.memory_space<vmem>>, %arg3: memref<512x256xbf16, #tpu.memory_space<vmem>>, %arg4: memref<1x256xf32, #tpu.memory_space<vmem>>, %arg5: memref<256x100xbf16, #tpu.memory_space<vmem>>, %arg6: memref<1x100xf32, #tpu.memory_space<vmem>>, %arg7: memref<8x100xf32, #tpu.memory_space<vmem>>) attributes {dimension_semantics = [], scalar_prefetch = 0 : i64, scratch_operands = 0 : i64, tpu.core_type = #tpu.core_type<tc>} {
    %c0 = arith.constant 0 : index
    %c0_0 = arith.constant 0 : index
    %0 = vector.load %arg0[%c0, %c0_0] : memref<8x1024xf32, #tpu.memory_space<vmem>>, vector<8x1024xf32>
    %1 = arith.truncf %0 : vector<8x1024xf32> to vector<8x1024xbf16>
    %c0_1 = arith.constant 0 : index
    %c0_2 = arith.constant 0 : index
    %2 = vector.load %arg1[%c0_1, %c0_2] : memref<1024x512xbf16, #tpu.memory_space<vmem>>, vector<1024x512xbf16>
    %cst = arith.constant dense<0.000000e+00> : vector<8x512xf32>
    %3 = tpu.matmul %1, %2, %cst {dimension_numbers = #tpu.dot_dimension_numbers<[1], [0], [0], [1], [0, 0, 1, 1], [], []>} : vector<8x1024xbf16>, vector<1024x512xbf16>, vector<8x512xf32> -> vector<8x512xf32>
    %c0_3 = arith.constant 0 : index
    %c0_4 = arith.constant 0 : index
    %4 = vector.load %arg2[%c0_3, %c0_4] : memref<1x512xf32, #tpu.memory_space<vmem>>, vector<1x512xf32>
    %5 = vector.broadcast %4 : vector<1x512xf32> to vector<8x512xf32>
    %6 = arith.addf %3, %5 : vector<8x512xf32>
    %cst_5 = arith.constant 0.000000e+00 : f32
    %7 = vector.broadcast %cst_5 : f32 to vector<8x512xf32>
    %8 = arith.maximumf %6, %7 : vector<8x512xf32>
    %9 = arith.truncf %8 : vector<8x512xf32> to vector<8x512xbf16>
    %c0_6 = arith.constant 0 : index
    %c0_7 = arith.constant 0 : index
    %10 = vector.load %arg3[%c0_6, %c0_7] : memref<512x256xbf16, #tpu.memory_space<vmem>>, vector<512x256xbf16>
    %cst_8 = arith.constant dense<0.000000e+00> : vector<8x256xf32>
    %11 = tpu.matmul %9, %10, %cst_8 {dimension_numbers = #tpu.dot_dimension_numbers<[1], [0], [0], [1], [0, 0, 1, 1], [], []>} : vector<8x512xbf16>, vector<512x256xbf16>, vector<8x256xf32> -> vector<8x256xf32>
    %c0_9 = arith.constant 0 : index
    %c0_10 = arith.constant 0 : index
    %12 = vector.load %arg4[%c0_9, %c0_10] : memref<1x256xf32, #tpu.memory_space<vmem>>, vector<1x256xf32>
    %13 = vector.broadcast %12 : vector<1x256xf32> to vector<8x256xf32>
    %14 = arith.addf %11, %13 : vector<8x256xf32>
    %cst_11 = arith.constant 0.000000e+00 : f32
    %15 = vector.broadcast %cst_11 : f32 to vector<8x256xf32>
    %16 = arith.maximumf %14, %15 : vector<8x256xf32>
    %17 = arith.truncf %16 : vector<8x256xf32> to vector<8x256xbf16>
    %c0_12 = arith.constant 0 : index
    %c0_13 = arith.constant 0 : index
    %18 = vector.load %arg5[%c0_12, %c0_13] : memref<256x100xbf16, #tpu.memory_space<vmem>>, vector<256x100xbf16>
    %cst_14 = arith.constant dense<0.000000e+00> : vector<8x100xf32>
    %19 = tpu.matmul %17, %18, %cst_14 {dimension_numbers = #tpu.dot_dimension_numbers<[1], [0], [0], [1], [0, 0, 1, 1], [], []>} : vector<8x256xbf16>, vector<256x100xbf16>, vector<8x100xf32> -> vector<8x100xf32>
    %c0_15 = arith.constant 0 : index
    %c0_16 = arith.constant 0 : index
    %20 = vector.load %arg6[%c0_15, %c0_16] : memref<1x100xf32, #tpu.memory_space<vmem>>, vector<1x100xf32>
    %21 = vector.broadcast %20 : vector<1x100xf32> to vector<8x100xf32>
    %22 = arith.addf %19, %21 : vector<8x100xf32>
    %c0_17 = arith.constant 0 : index
    %c0_18 = arith.constant 0 : index
    %23 = vector.load %arg7[%c0_17, %c0_18] : memref<8x100xf32, #tpu.memory_space<vmem>>, vector<8x100xf32>
    tpu.vector_store %arg7[%c0_17, %c0_18], %22 {strides = array<i32>} : memref<8x100xf32, #tpu.memory_space<vmem>>, vector<8x100xf32>,
    return
  }
}

</mosaic_0001>

<bundles_post_ra>
// kernel: pointnet_forward.8
= control target key start
LH: loop header
LB: loop body
LE: loop exit
PB: predicated region body
PF: predicated region fallthrough
CT: control target
= control target key end

     0   :  { %14 = vsyncpa [#allocation3], 0  ;;  %s2790_s0 = inlined_call_operand.vmem [shape: bf16[2,64,8], index: 0, kind: input, shape index: {}]   ;;  %s2791_s1 = inlined_call_operand.vmem [shape: bf16[2,8,64], index: 1, kind: input, shape index: {}]   ;;  %s2792_s2 = inlined_call_operand.hbm [shape: f32[1,64], index: 2, kind: input, shape index: {}]   ;;  %s2793_s3 = inlined_call_operand.hbm [shape: bf16[64,64], index: 3, kind: input, shape index: {}]   ;;  %s2794_s4 = inlined_call_operand.hbm [shape: f32[1,64], index: 4, kind: input, shape index: {}]   ;;  %s2795_s5 = inlined_call_operand.hbm [shape: bf16[64,128], index: 5, kind: input, shape index: {}]   ;;  %s2796_s6 = inlined_call_operand.hbm [shape: f32[1,128], index: 6, kind: input, shape index: {}]   ;;  %s2797_s7 = inlined_call_operand.hbm [shape: bf16[128,1024], index: 7, kind: input, shape index: {}]   ;;  %s2798_s8 = inlined_call_operand.hbm [shape: f32[1,1024], index: 8, kind: input, shape index: {}]   ;;  %s2799_s9 = inlined_call_operand.vmem [shape: f32[2,1,1024], index: 9, kind: output, shape index: {}]  }
   0x1   :  { %15 = vsyncpa [#allocation5], 0 }
   0x2   :  { %16 = vsyncpa [#allocation8], 0 }
   0x3   :  { %17 = vsyncpa [#allocation11], 0  ;;  %s2480_s30 = smov 0   ;;  %s2482_s10 = smov 0  }
   0x4   :  { %s2484_s11 = smov 0  }
   0x5 LB: > { %s2417_s12 = smov [#allocation4]   ;;  %s1886_s14 = sadd.s32 4294967295, %s2415_s11   ;;  %s2415_s11 = sphi %s2484_s11, %s23_s11   ;;  %s2411_s10 = sphi %s2482_s10, %s2810_s10   ;;  %s2407_s30 = sphi %s2480_s30, %s2809_s30  }
   0x6   : > { %s301_s13 = sshll.u32 %s2417_s12, 4  ;;  %p1888_p0 = scmp.ge.s32.totalorder %s2415_s11, 1  ;;  %s2502_s13 = int_to_ptr.vmem [resolvable:$true] %s301_s13 }
   0x7   : > { %p278_p1 = scmp.lt.s32.totalorder %s2415_s11, 3  ;;  %p2498_p2 = scmp.eq.s32.totalorder %s1886_s14, 0 }
   0x8   : > { %s2418_s17 = smov [#allocation7]   ;;  %s2419_s20 = smov [#allocation10]  }
   0x9   : > { %s2803_s15 = scalar_select %p2498_p2, 1, 0 }
   0xa   : > { %p2504_p3 = pnand %p1888_p0, %p278_p1  ;;  %s325_s18 = sshll.u32 %s2418_s17, 4  ;;  %s2510_s18 = int_to_ptr.vmem [resolvable:$true] %s325_s18 }
   0xb   : > { %s349_s21 = sshll.u32 %s2419_s20, 4  ;;  %s2181_s24 = scalar_lea.hbm %s2793_s3, 512  ;;  %s2518_s21 = int_to_ptr.vmem [resolvable:$true] %s349_s21 }
   0xc   : > { %s2804_s16 = scalar_select %p2504_p3, 1, 0 }
   0xd   : > { %p2095_p4 = pneg %p2504_p3  ;;  %p2182_p6 = scmp.ne.s32.totalorder %s2793_s3, %s2181_s24 }
   0xe   : > { %p2188_p10 = scmp.lt.u32.totalorder %s2181_s24, %s2793_s3 }
   0xf   : > { %p2514_p5 = pnand %p2498_p2, %p2095_p4 }
  0x11   : > { %p2528_p7 = pneg %p2514_p5 }
  0x13   : > { %p2184_p8 = pnand %p2528_p7, %p2182_p6 }
  0x15   : > { %p2185_p9 = pneg %p2184_p8 }
  0x17   : > { %p2190_p11 = pnand %p2188_p10, %p2185_p9 }
  0x19   : > { %2193 = shalt.err (!%p2190_p11)
}
  0x1a   : > { %s2194_s12 = scalar_lea.vmem %s2502_s13, 512  ;;  %p2202_p1 = scmp.lt.s32.totalorder %s2502_s13, %s2502_s13 }
  0x1b   : > { %p2195_p12 = scmp.ne.s32.totalorder %s2502_s13, %s2194_s12  ;;  %p2203_p4 = scmp.lt.s32.totalorder %s2194_s12, %s2194_s12 }
  0x1d   : > { %p2197_p13 = pnand %p2195_p12, %p2528_p7  ;;  %p2204_p6 = por %p2203_p4, %p2202_p1 }
  0x1f   : > { %p2198_p0 = pneg %p2197_p13 }
  0x21   : > { %p2205_p8 = pnand %p2204_p6, %p2198_p0 }
  0x23   : > { %2208 = shalt.err (!%p2205_p8)
}
  0x24   : > { %s2420_s14 = smov 64   ;;  %s2421_s17 = smov 4  }
  0x25   : > { %2101 = dma.hbm_to_vmem [thread:$0]  (!%p2514_p5), %s2793_s3, 512, %s2502_s13, [#allocation5], %s2420_s14, %s2420_s14, %s2421_s17  }
  0x26   : > { %s2209_s25 = scalar_lea.hbm %s2795_s5, 512 }
  0x27   : > { %p2210_p9 = scmp.ne.s32.totalorder %s2795_s5, %s2209_s25  ;;  %p2216_p12 = scmp.lt.u32.totalorder %s2209_s25, %s2795_s5 }
  0x29   : > { %p2212_p10 = pnand %p2210_p9, %p2528_p7 }
  0x2b   : > { %p2213_p11 = pneg %p2212_p10 }
  0x2d   : > { %p2218_p13 = pnand %p2216_p12, %p2213_p11 }
  0x2f   : > { %2221 = shalt.err (!%p2218_p13)
}
  0x30   : > { %s2222_s13 = scalar_lea.vmem %s2510_s18, 512  ;;  %p2230_p6 = scmp.lt.s32.totalorder %s2510_s18, %s2510_s18 }
  0x31   : > { %p2223_p0 = scmp.ne.s32.totalorder %s2510_s18, %s2222_s13  ;;  %p2231_p8 = scmp.lt.s32.totalorder %s2222_s13, %s2222_s13 }
  0x33   : > { %p2225_p1 = pnand %p2223_p0, %p2528_p7  ;;  %p2232_p9 = por %p2231_p8, %p2230_p6 }
  0x35   : > { %p2226_p4 = pneg %p2225_p1 }
  0x37   : > { %p2233_p10 = pnand %p2232_p9, %p2226_p4 }
  0x39   : > { %2236 = shalt.err (!%p2233_p10)
}
  0x3a   : > { %2107 = dma.hbm_to_vmem [thread:$0]  (!%p2514_p5), %s2795_s5, 512, %s2510_s18, [#allocation8], %s2420_s14, %s2420_s14, %s2421_s17  }
  0x3b   : > { %s2237_s25 = scalar_lea.hbm %s2797_s7, 8192 }
  0x3c   : > { %p2238_p11 = scmp.ne.s32.totalorder %s2797_s7, %s2237_s25  ;;  %p2244_p0 = scmp.lt.u32.totalorder %s2237_s25, %s2797_s7 }
  0x3e   : > { %p2240_p12 = pnand %p2238_p11, %p2528_p7 }
  0x40   : > { %p2241_p13 = pneg %p2240_p12 }
  0x42   : > { %p2246_p1 = pnand %p2244_p0, %p2241_p13 }
  0x44   : > { %2249 = shalt.err (!%p2246_p1)
}
  0x45   : > { %s2250_s18 = scalar_lea.vmem %s2518_s21, 8192  ;;  %p2258_p9 = scmp.lt.s32.totalorder %s2518_s21, %s2518_s21 }
  0x46   : > { %p2251_p4 = scmp.ne.s32.totalorder %s2518_s21, %s2250_s18  ;;  %p2259_p10 = scmp.lt.s32.totalorder %s2250_s18, %s2250_s18 }
  0x48   : > { %p2253_p6 = pnand %p2251_p4, %p2528_p7  ;;  %p2260_p11 = por %p2259_p10, %p2258_p9 }
  0x4a   : > { %p2254_p8 = pneg %p2253_p6 }
  0x4c   : > { %p2261_p12 = pnand %p2260_p11, %p2254_p8 }
  0x4e   : > { %2264 = shalt.err (!%p2261_p12)
}
  0x4f   : > { %s2422_s14 = smov 512   ;;  %s2423_s17 = smov 32  }
  0x50   : > { %2113 = dma.hbm_to_vmem [thread:$0]  (!%p2514_p5), %s2797_s7, 8192, %s2518_s21, [#allocation11], %s2422_s14, %s2422_s14, %s2423_s17  }
  0x51   : > { %s42_s22 = sadd.s32 1, %s2411_s10  ;;  %s2424_s23 = smov [#allocation2]  }
  0x52   : > { %p44_p13 = scmp.ge.s32.totalorder %s42_s22, 2  ;;  %s291_s24 = sshll.u32 %s2424_s23, 4  ;;  %s292_s24 = int_to_ptr.vmem [resolvable:$true] %s291_s24 }
  0x53   : > { %s2265_s28 = scalar_lea.hbm %s2792_s2, 16 }
  0x54   : > { %s2812_s22 = smov (%p44_p13, %s42_s22), 0  ;;  %p2266_p0 = scmp.ne.s32.totalorder %s2792_s2, %s2265_s28 }
  0x55   : > { %p2272_p6 = scmp.lt.u32.totalorder %s2265_s28, %s2792_s2 }
  0x56   : > { %p2268_p1 = pnand %p2266_p0, %p2528_p7 }
  0x58   : > { %p2269_p4 = pneg %p2268_p1 }
  0x5a   : > { %p2274_p8 = pnand %p2272_p6, %p2269_p4 }
  0x5c   : > { %2277 = shalt.err (!%p2274_p8)
}
  0x5d   : > { %s2278_s14 = scalar_lea.vmem %s292_s24, 16  ;;  %s2285_s17 = scalar_lea.vmem %s292_s24, 32 }
  0x5e   : > { %p2279_p9 = scmp.ne.s32.totalorder %s292_s24, %s2278_s14  ;;  %p2286_p12 = scmp.lt.s32.totalorder %s292_s24, %s292_s24 }
  0x5f   : > { %p2287_p13 = scmp.lt.s32.totalorder %s2285_s17, %s2278_s14 }
  0x60   : > { %p2281_p10 = pnand %p2279_p9, %p2528_p7 }
  0x61   : > { %p2288_p2 = por %p2287_p13, %p2286_p12 }
  0x62   : > { %p2282_p11 = pneg %p2281_p10 }
  0x64   : > { %p2289_p3 = pnand %p2288_p2, %p2282_p11 }
  0x66   : > { %2292 = shalt.err (!%p2289_p3)
}
  0x67   : > { %2098 = dma.hbm_to_vmem [thread:$0]  (!%p2514_p5), %s2792_s2, 16, %s292_s24, [#allocation3]  }
  0x68   : > { %s2425_s23 = smov [#allocation6]   ;;  %s2426_s26 = smov [#allocation9]  }
  0x69   : > { %s315_s25 = sshll.u32 %s2425_s23, 4  ;;  %s339_s28 = sshll.u32 %s2426_s26, 4  ;;  %s316_s25 = int_to_ptr.vmem [resolvable:$true] %s315_s25  ;;  %s340_s28 = int_to_ptr.vmem [resolvable:$true] %s339_s28 }
  0x6a   : > { %s2293_s18 = scalar_lea.hbm %s2794_s4, 16 }
  0x6b   : > { %p2294_p2 = scmp.ne.s32.totalorder %s2794_s4, %s2293_s18  ;;  %p2300_p1 = scmp.lt.u32.totalorder %s2293_s18, %s2794_s4 }
  0x6d   : > { %p2296_p3 = pnand %p2294_p2, %p2528_p7 }
  0x6f   : > { %p2297_p0 = pneg %p2296_p3 }
  0x71   : > { %p2302_p4 = pnand %p2300_p1, %p2297_p0 }
  0x73   : > { %2305 = shalt.err (!%p2302_p4)
}
  0x74   : > { %s2306_s24 = scalar_lea.vmem %s316_s25, 16  ;;  %s2313_s20 = scalar_lea.vmem %s316_s25, 32 }
  0x75   : > { %p2307_p6 = scmp.ne.s32.totalorder %s316_s25, %s2306_s24  ;;  %p2314_p10 = scmp.lt.s32.totalorder %s316_s25, %s316_s25 }
  0x76   : > { %p2315_p11 = scmp.lt.s32.totalorder %s2313_s20, %s2306_s24 }
  0x77   : > { %p2309_p8 = pnand %p2307_p6, %p2528_p7 }
  0x78   : > { %p2316_p12 = por %p2315_p11, %p2314_p10 }
  0x79   : > { %p2310_p9 = pneg %p2309_p8 }
  0x7b   : > { %p2317_p13 = pnand %p2316_p12, %p2310_p9 }
  0x7d   : > { %2320 = shalt.err (!%p2317_p13)
}
  0x7e   : > { %2104 = dma.hbm_to_vmem [thread:$0]  (!%p2514_p5), %s2794_s4, 16, %s316_s25, [#allocation5]  }
  0x7f   : > { %s2321_s18 = scalar_lea.hbm %s2796_s6, 16 }
  0x80   : > { %p2322_p2 = scmp.ne.s32.totalorder %s2796_s6, %s2321_s18  ;;  %p2328_p1 = scmp.lt.u32.totalorder %s2321_s18, %s2796_s6 }
  0x82   : > { %p2324_p3 = pnand %p2322_p2, %p2528_p7 }
  0x84   : > { %p2325_p0 = pneg %p2324_p3 }
  0x86   : > { %p2330_p4 = pnand %p2328_p1, %p2325_p0 }
  0x88   : > { %2333 = shalt.err (!%p2330_p4)
}
  0x89   : > { %s2334_s24 = scalar_lea.vmem %s340_s28, 16  ;;  %s2341_s25 = scalar_lea.vmem %s340_s28, 32 }
  0x8a   : > { %p2335_p6 = scmp.ne.s32.totalorder %s340_s28, %s2334_s24  ;;  %p2342_p10 = scmp.lt.s32.totalorder %s340_s28, %s340_s28 }
  0x8b   : > { %p2343_p11 = scmp.lt.s32.totalorder %s2341_s25, %s2334_s24 }
  0x8c   : > { %p2337_p8 = pnand %p2335_p6, %p2528_p7 }
  0x8d   : > { %p2344_p12 = por %p2343_p11, %p2342_p10 }
  0x8e   : > { %p2338_p9 = pneg %p2337_p8 }
  0x90   : > { %p2345_p13 = pnand %p2344_p12, %p2338_p9 }
  0x92   : > { %2348 = shalt.err (!%p2345_p13)
}
  0x93   : > { %2110 = dma.hbm_to_vmem [thread:$0]  (!%p2514_p5), %s2796_s6, 16, %s340_s28, [#allocation8]  }
  0x94   : > { %s2427_s26 = smov [#allocation12]   ;;  %s2349_s21 = scalar_lea.hbm %s2798_s8, 128 }
  0x95   : > { %s363_s29 = sshll.u32 %s2427_s26, 4  ;;  %p2350_p2 = scmp.ne.s32.totalorder %s2798_s8, %s2349_s21  ;;  %s364_s29 = int_to_ptr.vmem [resolvable:$true] %s363_s29 }
  0x96   : > { %p2356_p1 = scmp.lt.u32.totalorder %s2349_s21, %s2798_s8 }
  0x97   : > { %p2352_p3 = pnand %p2350_p2, %p2528_p7 }
  0x99   : > { %p2353_p0 = pneg %p2352_p3 }
  0x9b   : > { %p2358_p4 = pnand %p2356_p1, %p2353_p0 }
  0x9d   : > { %2361 = shalt.err (!%p2358_p4)
}
  0x9e   : > { %s2362_s28 = scalar_lea.vmem %s364_s29, 128  ;;  %p2370_p10 = scmp.lt.s32.totalorder %s364_s29, %s364_s29 }
  0x9f   : > { %p2363_p6 = scmp.ne.s32.totalorder %s364_s29, %s2362_s28  ;;  %p2371_p11 = scmp.lt.s32.totalorder %s2362_s28, %s2362_s28 }
  0xa1   : > { %p2365_p8 = pnand %p2363_p6, %p2528_p7  ;;  %p2372_p12 = por %p2371_p11, %p2370_p10 }
  0xa3   : > { %p2366_p9 = pneg %p2365_p8 }
  0xa5   : > { %p2373_p13 = pnand %p2372_p12, %p2366_p9 }
  0xa7   : > { %2376 = shalt.err (!%p2373_p13)
}
  0xa8   : > { %2116 = dma.hbm_to_vmem [thread:$0]  (!%p2514_p5), %s2798_s8, 128, %s364_s29, [#allocation11]  }
  0xa9   : > { %p2807_p2 = scmp.ne.s32.totalorder %s2804_s16, 0 }
  0xaa   : > { %p2808_p3 = scmp.ne.s32.totalorder (!%p2807_p2), %s2803_s15, 0 }
  0xab   : > { %398 = sbr.rel (%p2807_p2) target bundleno = 1160 (0x488), region = 56 }
  0xb2   : > { %2390 = dma.done.wait (%p2808_p3), [#allocation3], 16  }
  0xb3   : > { %2392 = vsyncadd (%p2808_p3), [#allocation3], 4294967280 }
  0xb4   : > { %2394 = dma.done.wait (%p2808_p3), [#allocation5], 528  }
  0xb5   : > { %2396 = vsyncadd (%p2808_p3), [#allocation5], 4294966768 }
  0xb6   : > { %2398 = dma.done.wait (%p2808_p3), [#allocation8], 528  }
  0xb7   : > { %2400 = vsyncadd (%p2808_p3), [#allocation8], 4294966768 }
  0xb8   : > { %2402 = dma.done.wait (%p2808_p3), [#allocation11], 8320  }
  0xb9   : > { %2404 = vsyncadd (%p2808_p3), [#allocation11], 4294958976  ;;  %p469_p5 = scmp.lt.s32.totalorder %s2407_s30, 1  ;;  %vm544_vm0 = vcmask 1043456   ;;  %vm531_vm1 = vcmask 64512   ;;  %v2173_v5 = vld [vmem:[#allocation4] sm:$0xff]  }
  0xba   : > { %v2174_v6 = vld [vmem:[#allocation4 + $0x8] sm:$0xff]   ;;  %2034 = vmatprep.subr.bf16.mxu1 %v2173_v5  ;;  %v2175_v8 = vld [vmem:[#allocation4 + $0x10] sm:$0xff]   ;;  %v2176_v9 = vld [vmem:[#allocation4 + $0x18] sm:$0xff]   ;;  %vm664_vm2 = vcmask 523264  }
  0xbb   : > { %s2814_s30 = smov (!%p469_p5, %s2407_s30), 1  ;;  %2035 = vmatpush3.bf16.msra.mxu1 %v2173_v5  ;;  %v2177_v10 = vld [vmem:[#allocation7] sm:$0xff]   ;;  %v2178_v11 = vld [vmem:[#allocation7 + $0x8] sm:$0xff]   ;;  %v1909_v12 = vld [vmem:[#allocation2] ss:$0 sm:$0xff] }
  0xbc   : > { %s2002_s16 = sshll.u32 %s2814_s30, 5  ;;  %s1907_s19 = sshll.u32 %s2814_s30, 2  ;;  %2036 = vmatprep.subr.bf16.mxu1 %v2174_v6  ;;  %v2179_v41 = vld [vmem:[#allocation7 + $0x10] sm:$0xff]   ;;  %v2180_v42 = vld [vmem:[#allocation7 + $0x18] sm:$0xff]   ;;  %v882_v43 = vld [vmem:[#allocation10] sm:$0xff] }
  0xbd   : > { %s476_s26 = scalar_lea.vmem %s2790_s0, %s2002_s16  ;;  %s482_s18 = scalar_lea.vmem %s2791_s1, %s1907_s19  ;;  %v886_v44 = vld [vmem:[#allocation10 + $0x20] sm:$0xff]  ;;  %v2708_v45 = vld [vmem:[#allocation10 + $0x8] sm:$0xff] }
  0xbe   : > { %v503_v0 = vld [vmem:[%s482_s18] sm:$0xf]  ;;  %v2170_v3 = vld [vmem:[%s476_s26 + $0x8] sm:$0xff]   ;;  %v2171_v4 = vld [vmem:[%s476_s26 + $0x10] sm:$0xff]   ;;  %v1936_v46 = vcombine.low %v882_v43, %v886_v44  ;;  %v1937_v47 = vcombine.high %v882_v43, %v886_v44  ;;  %s1908_s15 = sshll.u32 %s2814_s30, 3 }
  0xbf   : > { %2066 = vmatprep.subr.msk.bf16.mxu0 %vm544_vm0, %v503_v0  ;;  %v546_v1 = vsel %vm544_vm0, %v503_v0, 0  ;;  %v2169_v2 = vld [vmem:[%s476_s26] sm:$0xff]   ;;  %v2172_v7 = vld [vmem:[%s476_s26 + $0x18] sm:$0xff]   ;;  %2037 = vmatpush3.bf16.msra.mxu1 %v2174_v6  ;;  %v2710_v48 = vld [vmem:[#allocation10 + $0x28] sm:$0xff]  ;;  %s487_s17 = scalar_lea.vmem %s2799_s9, %s1908_s15 }
  0xc0   : > { %2025 = vmatpush3.bf16.msra.mxu0 %v546_v1  ;;  %2026 = vmatprep.mubr.msk.bf16.mxu0 %vm531_vm1, %v2169_v2  ;;  %v890_v49 = vld [vmem:[#allocation10 + $0x40] sm:$0xff]  ;;  %v1938_v51 = vcombine.low %v2708_v45, %v2710_v48  ;;  %v1939_v52 = vcombine.high %v2708_v45, %v2710_v48 }
  0xc1   : > { %2038 = vmatprep.subr.bf16.mxu1 %v2175_v8  ;;  %2050 = vmatprep.subr.bf16.mxu0 %v2177_v10  ;;  %v894_v50 = vld [vmem:[#allocation10 + $0x60] sm:$0xff] }
  0xc2   : > { %v1945_v53 = vcombine.high %v890_v49, %v894_v50  ;;  %v898_v54 = vld [vmem:[#allocation10 + $0x80] sm:$0xff]  ;;  %v1944_v56 = vcombine.low %v890_v49, %v894_v50  ;;  %v915_v49 = vld [vmem:[#allocation10 + $0x108] sm:$0xff] }
  0xc3   : > { %2027 = vmatmul.mubr.msk.bf16.vlgmr.msra.gmra.mrb[0].mxu0 %vm531_vm1, %v2170_v3  ;;  %2039 = vmatpush3.bf16.msra.mxu1 %v2175_v8  ;;  %v902_v55 = vld [vmem:[#allocation10 + $0xa0] sm:$0xff]  ;;  %v919_v50 = vld [vmem:[#allocation10 + $0x128] sm:$0xff] }
  0xc4   : > { %2030 = vmatprep.mubr.msk.bf16.mxu0 %vm531_vm1, %v2171_v4  ;;  %2040 = vmatprep.subr.bf16.mxu1 %v2176_v9  ;;  %v1953_v57 = vcombine.high %v898_v54, %v902_v55  ;;  %v906_v58 = vld [vmem:[#allocation10 + $0xc0] sm:$0xff]  ;;  %v1952_v60 = vcombine.low %v898_v54, %v902_v55  ;;  %v1971_v48 = vcombine.high %v915_v49, %v919_v50 }
  0xc5   : > { %2051 = vmatpush3.bf16.msra.mxu0 %v2177_v10  ;;  %v910_v59 = vld [vmem:[#allocation10 + $0xe0] sm:$0xff] }
  0xc6   : > { %2052 = vmatprep.subr.bf16.mxu0 %v2178_v11  ;;  %v1961_v61 = vcombine.high %v906_v58, %v910_v59  ;;  %v914_v62 = vld [vmem:[#allocation10 + $0x100] sm:$0xff]  ;;  %v1960_v0 = vcombine.low %v906_v58, %v910_v59  ;;  %v931_v58 = vld [vmem:[#allocation10 + $0x188] sm:$0xff] }
  0xc7   : > { %2041 = vmatpush3.bf16.msra.mxu1 %v2176_v9  ;;  %v918_v63 = vld [vmem:[#allocation10 + $0x120] sm:$0xff] }
  0xc8   : > { %1266 = vmatprep.subr.bf16.mxu1 %v1937_v47  ;;  %v1969_v1 = vcombine.high %v914_v62, %v918_v63  ;;  %v922_v2 = vld [vmem:[#allocation10 + $0x140] sm:$0xff]  ;;  %v1968_v4 = vcombine.low %v914_v62, %v918_v63 }
  0xc9   : > { %2053 = vmatpush3.bf16.msra.mxu0 %v2178_v11  ;;  %v926_v3 = vld [vmem:[#allocation10 + $0x160] sm:$0xff] }
  0xca   : > { %2054 = vmatprep.subr.bf16.mxu0 %v2179_v41  ;;  %v1977_v5 = vcombine.high %v922_v2, %v926_v3  ;;  %v1976_v6 = vcombine.low %v922_v2, %v926_v3  ;;  %v939_v2 = vld [vmem:[#allocation10 + $0x1c8] sm:$0xff] }
  0xcb   : > { %2031 = vmatmul.mubr.msk.bf16.gmra.mrb[4].mxu0 %vm531_vm1, %v2172_v7  ;;  %v1918_v7 = vld [vmem:[#allocation6] ss:$0 sm:$0xff] }
  0xcd   : > { %2055 = vmatpush3.bf16.msra.mxu0 %v2179_v41  ;;  %v907_v41 = vld [vmem:[#allocation10 + $0xc8] sm:$0xff] }
  0xce   : > { %2056 = vmatprep.subr.bf16.mxu0 %v2180_v42 }
  0xd1   : > { %2057 = vmatpush3.bf16.msra.mxu0 %v2180_v42  ;;  %v911_v42 = vld [vmem:[#allocation10 + $0xe8] sm:$0xff] }
  0xd2   : > { %1339 = vmatprep.subr.bf16.mxu0 %v1939_v52  ;;  %v1963_v47 = vcombine.high %v907_v41, %v911_v42  ;;  %v1962_v45 = vcombine.low %v907_v41, %v911_v42  ;;  %v927_v52 = vld [vmem:[#allocation10 + $0x168] sm:$0xff]  ;;  %v904_v42 = vld [vmem:[#allocation10 + $0xb0] sm:$0xff] }
 0x196   : > { %v2028_v13 = vpop.f32.mrb[0].mxu0 }
 0x197   : > { %v591_v14 = vadd.f32 %v2028_v13, %v1909_v12  ;;  %v582_v15 = vpop.f32.mrb[1].mxu0 }
 0x198   : > { %v583_v16 = vadd.f32 %v1909_v12, %v582_v15  ;;  %v2029_v17 = vpop.f32.mrb[2].mxu0 }
 0x199   : > { %v594_v18 = vadd.f32 %v2029_v17, %v1909_v12  ;;  %v585_v19 = vpop.f32.mrb[3].mxu0  ;;  %v615_v21 = vmax.f32 %v591_v14, 0.0 }
 0x19a   : > { %v586_v20 = vadd.f32 %v1909_v12, %v585_v19  ;;  %v613_v23 = vmax.f32 %v583_v16, 0.0 }
 0x19b   : > { %v616_v22 = vmax.f32 %v594_v18, 0.0 }
 0x19c   : > { %v614_v24 = vmax.f32 %v586_v20, 0.0  ;;  %v891_v20 = vld [vmem:[#allocation10 + $0x48] sm:$0xff] }
 0x19d   : > { %v622_v25 = vpack.c.bf16 %v616_v22, %v615_v21  ;;  %v895_v21 = vld [vmem:[#allocation10 + $0x68] sm:$0xff] }
 0x19e   : > { %v2032_v26 = vpop.f32.mrb[4].mxu0  ;;  %v621_v27 = vpack.c.bf16 %v614_v24, %v613_v23 }
 0x19f   : > { %v607_v28 = vadd.f32 %v2032_v26, %v1909_v12  ;;  %v598_v29 = vpop.f32.mrb[5].mxu0 }
 0x1a0   : > { %v599_v30 = vadd.f32 %v1909_v12, %v598_v29  ;;  %v2033_v31 = vpop.f32.mrb[6].mxu0  ;;  %2042 = vmatprep.mubr.msk.bf16.mxu1 %vm664_vm2, %v621_v27  ;;  %v1947_v27 = vcombine.high %v891_v20, %v895_v21 }
 0x1a1   : > { %v619_v32 = vmax.f32 %v607_v28, 0.0  ;;  %v610_v33 = vadd.f32 %v2033_v31, %v1909_v12  ;;  %v601_v34 = vpop.f32.mrb[7].mxu0  ;;  %2043 = vmatmul.mubr.msk.bf16.vlgmr.msra.gmra.mrb[0].mxu1 %vm664_vm2, %v622_v25  ;;  %v903_v31 = vld [vmem:[#allocation10 + $0xa8] sm:$0xff] }
 0x1a2   : > { %v617_v35 = vmax.f32 %v599_v30, 0.0  ;;  %v602_v36 = vadd.f32 %v1909_v12, %v601_v34  ;;  %1267 = vmatpush1.bf16.msra.mxu1 %v1936_v46  ;;  %v899_v30 = vld [vmem:[#allocation10 + $0x88] sm:$0xff] }
 0x1a3   : > { %v620_v37 = vmax.f32 %v610_v33, 0.0  ;;  %1268 = vmatprep.subr.bf16.mxu1 %v1945_v53  ;;  %v1954_v46 = vcombine.low %v899_v30, %v903_v31  ;;  %v1970_v53 = vcombine.low %v915_v49, %v919_v50 }
 0x1a4   : > { %v618_v38 = vmax.f32 %v602_v36, 0.0 }
 0x1a5   : > { %v624_v39 = vpack.c.bf16 %v620_v37, %v619_v32  ;;  %v1946_v37 = vcombine.low %v891_v20, %v895_v21 }
 0x1a6   : > { %v623_v40 = vpack.c.bf16 %v618_v38, %v617_v35  ;;  %1269 = vmatpush1.bf16.msra.mxu1 %v1944_v56  ;;  %v930_v56 = vld [vmem:[#allocation10 + $0x180] sm:$0xff] }
 0x1a7   : > { %1270 = vmatprep.subr.bf16.mxu1 %v1953_v57  ;;  %v934_v57 = vld [vmem:[#allocation10 + $0x1a0] sm:$0xff] }
 0x1a8   : > { %2046 = vmatprep.mubr.msk.bf16.mxu1 %vm664_vm2, %v623_v40  ;;  %v1985_v59 = vcombine.high %v930_v56, %v934_v57 }
 0x1a9   : > { %2047 = vmatmul.mubr.msk.bf16.gmra.mrb[4].mxu1 %vm664_vm2, %v624_v39  ;;  %v1955_v39 = vcombine.high %v899_v30, %v903_v31  ;;  %v893_v30 = vld [vmem:[#allocation10 + $0x58] sm:$0xff] }
 0x1aa   : > { %1271 = vmatpush1.bf16.msra.mxu1 %v1952_v60  ;;  %v935_v60 = vld [vmem:[#allocation10 + $0x1a8] sm:$0xff]  ;;  %v897_v31 = vld [vmem:[#allocation10 + $0x78] sm:$0xff] }
 0x1ab   : > { %1272 = vmatprep.subr.bf16.mxu1 %v1961_v61  ;;  %v1984_v61 = vcombine.low %v930_v56, %v934_v57  ;;  %v1986_v62 = vcombine.low %v931_v58, %v935_v60  ;;  %v1987_v63 = vcombine.high %v931_v58, %v935_v60  ;;  %v912_v57 = vld [vmem:[#allocation10 + $0xf0] sm:$0xff]  ;;  %v909_v58 = vld [vmem:[#allocation10 + $0xd8] sm:$0xff] }
 0x1ae   : > { %1273 = vmatpush1.bf16.msra.mxu1 %v1960_v0  ;;  %v938_v0 = vld [vmem:[#allocation10 + $0x1c0] sm:$0xff] }
 0x1af   : > { %1274 = vmatprep.subr.bf16.mxu1 %v1969_v1  ;;  %v942_v1 = vld [vmem:[#allocation10 + $0x1e0] sm:$0xff] }
 0x1b0   : > { %v1993_v3 = vcombine.high %v938_v0, %v942_v1 }
 0x1b2   : > { %1275 = vmatpush1.bf16.msra.mxu1 %v1968_v4  ;;  %v943_v4 = vld [vmem:[#allocation10 + $0x1e8] sm:$0xff] }
 0x1b3   : > { %1276 = vmatprep.subr.bf16.mxu1 %v1977_v5  ;;  %v1992_v5 = vcombine.low %v938_v0, %v942_v1 }
 0x1b6   : > { %1277 = vmatpush1.bf16.msra.mxu1 %v1976_v6  ;;  %v1994_v6 = vcombine.low %v939_v2, %v943_v4 }
 0x1b7   : > { %1278 = vmatprep.subr.bf16.mxu1 %v1985_v59  ;;  %v913_v59 = vld [vmem:[#allocation10 + $0xf8] sm:$0xff] }
 0x1ba   : > { %1279 = vmatpush1.bf16.msra.mxu1 %v1984_v61 }
 0x1bb   : > { %1280 = vmatprep.subr.bf16.mxu1 %v1993_v3  ;;  %v1967_v3 = vcombine.high %v909_v58, %v913_v59 }
 0x1be   : > { %1281 = vmatpush1.bf16.msra.mxu1 %v1992_v5  ;;  %v920_v5 = vld [vmem:[#allocation10 + $0x130] sm:$0xff] }
 0x274   : > { %v2044_v8 = vpop.f32.mrb[0].mxu1 }
 0x275   : > { %v720_v9 = vadd.f32 %v2044_v8, %v1918_v7  ;;  %v711_v10 = vpop.f32.mrb[1].mxu1  ;;  %v884_v8 = vld [vmem:[#allocation10 + $0x10] sm:$0xff] }
 0x276   : > { %v712_v11 = vadd.f32 %v1918_v7, %v711_v10  ;;  %v2045_v12 = vpop.f32.mrb[2].mxu1  ;;  %v885_v10 = vld [vmem:[#allocation10 + $0x18] sm:$0xff] }
 0x277   : > { %v723_v13 = vadd.f32 %v2045_v12, %v1918_v7  ;;  %v714_v14 = vpop.f32.mrb[3].mxu1  ;;  %v744_v16 = vmax.f32 %v720_v9, 0.0  ;;  %v888_v9 = vld [vmem:[#allocation10 + $0x30] sm:$0xff]  ;;  %v889_v12 = vld [vmem:[#allocation10 + $0x38] sm:$0xff] }
 0x278   : > { %v715_v15 = vadd.f32 %v1918_v7, %v714_v14  ;;  %v742_v18 = vmax.f32 %v712_v11, 0.0  ;;  %v1941_v11 = vcombine.high %v884_v8, %v888_v9  ;;  %v1940_v14 = vcombine.low %v884_v8, %v888_v9 }
 0x279   : > { %v745_v17 = vmax.f32 %v723_v13, 0.0  ;;  %v2428_v13 = vmov 0   ;;  %v1966_v9 = vcombine.low %v909_v58, %v913_v59 }
 0x27a   : > { %v743_v19 = vmax.f32 %v715_v15, 0.0  ;;  %1298 = vmatprep.mubr.bf16.mxu1 %v2428_v13  ;;  %v1942_v15 = vcombine.low %v885_v10, %v889_v12  ;;  %1412 = vmatprep.subr.bf16.mxu1 %v1941_v11 }
 0x27b   : > { %v751_v22 = vpack.c.bf16 %v745_v17, %v744_v16  ;;  %v1943_v16 = vcombine.high %v885_v10, %v889_v12  ;;  %v1927_v17 = vld [vmem:[#allocation9] ss:$0 sm:$0xff]  ;;  %v924_v12 = vld [vmem:[#allocation10 + $0x150] sm:$0xff] }
 0x27c   : > { %v750_v23 = vpack.c.bf16 %v743_v19, %v742_v18  ;;  %v2048_v24 = vpop.f32.mrb[4].mxu1 }
 0x27d   : > { %v736_v25 = vadd.f32 %v2048_v24, %v1918_v7  ;;  %v727_v26 = vpop.f32.mrb[5].mxu1 }
 0x27e   : > { %v728_v28 = vadd.f32 %v1918_v7, %v727_v26  ;;  %v2049_v29 = vpop.f32.mrb[6].mxu1  ;;  %2058 = vmatprep.mubr.msk.bf16.mxu0 %vm664_vm2, %v750_v23  ;;  %v892_v26 = vld [vmem:[#allocation10 + $0x50] sm:$0xff] }
 0x27f   : > { %v748_v32 = vmax.f32 %v736_v25, 0.0  ;;  %v739_v33 = vadd.f32 %v2049_v29, %v1918_v7  ;;  %v730_v34 = vpop.f32.mrb[7].mxu1  ;;  %2059 = vmatmul.mubr.msk.bf16.vlgmr.msra.gmra.mrb[8].mxu0 %vm664_vm2, %v751_v22  ;;  %v896_v29 = vld [vmem:[#allocation10 + $0x70] sm:$0xff] }
 0x280   : > { %v746_v35 = vmax.f32 %v728_v28, 0.0  ;;  %v731_v36 = vadd.f32 %v1918_v7, %v730_v34  ;;  %1340 = vmatpush1.bf16.msra.mxu0 %v1938_v51  ;;  %v923_v51 = vld [vmem:[#allocation10 + $0x148] sm:$0xff]  ;;  %v1995_v7 = vcombine.high %v939_v2, %v943_v4  ;;  %v916_v4 = vld [vmem:[#allocation10 + $0x110] sm:$0xff] }
 0x281   : > { %v749_v38 = vmax.f32 %v739_v33, 0.0  ;;  %1341 = vmatprep.subr.bf16.mxu0 %v1947_v27  ;;  %v1979_v54 = vcombine.high %v923_v51, %v927_v52  ;;  %v1978_v55 = vcombine.low %v923_v51, %v927_v52  ;;  %v1973_v10 = vcombine.high %v916_v4, %v920_v5 }
 0x282   : > { %v747_v40 = vmax.f32 %v731_v36, 0.0 }
 0x283   : > { %v753_v43 = vpack.c.bf16 %v749_v38, %v748_v32  ;;  %v1951_v38 = vcombine.high %v893_v30, %v897_v31 }
 0x284   : > { %v752_v44 = vpack.c.bf16 %v747_v40, %v746_v35  ;;  %1342 = vmatpush1.bf16.msra.mxu0 %v1946_v37  ;;  %v1949_v37 = vcombine.high %v892_v26, %v896_v29 }
 0x285   : > { %1343 = vmatprep.subr.bf16.mxu0 %v1955_v39  ;;  %v900_v39 = vld [vmem:[#allocation10 + $0x90] sm:$0xff] }
 0x286   : > { %2062 = vmatprep.mubr.msk.bf16.mxu0 %vm664_vm2, %v752_v44  ;;  %v905_v44 = vld [vmem:[#allocation10 + $0xb8] sm:$0xff]  ;;  %v1957_v52 = vcombine.high %v900_v39, %v904_v42 }
 0x287   : > { %2063 = vmatmul.mubr.msk.bf16.gmra.mrb[12].mxu0 %vm664_vm2, %v753_v43  ;;  %v901_v43 = vld [vmem:[#allocation10 + $0x98] sm:$0xff] }
 0x288   : > { %1344 = vmatpush1.bf16.msra.mxu0 %v1954_v46  ;;  %1371 = vmatprep.mubr.bf16.mxu0 %v2428_v13  ;;  %v1958_v0 = vcombine.low %v901_v43, %v905_v44 }
 0x289   : > { %1345 = vmatprep.subr.bf16.mxu0 %v1963_v47 }
 0x28c   : > { %1346 = vmatpush1.bf16.msra.mxu0 %v1962_v45  ;;  %v1948_v45 = vcombine.low %v892_v26, %v896_v29  ;;  %v940_v29 = vld [vmem:[#allocation10 + $0x1d0] sm:$0xff] }
 0x28d   : > { %1347 = vmatprep.subr.bf16.mxu0 %v1971_v48  ;;  %v1950_v48 = vcombine.low %v893_v30, %v897_v31  ;;  %v944_v30 = vld [vmem:[#allocation10 + $0x1f0] sm:$0xff]  ;;  %v941_v31 = vld [vmem:[#allocation10 + $0x1d8] sm:$0xff] }
 0x290   : > { %1348 = vmatpush1.bf16.msra.mxu0 %v1970_v53  ;;  %v1959_v53 = vcombine.high %v901_v43, %v905_v44 }
 0x291   : > { %1349 = vmatprep.subr.bf16.mxu0 %v1979_v54  ;;  %v908_v54 = vld [vmem:[#allocation10 + $0xd0] sm:$0xff] }
 0x292   : > { %v1965_v2 = vcombine.high %v908_v54, %v912_v57  ;;  %v1964_v8 = vcombine.low %v908_v54, %v912_v57 }
 0x294   : > { %1350 = vmatpush1.bf16.msra.mxu0 %v1978_v55 }
 0x295   : > { %1351 = vmatprep.subr.bf16.mxu0 %v1987_v63  ;;  %v1956_v63 = vcombine.low %v900_v39, %v904_v42  ;;  %v1996_v39 = vcombine.low %v940_v29, %v944_v30 }
 0x298   : > { %1352 = vmatpush1.bf16.msra.mxu0 %v1986_v62 }
 0x299   : > { %1353 = vmatprep.subr.bf16.mxu0 %v1995_v7  ;;  %v921_v7 = vld [vmem:[#allocation10 + $0x138] sm:$0xff] }
 0x29c   : > { %1354 = vmatpush1.bf16.msra.mxu0 %v1994_v6  ;;  %v917_v6 = vld [vmem:[#allocation10 + $0x118] sm:$0xff] }
 0x29d   : > { %1485 = vmatprep.subr.bf16.mxu0 %v1943_v16  ;;  %v1975_v11 = vcombine.high %v917_v6, %v921_v7  ;;  %v929_v16 = vld [vmem:[#allocation10 + $0x178] sm:$0xff] }
 0x352   : > { %v2060_v18 = vpop.f32.mrb[8].mxu0 }
 0x353   : > { %v848_v19 = vadd.f32 %v2060_v18, %v1927_v17  ;;  %v839_v20 = vpop.f32.mrb[9].mxu0  ;;  %v1974_v18 = vcombine.low %v917_v6, %v921_v7 }
 0x354   : > { %v840_v21 = vadd.f32 %v1927_v17, %v839_v20  ;;  %v2061_v22 = vpop.f32.mrb[10].mxu0 }
 0x355   : > { %v851_v23 = vadd.f32 %v2061_v22, %v1927_v17  ;;  %v842_v24 = vpop.f32.mrb[11].mxu0  ;;  %v872_v27 = vmax.f32 %v848_v19, 0.0  ;;  %v936_v22 = vld [vmem:[#allocation10 + $0x1b0] sm:$0xff] }
 0x356   : > { %v843_v25 = vadd.f32 %v1927_v17, %v842_v24  ;;  %v870_v32 = vmax.f32 %v840_v21, 0.0  ;;  %v932_v21 = vld [vmem:[#allocation10 + $0x190] sm:$0xff]  ;;  %v937_v24 = vld [vmem:[#allocation10 + $0x1b8] sm:$0xff] }
 0x357   : > { %v873_v28 = vmax.f32 %v851_v23, 0.0  ;;  %v933_v23 = vld [vmem:[#allocation10 + $0x198] sm:$0xff] }
 0x358   : > { %v871_v33 = vmax.f32 %v843_v25, 0.0 }
 0x359   : > { %v2725_v34 = vpack.c.bf16 %v873_v28, %v872_v27  ;;  %v1989_v27 = vcombine.high %v932_v21, %v936_v22  ;;  %v1991_v28 = vcombine.high %v933_v23, %v937_v24 }
 0x35a   : > { %v2727_v35 = vpack.c.bf16 %v871_v33, %v870_v32  ;;  %v2064_v36 = vpop.f32.mrb[12].mxu0  ;;  %v945_v32 = vld [vmem:[#allocation10 + $0x1f8] sm:$0xff]  ;;  %v1988_v33 = vcombine.low %v932_v21, %v936_v22 }
 0x35b   : > { %v864_v40 = vadd.f32 %v2064_v36, %v1927_v17  ;;  %v855_v41 = vpop.f32.mrb[13].mxu0  ;;  %v1990_v36 = vcombine.low %v933_v23, %v937_v24 }
 0x35c   : > { %v856_v46 = vadd.f32 %v1927_v17, %v855_v41  ;;  %v2065_v47 = vpop.f32.mrb[14].mxu0  ;;  %1299 = vmatmul.mubr.bf16.vlgmr.msra.gmra.mrb[8].mxu1 %v2727_v35  ;;  %1372 = vmatmul.mubr.bf16.vlgmr.msra.gmra.mrb[16].mxu0 %v2727_v35 }
 0x35d   : > { %v867_v49 = vadd.f32 %v2065_v47, %v1927_v17  ;;  %1413 = vmatpush1.bf16.msra.mxu1 %v1940_v14  ;;  %1486 = vmatpush1.bf16.msra.mxu0 %v1942_v15  ;;  %v858_v50 = vpop.f32.mrb[15].mxu0  ;;  %v876_v55 = vmax.f32 %v864_v40, 0.0  ;;  %v928_v14 = vld [vmem:[#allocation10 + $0x170] sm:$0xff]  ;;  %v925_v15 = vld [vmem:[#allocation10 + $0x158] sm:$0xff]  ;;  %v1998_v40 = vcombine.low %v941_v31, %v945_v32 }
 0x35e   : > { %v859_v51 = vadd.f32 %v1927_v17, %v858_v50  ;;  %1414 = vmatprep.subr.bf16.mxu1 %v1949_v37  ;;  %1487 = vmatprep.subr.bf16.mxu0 %v1951_v38  ;;  %v874_v60 = vmax.f32 %v856_v46, 0.0  ;;  %v1972_v17 = vcombine.low %v916_v4, %v920_v5  ;;  %v1981_v19 = vcombine.high %v924_v12, %v928_v14 }
 0x35f   : > { %v877_v56 = vmax.f32 %v867_v49, 0.0  ;;  %1308 = vmatprep.mubr.bf16.mxu1 %v2428_v13  ;;  %1381 = vmatprep.mubr.bf16.mxu0 %v2428_v13  ;;  %v1983_v20 = vcombine.high %v925_v15, %v929_v16  ;;  %v1980_v25 = vcombine.low %v924_v12, %v928_v14  ;;  %v1982_v26 = vcombine.low %v925_v15, %v929_v16 }
 0x360   : > { %v875_v61 = vmax.f32 %v859_v51, 0.0  ;;  %v1997_v37 = vcombine.high %v940_v29, %v944_v30  ;;  %v1999_v38 = vcombine.high %v941_v31, %v945_v32 }
 0x361   : > { %v2733_v62 = vpack.c.bf16 %v877_v56, %v876_v55  ;;  %1415 = vmatpush1.bf16.msra.mxu1 %v1948_v45  ;;  %1488 = vmatpush1.bf16.msra.mxu0 %v1950_v48 }
 0x362   : > { %v2735_v1 = vpack.c.bf16 %v875_v61, %v874_v60  ;;  %1416 = vmatprep.subr.bf16.mxu1 %v1957_v52  ;;  %1489 = vmatprep.subr.bf16.mxu0 %v1959_v53 }
 0x364   : > { %1309 = vmatmul.mubr.bf16.gmra.mrb[12].mxu1 %v2725_v34  ;;  %1382 = vmatmul.mubr.bf16.gmra.mrb[20].mxu0 %v2725_v34 }
 0x365   : > { %1417 = vmatpush1.bf16.msra.mxu1 %v1956_v63  ;;  %1490 = vmatpush1.bf16.msra.mxu0 %v1958_v0 }
 0x366   : > { %1418 = vmatprep.subr.bf16.mxu1 %v1965_v2  ;;  %1491 = vmatprep.subr.bf16.mxu0 %v1967_v3 }
 0x367   : > { %1318 = vmatprep.mubr.bf16.mxu1 %v2428_v13  ;;  %1391 = vmatprep.mubr.bf16.mxu0 %v2428_v13 }
 0x369   : > { %1419 = vmatpush1.bf16.msra.mxu1 %v1964_v8  ;;  %1492 = vmatpush1.bf16.msra.mxu0 %v1966_v9 }
 0x36a   : > { %1420 = vmatprep.subr.bf16.mxu1 %v1973_v10  ;;  %1493 = vmatprep.subr.bf16.mxu0 %v1975_v11 }
 0x36c   : > { %1319 = vmatmul.mubr.bf16.gmra.mrb[16].mxu1 %v2735_v1  ;;  %1392 = vmatmul.mubr.bf16.gmra.mrb[24].mxu0 %v2735_v1 }
 0x36d   : > { %1421 = vmatpush1.bf16.msra.mxu1 %v1972_v17  ;;  %1494 = vmatpush1.bf16.msra.mxu0 %v1974_v18 }
 0x36e   : > { %1422 = vmatprep.subr.bf16.mxu1 %v1981_v19  ;;  %1495 = vmatprep.subr.bf16.mxu0 %v1983_v20 }
 0x36f   : > { %1328 = vmatprep.mubr.bf16.mxu1 %v2428_v13  ;;  %1401 = vmatprep.mubr.bf16.mxu0 %v2428_v13 }
 0x371   : > { %1423 = vmatpush1.bf16.msra.mxu1 %v1980_v25  ;;  %1496 = vmatpush1.bf16.msra.mxu0 %v1982_v26 }
 0x372   : > { %1424 = vmatprep.subr.bf16.mxu1 %v1989_v27  ;;  %1497 = vmatprep.subr.bf16.mxu0 %v1991_v28 }
 0x374   : > { %1329 = vmatmul.mubr.bf16.gmra.mrb[20].mxu1 %v2733_v62  ;;  %1402 = vmatmul.mubr.bf16.gmra.mrb[28].mxu0 %v2733_v62 }
 0x375   : > { %1425 = vmatpush1.bf16.msra.mxu1 %v1988_v33  ;;  %1498 = vmatpush1.bf16.msra.mxu0 %v1990_v36 }
 0x376   : > { %1426 = vmatprep.subr.bf16.mxu1 %v1997_v37  ;;  %1499 = vmatprep.subr.bf16.mxu0 %v1999_v38 }
 0x377   : > { %1444 = vmatprep.mubr.bf16.mxu1 %v2428_v13  ;;  %1517 = vmatprep.mubr.bf16.mxu0 %v2428_v13 }
 0x379   : > { %1427 = vmatpush1.bf16.msra.mxu1 %v1996_v39  ;;  %1500 = vmatpush1.bf16.msra.mxu0 %v1998_v40  ;;  %v2429_v40 = vmov 1966171168  }
 0x37c   : > { %1445 = vmatmul.mubr.bf16.vlgmr.msra.gmra.mrb[24].mxu1 %v2727_v35  ;;  %1518 = vmatmul.mubr.bf16.vlgmr.msra.gmra.mrb[32].mxu0 %v2727_v35 }
 0x37d   : > { %1454 = vmatprep.mubr.bf16.mxu1 %v2428_v13  ;;  %1527 = vmatprep.mubr.bf16.mxu0 %v2428_v13 }
 0x384   : > { %1455 = vmatmul.mubr.bf16.gmra.mrb[28].mxu1 %v2725_v34  ;;  %1528 = vmatmul.mubr.bf16.gmra.mrb[36].mxu0 %v2725_v34 }
 0x385   : > { %1464 = vmatprep.mubr.bf16.mxu1 %v2428_v13  ;;  %1537 = vmatprep.mubr.bf16.mxu0 %v2428_v13 }
 0x38c   : > { %1465 = vmatmul.mubr.bf16.gmra.mrb[32].mxu1 %v2735_v1  ;;  %1538 = vmatmul.mubr.bf16.gmra.mrb[40].mxu0 %v2735_v1 }
 0x38d   : > { %1474 = vmatprep.mubr.bf16.mxu1 %v2428_v13  ;;  %1547 = vmatprep.mubr.bf16.mxu0 %v2428_v13 }
 0x394   : > { %1475 = vmatmul.mubr.bf16.gmra.mrb[36].mxu1 %v2733_v62  ;;  %1548 = vmatmul.mubr.bf16.gmra.mrb[44].mxu0 %v2733_v62 }
 0x42f   : > { %v1300_v35 = vpop.f32.mrb[8].mxu1  ;;  %v1373_v41 = vpop.f32.mrb[16].mxu0 }
 0x430   : > { %v1302_v42 = vpop.f32.mrb[9].mxu1  ;;  %v1375_v34 = vpop.f32.mrb[17].mxu0 }
 0x431   : > { %v1304_v43 = vpop.f32.mrb[10].mxu1  ;;  %v1377_v44 = vpop.f32.mrb[18].mxu0 }
 0x432   : > { %v1559_v46 = vmax.f32 %v1300_v35, %v1304_v43  ;;  %v1585_v47 = vmax.f32 %v1373_v41, %v1377_v44  ;;  %v1306_v49 = vpop.f32.mrb[11].mxu1  ;;  %v1379_v50 = vpop.f32.mrb[19].mxu0  ;;  %v1676_v35 = vunpack.c.l.s4 %v2429_v40  ;;  %v1678_v41 = vlaneseq }
 0x433   : > { %v1572_v45 = vmax.f32 %v1302_v42, %v1306_v49  ;;  %v1598_v48 = vmax.f32 %v1375_v34, %v1379_v50 }
 0x437   : > { %v1310_v51 = vpop.f32.mrb[12].mxu1  ;;  %v1383_v52 = vpop.f32.mrb[20].mxu0 }
 0x438   : > { %v1560_v53 = vmax.f32 %v1559_v46, %v1310_v51  ;;  %v1586_v13 = vmax.f32 %v1585_v47, %v1383_v52  ;;  %v1312_v54 = vpop.f32.mrb[13].mxu1  ;;  %v1385_v55 = vpop.f32.mrb[21].mxu0 }
 0x439   : > { %v1573_v56 = vmax.f32 %v1572_v45, %v1312_v54  ;;  %v1599_v57 = vmax.f32 %v1598_v48, %v1385_v55  ;;  %v1314_v58 = vpop.f32.mrb[14].mxu1  ;;  %v1387_v59 = vpop.f32.mrb[22].mxu0 }
 0x43a   : > { %v1561_v60 = vmax.f32 %v1560_v53, %v1314_v58  ;;  %v1587_v61 = vmax.f32 %v1586_v13, %v1387_v59  ;;  %v1316_v62 = vpop.f32.mrb[15].mxu1  ;;  %v1389_v63 = vpop.f32.mrb[23].mxu0  ;;  %v1677_v53 = vunpack.c.0.s8 %v1676_v35  ;;  %v1679_v13 = vshrl.u32 %v1678_v41, 7 }
 0x43b   : > { %v1574_v0 = vmax.f32 %v1573_v56, %v1316_v62  ;;  %v1600_v1 = vmax.f32 %v1599_v57, %v1389_v63 }
 0x43f   : > { %v1320_v2 = vpop.f32.mrb[16].mxu1  ;;  %v1393_v3 = vpop.f32.mrb[24].mxu0 }
 0x440   : > { %v1562_v4 = vmax.f32 %v1561_v60, %v1320_v2  ;;  %v1588_v5 = vmax.f32 %v1587_v61, %v1393_v3  ;;  %v1322_v6 = vpop.f32.mrb[17].mxu1  ;;  %v1395_v7 = vpop.f32.mrb[25].mxu0 }
 0x441   : > { %v1575_v8 = vmax.f32 %v1574_v0, %v1322_v6  ;;  %v1601_v9 = vmax.f32 %v1600_v1, %v1395_v7  ;;  %v1324_v10 = vpop.f32.mrb[18].mxu1  ;;  %v1397_v11 = vpop.f32.mrb[26].mxu0 }
 0x442   : > { %v1563_v12 = vmax.f32 %v1562_v4, %v1324_v10  ;;  %v1589_v14 = vmax.f32 %v1588_v5, %v1397_v11  ;;  %v1326_v15 = vpop.f32.mrb[19].mxu1  ;;  %v1399_v16 = vpop.f32.mrb[27].mxu0  ;;  %v2763_v10 = vsub.s32 %v1677_v53, %v1679_v13 }
 0x443   : > { %v1576_v17 = vmax.f32 %v1575_v8, %v1326_v15  ;;  %v1602_v18 = vmax.f32 %v1601_v9, %v1399_v16 }
 0x447   : > { %v1330_v19 = vpop.f32.mrb[20].mxu1  ;;  %v1403_v20 = vpop.f32.mrb[28].mxu0 }
 0x448   : > { %v1564_v21 = vmax.f32 %v1563_v12, %v1330_v19  ;;  %v1590_v22 = vmax.f32 %v1589_v14, %v1403_v20  ;;  %v1332_v23 = vpop.f32.mrb[21].mxu1  ;;  %v1405_v24 = vpop.f32.mrb[29].mxu0 }
 0x449   : > { %v1577_v25 = vmax.f32 %v1576_v17, %v1332_v23  ;;  %v1603_v26 = vmax.f32 %v1602_v18, %v1405_v24  ;;  %v1334_v27 = vpop.f32.mrb[22].mxu1  ;;  %v1407_v28 = vpop.f32.mrb[30].mxu0 }
 0x44a   : > { %v1565_v29 = vmax.f32 %v1564_v21, %v1334_v27  ;;  %v1591_v30 = vmax.f32 %v1590_v22, %v1407_v28  ;;  %v1336_v31 = vpop.f32.mrb[23].mxu1  ;;  %v1409_v32 = vpop.f32.mrb[31].mxu0 }
 0x44b   : > { %v1578_v33 = vmax.f32 %v1577_v25, %v1336_v31  ;;  %v1604_v36 = vmax.f32 %v1603_v26, %v1409_v32 }
 0x44c   : > { %v1566_v37 = vrot.slane %v1565_v29, 4  ;;  %v1592_v38 = vrot.slane %v1591_v30, 4 }
 0x44d   : > { %v1579_v39 = vrot.slane %v1578_v33, 4  ;;  %v1605_v42 = vrot.slane %v1604_v36, 4 }
 0x44e   : > { %v1567_v34 = vmax.f32 %v1565_v29, %v1566_v37  ;;  %v1593_v43 = vmax.f32 %v1591_v30, %v1592_v38 }
 0x44f   : > { %v1580_v44 = vmax.f32 %v1578_v33, %v1579_v39  ;;  %v1606_v46 = vmax.f32 %v1604_v36, %v1605_v42  ;;  %v1446_v47 = vpop.f32.mrb[24].mxu1  ;;  %v1519_v49 = vpop.f32.mrb[32].mxu0 }
 0x450   : > { %v1568_v50 = vrot.slane %v1567_v34, 2  ;;  %v1594_v45 = vrot.slane %v1593_v43, 2  ;;  %v1448_v48 = vpop.f32.mrb[25].mxu1  ;;  %v1521_v51 = vpop.f32.mrb[33].mxu0 }
 0x451   : > { %v1581_v52 = vrot.slane %v1580_v44, 2  ;;  %v1607_v54 = vrot.slane %v1606_v46, 2  ;;  %v1450_v55 = vpop.f32.mrb[26].mxu1  ;;  %v1523_v56 = vpop.f32.mrb[34].mxu0 }
 0x452   : > { %v1569_v57 = vmax.f32 %v1567_v34, %v1568_v50  ;;  %v1595_v58 = vmax.f32 %v1593_v43, %v1594_v45  ;;  %v1611_v59 = vmax.f32 %v1446_v47, %v1450_v55  ;;  %v1637_v60 = vmax.f32 %v1519_v49, %v1523_v56  ;;  %v1452_v61 = vpop.f32.mrb[27].mxu1  ;;  %v1525_v62 = vpop.f32.mrb[35].mxu0 }
 0x453   : > { %v1582_v63 = vmax.f32 %v1580_v44, %v1581_v52  ;;  %v1608_v0 = vmax.f32 %v1606_v46, %v1607_v54  ;;  %v1624_v1 = vmax.f32 %v1448_v48, %v1452_v61  ;;  %v1650_v2 = vmax.f32 %v1521_v51, %v1525_v62 }
 0x454   : > { %v1570_v3 = vrot.slane %v1569_v57, 1  ;;  %v1596_v4 = vrot.slane %v1595_v58, 1 }
 0x455   : > { %v1583_v5 = vrot.slane %v1582_v63, 1  ;;  %v1609_v6 = vrot.slane %v1608_v0, 1 }
 0x456   : > { %v1571_v7 = vmax.f32 %v1569_v57, %v1570_v3  ;;  %v1597_v8 = vmax.f32 %v1595_v58, %v1596_v4 }
 0x457   : > { %v1584_v9 = vmax.f32 %v1582_v63, %v1583_v5  ;;  %v1610_v11 = vmax.f32 %v1608_v0, %v1609_v6  ;;  %v1456_v12 = vpop.f32.mrb[28].mxu1  ;;  %v1529_v14 = vpop.f32.mrb[36].mxu0 }
 0x458   : > { %v1612_v15 = vmax.f32 %v1611_v59, %v1456_v12  ;;  %v1638_v16 = vmax.f32 %v1637_v60, %v1529_v14  ;;  %v1458_v17 = vpop.f32.mrb[29].mxu1  ;;  %v1531_v18 = vpop.f32.mrb[37].mxu0 }
 0x459   : > { %v1671_v19 = vcombine.low %v1571_v7, %v1584_v9  ;;  %v1672_v20 = vcombine.low %v1597_v8, %v1610_v11  ;;  %v1625_v21 = vmax.f32 %v1624_v1, %v1458_v17  ;;  %v1651_v22 = vmax.f32 %v1650_v2, %v1531_v18  ;;  %v1460_v23 = vpop.f32.mrb[30].mxu1  ;;  %v1533_v24 = vpop.f32.mrb[38].mxu0 }
 0x45a   : > { %v1613_v25 = vmax.f32 %v1612_v15, %v1460_v23  ;;  %v1639_v26 = vmax.f32 %v1638_v16, %v1533_v24  ;;  %v1462_v27 = vpop.f32.mrb[31].mxu1  ;;  %v1535_v28 = vpop.f32.mrb[39].mxu0 }
 0x45b   : > { %v2766_v29 = vrot.slane %v1671_v19, %v2763_v10  ;;  %v2769_v30 = vrot.slane %v1672_v20, %v2763_v10  ;;  %v1626_v31 = vmax.f32 %v1625_v21, %v1462_v27  ;;  %v1652_v32 = vmax.f32 %v1651_v22, %v1535_v28 }
 0x45d   : > { %v1703_v33 = vcombine.low %v2766_v29, %v2769_v30 }
 0x45f   : > { %v1466_v36 = vpop.f32.mrb[32].mxu1  ;;  %v1539_v37 = vpop.f32.mrb[40].mxu0 }
 0x460   : > { %v1614_v38 = vmax.f32 %v1613_v25, %v1466_v36  ;;  %v1640_v39 = vmax.f32 %v1639_v26, %v1539_v37  ;;  %v1468_v40 = vpop.f32.mrb[33].mxu1  ;;  %v1541_v35 = vpop.f32.mrb[41].mxu0 }
 0x461   : > { %v1627_v41 = vmax.f32 %v1626_v31, %v1468_v40  ;;  %v1653_v42 = vmax.f32 %v1652_v32, %v1541_v35  ;;  %v1470_v34 = vpop.f32.mrb[34].mxu1  ;;  %v1543_v43 = vpop.f32.mrb[42].mxu0  ;;  %v1711_v32 = vrot.slane %v1703_v33, %v2763_v10 }
 0x462   : > { %v1615_v44 = vmax.f32 %v1614_v38, %v1470_v34  ;;  %v1641_v46 = vmax.f32 %v1640_v39, %v1543_v43  ;;  %v1472_v47 = vpop.f32.mrb[35].mxu1  ;;  %v1545_v49 = vpop.f32.mrb[43].mxu0  ;;  %v1727_v38 = vld [vmem:[#allocation12] sm:$0xff] }
 0x463   : > { %v1628_v50 = vmax.f32 %v1627_v41, %v1472_v47  ;;  %v1654_v45 = vmax.f32 %v1653_v42, %v1545_v49 }
 0x467   : > { %v1476_v48 = vpop.f32.mrb[36].mxu1  ;;  %v1549_v51 = vpop.f32.mrb[44].mxu0 }
 0x468   : > { %v1616_v52 = vmax.f32 %v1615_v44, %v1476_v48  ;;  %v1642_v53 = vmax.f32 %v1641_v46, %v1549_v51  ;;  %v1478_v13 = vpop.f32.mrb[37].mxu1  ;;  %v1551_v54 = vpop.f32.mrb[45].mxu0 }
 0x469   : > { %v1629_v55 = vmax.f32 %v1628_v50, %v1478_v13  ;;  %v1655_v56 = vmax.f32 %v1654_v45, %v1551_v54  ;;  %v1480_v57 = vpop.f32.mrb[38].mxu1  ;;  %v1553_v58 = vpop.f32.mrb[46].mxu0 }
 0x46a   : > { %v1617_v59 = vmax.f32 %v1616_v52, %v1480_v57  ;;  %v1643_v60 = vmax.f32 %v1642_v53, %v1553_v58  ;;  %v1482_v61 = vpop.f32.mrb[39].mxu1  ;;  %v1555_v62 = vpop.f32.mrb[47].mxu0 }
 0x46b   : > { %v1630_v63 = vmax.f32 %v1629_v55, %v1482_v61  ;;  %v1656_v0 = vmax.f32 %v1655_v56, %v1555_v62 }
 0x46c   : > { %v1618_v1 = vrot.slane %v1617_v59, 4  ;;  %v1644_v2 = vrot.slane %v1643_v60, 4 }
 0x46d   : > { %v1631_v3 = vrot.slane %v1630_v63, 4  ;;  %v1657_v4 = vrot.slane %v1656_v0, 4 }
 0x46e   : > { %v1619_v5 = vmax.f32 %v1617_v59, %v1618_v1  ;;  %v1645_v6 = vmax.f32 %v1643_v60, %v1644_v2 }
 0x46f   : > { %v1632_v7 = vmax.f32 %v1630_v63, %v1631_v3  ;;  %v1658_v8 = vmax.f32 %v1656_v0, %v1657_v4 }
 0x470   : > { %v1620_v9 = vrot.slane %v1619_v5, 2  ;;  %v1646_v11 = vrot.slane %v1645_v6, 2 }
 0x471   : > { %v1633_v12 = vrot.slane %v1632_v7, 2  ;;  %v1659_v14 = vrot.slane %v1658_v8, 2 }
 0x472   : > { %v1621_v15 = vmax.f32 %v1619_v5, %v1620_v9  ;;  %v1647_v16 = vmax.f32 %v1645_v6, %v1646_v11 }
 0x473   : > { %v1634_v17 = vmax.f32 %v1632_v7, %v1633_v12  ;;  %v1660_v18 = vmax.f32 %v1658_v8, %v1659_v14 }
 0x474   : > { %v1622_v19 = vrot.slane %v1621_v15, 1  ;;  %v1648_v20 = vrot.slane %v1647_v16, 1 }
 0x475   : > { %v1635_v21 = vrot.slane %v1634_v17, 1  ;;  %v1661_v22 = vrot.slane %v1660_v18, 1 }
 0x476   : > { %v1623_v23 = vmax.f32 %v1621_v15, %v1622_v19  ;;  %v1649_v24 = vmax.f32 %v1647_v16, %v1648_v20 }
 0x477   : > { %v1636_v25 = vmax.f32 %v1634_v17, %v1635_v21  ;;  %v1662_v26 = vmax.f32 %v1660_v18, %v1661_v22 }
 0x479   : > { %v1673_v27 = vcombine.low %v1623_v23, %v1636_v25  ;;  %v1674_v28 = vcombine.low %v1649_v24, %v1662_v26 }
 0x47b   : > { %v1695_v29 = vrot.slane %v1673_v27, %v2763_v10  ;;  %v1702_v30 = vrot.slane %v1674_v28, %v2763_v10 }
 0x47d   : > { %v1704_v31 = vcombine.low %v1695_v29, %v1702_v30 }
 0x47f   : > { %v1718_v36 = vrot.slane %v1704_v31, %v2763_v10 }
 0x481   : > { %v1719_v37 = vcombine.low %v1711_v32, %v1718_v36 }
 0x483   : > { %v1728_v39 = vadd.f32 %v1727_v38, %v1719_v37 }
 0x485   : > { %v1729_v40 = vmax.f32 %v1728_v39, 0.0 }
 0x487   : > { %1730 = vst [vmem:[%s487_s17] sm:$0xff] %v1729_v40 }
 0x488 PF: > { %s23_s11 = sadd.s32 1, %s2415_s11   ;;  %s2809_s30 = smov %s2411_s10 }
 0x489   : > { %p20_p7 = scmp.ge.s32.totalorder %s23_s11, 4   ;;  %s2810_s10 = smov %s2812_s22 }
 0x48b   :  { %22 = sbr.rel (!%p20_p7) target bundleno = 5 (0x5), region = 126 }
 0x492   :  { %1753 = vsyncpa [#allocation3], 1 }
 0x493   :  { %1755 = vsyncpa [#allocation3 + $0x1], 1 }
 0x494   :  { %1756 = vsyncpa [#allocation5], 1 }
 0x495   :  { %1757 = vsyncpa [#allocation8], 1 }
 0x496   :  { %1758 = vsyncpa [#allocation11], 1 }

// kernel: pointnet_forward.6
= control target key start
LH: loop header
LB: loop body
LE: loop exit
PB: predicated region body
PF: predicated region fallthrough
CT: control target
= control target key end

     0   :  { %12 = vsyncpa [#allocation3], 0  ;;  %s2438_s0 = inlined_call_operand.vmem [shape: bf16[2,64,8], index: 0, kind: input, shape index: {}]   ;;  %s2439_s1 = inlined_call_operand.hbm [shape: bf16[8,64], index: 1, kind: input, shape index: {}]   ;;  %s2440_s2 = inlined_call_operand.hbm [shape: f32[1,64], index: 2, kind: input, shape index: {}]   ;;  %s2441_s3 = inlined_call_operand.hbm [shape: bf16[64,128], index: 3, kind: input, shape index: {}]   ;;  %s2442_s4 = inlined_call_operand.hbm [shape: f32[1,128], index: 4, kind: input, shape index: {}]   ;;  %s2443_s5 = inlined_call_operand.hbm [shape: bf16[128,1024], index: 5, kind: input, shape index: {}]   ;;  %s2444_s6 = inlined_call_operand.hbm [shape: f32[1,1024], index: 6, kind: input, shape index: {}]   ;;  %s2445_s7 = inlined_call_operand.vmem [shape: f32[2,1,1024], index: 7, kind: output, shape index: {}]  }
   0x1   :  { %13 = vsyncpa [#allocation5], 0 }
   0x2   :  { %14 = vsyncpa [#allocation8], 0 }
   0x3   :  { %15 = vsyncpa [#allocation11], 0  ;;  %s2157_s24 = smov 0   ;;  %s2159_s25 = smov 0  }
   0x4   :  { %s2161_s26 = smov 0  }
   0x5 LB: > { %s2105_s27 = smov [#allocation4]   ;;  %s1652_s29 = sadd.s32 4294967295, %s2103_s26   ;;  %s2103_s26 = sphi %s2161_s26, %s21_s26   ;;  %s2099_s25 = sphi %s2159_s25, %s2458_s25   ;;  %s2095_s24 = sphi %s2157_s24, %s2457_s24  }
   0x6   : > { %s253_s28 = sshll.u32 %s2105_s27, 4  ;;  %p1654_p0 = scmp.ge.s32.totalorder %s2103_s26, 1  ;;  %s254_s28 = int_to_ptr.vmem [resolvable:$true] %s253_s28 }
   0x7   : > { %p229_p1 = scmp.lt.s32.totalorder %s2103_s26, 3  ;;  %p2175_p2 = scmp.eq.s32.totalorder %s1652_s29, 0 }
   0x8   : > { %s2106_s9 = smov [#allocation7]   ;;  %s40_s12 = sadd.s32 1, %s2099_s25 }
   0x9   : > { %s2449_s30 = scalar_select %p2175_p2, 1, 0 }
   0xa   : > { %p2179_p3 = pnand %p1654_p0, %p229_p1  ;;  %s277_s10 = sshll.u32 %s2106_s9, 4  ;;  %s2185_s10 = int_to_ptr.vmem [resolvable:$true] %s277_s10 }
   0xb   : > { %p2196_p6 = scmp.ge.s32.totalorder %s40_s12, 2  ;;  %s1897_s16 = scalar_lea.hbm %s2440_s2, 16 }
   0xc   : > { %s2450_s8 = scalar_select %p2179_p3, 1, 0 }
   0xd   : > { %p1821_p4 = pneg %p2179_p3  ;;  %p1898_p7 = scmp.ne.s32.totalorder %s2440_s2, %s1897_s16 }
   0xe   : > { %s2452_s13 = scalar_select %p2196_p6, 1, 0 }
   0xf   : > { %p2189_p5 = pnand %p2175_p2, %p1821_p4  ;;  %p1904_p11 = scmp.lt.u32.totalorder %s1897_s16, %s2440_s2 }
  0x11   : > { %p2208_p8 = pneg %p2189_p5 }
  0x13   : > { %p1900_p9 = pnand %p2208_p8, %p1898_p7 }
  0x15   : > { %p1901_p10 = pneg %p1900_p9 }
  0x17   : > { %p1906_p12 = pnand %p1904_p11, %p1901_p10 }
  0x19   : > { %1909 = shalt.err (!%p1906_p12)
}
  0x1a   : > { %s1910_s22 = scalar_lea.vmem %s254_s28, 16  ;;  %s1917_s23 = scalar_lea.vmem %s254_s28, 32 }
  0x1b   : > { %p1911_p13 = scmp.ne.s32.totalorder %s254_s28, %s1910_s22  ;;  %p1918_p4 = scmp.lt.s32.totalorder %s254_s28, %s254_s28 }
  0x1c   : > { %p1919_p2 = scmp.lt.s32.totalorder %s1917_s23, %s1910_s22 }
  0x1d   : > { %p1913_p0 = pnand %p1911_p13, %p2208_p8 }
  0x1e   : > { %p1920_p3 = por %p1919_p2, %p1918_p4 }
  0x1f   : > { %p1914_p1 = pneg %p1913_p0 }
  0x21   : > { %p1921_p6 = pnand %p1920_p3, %p1914_p1 }
  0x23   : > { %1924 = shalt.err (!%p1921_p6)
}
  0x24   : > { %1827 = dma.hbm_to_vmem [thread:$0]  (!%p2189_p5), %s2440_s2, 16, %s254_s28, [#allocation5]  }
  0x25   : > { %s1925_s15 = scalar_lea.hbm %s2442_s4, 16 }
  0x26   : > { %p1926_p7 = scmp.ne.s32.totalorder %s2442_s4, %s1925_s15  ;;  %p1932_p3 = scmp.lt.u32.totalorder %s1925_s15, %s2442_s4 }
  0x28   : > { %p1928_p9 = pnand %p1926_p7, %p2208_p8 }
  0x2a   : > { %p1929_p2 = pneg %p1928_p9 }
  0x2c   : > { %p1934_p6 = pnand %p1932_p3, %p1929_p2 }
  0x2e   : > { %1937 = shalt.err (!%p1934_p6)
}
  0x2f   : > { %s1938_s28 = scalar_lea.vmem %s2185_s10, 16  ;;  %s1945_s21 = scalar_lea.vmem %s2185_s10, 32 }
  0x30   : > { %p1939_p10 = scmp.ne.s32.totalorder %s2185_s10, %s1938_s28  ;;  %p1946_p13 = scmp.lt.s32.totalorder %s2185_s10, %s2185_s10 }
  0x31   : > { %p1947_p0 = scmp.lt.s32.totalorder %s1945_s21, %s1938_s28 }
  0x32   : > { %p1941_p11 = pnand %p1939_p10, %p2208_p8 }
  0x33   : > { %p1948_p1 = por %p1947_p0, %p1946_p13 }
  0x34   : > { %p1942_p12 = pneg %p1941_p11 }
  0x36   : > { %p1949_p4 = pnand %p1948_p1, %p1942_p12 }
  0x38   : > { %1952 = shalt.err (!%p1949_p4)
}
  0x39   : > { %1833 = dma.hbm_to_vmem [thread:$0]  (!%p2189_p5), %s2442_s4, 16, %s2185_s10, [#allocation8]  }
  0x3a   : > { %p2454_p7 = scmp.ne.s32.totalorder %s2452_s13, 0  ;;  %s2107_s27 = smov [#allocation2]  }
  0x3b   : > { %s242_s29 = sshll.u32 %s2107_s27, 4  ;;  %s2108_s9 = smov [#allocation6]   ;;  %s243_s29 = int_to_ptr.vmem [resolvable:$true] %s242_s29 }
  0x3c   : > { %s2460_s12 = smov (%p2454_p7, %s40_s12), 0  ;;  %s263_s14 = sshll.u32 %s2108_s9, 4  ;;  %s264_s14 = int_to_ptr.vmem [resolvable:$true] %s263_s14 }
  0x3d   : > { %s1953_s17 = scalar_lea.hbm %s2439_s1, 64 }
  0x3e   : > { %p1954_p9 = scmp.ne.s32.totalorder %s2439_s1, %s1953_s17  ;;  %p1960_p6 = scmp.lt.u32.totalorder %s1953_s17, %s2439_s1 }
  0x40   : > { %p1956_p2 = pnand %p1954_p9, %p2208_p8 }
  0x42   : > { %p1957_p3 = pneg %p1956_p2 }
  0x44   : > { %p1962_p10 = pnand %p1960_p6, %p1957_p3 }
  0x46   : > { %1965 = shalt.err (!%p1962_p10)
}
  0x47   : > { %s1966_s28 = scalar_lea.vmem %s243_s29, 64  ;;  %p1974_p0 = scmp.lt.s32.totalorder %s243_s29, %s243_s29 }
  0x48   : > { %p1967_p11 = scmp.ne.s32.totalorder %s243_s29, %s1966_s28  ;;  %p1975_p1 = scmp.lt.s32.totalorder %s1966_s28, %s1966_s28 }
  0x4a   : > { %p1969_p12 = pnand %p1967_p11, %p2208_p8  ;;  %p1976_p4 = por %p1975_p1, %p1974_p0 }
  0x4c   : > { %p1970_p13 = pneg %p1969_p12 }
  0x4e   : > { %p1977_p7 = pnand %p1976_p4, %p1970_p13 }
  0x50   : > { %1980 = shalt.err (!%p1977_p7)
}
  0x51   : > { %1824 = dma.hbm_to_vmem [thread:$0]  (!%p2189_p5), %s2439_s1, 64, %s243_s29, [#allocation3]  }
  0x52   : > { %s1981_s9 = scalar_lea.hbm %s2441_s3, 512 }
  0x53   : > { %p1982_p9 = scmp.ne.s32.totalorder %s2441_s3, %s1981_s9  ;;  %p1988_p6 = scmp.lt.u32.totalorder %s1981_s9, %s2441_s3 }
  0x55   : > { %p1984_p2 = pnand %p1982_p9, %p2208_p8 }
  0x57   : > { %p1985_p3 = pneg %p1984_p2 }
  0x59   : > { %p1990_p10 = pnand %p1988_p6, %p1985_p3 }
  0x5b   : > { %1993 = shalt.err (!%p1990_p10)
}
  0x5c   : > { %s1994_s20 = scalar_lea.vmem %s264_s14, 512  ;;  %p2002_p0 = scmp.lt.s32.totalorder %s264_s14, %s264_s14 }
  0x5d   : > { %p1995_p11 = scmp.ne.s32.totalorder %s264_s14, %s1994_s20  ;;  %p2003_p1 = scmp.lt.s32.totalorder %s1994_s20, %s1994_s20 }
  0x5f   : > { %p1997_p12 = pnand %p1995_p11, %p2208_p8  ;;  %p2004_p4 = por %p2003_p1, %p2002_p0 }
  0x61   : > { %p1998_p13 = pneg %p1997_p12 }
  0x63   : > { %p2005_p7 = pnand %p2004_p4, %p1998_p13 }
  0x65   : > { %2008 = shalt.err (!%p2005_p7)
}
  0x66   : > { %s2109_s29 = smov 64   ;;  %s2110_s10 = smov 4  }
  0x67   : > { %1830 = dma.hbm_to_vmem [thread:$0]  (!%p2189_p5), %s2441_s3, 512, %s264_s14, [#allocation5], %s2109_s29, %s2109_s29, %s2110_s10  }
  0x68   : > { %s2111_s21 = smov [#allocation9]   ;;  %s2009_s9 = scalar_lea.hbm %s2443_s5, 8192 }
  0x69   : > { %s287_s22 = sshll.u32 %s2111_s21, 4  ;;  %p2010_p9 = scmp.ne.s32.totalorder %s2443_s5, %s2009_s9  ;;  %s288_s22 = int_to_ptr.vmem [resolvable:$true] %s287_s22 }
  0x6a   : > { %p2016_p6 = scmp.lt.u32.totalorder %s2009_s9, %s2443_s5 }
  0x6b   : > { %p2012_p2 = pnand %p2010_p9, %p2208_p8 }
  0x6d   : > { %p2013_p3 = pneg %p2012_p2 }
  0x6f   : > { %p2018_p10 = pnand %p2016_p6, %p2013_p3 }
  0x71   : > { %2021 = shalt.err (!%p2018_p10)
}
  0x72   : > { %s2022_s14 = scalar_lea.vmem %s288_s22, 8192  ;;  %p2030_p0 = scmp.lt.s32.totalorder %s288_s22, %s288_s22 }
  0x73   : > { %p2023_p11 = scmp.ne.s32.totalorder %s288_s22, %s2022_s14  ;;  %p2031_p1 = scmp.lt.s32.totalorder %s2022_s14, %s2022_s14 }
  0x75   : > { %p2025_p12 = pnand %p2023_p11, %p2208_p8  ;;  %p2032_p4 = por %p2031_p1, %p2030_p0 }
  0x77   : > { %p2026_p13 = pneg %p2025_p12 }
  0x79   : > { %p2033_p7 = pnand %p2032_p4, %p2026_p13 }
  0x7b   : > { %2036 = shalt.err (!%p2033_p7)
}
  0x7c   : > { %s2112_s20 = smov 512   ;;  %s2113_s29 = smov 32  }
  0x7d   : > { %1836 = dma.hbm_to_vmem [thread:$0]  (!%p2189_p5), %s2443_s5, 8192, %s288_s22, [#allocation8], %s2112_s20, %s2112_s20, %s2113_s29  }
  0x7e   : > { %s2114_s28 = smov [#allocation10]   ;;  %s2037_s9 = scalar_lea.hbm %s2444_s6, 128 }
  0x7f   : > { %s301_s21 = sshll.u32 %s2114_s28, 4  ;;  %p2038_p9 = scmp.ne.s32.totalorder %s2444_s6, %s2037_s9  ;;  %s302_s21 = int_to_ptr.vmem [resolvable:$true] %s301_s21 }
  0x80   : > { %p2044_p6 = scmp.lt.u32.totalorder %s2037_s9, %s2444_s6 }
  0x81   : > { %p2040_p2 = pnand %p2038_p9, %p2208_p8 }
  0x83   : > { %p2041_p3 = pneg %p2040_p2 }
  0x85   : > { %p2046_p10 = pnand %p2044_p6, %p2041_p3 }
  0x87   : > { %2049 = shalt.err (!%p2046_p10)
}
  0x88   : > { %s2050_s22 = scalar_lea.vmem %s302_s21, 128  ;;  %p2058_p0 = scmp.lt.s32.totalorder %s302_s21, %s302_s21 }
  0x89   : > { %p2051_p11 = scmp.ne.s32.totalorder %s302_s21, %s2050_s22  ;;  %p2059_p1 = scmp.lt.s32.totalorder %s2050_s22, %s2050_s22 }
  0x8b   : > { %p2053_p12 = pnand %p2051_p11, %p2208_p8  ;;  %p2060_p4 = por %p2059_p1, %p2058_p0 }
  0x8d   : > { %p2054_p13 = pneg %p2053_p12 }
  0x8f   : > { %p2061_p7 = pnand %p2060_p4, %p2054_p13 }
  0x91   : > { %2064 = shalt.err (!%p2061_p7)
}
  0x92   : > { %1839 = dma.hbm_to_vmem [thread:$0]  (!%p2189_p5), %s2444_s6, 128, %s302_s21, [#allocation11]  }
  0x93   : > { %p2455_p9 = scmp.ne.s32.totalorder %s2450_s8, 0 }
  0x94   : > { %p2456_p2 = scmp.ne.s32.totalorder (!%p2455_p9), %s2449_s30, 0 }
  0x95   : > { %329 = sbr.rel (%p2455_p9) target bundleno = 913 (0x391), region = 48 }
  0x9c   : > { %2078 = dma.done.wait (%p2456_p2), [#allocation3], 64  }
  0x9d   : > { %2080 = vsyncadd (%p2456_p2), [#allocation3], 4294967232 }
  0x9e   : > { %2082 = dma.done.wait (%p2456_p2), [#allocation5], 528  }
  0x9f   : > { %2084 = vsyncadd (%p2456_p2), [#allocation5], 4294966768 }
  0xa0   : > { %2086 = dma.done.wait (%p2456_p2), [#allocation8], 8208  }
  0xa1   : > { %2088 = vsyncadd (%p2456_p2), [#allocation8], 4294959088 }
  0xa2   : > { %2090 = dma.done.wait (%p2456_p2), [#allocation11], 128  }
  0xa3   : > { %2092 = vsyncadd (%p2456_p2), [#allocation11], 4294967168  ;;  %p388_p5 = scmp.lt.s32.totalorder %s2095_s24, 1  ;;  %vm459_vm0 = vcmask 1043456   ;;  %vm446_vm1 = vcmask 64512   ;;  %v1893_v5 = vld [vmem:[#allocation6] sm:$0xff]  }
  0xa4   : > { %v418_v0 = vld [vmem:[#allocation2] sm:$0xf]  ;;  %v1894_v6 = vld [vmem:[#allocation6 + $0x8] sm:$0xff]   ;;  %1780 = vmatprep.subr.bf16.mxu1 %v1893_v5  ;;  %v1895_v8 = vld [vmem:[#allocation6 + $0x10] sm:$0xff]   ;;  %vm579_vm2 = vcmask 523264  }
  0xa5   : > { %s2462_s24 = smov (!%p388_p5, %s2095_s24), 1  ;;  %1796 = vmatprep.subr.msk.bf16.mxu0 %vm459_vm0, %v418_v0  ;;  %v461_v1 = vsel %vm459_vm0, %v418_v0, 0  ;;  %1781 = vmatpush3.bf16.msra.mxu1 %v1893_v5  ;;  %v1896_v9 = vld [vmem:[#allocation6 + $0x18] sm:$0xff]   ;;  %v669_v10 = vld [vmem:[#allocation9] sm:$0xff]  ;;  %v2356_v12 = vld [vmem:[#allocation9 + $0x8] sm:$0xff] }
  0xa6   : > { %s1756_s8 = sshll.u32 %s2462_s24, 5  ;;  %1771 = vmatpush3.bf16.msra.mxu0 %v461_v1  ;;  %1782 = vmatprep.subr.bf16.mxu1 %v1894_v6  ;;  %v673_v11 = vld [vmem:[#allocation9 + $0x20] sm:$0xff]  ;;  %v2358_v15 = vld [vmem:[#allocation9 + $0x28] sm:$0xff]  ;;  %v1672_v38 = vld [vmem:[#allocation4] ss:$0 sm:$0xff]  ;;  %s1671_s30 = sshll.u32 %s2462_s24, 3 }
  0xa7   : > { %s395_s29 = scalar_lea.vmem %s2438_s0, %s1756_s8  ;;  %v1690_v13 = vcombine.low %v669_v10, %v673_v11  ;;  %v1691_v14 = vcombine.high %v669_v10, %v673_v11  ;;  %v677_v16 = vld [vmem:[#allocation9 + $0x40] sm:$0xff]  ;;  %v1692_v18 = vcombine.low %v2356_v12, %v2358_v15  ;;  %v1693_v19 = vcombine.high %v2356_v12, %v2358_v15  ;;  %v678_v51 = vld [vmem:[#allocation9 + $0x48] sm:$0xff]  ;;  %s402_s28 = scalar_lea.vmem %s2445_s7, %s1671_s30 }
  0xa8   : > { %v1889_v2 = vld [vmem:[%s395_s29] sm:$0xff]   ;;  %v1890_v3 = vld [vmem:[%s395_s29 + $0x8] sm:$0xff]   ;;  %v1891_v4 = vld [vmem:[%s395_s29 + $0x10] sm:$0xff]  }
  0xa9   : > { %1772 = vmatprep.mubr.msk.bf16.mxu0 %vm446_vm1, %v1889_v2  ;;  %v1892_v7 = vld [vmem:[%s395_s29 + $0x18] sm:$0xff]   ;;  %1783 = vmatpush3.bf16.msra.mxu1 %v1894_v6  ;;  %v681_v17 = vld [vmem:[#allocation9 + $0x60] sm:$0xff]  ;;  %v682_v52 = vld [vmem:[#allocation9 + $0x68] sm:$0xff] }
  0xaa   : > { %1773 = vmatmul.mubr.msk.bf16.vlgmr.msra.gmra.mrb[0].mxu0 %vm446_vm1, %v1890_v3  ;;  %1784 = vmatprep.subr.bf16.mxu1 %v1895_v8  ;;  %v1699_v20 = vcombine.high %v677_v16, %v681_v17  ;;  %v685_v21 = vld [vmem:[#allocation9 + $0x80] sm:$0xff]  ;;  %v1698_v23 = vcombine.low %v677_v16, %v681_v17  ;;  %v1701_v58 = vcombine.high %v678_v51, %v682_v52  ;;  %v686_v61 = vld [vmem:[#allocation9 + $0x88] sm:$0xff] }
  0xab   : > { %1776 = vmatprep.mubr.msk.bf16.mxu0 %vm446_vm1, %v1891_v4  ;;  %1053 = vmatprep.subr.bf16.mxu0 %v1691_v14  ;;  %v689_v22 = vld [vmem:[#allocation9 + $0xa0] sm:$0xff]  ;;  %v690_v62 = vld [vmem:[#allocation9 + $0xa8] sm:$0xff]  ;;  %v1700_v4 = vcombine.low %v678_v51, %v682_v52 }
  0xac   : > { %1054 = vmatpush1.bf16.msra.mxu0 %v1690_v13  ;;  %v1707_v24 = vcombine.high %v685_v21, %v689_v22  ;;  %v693_v25 = vld [vmem:[#allocation9 + $0xc0] sm:$0xff]  ;;  %v1706_v27 = vcombine.low %v685_v21, %v689_v22  ;;  %v1709_v6 = vcombine.high %v686_v61, %v690_v62  ;;  %v1708_v13 = vcombine.low %v686_v61, %v690_v62  ;;  %v702_v16 = vld [vmem:[#allocation9 + $0x108] sm:$0xff]  ;;  %v680_v61 = vld [vmem:[#allocation9 + $0x58] sm:$0xff] }
  0xad   : > { %1785 = vmatpush3.bf16.msra.mxu1 %v1895_v8  ;;  %1055 = vmatprep.subr.bf16.mxu0 %v1699_v20  ;;  %v697_v26 = vld [vmem:[#allocation9 + $0xe0] sm:$0xff]  ;;  %v694_v8 = vld [vmem:[#allocation9 + $0xc8] sm:$0xff]  ;;  %v684_v62 = vld [vmem:[#allocation9 + $0x78] sm:$0xff] }
  0xae   : > { %1786 = vmatprep.subr.bf16.mxu1 %v1896_v9  ;;  %v1715_v28 = vcombine.high %v693_v25, %v697_v26  ;;  %v701_v29 = vld [vmem:[#allocation9 + $0x100] sm:$0xff]  ;;  %v1714_v31 = vcombine.low %v693_v25, %v697_v26  ;;  %v706_v17 = vld [vmem:[#allocation9 + $0x128] sm:$0xff] }
  0xaf   : > { %v705_v30 = vld [vmem:[#allocation9 + $0x120] sm:$0xff]  ;;  %v1725_v15 = vcombine.high %v702_v16, %v706_v17  ;;  %v1724_v20 = vcombine.low %v702_v16, %v706_v17  ;;  %v718_v25 = vld [vmem:[#allocation9 + $0x188] sm:$0xff] }
  0xb0   : > { %1056 = vmatpush1.bf16.msra.mxu0 %v1698_v23  ;;  %v1723_v32 = vcombine.high %v701_v29, %v705_v30  ;;  %v709_v33 = vld [vmem:[#allocation9 + $0x140] sm:$0xff]  ;;  %v1722_v35 = vcombine.low %v701_v29, %v705_v30 }
  0xb1   : > { %1787 = vmatpush3.bf16.msra.mxu1 %v1896_v9  ;;  %1057 = vmatprep.subr.bf16.mxu0 %v1707_v24  ;;  %v713_v34 = vld [vmem:[#allocation9 + $0x160] sm:$0xff]  ;;  %v698_v9 = vld [vmem:[#allocation9 + $0xe8] sm:$0xff] }
  0xb2   : > { %1777 = vmatmul.mubr.msk.bf16.gmra.mrb[4].mxu0 %vm446_vm1, %v1892_v7  ;;  %1126 = vmatprep.subr.bf16.mxu1 %v1693_v19  ;;  %v1731_v36 = vcombine.high %v709_v33, %v713_v34  ;;  %v1730_v37 = vcombine.low %v709_v33, %v713_v34  ;;  %v1717_v14 = vcombine.high %v694_v8, %v698_v9  ;;  %v714_v19 = vld [vmem:[#allocation9 + $0x168] sm:$0xff]  ;;  %v717_v23 = vld [vmem:[#allocation9 + $0x180] sm:$0xff] }
  0xb3   : > { %v1716_v12 = vcombine.low %v694_v8, %v698_v9  ;;  %v721_v24 = vld [vmem:[#allocation9 + $0x1a0] sm:$0xff]  ;;  %v726_v33 = vld [vmem:[#allocation9 + $0x1c8] sm:$0xff]  ;;  %v691_v9 = vld [vmem:[#allocation9 + $0xb0] sm:$0xff] }
  0xb4   : > { %1058 = vmatpush1.bf16.msra.mxu0 %v1706_v27  ;;  %v1739_v26 = vcombine.high %v717_v23, %v721_v24  ;;  %v722_v27 = vld [vmem:[#allocation9 + $0x1a8] sm:$0xff] }
  0xb5   : > { %1059 = vmatprep.subr.bf16.mxu0 %v1715_v28  ;;  %v1738_v28 = vcombine.low %v717_v23, %v721_v24  ;;  %v1740_v29 = vcombine.low %v718_v25, %v722_v27  ;;  %v1741_v30 = vcombine.high %v718_v25, %v722_v27  ;;  %v695_v23 = vld [vmem:[#allocation9 + $0xd0] sm:$0xff]  ;;  %v700_v27 = vld [vmem:[#allocation9 + $0xf8] sm:$0xff] }
  0xb6   : > { %v699_v25 = vld [vmem:[#allocation9 + $0xf0] sm:$0xff] }
  0xb8   : > { %1060 = vmatpush1.bf16.msra.mxu0 %v1714_v31  ;;  %v725_v31 = vld [vmem:[#allocation9 + $0x1c0] sm:$0xff] }
  0xb9   : > { %1061 = vmatprep.subr.bf16.mxu0 %v1723_v32  ;;  %v729_v32 = vld [vmem:[#allocation9 + $0x1e0] sm:$0xff] }
  0xba   : > { %v1747_v34 = vcombine.high %v725_v31, %v729_v32 }
  0xbc   : > { %1062 = vmatpush1.bf16.msra.mxu0 %v1722_v35  ;;  %v730_v35 = vld [vmem:[#allocation9 + $0x1e8] sm:$0xff] }
  0xbd   : > { %1063 = vmatprep.subr.bf16.mxu0 %v1731_v36  ;;  %v1746_v36 = vcombine.low %v725_v31, %v729_v32 }
  0xc0   : > { %1064 = vmatpush1.bf16.msra.mxu0 %v1730_v37  ;;  %v1748_v37 = vcombine.low %v726_v33, %v730_v35 }
  0xc1   : > { %1065 = vmatprep.subr.bf16.mxu0 %v1739_v26  ;;  %v696_v26 = vld [vmem:[#allocation9 + $0xd8] sm:$0xff] }
  0xc4   : > { %1066 = vmatpush1.bf16.msra.mxu0 %v1738_v28 }
  0xc5   : > { %1067 = vmatprep.subr.bf16.mxu0 %v1747_v34  ;;  %v1721_v34 = vcombine.high %v696_v26, %v700_v27 }
  0xc8   : > { %1068 = vmatpush1.bf16.msra.mxu0 %v1746_v36  ;;  %v707_v36 = vld [vmem:[#allocation9 + $0x130] sm:$0xff] }
 0x17d   : > { %v1774_v39 = vpop.f32.mrb[0].mxu0 }
 0x17e   : > { %v506_v40 = vadd.f32 %v1774_v39, %v1672_v38  ;;  %v497_v41 = vpop.f32.mrb[1].mxu0  ;;  %v671_v39 = vld [vmem:[#allocation9 + $0x10] sm:$0xff] }
 0x17f   : > { %v498_v42 = vadd.f32 %v1672_v38, %v497_v41  ;;  %v1775_v43 = vpop.f32.mrb[2].mxu0  ;;  %v672_v41 = vld [vmem:[#allocation9 + $0x18] sm:$0xff] }
 0x180   : > { %v509_v44 = vadd.f32 %v1775_v43, %v1672_v38  ;;  %v500_v45 = vpop.f32.mrb[3].mxu0  ;;  %v530_v47 = vmax.f32 %v506_v40, 0.0  ;;  %v675_v40 = vld [vmem:[#allocation9 + $0x30] sm:$0xff]  ;;  %v676_v43 = vld [vmem:[#allocation9 + $0x38] sm:$0xff] }
 0x181   : > { %v501_v46 = vadd.f32 %v1672_v38, %v500_v45  ;;  %v528_v49 = vmax.f32 %v498_v42, 0.0  ;;  %v1695_v42 = vcombine.high %v671_v39, %v675_v40  ;;  %v1694_v45 = vcombine.low %v671_v39, %v675_v40 }
 0x182   : > { %v531_v48 = vmax.f32 %v509_v44, 0.0  ;;  %v2115_v44 = vmov 0   ;;  %v1718_v39 = vcombine.low %v695_v23, %v699_v25  ;;  %v1720_v40 = vcombine.low %v696_v26, %v700_v27 }
 0x183   : > { %v529_v50 = vmax.f32 %v501_v46, 0.0  ;;  %1085 = vmatprep.mubr.bf16.mxu0 %v2115_v44  ;;  %v1696_v46 = vcombine.low %v672_v41, %v676_v43  ;;  %1199 = vmatprep.subr.bf16.mxu0 %v1695_v42 }
 0x184   : > { %v537_v53 = vpack.c.bf16 %v531_v48, %v530_v47  ;;  %v1697_v47 = vcombine.high %v672_v41, %v676_v43  ;;  %v1681_v48 = vld [vmem:[#allocation7] ss:$0 sm:$0xff]  ;;  %v711_v43 = vld [vmem:[#allocation9 + $0x150] sm:$0xff] }
 0x185   : > { %v1778_v54 = vpop.f32.mrb[4].mxu0  ;;  %v536_v55 = vpack.c.bf16 %v529_v50, %v528_v49 }
 0x186   : > { %v522_v56 = vadd.f32 %v1778_v54, %v1672_v38  ;;  %v513_v57 = vpop.f32.mrb[5].mxu0 }
 0x187   : > { %v514_v59 = vadd.f32 %v1672_v38, %v513_v57  ;;  %1788 = vmatprep.mubr.msk.bf16.mxu1 %vm579_vm2, %v536_v55  ;;  %v1779_v60 = vpop.f32.mrb[6].mxu0  ;;  %v679_v57 = vld [vmem:[#allocation9 + $0x50] sm:$0xff] }
 0x188   : > { %v534_v63 = vmax.f32 %v522_v56, 0.0  ;;  %v525_v0 = vadd.f32 %v1779_v60, %v1672_v38  ;;  %1789 = vmatmul.mubr.msk.bf16.vlgmr.msra.gmra.mrb[0].mxu1 %vm579_vm2, %v537_v53  ;;  %v516_v1 = vpop.f32.mrb[7].mxu0  ;;  %v683_v60 = vld [vmem:[#allocation9 + $0x70] sm:$0xff] }
 0x189   : > { %v532_v2 = vmax.f32 %v514_v59, 0.0  ;;  %v517_v3 = vadd.f32 %v1672_v38, %v516_v1  ;;  %1127 = vmatpush1.bf16.msra.mxu1 %v1692_v18  ;;  %v710_v18 = vld [vmem:[#allocation9 + $0x148] sm:$0xff]  ;;  %v1749_v38 = vcombine.high %v726_v33, %v730_v35  ;;  %v1719_v33 = vcombine.high %v695_v23, %v699_v25  ;;  %v703_v35 = vld [vmem:[#allocation9 + $0x110] sm:$0xff] }
 0x18a   : > { %v535_v5 = vmax.f32 %v525_v0, 0.0  ;;  %1128 = vmatprep.subr.bf16.mxu1 %v1701_v58  ;;  %v1733_v21 = vcombine.high %v710_v18, %v714_v19  ;;  %v1732_v22 = vcombine.low %v710_v18, %v714_v19  ;;  %v1704_v18 = vcombine.low %v680_v61, %v684_v62 }
 0x18b   : > { %v533_v7 = vmax.f32 %v517_v3, 0.0  ;;  %v1727_v41 = vcombine.high %v703_v35, %v707_v36 }
 0x18c   : > { %v539_v10 = vpack.c.bf16 %v535_v5, %v534_v63  ;;  %v1705_v5 = vcombine.high %v680_v61, %v684_v62  ;;  %v731_v61 = vld [vmem:[#allocation9 + $0x1f0] sm:$0xff]  ;;  %v728_v62 = vld [vmem:[#allocation9 + $0x1d8] sm:$0xff] }
 0x18d   : > { %v538_v11 = vpack.c.bf16 %v533_v7, %v532_v2  ;;  %1129 = vmatpush1.bf16.msra.mxu1 %v1700_v4  ;;  %v1703_v4 = vcombine.high %v679_v57, %v683_v60 }
 0x18e   : > { %1130 = vmatprep.subr.bf16.mxu1 %v1709_v6  ;;  %v687_v6 = vld [vmem:[#allocation9 + $0x90] sm:$0xff] }
 0x18f   : > { %1792 = vmatprep.mubr.msk.bf16.mxu1 %vm579_vm2, %v538_v11  ;;  %v692_v11 = vld [vmem:[#allocation9 + $0xb8] sm:$0xff] }
 0x190   : > { %1793 = vmatmul.mubr.msk.bf16.gmra.mrb[4].mxu1 %vm579_vm2, %v539_v10  ;;  %v688_v10 = vld [vmem:[#allocation9 + $0x98] sm:$0xff] }
 0x191   : > { %1131 = vmatpush1.bf16.msra.mxu1 %v1708_v13  ;;  %1158 = vmatprep.mubr.bf16.mxu1 %v2115_v44  ;;  %v1712_v31 = vcombine.low %v688_v10, %v692_v11 }
 0x192   : > { %1132 = vmatprep.subr.bf16.mxu1 %v1717_v14 }
 0x195   : > { %1133 = vmatpush1.bf16.msra.mxu1 %v1716_v12 }
 0x196   : > { %1134 = vmatprep.subr.bf16.mxu1 %v1725_v15  ;;  %v1702_v15 = vcombine.low %v679_v57, %v683_v60  ;;  %v727_v60 = vld [vmem:[#allocation9 + $0x1d0] sm:$0xff] }
 0x199   : > { %1135 = vmatpush1.bf16.msra.mxu1 %v1724_v20 }
 0x19a   : > { %1136 = vmatprep.subr.bf16.mxu1 %v1733_v21  ;;  %v1711_v21 = vcombine.high %v687_v6, %v691_v9 }
 0x19d   : > { %1137 = vmatpush1.bf16.msra.mxu1 %v1732_v22  ;;  %v1713_v22 = vcombine.high %v688_v10, %v692_v11 }
 0x19e   : > { %1138 = vmatprep.subr.bf16.mxu1 %v1741_v30  ;;  %v1710_v30 = vcombine.low %v687_v6, %v691_v9  ;;  %v1750_v6 = vcombine.low %v727_v60, %v731_v61 }
 0x1a1   : > { %1139 = vmatpush1.bf16.msra.mxu1 %v1740_v29 }
 0x1a2   : > { %1140 = vmatprep.subr.bf16.mxu1 %v1749_v38  ;;  %v708_v38 = vld [vmem:[#allocation9 + $0x138] sm:$0xff] }
 0x1a5   : > { %1141 = vmatpush1.bf16.msra.mxu1 %v1748_v37  ;;  %v704_v37 = vld [vmem:[#allocation9 + $0x118] sm:$0xff] }
 0x1a6   : > { %1272 = vmatprep.subr.bf16.mxu1 %v1697_v47  ;;  %v1729_v42 = vcombine.high %v704_v37, %v708_v38  ;;  %v716_v47 = vld [vmem:[#allocation9 + $0x178] sm:$0xff] }
 0x25b   : > { %v1790_v49 = vpop.f32.mrb[0].mxu1 }
 0x25c   : > { %v635_v50 = vadd.f32 %v1790_v49, %v1681_v48  ;;  %v626_v51 = vpop.f32.mrb[1].mxu1  ;;  %v1728_v49 = vcombine.low %v704_v37, %v708_v38 }
 0x25d   : > { %v627_v52 = vadd.f32 %v1681_v48, %v626_v51  ;;  %v1791_v53 = vpop.f32.mrb[2].mxu1 }
 0x25e   : > { %v638_v54 = vadd.f32 %v1791_v53, %v1681_v48  ;;  %v629_v55 = vpop.f32.mrb[3].mxu1  ;;  %v659_v58 = vmax.f32 %v635_v50, 0.0  ;;  %v723_v53 = vld [vmem:[#allocation9 + $0x1b0] sm:$0xff] }
 0x25f   : > { %v630_v56 = vadd.f32 %v1681_v48, %v629_v55  ;;  %v657_v63 = vmax.f32 %v627_v52, 0.0  ;;  %v719_v52 = vld [vmem:[#allocation9 + $0x190] sm:$0xff]  ;;  %v724_v55 = vld [vmem:[#allocation9 + $0x1b8] sm:$0xff] }
 0x260   : > { %v660_v59 = vmax.f32 %v638_v54, 0.0  ;;  %v720_v54 = vld [vmem:[#allocation9 + $0x198] sm:$0xff] }
 0x261   : > { %v658_v0 = vmax.f32 %v630_v56, 0.0 }
 0x262   : > { %v2373_v1 = vpack.c.bf16 %v660_v59, %v659_v58  ;;  %v1743_v58 = vcombine.high %v719_v52, %v723_v53  ;;  %v1745_v59 = vcombine.high %v720_v54, %v724_v55 }
 0x263   : > { %v2375_v2 = vpack.c.bf16 %v658_v0, %v657_v63  ;;  %v1794_v3 = vpop.f32.mrb[4].mxu1  ;;  %v732_v63 = vld [vmem:[#allocation9 + $0x1f8] sm:$0xff]  ;;  %v1742_v0 = vcombine.low %v719_v52, %v723_v53 }
 0x264   : > { %v651_v7 = vadd.f32 %v1794_v3, %v1681_v48  ;;  %v642_v8 = vpop.f32.mrb[5].mxu1  ;;  %v1744_v3 = vcombine.low %v720_v54, %v724_v55 }
 0x265   : > { %v643_v13 = vadd.f32 %v1681_v48, %v642_v8  ;;  %1086 = vmatmul.mubr.bf16.vlgmr.msra.gmra.mrb[8].mxu0 %v2375_v2  ;;  %1159 = vmatmul.mubr.bf16.vlgmr.msra.gmra.mrb[8].mxu1 %v2375_v2  ;;  %v1795_v14 = vpop.f32.mrb[6].mxu1 }
 0x266   : > { %v663_v16 = vmax.f32 %v651_v7, 0.0  ;;  %1200 = vmatpush1.bf16.msra.mxu0 %v1694_v45  ;;  %1273 = vmatpush1.bf16.msra.mxu1 %v1696_v46  ;;  %v654_v17 = vadd.f32 %v1795_v14, %v1681_v48  ;;  %v645_v12 = vpop.f32.mrb[7].mxu1  ;;  %v715_v45 = vld [vmem:[#allocation9 + $0x170] sm:$0xff]  ;;  %v712_v46 = vld [vmem:[#allocation9 + $0x158] sm:$0xff]  ;;  %v1752_v7 = vcombine.low %v728_v62, %v732_v63 }
 0x267   : > { %v661_v19 = vmax.f32 %v643_v13, 0.0  ;;  %v646_v20 = vadd.f32 %v1681_v48, %v645_v12  ;;  %1201 = vmatprep.subr.bf16.mxu0 %v1703_v4  ;;  %1274 = vmatprep.subr.bf16.mxu1 %v1705_v5  ;;  %v1726_v48 = vcombine.low %v703_v35, %v707_v36  ;;  %v1735_v50 = vcombine.high %v711_v43, %v715_v45 }
 0x268   : > { %v664_v24 = vmax.f32 %v654_v17, 0.0  ;;  %1095 = vmatprep.mubr.bf16.mxu0 %v2115_v44  ;;  %1168 = vmatprep.mubr.bf16.mxu1 %v2115_v44  ;;  %v1737_v51 = vcombine.high %v712_v46, %v716_v47  ;;  %v1734_v56 = vcombine.low %v711_v43, %v715_v45  ;;  %v1736_v57 = vcombine.low %v712_v46, %v716_v47 }
 0x269   : > { %v662_v28 = vmax.f32 %v646_v20, 0.0  ;;  %v1751_v4 = vcombine.high %v727_v60, %v731_v61  ;;  %v1753_v5 = vcombine.high %v728_v62, %v732_v63 }
 0x26a   : > { %v2381_v29 = vpack.c.bf16 %v664_v24, %v663_v16  ;;  %1202 = vmatpush1.bf16.msra.mxu0 %v1702_v15  ;;  %1275 = vmatpush1.bf16.msra.mxu1 %v1704_v18 }
 0x26b   : > { %v2383_v32 = vpack.c.bf16 %v662_v28, %v661_v19  ;;  %1203 = vmatprep.subr.bf16.mxu0 %v1711_v21  ;;  %1276 = vmatprep.subr.bf16.mxu1 %v1713_v22 }
 0x26d   : > { %1096 = vmatmul.mubr.bf16.gmra.mrb[12].mxu0 %v2373_v1  ;;  %1169 = vmatmul.mubr.bf16.gmra.mrb[12].mxu1 %v2373_v1 }
 0x26e   : > { %1204 = vmatpush1.bf16.msra.mxu0 %v1710_v30  ;;  %1277 = vmatpush1.bf16.msra.mxu1 %v1712_v31 }
 0x26f   : > { %1205 = vmatprep.subr.bf16.mxu0 %v1719_v33  ;;  %1278 = vmatprep.subr.bf16.mxu1 %v1721_v34 }
 0x270   : > { %1105 = vmatprep.mubr.bf16.mxu0 %v2115_v44  ;;  %1178 = vmatprep.mubr.bf16.mxu1 %v2115_v44 }
 0x272   : > { %1206 = vmatpush1.bf16.msra.mxu0 %v1718_v39  ;;  %1279 = vmatpush1.bf16.msra.mxu1 %v1720_v40 }
 0x273   : > { %1207 = vmatprep.subr.bf16.mxu0 %v1727_v41  ;;  %1280 = vmatprep.subr.bf16.mxu1 %v1729_v42 }
 0x275   : > { %1106 = vmatmul.mubr.bf16.gmra.mrb[16].mxu0 %v2383_v32  ;;  %1179 = vmatmul.mubr.bf16.gmra.mrb[16].mxu1 %v2383_v32 }
 0x276   : > { %1208 = vmatpush1.bf16.msra.mxu0 %v1726_v48  ;;  %1281 = vmatpush1.bf16.msra.mxu1 %v1728_v49 }
 0x277   : > { %1209 = vmatprep.subr.bf16.mxu0 %v1735_v50  ;;  %1282 = vmatprep.subr.bf16.mxu1 %v1737_v51 }
 0x278   : > { %1115 = vmatprep.mubr.bf16.mxu0 %v2115_v44  ;;  %1188 = vmatprep.mubr.bf16.mxu1 %v2115_v44 }
 0x27a   : > { %1210 = vmatpush1.bf16.msra.mxu0 %v1734_v56  ;;  %1283 = vmatpush1.bf16.msra.mxu1 %v1736_v57 }
 0x27b   : > { %1211 = vmatprep.subr.bf16.mxu0 %v1743_v58  ;;  %1284 = vmatprep.subr.bf16.mxu1 %v1745_v59 }
 0x27d   : > { %1116 = vmatmul.mubr.bf16.gmra.mrb[20].mxu0 %v2381_v29  ;;  %1189 = vmatmul.mubr.bf16.gmra.mrb[20].mxu1 %v2381_v29 }
 0x27e   : > { %1212 = vmatpush1.bf16.msra.mxu0 %v1742_v0  ;;  %1285 = vmatpush1.bf16.msra.mxu1 %v1744_v3 }
 0x27f   : > { %1213 = vmatprep.subr.bf16.mxu0 %v1751_v4  ;;  %1286 = vmatprep.subr.bf16.mxu1 %v1753_v5 }
 0x280   : > { %1231 = vmatprep.mubr.bf16.mxu0 %v2115_v44  ;;  %1304 = vmatprep.mubr.bf16.mxu1 %v2115_v44 }
 0x282   : > { %1214 = vmatpush1.bf16.msra.mxu0 %v1750_v6  ;;  %1287 = vmatpush1.bf16.msra.mxu1 %v1752_v7  ;;  %v2116_v7 = vmov 1966171168  }
 0x285   : > { %1232 = vmatmul.mubr.bf16.vlgmr.msra.gmra.mrb[24].mxu0 %v2375_v2  ;;  %1305 = vmatmul.mubr.bf16.vlgmr.msra.gmra.mrb[24].mxu1 %v2375_v2 }
 0x286   : > { %1241 = vmatprep.mubr.bf16.mxu0 %v2115_v44  ;;  %1314 = vmatprep.mubr.bf16.mxu1 %v2115_v44 }
 0x28d   : > { %1242 = vmatmul.mubr.bf16.gmra.mrb[28].mxu0 %v2373_v1  ;;  %1315 = vmatmul.mubr.bf16.gmra.mrb[28].mxu1 %v2373_v1 }
 0x28e   : > { %1251 = vmatprep.mubr.bf16.mxu0 %v2115_v44  ;;  %1324 = vmatprep.mubr.bf16.mxu1 %v2115_v44 }
 0x295   : > { %1252 = vmatmul.mubr.bf16.gmra.mrb[32].mxu0 %v2383_v32  ;;  %1325 = vmatmul.mubr.bf16.gmra.mrb[32].mxu1 %v2383_v32 }
 0x296   : > { %1261 = vmatprep.mubr.bf16.mxu0 %v2115_v44  ;;  %1334 = vmatprep.mubr.bf16.mxu1 %v2115_v44 }
 0x29d   : > { %1262 = vmatmul.mubr.bf16.gmra.mrb[36].mxu0 %v2381_v29  ;;  %1335 = vmatmul.mubr.bf16.gmra.mrb[36].mxu1 %v2381_v29 }
 0x338   : > { %v1087_v2 = vpop.f32.mrb[8].mxu0  ;;  %v1160_v8 = vpop.f32.mrb[8].mxu1 }
 0x339   : > { %v1089_v9 = vpop.f32.mrb[9].mxu0  ;;  %v1162_v1 = vpop.f32.mrb[9].mxu1 }
 0x33a   : > { %v1091_v10 = vpop.f32.mrb[10].mxu0  ;;  %v1164_v11 = vpop.f32.mrb[10].mxu1 }
 0x33b   : > { %v1346_v13 = vmax.f32 %v1087_v2, %v1091_v10  ;;  %v1372_v14 = vmax.f32 %v1160_v8, %v1164_v11  ;;  %v1093_v16 = vpop.f32.mrb[11].mxu0  ;;  %v1166_v17 = vpop.f32.mrb[11].mxu1  ;;  %v1463_v2 = vunpack.c.l.s4 %v2116_v7  ;;  %v1465_v8 = vlaneseq }
 0x33c   : > { %v1359_v12 = vmax.f32 %v1089_v9, %v1093_v16  ;;  %v1385_v15 = vmax.f32 %v1162_v1, %v1166_v17 }
 0x340   : > { %v1097_v18 = vpop.f32.mrb[12].mxu0  ;;  %v1170_v19 = vpop.f32.mrb[12].mxu1 }
 0x341   : > { %v1347_v20 = vmax.f32 %v1346_v13, %v1097_v18  ;;  %v1373_v44 = vmax.f32 %v1372_v14, %v1170_v19  ;;  %v1099_v21 = vpop.f32.mrb[13].mxu0  ;;  %v1172_v22 = vpop.f32.mrb[13].mxu1 }
 0x342   : > { %v1360_v23 = vmax.f32 %v1359_v12, %v1099_v21  ;;  %v1386_v24 = vmax.f32 %v1385_v15, %v1172_v22  ;;  %v1101_v25 = vpop.f32.mrb[14].mxu0  ;;  %v1174_v26 = vpop.f32.mrb[14].mxu1 }
 0x343   : > { %v1348_v27 = vmax.f32 %v1347_v20, %v1101_v25  ;;  %v1374_v28 = vmax.f32 %v1373_v44, %v1174_v26  ;;  %v1103_v29 = vpop.f32.mrb[15].mxu0  ;;  %v1176_v30 = vpop.f32.mrb[15].mxu1  ;;  %v1464_v20 = vunpack.c.0.s8 %v1463_v2  ;;  %v1466_v44 = vshrl.u32 %v1465_v8, 7 }
 0x344   : > { %v1361_v31 = vmax.f32 %v1360_v23, %v1103_v29  ;;  %v1387_v32 = vmax.f32 %v1386_v24, %v1176_v30 }
 0x348   : > { %v1107_v33 = vpop.f32.mrb[16].mxu0  ;;  %v1180_v34 = vpop.f32.mrb[16].mxu1 }
 0x349   : > { %v1349_v35 = vmax.f32 %v1348_v27, %v1107_v33  ;;  %v1375_v36 = vmax.f32 %v1374_v28, %v1180_v34  ;;  %v1109_v37 = vpop.f32.mrb[17].mxu0  ;;  %v1182_v38 = vpop.f32.mrb[17].mxu1 }
 0x34a   : > { %v1362_v39 = vmax.f32 %v1361_v31, %v1109_v37  ;;  %v1388_v40 = vmax.f32 %v1387_v32, %v1182_v38  ;;  %v1111_v41 = vpop.f32.mrb[18].mxu0  ;;  %v1184_v42 = vpop.f32.mrb[18].mxu1 }
 0x34b   : > { %v1350_v43 = vmax.f32 %v1349_v35, %v1111_v41  ;;  %v1376_v45 = vmax.f32 %v1375_v36, %v1184_v42  ;;  %v1113_v46 = vpop.f32.mrb[19].mxu0  ;;  %v1186_v47 = vpop.f32.mrb[19].mxu1  ;;  %v2411_v41 = vsub.s32 %v1464_v20, %v1466_v44 }
 0x34c   : > { %v1363_v48 = vmax.f32 %v1362_v39, %v1113_v46  ;;  %v1389_v49 = vmax.f32 %v1388_v40, %v1186_v47 }
 0x350   : > { %v1117_v50 = vpop.f32.mrb[20].mxu0  ;;  %v1190_v51 = vpop.f32.mrb[20].mxu1 }
 0x351   : > { %v1351_v52 = vmax.f32 %v1350_v43, %v1117_v50  ;;  %v1377_v53 = vmax.f32 %v1376_v45, %v1190_v51  ;;  %v1119_v54 = vpop.f32.mrb[21].mxu0  ;;  %v1192_v55 = vpop.f32.mrb[21].mxu1 }
 0x352   : > { %v1364_v56 = vmax.f32 %v1363_v48, %v1119_v54  ;;  %v1390_v57 = vmax.f32 %v1389_v49, %v1192_v55  ;;  %v1121_v58 = vpop.f32.mrb[22].mxu0  ;;  %v1194_v59 = vpop.f32.mrb[22].mxu1 }
 0x353   : > { %v1352_v60 = vmax.f32 %v1351_v52, %v1121_v58  ;;  %v1378_v61 = vmax.f32 %v1377_v53, %v1194_v59  ;;  %v1123_v62 = vpop.f32.mrb[23].mxu0  ;;  %v1196_v63 = vpop.f32.mrb[23].mxu1 }
 0x354   : > { %v1365_v0 = vmax.f32 %v1364_v56, %v1123_v62  ;;  %v1391_v3 = vmax.f32 %v1390_v57, %v1196_v63 }
 0x355   : > { %v1353_v4 = vrot.slane %v1352_v60, 4  ;;  %v1379_v5 = vrot.slane %v1378_v61, 4 }
 0x356   : > { %v1366_v6 = vrot.slane %v1365_v0, 4  ;;  %v1392_v9 = vrot.slane %v1391_v3, 4 }
 0x357   : > { %v1354_v1 = vmax.f32 %v1352_v60, %v1353_v4  ;;  %v1380_v10 = vmax.f32 %v1378_v61, %v1379_v5 }
 0x358   : > { %v1367_v11 = vmax.f32 %v1365_v0, %v1366_v6  ;;  %v1393_v13 = vmax.f32 %v1391_v3, %v1392_v9  ;;  %v1233_v14 = vpop.f32.mrb[24].mxu0  ;;  %v1306_v16 = vpop.f32.mrb[24].mxu1 }
 0x359   : > { %v1355_v17 = vrot.slane %v1354_v1, 2  ;;  %v1381_v12 = vrot.slane %v1380_v10, 2  ;;  %v1235_v15 = vpop.f32.mrb[25].mxu0  ;;  %v1308_v18 = vpop.f32.mrb[25].mxu1 }
 0x35a   : > { %v1368_v19 = vrot.slane %v1367_v11, 2  ;;  %v1394_v21 = vrot.slane %v1393_v13, 2  ;;  %v1237_v22 = vpop.f32.mrb[26].mxu0  ;;  %v1310_v23 = vpop.f32.mrb[26].mxu1 }
 0x35b   : > { %v1356_v24 = vmax.f32 %v1354_v1, %v1355_v17  ;;  %v1382_v25 = vmax.f32 %v1380_v10, %v1381_v12  ;;  %v1398_v26 = vmax.f32 %v1233_v14, %v1237_v22  ;;  %v1424_v27 = vmax.f32 %v1306_v16, %v1310_v23  ;;  %v1239_v28 = vpop.f32.mrb[27].mxu0  ;;  %v1312_v29 = vpop.f32.mrb[27].mxu1 }
 0x35c   : > { %v1369_v30 = vmax.f32 %v1367_v11, %v1368_v19  ;;  %v1395_v31 = vmax.f32 %v1393_v13, %v1394_v21  ;;  %v1411_v32 = vmax.f32 %v1235_v15, %v1239_v28  ;;  %v1437_v33 = vmax.f32 %v1308_v18, %v1312_v29 }
 0x35d   : > { %v1357_v34 = vrot.slane %v1356_v24, 1  ;;  %v1383_v35 = vrot.slane %v1382_v25, 1 }
 0x35e   : > { %v1370_v36 = vrot.slane %v1369_v30, 1  ;;  %v1396_v37 = vrot.slane %v1395_v31, 1 }
 0x35f   : > { %v1358_v38 = vmax.f32 %v1356_v24, %v1357_v34  ;;  %v1384_v39 = vmax.f32 %v1382_v25, %v1383_v35 }
 0x360   : > { %v1371_v40 = vmax.f32 %v1369_v30, %v1370_v36  ;;  %v1397_v42 = vmax.f32 %v1395_v31, %v1396_v37  ;;  %v1243_v43 = vpop.f32.mrb[28].mxu0  ;;  %v1316_v45 = vpop.f32.mrb[28].mxu1 }
 0x361   : > { %v1399_v46 = vmax.f32 %v1398_v26, %v1243_v43  ;;  %v1425_v47 = vmax.f32 %v1424_v27, %v1316_v45  ;;  %v1245_v48 = vpop.f32.mrb[29].mxu0  ;;  %v1318_v49 = vpop.f32.mrb[29].mxu1 }
 0x362   : > { %v1458_v50 = vcombine.low %v1358_v38, %v1371_v40  ;;  %v1459_v51 = vcombine.low %v1384_v39, %v1397_v42  ;;  %v1412_v52 = vmax.f32 %v1411_v32, %v1245_v48  ;;  %v1438_v53 = vmax.f32 %v1437_v33, %v1318_v49  ;;  %v1247_v54 = vpop.f32.mrb[30].mxu0  ;;  %v1320_v55 = vpop.f32.mrb[30].mxu1 }
 0x363   : > { %v1400_v56 = vmax.f32 %v1399_v46, %v1247_v54  ;;  %v1426_v57 = vmax.f32 %v1425_v47, %v1320_v55  ;;  %v1249_v58 = vpop.f32.mrb[31].mxu0  ;;  %v1322_v59 = vpop.f32.mrb[31].mxu1 }
 0x364   : > { %v2414_v60 = vrot.slane %v1458_v50, %v2411_v41  ;;  %v2417_v61 = vrot.slane %v1459_v51, %v2411_v41  ;;  %v1413_v62 = vmax.f32 %v1412_v52, %v1249_v58  ;;  %v1439_v63 = vmax.f32 %v1438_v53, %v1322_v59 }
 0x366   : > { %v1490_v0 = vcombine.low %v2414_v60, %v2417_v61 }
 0x368   : > { %v1253_v3 = vpop.f32.mrb[32].mxu0  ;;  %v1326_v4 = vpop.f32.mrb[32].mxu1 }
 0x369   : > { %v1401_v5 = vmax.f32 %v1400_v56, %v1253_v3  ;;  %v1427_v6 = vmax.f32 %v1426_v57, %v1326_v4  ;;  %v1255_v7 = vpop.f32.mrb[33].mxu0  ;;  %v1328_v2 = vpop.f32.mrb[33].mxu1 }
 0x36a   : > { %v1414_v8 = vmax.f32 %v1413_v62, %v1255_v7  ;;  %v1440_v9 = vmax.f32 %v1439_v63, %v1328_v2  ;;  %v1257_v1 = vpop.f32.mrb[34].mxu0  ;;  %v1330_v10 = vpop.f32.mrb[34].mxu1  ;;  %v1498_v63 = vrot.slane %v1490_v0, %v2411_v41 }
 0x36b   : > { %v1402_v11 = vmax.f32 %v1401_v5, %v1257_v1  ;;  %v1428_v13 = vmax.f32 %v1427_v6, %v1330_v10  ;;  %v1259_v14 = vpop.f32.mrb[35].mxu0  ;;  %v1332_v16 = vpop.f32.mrb[35].mxu1  ;;  %v1514_v5 = vld [vmem:[#allocation10] sm:$0xff] }
 0x36c   : > { %v1415_v17 = vmax.f32 %v1414_v8, %v1259_v14  ;;  %v1441_v12 = vmax.f32 %v1440_v9, %v1332_v16 }
 0x370   : > { %v1263_v15 = vpop.f32.mrb[36].mxu0  ;;  %v1336_v18 = vpop.f32.mrb[36].mxu1 }
 0x371   : > { %v1403_v19 = vmax.f32 %v1402_v11, %v1263_v15  ;;  %v1429_v20 = vmax.f32 %v1428_v13, %v1336_v18  ;;  %v1265_v44 = vpop.f32.mrb[37].mxu0  ;;  %v1338_v21 = vpop.f32.mrb[37].mxu1 }
 0x372   : > { %v1416_v22 = vmax.f32 %v1415_v17, %v1265_v44  ;;  %v1442_v23 = vmax.f32 %v1441_v12, %v1338_v21  ;;  %v1267_v24 = vpop.f32.mrb[38].mxu0  ;;  %v1340_v25 = vpop.f32.mrb[38].mxu1 }
 0x373   : > { %v1404_v26 = vmax.f32 %v1403_v19, %v1267_v24  ;;  %v1430_v27 = vmax.f32 %v1429_v20, %v1340_v25  ;;  %v1269_v28 = vpop.f32.mrb[39].mxu0  ;;  %v1342_v29 = vpop.f32.mrb[39].mxu1 }
 0x374   : > { %v1417_v30 = vmax.f32 %v1416_v22, %v1269_v28  ;;  %v1443_v31 = vmax.f32 %v1442_v23, %v1342_v29 }
 0x375   : > { %v1405_v32 = vrot.slane %v1404_v26, 4  ;;  %v1431_v33 = vrot.slane %v1430_v27, 4 }
 0x376   : > { %v1418_v34 = vrot.slane %v1417_v30, 4  ;;  %v1444_v35 = vrot.slane %v1443_v31, 4 }
 0x377   : > { %v1406_v36 = vmax.f32 %v1404_v26, %v1405_v32  ;;  %v1432_v37 = vmax.f32 %v1430_v27, %v1431_v33 }
 0x378   : > { %v1419_v38 = vmax.f32 %v1417_v30, %v1418_v34  ;;  %v1445_v39 = vmax.f32 %v1443_v31, %v1444_v35 }
 0x379   : > { %v1407_v40 = vrot.slane %v1406_v36, 2  ;;  %v1433_v42 = vrot.slane %v1432_v37, 2 }
 0x37a   : > { %v1420_v43 = vrot.slane %v1419_v38, 2  ;;  %v1446_v45 = vrot.slane %v1445_v39, 2 }
 0x37b   : > { %v1408_v46 = vmax.f32 %v1406_v36, %v1407_v40  ;;  %v1434_v47 = vmax.f32 %v1432_v37, %v1433_v42 }
 0x37c   : > { %v1421_v48 = vmax.f32 %v1419_v38, %v1420_v43  ;;  %v1447_v49 = vmax.f32 %v1445_v39, %v1446_v45 }
 0x37d   : > { %v1409_v50 = vrot.slane %v1408_v46, 1  ;;  %v1435_v51 = vrot.slane %v1434_v47, 1 }
 0x37e   : > { %v1422_v52 = vrot.slane %v1421_v48, 1  ;;  %v1448_v53 = vrot.slane %v1447_v49, 1 }
 0x37f   : > { %v1410_v54 = vmax.f32 %v1408_v46, %v1409_v50  ;;  %v1436_v55 = vmax.f32 %v1434_v47, %v1435_v51 }
 0x380   : > { %v1423_v56 = vmax.f32 %v1421_v48, %v1422_v52  ;;  %v1449_v57 = vmax.f32 %v1447_v49, %v1448_v53 }
 0x382   : > { %v1460_v58 = vcombine.low %v1410_v54, %v1423_v56  ;;  %v1461_v59 = vcombine.low %v1436_v55, %v1449_v57 }
 0x384   : > { %v1482_v60 = vrot.slane %v1460_v58, %v2411_v41  ;;  %v1489_v61 = vrot.slane %v1461_v59, %v2411_v41 }
 0x386   : > { %v1491_v62 = vcombine.low %v1482_v60, %v1489_v61 }
 0x388   : > { %v1505_v3 = vrot.slane %v1491_v62, %v2411_v41 }
 0x38a   : > { %v1506_v4 = vcombine.low %v1498_v63, %v1505_v3 }
 0x38c   : > { %v1515_v6 = vadd.f32 %v1514_v5, %v1506_v4 }
 0x38e   : > { %v1516_v7 = vmax.f32 %v1515_v6, 0.0 }
 0x390   : > { %1517 = vst [vmem:[%s402_s28] sm:$0xff] %v1516_v7 }
 0x391 PF: > { %s21_s26 = sadd.s32 1, %s2103_s26   ;;  %s2457_s24 = smov %s2099_s25 }
 0x392   : > { %p18_p8 = scmp.ge.s32.totalorder %s21_s26, 4   ;;  %s2458_s25 = smov %s2460_s12 }
 0x394   :  { %20 = sbr.rel (!%p18_p8) target bundleno = 5 (0x5), region = 111 }
 0x39b   :  { %1540 = vsyncpa [#allocation3], 1 }
 0x39c   :  { %1542 = vsyncpa [#allocation3 + $0x1], 1 }
 0x39d   :  { %1543 = vsyncpa [#allocation5], 1 }
 0x39e   :  { %1544 = vsyncpa [#allocation8], 1 }
 0x39f   :  { %1545 = vsyncpa [#allocation11], 1 }

// kernel: pointnet_forward.7
= control target key start
LH: loop header
LB: loop body
LE: loop exit
PB: predicated region body
PF: predicated region fallthrough
CT: control target
= control target key end

     0   :  { %12 = vsyncpa [#allocation3], 0  ;;  %s3913_s0 = inlined_call_operand.vmem [shape: f32[8,1024], index: 0, kind: input, shape index: {}]   ;;  %s3914_s1 = inlined_call_operand.hbm [shape: bf16[1024,512], index: 1, kind: input, shape index: {}]   ;;  %s3915_s2 = inlined_call_operand.hbm [shape: f32[1,512], index: 2, kind: input, shape index: {}]   ;;  %s3916_s3 = inlined_call_operand.hbm [shape: bf16[512,256], index: 3, kind: input, shape index: {}]   ;;  %s3917_s4 = inlined_call_operand.hbm [shape: f32[1,256], index: 4, kind: input, shape index: {}]   ;;  %s3918_s5 = inlined_call_operand.vmem [shape: bf16[256,9], index: 5, kind: input, shape index: {}]   ;;  %s3919_s6 = inlined_call_operand.hbm [shape: f32[1,9], index: 6, kind: input, shape index: {}]   ;;  %s3920_s7 = inlined_call_operand.vmem [shape: f32[8,9], index: 7, kind: output, shape index: {}]  }
   0x1   :  { %13 = vsyncpa [#allocation5], 0 }
   0x2   :  { %14 = vsyncpa [#allocation8], 0  ;;  %s3677_s24 = smov [#allocation4]   ;;  %s3678_s26 = smov [#allocation7]  }
   0x3   :  { %s35_s25 = sshll.u32 %s3677_s24, 4  ;;  %s57_s27 = sshll.u32 %s3678_s26, 4  ;;  %s36_s25 = int_to_ptr.vmem [resolvable:$true] %s35_s25  ;;  %s58_s27 = int_to_ptr.vmem [resolvable:$true] %s57_s27 }
   0x4   :  { %s3561_s30 = scalar_lea.hbm %s3915_s2, 64 }
   0x5   :  { %p3562_p0 = scmp.ne.s32.totalorder %s3915_s2, %s3561_s30  ;;  %p3565_p1 = scmp.lt.u32.totalorder %s3561_s30, %s3915_s2 }
   0x7   :  { %p3567_p2 = pnand %p3565_p1, %p3562_p0 }
   0x9   :  { %3570 = shalt.err (!%p3567_p2)
}
   0xa   :  { %s3571_s12 = scalar_lea.vmem %s36_s25, 64  ;;  %p3576_p4 = scmp.lt.s32.totalorder %s36_s25, %s36_s25 }
   0xb   :  { %p3572_p3 = scmp.ne.s32.totalorder %s36_s25, %s3571_s12  ;;  %p3577_p5 = scmp.lt.s32.totalorder %s3571_s12, %s3571_s12 }
   0xd   :  { %p3578_p6 = por %p3577_p5, %p3576_p4 }
   0xf   :  { %p3579_p7 = pnand %p3578_p6, %p3572_p3 }
  0x11   :  { %3582 = shalt.err (!%p3579_p7)
}
  0x12   :  { %38 = dma.hbm_to_vmem [thread:$0]  %s3915_s2, 64, %s36_s25, [#allocation5]  }
  0x13   :  { %s3583_s17 = scalar_lea.hbm %s3917_s4, 32 }
  0x14   :  { %p3584_p8 = scmp.ne.s32.totalorder %s3917_s4, %s3583_s17  ;;  %p3587_p9 = scmp.lt.u32.totalorder %s3583_s17, %s3917_s4 }
  0x16   :  { %p3589_p10 = pnand %p3587_p9, %p3584_p8 }
  0x18   :  { %3592 = shalt.err (!%p3589_p10)
}
  0x19   :  { %s3593_s22 = scalar_lea.vmem %s58_s27, 32  ;;  %p3598_p12 = scmp.lt.s32.totalorder %s58_s27, %s58_s27 }
  0x1a   :  { %p3594_p11 = scmp.ne.s32.totalorder %s58_s27, %s3593_s22  ;;  %p3599_p13 = scmp.lt.s32.totalorder %s3593_s22, %s3593_s22 }
  0x1c   :  { %p3600_p0 = por %p3599_p13, %p3598_p12 }
  0x1e   :  { %p3601_p1 = pnand %p3600_p0, %p3594_p11 }
  0x20   :  { %3604 = shalt.err (!%p3601_p1)
}
  0x21   :  { %60 = dma.hbm_to_vmem [thread:$0]  %s3917_s4, 32, %s58_s27, [#allocation8]  }
  0x22   :  { %s3679_s24 = smov [#allocation2]   ;;  %s3605_s29 = scalar_lea.hbm %s3914_s1, 32768 }
  0x23   :  { %s22_s25 = sshll.u32 %s3679_s24, 4  ;;  %p3606_p2 = scmp.ne.s32.totalorder %s3914_s1, %s3605_s29  ;;  %s23_s25 = int_to_ptr.vmem [resolvable:$true] %s22_s25 }
  0x24   :  { %p3609_p3 = scmp.lt.u32.totalorder %s3605_s29, %s3914_s1 }
  0x26   :  { %p3611_p4 = pnand %p3609_p3, %p3606_p2 }
  0x28   :  { %3614 = shalt.err (!%p3611_p4)
}
  0x29   :  { %s3615_s11 = scalar_lea.vmem %s23_s25, 32768  ;;  %p3620_p6 = scmp.lt.s32.totalorder %s23_s25, %s23_s25 }
  0x2a   :  { %p3616_p5 = scmp.ne.s32.totalorder %s23_s25, %s3615_s11  ;;  %p3621_p7 = scmp.lt.s32.totalorder %s3615_s11, %s3615_s11 }
  0x2c   :  { %p3622_p8 = por %p3621_p7, %p3620_p6 }
  0x2e   :  { %p3623_p9 = pnand %p3622_p8, %p3616_p5 }
  0x30   :  { %3626 = shalt.err (!%p3623_p9)
}
  0x31   :  { %s3680_s4 = smov 256   ;;  %s3681_s27 = smov 16  }
  0x32   :  { %28 = dma.hbm_to_vmem [thread:$0]  %s3914_s1, 32768, %s23_s25, [#allocation3], %s3680_s4, %s3680_s4, %s3681_s27  }
  0x33   :  { %s3682_s14 = smov [#allocation6]   ;;  %s3627_s18 = scalar_lea.hbm %s3916_s3, 8192 }
  0x34   :  { %s44_s15 = sshll.u32 %s3682_s14, 4  ;;  %p3628_p10 = scmp.ne.s32.totalorder %s3916_s3, %s3627_s18  ;;  %s45_s15 = int_to_ptr.vmem [resolvable:$true] %s44_s15 }
  0x35   :  { %p3631_p11 = scmp.lt.u32.totalorder %s3627_s18, %s3916_s3 }
  0x37   :  { %p3633_p12 = pnand %p3631_p11, %p3628_p10 }
  0x39   :  { %3636 = shalt.err (!%p3633_p12)
}
  0x3a   :  { %s3637_s2 = scalar_lea.vmem %s45_s15, 8192  ;;  %p3642_p0 = scmp.lt.s32.totalorder %s45_s15, %s45_s15 }
  0x3b   :  { %p3638_p13 = scmp.ne.s32.totalorder %s45_s15, %s3637_s2  ;;  %p3643_p1 = scmp.lt.s32.totalorder %s3637_s2, %s3637_s2 }
  0x3d   :  { %p3644_p2 = por %p3643_p1, %p3642_p0 }
  0x3f   :  { %p3645_p3 = pnand %p3644_p2, %p3638_p13 }
  0x41   :  { %3648 = shalt.err (!%p3645_p3)
}
  0x42   :  { %s3683_s1 = smov 128   ;;  %s3684_s23 = smov 8  }
  0x43   :  { %50 = dma.hbm_to_vmem [thread:$0]  %s3916_s3, 8192, %s45_s15, [#allocation5], %s3683_s1, %s3683_s1, %s3684_s23  }
  0x44   :  { %s3685_s26 = smov [#allocation9]   ;;  %s3649_s8 = scalar_lea.hbm %s3919_s6, 16 }
  0x45   :  { %s69_s28 = sshll.u32 %s3685_s26, 4  ;;  %p3650_p4 = scmp.ne.s32.totalorder %s3919_s6, %s3649_s8  ;;  %s70_s28 = int_to_ptr.vmem [resolvable:$true] %s69_s28 }
  0x46   :  { %p3653_p5 = scmp.lt.u32.totalorder %s3649_s8, %s3919_s6 }
  0x48   :  { %p3655_p6 = pnand %p3653_p5, %p3650_p4 }
  0x4a   :  { %3658 = shalt.err (!%p3655_p6)
}
  0x4b   :  { %s3659_s27 = scalar_lea.vmem %s70_s28, 16  ;;  %s3663_s3 = scalar_lea.vmem %s70_s28, 32 }
  0x4c   :  { %p3660_p7 = scmp.ne.s32.totalorder %s70_s28, %s3659_s27  ;;  %p3664_p8 = scmp.lt.s32.totalorder %s70_s28, %s70_s28 }
  0x4d   :  { %p3665_p9 = scmp.lt.s32.totalorder %s3663_s3, %s3659_s27 }
  0x4f   :  { %p3666_p10 = por %p3665_p9, %p3664_p8 }
  0x51   :  { %p3667_p11 = pnand %p3666_p10, %p3660_p7 }
  0x53   :  { %3670 = shalt.err (!%p3667_p11)
}
  0x54   :  { %72 = dma.hbm_to_vmem [thread:$0]  %s3919_s6, 16, %s70_s28, [#allocation8]  }
  0x55   :  { %3671 = dma.done.wait [#allocation3], 32768  }
  0x56   :  { %3672 = vsyncadd [#allocation3], 4294934528 }
  0x57   :  { %3673 = dma.done.wait [#allocation5], 8256  }
  0x58   :  { %3674 = vsyncadd [#allocation5], 4294959040 }
  0x59   :  { %3675 = dma.done.wait [#allocation8], 48  }
  0x5a   :  { %3676 = vsyncadd [#allocation8], 4294967248  ;;  %v3065_v0 = vld [vmem:[#allocation2 + $0x4] ss:$16 sps:$4 sm:$0xff]   ;;  %v3069_v2 = vld [vmem:[#allocation2] ss:$16 sps:$4 sm:$0xff]  }
  0x5b   :  { %v3067_v1 = vld [vmem:[#allocation2 + $0x204] ss:$16 sps:$4 sm:$0xff]   ;;  %1663 = vmatprep.subr.bf16.mxu1 %v3065_v0  ;;  %v3070_v3 = vld [vmem:[#allocation2 + $0x200] ss:$16 sps:$4 sm:$0xff]   ;;  %v90_v46 = vld [vmem:[%s3913_s0 + $0x8] sm:$0xff]  ;;  %vm2656_vm0 = vcmask 72704  }
  0x5c   :  { %1704 = vmatprep.subr.bf16.mxu0 %v3067_v1  ;;  %v3071_v4 = vld [vmem:[#allocation2 + $0x24] ss:$16 sps:$4 sm:$0xff]   ;;  %1664 = vmatpush1.bf16.msra.mxu1 %v3069_v2  ;;  %v3075_v6 = vld [vmem:[#allocation2 + $0x20] ss:$16 sps:$4 sm:$0xff]   ;;  %v3789_v48 = vpack.c.bf16 %v90_v46, %v90_v46  ;;  %v92_v49 = vld [vmem:[%s3913_s0 + $0x18] sm:$0xff] }
  0x5d   :  { %1705 = vmatpush1.bf16.msra.mxu0 %v3070_v3  ;;  %v3073_v5 = vld [vmem:[#allocation2 + $0x224] ss:$16 sps:$4 sm:$0xff]   ;;  %1665 = vmatprep.subr.bf16.mxu1 %v3071_v4  ;;  %v3076_v7 = vld [vmem:[#allocation2 + $0x220] ss:$16 sps:$4 sm:$0xff]   ;;  %v3794_v52 = vpack.c.bf16 %v92_v49, %v92_v49  ;;  %v3218_v49 = vld [vmem:[#allocation2 + $0x128] ss:$16 sps:$4 sm:$0xff]  }
  0x5e   :  { %1706 = vmatprep.subr.bf16.mxu0 %v3073_v5  ;;  %v3077_v8 = vld [vmem:[#allocation2 + $0x44] ss:$16 sps:$4 sm:$0xff]   ;;  %v3081_v10 = vld [vmem:[#allocation2 + $0x40] ss:$16 sps:$4 sm:$0xff]   ;;  %1695 = vmatprep.mubr.bf16.mxu1 %v3789_v48 }
  0x5f   :  { %v3079_v9 = vld [vmem:[#allocation2 + $0x244] ss:$16 sps:$4 sm:$0xff]   ;;  %v3082_v11 = vld [vmem:[#allocation2 + $0x240] ss:$16 sps:$4 sm:$0xff]   ;;  %1736 = vmatprep.mubr.bf16.mxu0 %v3794_v52 }
  0x60   :  { %1666 = vmatpush1.bf16.msra.mxu1 %v3075_v6  ;;  %v3083_v12 = vld [vmem:[#allocation2 + $0x64] ss:$16 sps:$4 sm:$0xff]   ;;  %v3087_v14 = vld [vmem:[#allocation2 + $0x60] ss:$16 sps:$4 sm:$0xff]  }
  0x61   :  { %1707 = vmatpush1.bf16.msra.mxu0 %v3076_v7  ;;  %1667 = vmatprep.subr.bf16.mxu1 %v3077_v8  ;;  %v3085_v13 = vld [vmem:[#allocation2 + $0x264] ss:$16 sps:$4 sm:$0xff]   ;;  %v3088_v15 = vld [vmem:[#allocation2 + $0x260] ss:$16 sps:$4 sm:$0xff]   ;;  %v3166_v7 = vld [vmem:[#allocation2 + $0xc] ss:$16 sps:$4 sm:$0xff]  }
  0x62   :  { %1708 = vmatprep.subr.bf16.mxu0 %v3079_v9  ;;  %v3089_v16 = vld [vmem:[#allocation2 + $0x84] ss:$16 sps:$4 sm:$0xff]   ;;  %v3093_v18 = vld [vmem:[#allocation2 + $0x80] ss:$16 sps:$4 sm:$0xff]  }
  0x63   :  { %v3091_v17 = vld [vmem:[#allocation2 + $0x284] ss:$16 sps:$4 sm:$0xff]   ;;  %v3094_v19 = vld [vmem:[#allocation2 + $0x280] ss:$16 sps:$4 sm:$0xff]  }
  0x64   :  { %1668 = vmatpush1.bf16.msra.mxu1 %v3081_v10  ;;  %v3095_v20 = vld [vmem:[#allocation2 + $0xa4] ss:$16 sps:$4 sm:$0xff]   ;;  %v3099_v22 = vld [vmem:[#allocation2 + $0xa0] ss:$16 sps:$4 sm:$0xff]   ;;  %v3164_v10 = vld [vmem:[#allocation2 + $0x8] ss:$16 sps:$4 sm:$0xff]  }
  0x65   :  { %1709 = vmatpush1.bf16.msra.mxu0 %v3082_v11  ;;  %1669 = vmatprep.subr.bf16.mxu1 %v3083_v12  ;;  %v3097_v21 = vld [vmem:[#allocation2 + $0x2a4] ss:$16 sps:$4 sm:$0xff]   ;;  %v3100_v23 = vld [vmem:[#allocation2 + $0x2a0] ss:$16 sps:$4 sm:$0xff]  }
  0x66   :  { %1710 = vmatprep.subr.bf16.mxu0 %v3085_v13  ;;  %v3101_v24 = vld [vmem:[#allocation2 + $0xc4] ss:$16 sps:$4 sm:$0xff]   ;;  %v3105_v26 = vld [vmem:[#allocation2 + $0xc0] ss:$16 sps:$4 sm:$0xff]   ;;  %v3172_v13 = vld [vmem:[#allocation2 + $0x2c] ss:$16 sps:$4 sm:$0xff]  }
  0x67   :  { %v3103_v25 = vld [vmem:[#allocation2 + $0x2c4] ss:$16 sps:$4 sm:$0xff]   ;;  %v3106_v27 = vld [vmem:[#allocation2 + $0x2c0] ss:$16 sps:$4 sm:$0xff]  }
  0x68   :  { %1670 = vmatpush1.bf16.msra.mxu1 %v3087_v14  ;;  %v3107_v28 = vld [vmem:[#allocation2 + $0xe4] ss:$16 sps:$4 sm:$0xff]   ;;  %v3111_v30 = vld [vmem:[#allocation2 + $0xe0] ss:$16 sps:$4 sm:$0xff]  }
  0x69   :  { %1711 = vmatpush1.bf16.msra.mxu0 %v3088_v15  ;;  %1671 = vmatprep.subr.bf16.mxu1 %v3089_v16  ;;  %v3109_v29 = vld [vmem:[#allocation2 + $0x2e4] ss:$16 sps:$4 sm:$0xff]   ;;  %v3112_v31 = vld [vmem:[#allocation2 + $0x2e0] ss:$16 sps:$4 sm:$0xff]   ;;  %v3170_v15 = vld [vmem:[#allocation2 + $0x28] ss:$16 sps:$4 sm:$0xff]  }
  0x6a   :  { %1712 = vmatprep.subr.bf16.mxu0 %v3091_v17  ;;  %v3113_v32 = vld [vmem:[#allocation2 + $0x104] ss:$16 sps:$4 sm:$0xff]   ;;  %v3117_v34 = vld [vmem:[#allocation2 + $0x100] ss:$16 sps:$4 sm:$0xff]   ;;  %v3178_v17 = vld [vmem:[#allocation2 + $0x4c] ss:$16 sps:$4 sm:$0xff]  }
  0x6b   :  { %v3115_v33 = vld [vmem:[#allocation2 + $0x304] ss:$16 sps:$4 sm:$0xff]   ;;  %v3118_v35 = vld [vmem:[#allocation2 + $0x300] ss:$16 sps:$4 sm:$0xff]  }
  0x6c   :  { %1672 = vmatpush1.bf16.msra.mxu1 %v3093_v18  ;;  %v3119_v36 = vld [vmem:[#allocation2 + $0x124] ss:$16 sps:$4 sm:$0xff]   ;;  %v3123_v38 = vld [vmem:[#allocation2 + $0x120] ss:$16 sps:$4 sm:$0xff]  }
  0x6d   :  { %1713 = vmatpush1.bf16.msra.mxu0 %v3094_v19  ;;  %1673 = vmatprep.subr.bf16.mxu1 %v3095_v20  ;;  %v3121_v37 = vld [vmem:[#allocation2 + $0x324] ss:$16 sps:$4 sm:$0xff]   ;;  %v3124_v39 = vld [vmem:[#allocation2 + $0x320] ss:$16 sps:$4 sm:$0xff]   ;;  %v3176_v19 = vld [vmem:[#allocation2 + $0x48] ss:$16 sps:$4 sm:$0xff]  }
  0x6e   :  { %1714 = vmatprep.subr.bf16.mxu0 %v3097_v21  ;;  %v3125_v40 = vld [vmem:[#allocation2 + $0x144] ss:$16 sps:$4 sm:$0xff]   ;;  %v3129_v42 = vld [vmem:[#allocation2 + $0x140] ss:$16 sps:$4 sm:$0xff]   ;;  %v3184_v21 = vld [vmem:[#allocation2 + $0x6c] ss:$16 sps:$4 sm:$0xff]  }
  0x6f   :  { %v3127_v41 = vld [vmem:[#allocation2 + $0x344] ss:$16 sps:$4 sm:$0xff]   ;;  %v3130_v43 = vld [vmem:[#allocation2 + $0x340] ss:$16 sps:$4 sm:$0xff]  }
  0x70   :  { %1674 = vmatpush1.bf16.msra.mxu1 %v3099_v22  ;;  %v3131_v44 = vld [vmem:[#allocation2 + $0x164] ss:$16 sps:$4 sm:$0xff]   ;;  %v3135_v47 = vld [vmem:[#allocation2 + $0x160] ss:$16 sps:$4 sm:$0xff]  }
  0x71   :  { %1715 = vmatpush1.bf16.msra.mxu0 %v3100_v23  ;;  %1675 = vmatprep.subr.bf16.mxu1 %v3101_v24  ;;  %v3133_v45 = vld [vmem:[#allocation2 + $0x364] ss:$16 sps:$4 sm:$0xff]   ;;  %v3136_v50 = vld [vmem:[#allocation2 + $0x360] ss:$16 sps:$4 sm:$0xff]   ;;  %v3182_v23 = vld [vmem:[#allocation2 + $0x68] ss:$16 sps:$4 sm:$0xff]  }
  0x72   :  { %1716 = vmatprep.subr.bf16.mxu0 %v3103_v25  ;;  %v3137_v51 = vld [vmem:[#allocation2 + $0x184] ss:$16 sps:$4 sm:$0xff]   ;;  %v3141_v54 = vld [vmem:[#allocation2 + $0x180] ss:$16 sps:$4 sm:$0xff]   ;;  %v3190_v25 = vld [vmem:[#allocation2 + $0x8c] ss:$16 sps:$4 sm:$0xff]  }
  0x73   :  { %v3139_v53 = vld [vmem:[#allocation2 + $0x384] ss:$16 sps:$4 sm:$0xff]   ;;  %v3142_v55 = vld [vmem:[#allocation2 + $0x380] ss:$16 sps:$4 sm:$0xff]  }
  0x74   :  { %1676 = vmatpush1.bf16.msra.mxu1 %v3105_v26  ;;  %v3143_v56 = vld [vmem:[#allocation2 + $0x1a4] ss:$16 sps:$4 sm:$0xff]   ;;  %v3147_v58 = vld [vmem:[#allocation2 + $0x1a0] ss:$16 sps:$4 sm:$0xff]  }
  0x75   :  { %1717 = vmatpush1.bf16.msra.mxu0 %v3106_v27  ;;  %1677 = vmatprep.subr.bf16.mxu1 %v3107_v28  ;;  %v3145_v57 = vld [vmem:[#allocation2 + $0x3a4] ss:$16 sps:$4 sm:$0xff]   ;;  %v3148_v59 = vld [vmem:[#allocation2 + $0x3a0] ss:$16 sps:$4 sm:$0xff]   ;;  %v3188_v27 = vld [vmem:[#allocation2 + $0x88] ss:$16 sps:$4 sm:$0xff]  }
  0x76   :  { %1718 = vmatprep.subr.bf16.mxu0 %v3109_v29  ;;  %v3149_v60 = vld [vmem:[#allocation2 + $0x1c4] ss:$16 sps:$4 sm:$0xff]   ;;  %v3153_v62 = vld [vmem:[#allocation2 + $0x1c0] ss:$16 sps:$4 sm:$0xff]   ;;  %v3196_v29 = vld [vmem:[#allocation2 + $0xac] ss:$16 sps:$4 sm:$0xff]  }
  0x77   :  { %v3151_v61 = vld [vmem:[#allocation2 + $0x3c4] ss:$16 sps:$4 sm:$0xff]   ;;  %v3154_v63 = vld [vmem:[#allocation2 + $0x3c0] ss:$16 sps:$4 sm:$0xff]  }
  0x78   :  { %1678 = vmatpush1.bf16.msra.mxu1 %v3111_v30  ;;  %v3155_v0 = vld [vmem:[#allocation2 + $0x1e4] ss:$16 sps:$4 sm:$0xff]   ;;  %v3159_v2 = vld [vmem:[#allocation2 + $0x1e0] ss:$16 sps:$4 sm:$0xff]  }
  0x79   :  { %1719 = vmatpush1.bf16.msra.mxu0 %v3112_v31  ;;  %1679 = vmatprep.subr.bf16.mxu1 %v3113_v32  ;;  %v3157_v1 = vld [vmem:[#allocation2 + $0x3e4] ss:$16 sps:$4 sm:$0xff]   ;;  %v3160_v3 = vld [vmem:[#allocation2 + $0x3e0] ss:$16 sps:$4 sm:$0xff]   ;;  %v3194_v31 = vld [vmem:[#allocation2 + $0xa8] ss:$16 sps:$4 sm:$0xff]  }
  0x7a   :  { %1720 = vmatprep.subr.bf16.mxu0 %v3115_v33  ;;  %v89_v4 = vld [vmem:[%s3913_s0] sm:$0xff]  ;;  %v91_v6 = vld [vmem:[%s3913_s0 + $0x10] sm:$0xff]  ;;  %v3202_v33 = vld [vmem:[#allocation2 + $0xcc] ss:$16 sps:$4 sm:$0xff]  }
  0x7b   :  { %v3163_v5 = vld [vmem:[#allocation2 + $0x404] ss:$16 sps:$4 sm:$0xff]   ;;  %v3804_v8 = vpack.c.bf16 %v89_v4, %v89_v4  ;;  %v3161_v9 = vld [vmem:[#allocation2 + $0x400] ss:$16 sps:$4 sm:$0xff]   ;;  %v3806_v11 = vpack.c.bf16 %v91_v6, %v91_v6  ;;  %v3250_v4 = vld [vmem:[#allocation2 + $0x1cc] ss:$16 sps:$4 sm:$0xff]  }
  0x7c   :  { %1680 = vmatpush1.bf16.msra.mxu1 %v3117_v34  ;;  %v3169_v12 = vld [vmem:[#allocation2 + $0x424] ss:$16 sps:$4 sm:$0xff]   ;;  %v3167_v14 = vld [vmem:[#allocation2 + $0x420] ss:$16 sps:$4 sm:$0xff]   ;;  %v94_v34 = vld [vmem:[%s3913_s0 + $0x28] sm:$0xff] }
  0x7d   :  { %1721 = vmatpush1.bf16.msra.mxu0 %v3118_v35  ;;  %1681 = vmatprep.subr.bf16.mxu1 %v3119_v36  ;;  %v3175_v16 = vld [vmem:[#allocation2 + $0x444] ss:$16 sps:$4 sm:$0xff]   ;;  %v3173_v18 = vld [vmem:[#allocation2 + $0x440] ss:$16 sps:$4 sm:$0xff]   ;;  %v3814_v36 = vpack.c.bf16 %v94_v34, %v94_v34  ;;  %v3248_v6 = vld [vmem:[#allocation2 + $0x1c8] ss:$16 sps:$4 sm:$0xff]  }
  0x7e   :  { %1722 = vmatprep.subr.bf16.mxu0 %v3121_v37  ;;  %v3181_v20 = vld [vmem:[#allocation2 + $0x464] ss:$16 sps:$4 sm:$0xff]   ;;  %v3179_v22 = vld [vmem:[#allocation2 + $0x460] ss:$16 sps:$4 sm:$0xff]   ;;  %v3200_v37 = vld [vmem:[#allocation2 + $0xc8] ss:$16 sps:$4 sm:$0xff]  }
  0x7f   :  { %v3187_v24 = vld [vmem:[#allocation2 + $0x484] ss:$16 sps:$4 sm:$0xff]   ;;  %v3185_v26 = vld [vmem:[#allocation2 + $0x480] ss:$16 sps:$4 sm:$0xff]  }
  0x80   :  { %1682 = vmatpush1.bf16.msra.mxu1 %v3123_v38  ;;  %v3193_v28 = vld [vmem:[#allocation2 + $0x4a4] ss:$16 sps:$4 sm:$0xff]   ;;  %v3191_v30 = vld [vmem:[#allocation2 + $0x4a0] ss:$16 sps:$4 sm:$0xff]  }
  0x81   :  { %1723 = vmatpush1.bf16.msra.mxu0 %v3124_v39  ;;  %1683 = vmatprep.subr.bf16.mxu1 %v3125_v40  ;;  %v3199_v32 = vld [vmem:[#allocation2 + $0x4c4] ss:$16 sps:$4 sm:$0xff]   ;;  %v3197_v35 = vld [vmem:[#allocation2 + $0x4c0] ss:$16 sps:$4 sm:$0xff]   ;;  %v3208_v39 = vld [vmem:[#allocation2 + $0xec] ss:$16 sps:$4 sm:$0xff]  }
  0x82   :  { %1724 = vmatprep.subr.bf16.mxu0 %v3127_v41  ;;  %v3205_v38 = vld [vmem:[#allocation2 + $0x4e4] ss:$16 sps:$4 sm:$0xff]   ;;  %v3203_v40 = vld [vmem:[#allocation2 + $0x4e0] ss:$16 sps:$4 sm:$0xff]   ;;  %v3206_v41 = vld [vmem:[#allocation2 + $0xe8] ss:$16 sps:$4 sm:$0xff]  }
  0x83   :  { %v3217_v46 = vld [vmem:[#allocation2 + $0x524] ss:$16 sps:$4 sm:$0xff]   ;;  %v3281_v34 = vld [vmem:[#allocation2 + $0x680] ss:$16 sps:$4 sm:$0xff]  }
  0x84   :  { %1684 = vmatpush1.bf16.msra.mxu1 %v3129_v42  ;;  %v3211_v42 = vld [vmem:[#allocation2 + $0x504] ss:$16 sps:$4 sm:$0xff]  }
  0x85   :  { %1725 = vmatpush1.bf16.msra.mxu0 %v3130_v43  ;;  %1685 = vmatprep.subr.bf16.mxu1 %v3131_v44  ;;  %v3214_v43 = vld [vmem:[#allocation2 + $0x10c] ss:$16 sps:$4 sm:$0xff]   ;;  %v3209_v44 = vld [vmem:[#allocation2 + $0x500] ss:$16 sps:$4 sm:$0xff]  }
  0x86   :  { %1726 = vmatprep.subr.bf16.mxu0 %v3133_v45  ;;  %v3212_v45 = vld [vmem:[#allocation2 + $0x108] ss:$16 sps:$4 sm:$0xff]  }
  0x88   :  { %1686 = vmatpush1.bf16.msra.mxu1 %v3135_v47  ;;  %v3220_v47 = vld [vmem:[#allocation2 + $0x12c] ss:$16 sps:$4 sm:$0xff]  }
  0x89   :  { %1727 = vmatpush1.bf16.msra.mxu0 %v3136_v50  ;;  %1687 = vmatprep.subr.bf16.mxu1 %v3137_v51  ;;  %v3223_v50 = vld [vmem:[#allocation2 + $0x544] ss:$16 sps:$4 sm:$0xff]   ;;  %v3226_v51 = vld [vmem:[#allocation2 + $0x14c] ss:$16 sps:$4 sm:$0xff]  }
  0x8a   :  { %1728 = vmatprep.subr.bf16.mxu0 %v3139_v53  ;;  %v3221_v53 = vld [vmem:[#allocation2 + $0x540] ss:$16 sps:$4 sm:$0xff]  }
  0x8c   :  { %1688 = vmatpush1.bf16.msra.mxu1 %v3141_v54  ;;  %v3224_v54 = vld [vmem:[#allocation2 + $0x148] ss:$16 sps:$4 sm:$0xff]  }
  0x8d   :  { %1729 = vmatpush1.bf16.msra.mxu0 %v3142_v55  ;;  %1689 = vmatprep.subr.bf16.mxu1 %v3143_v56  ;;  %v3229_v55 = vld [vmem:[#allocation2 + $0x564] ss:$16 sps:$4 sm:$0xff]   ;;  %v3232_v56 = vld [vmem:[#allocation2 + $0x16c] ss:$16 sps:$4 sm:$0xff]  }
  0x8e   :  { %1730 = vmatprep.subr.bf16.mxu0 %v3145_v57  ;;  %v3227_v57 = vld [vmem:[#allocation2 + $0x560] ss:$16 sps:$4 sm:$0xff]  }
  0x90   :  { %1690 = vmatpush1.bf16.msra.mxu1 %v3147_v58  ;;  %v3230_v58 = vld [vmem:[#allocation2 + $0x168] ss:$16 sps:$4 sm:$0xff]  }
  0x91   :  { %1731 = vmatpush1.bf16.msra.mxu0 %v3148_v59  ;;  %1691 = vmatprep.subr.bf16.mxu1 %v3149_v60  ;;  %v3235_v59 = vld [vmem:[#allocation2 + $0x584] ss:$16 sps:$4 sm:$0xff]   ;;  %v3238_v60 = vld [vmem:[#allocation2 + $0x18c] ss:$16 sps:$4 sm:$0xff]  }
  0x92   :  { %1732 = vmatprep.subr.bf16.mxu0 %v3151_v61  ;;  %v3233_v61 = vld [vmem:[#allocation2 + $0x580] ss:$16 sps:$4 sm:$0xff]  }
  0x94   :  { %1692 = vmatpush1.bf16.msra.mxu1 %v3153_v62  ;;  %v3236_v62 = vld [vmem:[#allocation2 + $0x188] ss:$16 sps:$4 sm:$0xff]  }
  0x95   :  { %1733 = vmatpush1.bf16.msra.mxu0 %v3154_v63  ;;  %1693 = vmatprep.subr.bf16.mxu1 %v3155_v0  ;;  %v3241_v63 = vld [vmem:[#allocation2 + $0x5a4] ss:$16 sps:$4 sm:$0xff]   ;;  %v3244_v0 = vld [vmem:[#allocation2 + $0x1ac] ss:$16 sps:$4 sm:$0xff]  }
  0x96   :  { %1734 = vmatprep.subr.bf16.mxu0 %v3157_v1  ;;  %v3239_v1 = vld [vmem:[#allocation2 + $0x5a0] ss:$16 sps:$4 sm:$0xff]  }
  0x98   :  { %1694 = vmatpush1.bf16.msra.mxu1 %v3159_v2  ;;  %v3242_v2 = vld [vmem:[#allocation2 + $0x1a8] ss:$16 sps:$4 sm:$0xff]  }
  0x99   :  { %1735 = vmatpush1.bf16.msra.mxu0 %v3160_v3  ;;  %1827 = vmatprep.subr.bf16.mxu1 %v3166_v7  ;;  %v3247_v3 = vld [vmem:[#allocation2 + $0x5c4] ss:$16 sps:$4 sm:$0xff]  }
  0x9a   :  { %1745 = vmatprep.subr.bf16.mxu0 %v3163_v5  ;;  %v3245_v5 = vld [vmem:[#allocation2 + $0x5c0] ss:$16 sps:$4 sm:$0xff]   ;;  %v3253_v7 = vld [vmem:[#allocation2 + $0x5e4] ss:$16 sps:$4 sm:$0xff]  }
  0x9b   :  { %1696 = vmatmul.mubr.bf16.vlgmr.msra.gmra.mrb[0].mxu1 %v3804_v8 }
  0x9c   :  { %1737 = vmatmul.mubr.bf16.vlgmr.msra.gmra.mrb[0].mxu0 %v3806_v11  ;;  %1828 = vmatpush1.bf16.msra.mxu1 %v3164_v10  ;;  %v3251_v10 = vld [vmem:[#allocation2 + $0x5e0] ss:$16 sps:$4 sm:$0xff]  }
  0x9d   :  { %1746 = vmatpush1.bf16.msra.mxu0 %v3161_v9  ;;  %1829 = vmatprep.subr.bf16.mxu1 %v3172_v13  ;;  %v3256_v9 = vld [vmem:[#allocation2 + $0x1ec] ss:$16 sps:$4 sm:$0xff]   ;;  %v93_v13 = vld [vmem:[%s3913_s0 + $0x20] sm:$0xff] }
  0x9e   :  { %1747 = vmatprep.subr.bf16.mxu0 %v3169_v12  ;;  %1859 = vmatprep.mubr.bf16.mxu1 %v3789_v48  ;;  %v3215_v48 = vld [vmem:[#allocation2 + $0x520] ss:$16 sps:$4 sm:$0xff]   ;;  %v3254_v12 = vld [vmem:[#allocation2 + $0x1e8] ss:$16 sps:$4 sm:$0xff]  }
  0x9f   :  { %1777 = vmatprep.mubr.bf16.mxu0 %v3814_v36 }
  0xa0   :  { %1830 = vmatpush1.bf16.msra.mxu1 %v3170_v15  ;;  %v3262_v15 = vld [vmem:[#allocation2 + $0x20c] ss:$16 sps:$4 sm:$0xff]  }
  0xa1   :  { %1748 = vmatpush1.bf16.msra.mxu0 %v3167_v14  ;;  %1831 = vmatprep.subr.bf16.mxu1 %v3178_v17  ;;  %v3259_v14 = vld [vmem:[#allocation2 + $0x604] ss:$16 sps:$4 sm:$0xff]   ;;  %v3257_v17 = vld [vmem:[#allocation2 + $0x600] ss:$16 sps:$4 sm:$0xff]  }
  0xa2   :  { %1749 = vmatprep.subr.bf16.mxu0 %v3175_v16  ;;  %v3820_v16 = vpack.c.bf16 %v93_v13, %v93_v13  ;;  %v3341_v13 = vld [vmem:[#allocation2 + $0x7c0] ss:$16 sps:$4 sm:$0xff]  }
  0xa4   :  { %1832 = vmatpush1.bf16.msra.mxu1 %v3176_v19  ;;  %v3265_v19 = vld [vmem:[#allocation2 + $0x624] ss:$16 sps:$4 sm:$0xff]  }
  0xa5   :  { %1750 = vmatpush1.bf16.msra.mxu0 %v3173_v18  ;;  %1833 = vmatprep.subr.bf16.mxu1 %v3184_v21  ;;  %v3260_v18 = vld [vmem:[#allocation2 + $0x208] ss:$16 sps:$4 sm:$0xff]  }
  0xa6   :  { %1751 = vmatprep.subr.bf16.mxu0 %v3181_v20  ;;  %v3268_v20 = vld [vmem:[#allocation2 + $0x22c] ss:$16 sps:$4 sm:$0xff]  }
  0xa7   :  { %v96_v21 = vld [vmem:[%s3913_s0 + $0x38] sm:$0xff] }
  0xa8   :  { %1834 = vmatpush1.bf16.msra.mxu1 %v3182_v23  ;;  %v3266_v23 = vld [vmem:[#allocation2 + $0x228] ss:$16 sps:$4 sm:$0xff]  }
  0xa9   :  { %1752 = vmatpush1.bf16.msra.mxu0 %v3179_v22  ;;  %1835 = vmatprep.subr.bf16.mxu1 %v3190_v25  ;;  %v3263_v22 = vld [vmem:[#allocation2 + $0x620] ss:$16 sps:$4 sm:$0xff]   ;;  %v3271_v25 = vld [vmem:[#allocation2 + $0x644] ss:$16 sps:$4 sm:$0xff]  }
  0xaa   :  { %1753 = vmatprep.subr.bf16.mxu0 %v3187_v24  ;;  %v3827_v24 = vpack.c.bf16 %v96_v21, %v96_v21  ;;  %v3355_v21 = vld [vmem:[#allocation2 + $0x40c] ss:$16 sps:$4 sm:$0xff]  }
  0xac   :  { %1836 = vmatpush1.bf16.msra.mxu1 %v3188_v27  ;;  %v3269_v27 = vld [vmem:[#allocation2 + $0x640] ss:$16 sps:$4 sm:$0xff]  }
  0xad   :  { %1754 = vmatpush1.bf16.msra.mxu0 %v3185_v26  ;;  %1837 = vmatprep.subr.bf16.mxu1 %v3196_v29  ;;  %v3274_v26 = vld [vmem:[#allocation2 + $0x24c] ss:$16 sps:$4 sm:$0xff]   ;;  %v3277_v29 = vld [vmem:[#allocation2 + $0x664] ss:$16 sps:$4 sm:$0xff]  }
  0xae   :  { %1755 = vmatprep.subr.bf16.mxu0 %v3193_v28  ;;  %v3272_v28 = vld [vmem:[#allocation2 + $0x248] ss:$16 sps:$4 sm:$0xff]  }
  0xb0   :  { %1838 = vmatpush1.bf16.msra.mxu1 %v3194_v31  ;;  %v3278_v31 = vld [vmem:[#allocation2 + $0x268] ss:$16 sps:$4 sm:$0xff]  }
  0xb1   :  { %1756 = vmatpush1.bf16.msra.mxu0 %v3191_v30  ;;  %1839 = vmatprep.subr.bf16.mxu1 %v3202_v33  ;;  %v3275_v30 = vld [vmem:[#allocation2 + $0x660] ss:$16 sps:$4 sm:$0xff]   ;;  %v3286_v33 = vld [vmem:[#allocation2 + $0x28c] ss:$16 sps:$4 sm:$0xff]  }
  0xb2   :  { %1757 = vmatprep.subr.bf16.mxu0 %v3199_v32  ;;  %v3283_v32 = vld [vmem:[#allocation2 + $0x684] ss:$16 sps:$4 sm:$0xff]  }
  0xb4   :  { %1840 = vmatpush1.bf16.msra.mxu1 %v3200_v37  ;;  %v3292_v37 = vld [vmem:[#allocation2 + $0x2ac] ss:$16 sps:$4 sm:$0xff]  }
  0xb5   :  { %1758 = vmatpush1.bf16.msra.mxu0 %v3197_v35  ;;  %1841 = vmatprep.subr.bf16.mxu1 %v3208_v39  ;;  %v3284_v35 = vld [vmem:[#allocation2 + $0x288] ss:$16 sps:$4 sm:$0xff]  }
  0xb6   :  { %1759 = vmatprep.subr.bf16.mxu0 %v3205_v38  ;;  %v3287_v38 = vld [vmem:[#allocation2 + $0x6a0] ss:$16 sps:$4 sm:$0xff]   ;;  %v3290_v39 = vld [vmem:[#allocation2 + $0x2a8] ss:$16 sps:$4 sm:$0xff]  }
  0xb8   :  { %1842 = vmatpush1.bf16.msra.mxu1 %v3206_v41  ;;  %v3298_v41 = vld [vmem:[#allocation2 + $0x2cc] ss:$16 sps:$4 sm:$0xff]  }
  0xb9   :  { %1760 = vmatpush1.bf16.msra.mxu0 %v3203_v40  ;;  %1843 = vmatprep.subr.bf16.mxu1 %v3214_v43  ;;  %v3295_v40 = vld [vmem:[#allocation2 + $0x6c4] ss:$16 sps:$4 sm:$0xff]   ;;  %v3296_v43 = vld [vmem:[#allocation2 + $0x2c8] ss:$16 sps:$4 sm:$0xff]  }
  0xba   :  { %1761 = vmatprep.subr.bf16.mxu0 %v3211_v42  ;;  %v3293_v42 = vld [vmem:[#allocation2 + $0x6c0] ss:$16 sps:$4 sm:$0xff]  }
  0xbc   :  { %1844 = vmatpush1.bf16.msra.mxu1 %v3212_v45  ;;  %v3304_v45 = vld [vmem:[#allocation2 + $0x2ec] ss:$16 sps:$4 sm:$0xff]  }
  0xbd   :  { %1762 = vmatpush1.bf16.msra.mxu0 %v3209_v44  ;;  %1845 = vmatprep.subr.bf16.mxu1 %v3220_v47  ;;  %v3301_v44 = vld [vmem:[#allocation2 + $0x6e4] ss:$16 sps:$4 sm:$0xff]   ;;  %v3302_v47 = vld [vmem:[#allocation2 + $0x2e8] ss:$16 sps:$4 sm:$0xff]  }
  0xbe   :  { %1763 = vmatprep.subr.bf16.mxu0 %v3217_v46  ;;  %v3299_v46 = vld [vmem:[#allocation2 + $0x6e0] ss:$16 sps:$4 sm:$0xff]  }
  0xc0   :  { %1846 = vmatpush1.bf16.msra.mxu1 %v3218_v49  ;;  %v3310_v49 = vld [vmem:[#allocation2 + $0x30c] ss:$16 sps:$4 sm:$0xff]  }
  0xc1   :  { %1764 = vmatpush1.bf16.msra.mxu0 %v3215_v48  ;;  %1847 = vmatprep.subr.bf16.mxu1 %v3226_v51  ;;  %v3307_v48 = vld [vmem:[#allocation2 + $0x704] ss:$16 sps:$4 sm:$0xff]   ;;  %v3308_v51 = vld [vmem:[#allocation2 + $0x308] ss:$16 sps:$4 sm:$0xff]  }
  0xc2   :  { %1765 = vmatprep.subr.bf16.mxu0 %v3223_v50  ;;  %v3305_v50 = vld [vmem:[#allocation2 + $0x700] ss:$16 sps:$4 sm:$0xff]  }
  0xc4   :  { %1848 = vmatpush1.bf16.msra.mxu1 %v3224_v54  ;;  %v3316_v54 = vld [vmem:[#allocation2 + $0x32c] ss:$16 sps:$4 sm:$0xff]  }
  0xc5   :  { %1766 = vmatpush1.bf16.msra.mxu0 %v3221_v53  ;;  %1849 = vmatprep.subr.bf16.mxu1 %v3232_v56  ;;  %v3313_v53 = vld [vmem:[#allocation2 + $0x724] ss:$16 sps:$4 sm:$0xff]   ;;  %v3314_v56 = vld [vmem:[#allocation2 + $0x328] ss:$16 sps:$4 sm:$0xff]  }
  0xc6   :  { %1767 = vmatprep.subr.bf16.mxu0 %v3229_v55  ;;  %v3311_v55 = vld [vmem:[#allocation2 + $0x720] ss:$16 sps:$4 sm:$0xff]  }
  0xc8   :  { %1850 = vmatpush1.bf16.msra.mxu1 %v3230_v58  ;;  %v3322_v58 = vld [vmem:[#allocation2 + $0x34c] ss:$16 sps:$4 sm:$0xff]  }
  0xc9   :  { %1768 = vmatpush1.bf16.msra.mxu0 %v3227_v57  ;;  %1851 = vmatprep.subr.bf16.mxu1 %v3238_v60  ;;  %v3319_v57 = vld [vmem:[#allocation2 + $0x744] ss:$16 sps:$4 sm:$0xff]   ;;  %v3320_v60 = vld [vmem:[#allocation2 + $0x348] ss:$16 sps:$4 sm:$0xff]  }
  0xca   :  { %1769 = vmatprep.subr.bf16.mxu0 %v3235_v59  ;;  %v3317_v59 = vld [vmem:[#allocation2 + $0x740] ss:$16 sps:$4 sm:$0xff]  }
  0xcc   :  { %1852 = vmatpush1.bf16.msra.mxu1 %v3236_v62  ;;  %v3328_v62 = vld [vmem:[#allocation2 + $0x36c] ss:$16 sps:$4 sm:$0xff]  }
  0xcd   :  { %1770 = vmatpush1.bf16.msra.mxu0 %v3233_v61  ;;  %1853 = vmatprep.subr.bf16.mxu1 %v3244_v0  ;;  %v3325_v61 = vld [vmem:[#allocation2 + $0x764] ss:$16 sps:$4 sm:$0xff]   ;;  %v3326_v0 = vld [vmem:[#allocation2 + $0x368] ss:$16 sps:$4 sm:$0xff]  }
  0xce   :  { %1771 = vmatprep.subr.bf16.mxu0 %v3241_v63  ;;  %v3323_v63 = vld [vmem:[#allocation2 + $0x760] ss:$16 sps:$4 sm:$0xff]  }
  0xd0   :  { %1854 = vmatpush1.bf16.msra.mxu1 %v3242_v2  ;;  %v3334_v2 = vld [vmem:[#allocation2 + $0x38c] ss:$16 sps:$4 sm:$0xff]  }
  0xd1   :  { %1772 = vmatpush1.bf16.msra.mxu0 %v3239_v1  ;;  %1855 = vmatprep.subr.bf16.mxu1 %v3250_v4  ;;  %v3331_v1 = vld [vmem:[#allocation2 + $0x784] ss:$16 sps:$4 sm:$0xff]   ;;  %v3332_v4 = vld [vmem:[#allocation2 + $0x388] ss:$16 sps:$4 sm:$0xff]  }
  0xd2   :  { %1773 = vmatprep.subr.bf16.mxu0 %v3247_v3  ;;  %v3329_v3 = vld [vmem:[#allocation2 + $0x780] ss:$16 sps:$4 sm:$0xff]  }
  0xd4   :  { %1856 = vmatpush1.bf16.msra.mxu1 %v3248_v6  ;;  %v3340_v6 = vld [vmem:[#allocation2 + $0x3ac] ss:$16 sps:$4 sm:$0xff]  }
  0xd5   :  { %1774 = vmatpush1.bf16.msra.mxu0 %v3245_v5  ;;  %1857 = vmatprep.subr.bf16.mxu1 %v3256_v9  ;;  %v3337_v5 = vld [vmem:[#allocation2 + $0x7a4] ss:$16 sps:$4 sm:$0xff]   ;;  %v3338_v9 = vld [vmem:[#allocation2 + $0x3a8] ss:$16 sps:$4 sm:$0xff]  }
  0xd6   :  { %1775 = vmatprep.subr.bf16.mxu0 %v3253_v7  ;;  %v3335_v7 = vld [vmem:[#allocation2 + $0x7a0] ss:$16 sps:$4 sm:$0xff]  }
  0xd8   :  { %1858 = vmatpush1.bf16.msra.mxu1 %v3254_v12  ;;  %v3346_v12 = vld [vmem:[#allocation2 + $0x3cc] ss:$16 sps:$4 sm:$0xff]  }
  0xd9   :  { %1776 = vmatpush1.bf16.msra.mxu0 %v3251_v10  ;;  %1868 = vmatprep.subr.bf16.mxu1 %v3262_v15  ;;  %v3343_v10 = vld [vmem:[#allocation2 + $0x7c4] ss:$16 sps:$4 sm:$0xff]  }
  0xda   :  { %1786 = vmatprep.subr.bf16.mxu0 %v3259_v14  ;;  %v3344_v14 = vld [vmem:[#allocation2 + $0x3c8] ss:$16 sps:$4 sm:$0xff]   ;;  %v3349_v15 = vld [vmem:[#allocation2 + $0x7e4] ss:$16 sps:$4 sm:$0xff]  }
  0xdb   :  { %1860 = vmatmul.mubr.bf16.vlgmr.msra.gmra.mrb[4].mxu1 %v3804_v8  ;;  %v3280_v8 = vld [vmem:[#allocation2 + $0x26c] ss:$16 sps:$4 sm:$0xff]  }
  0xdc   :  { %1778 = vmatmul.mubr.bf16.vlgmr.msra.gmra.mrb[0].mxu0 %v3820_v16  ;;  %1869 = vmatpush1.bf16.msra.mxu1 %v3260_v18  ;;  %v3347_v18 = vld [vmem:[#allocation2 + $0x7e0] ss:$16 sps:$4 sm:$0xff]  }
  0xdd   :  { %1787 = vmatpush1.bf16.msra.mxu0 %v3257_v17  ;;  %1870 = vmatprep.subr.bf16.mxu1 %v3268_v20  ;;  %v3352_v17 = vld [vmem:[#allocation2 + $0x3ec] ss:$16 sps:$4 sm:$0xff]   ;;  %v95_v20 = vld [vmem:[%s3913_s0 + $0x30] sm:$0xff] }
  0xde   :  { %1788 = vmatprep.subr.bf16.mxu0 %v3265_v19  ;;  %1818 = vmatprep.mubr.bf16.mxu0 %v3827_v24  ;;  %v3350_v19 = vld [vmem:[#allocation2 + $0x3e8] ss:$16 sps:$4 sm:$0xff]  }
  0xdf   :  { %1900 = vmatprep.mubr.bf16.mxu1 %v3794_v52  ;;  %v3289_v52 = vld [vmem:[#allocation2 + $0x6a4] ss:$16 sps:$4 sm:$0xff]  }
  0xe0   :  { %1871 = vmatpush1.bf16.msra.mxu1 %v3266_v23  ;;  %v3834_v23 = vpack.c.bf16 %v95_v20, %v95_v20  ;;  %v3403_v20 = vld [vmem:[#allocation2 + $0x60c] ss:$16 sps:$4 sm:$0xff]  }
  0xe1   :  { %1789 = vmatpush1.bf16.msra.mxu0 %v3263_v22  ;;  %1872 = vmatprep.subr.bf16.mxu1 %v3274_v26  ;;  %v3353_v22 = vld [vmem:[#allocation2 + $0x408] ss:$16 sps:$4 sm:$0xff]   ;;  %v3449_v26 = vld [vmem:[#allocation6] ss:$8 sps:$4 sm:$0xff]  }
  0xe2   :  { %1790 = vmatprep.subr.bf16.mxu0 %v3271_v25  ;;  %v3358_v25 = vld [vmem:[#allocation2 + $0x42c] ss:$16 sps:$4 sm:$0xff]  }
  0xe4   :  { %1873 = vmatpush1.bf16.msra.mxu1 %v3272_v28  ;;  %v3356_v28 = vld [vmem:[#allocation2 + $0x428] ss:$16 sps:$4 sm:$0xff]  }
  0xe5   :  { %1791 = vmatpush1.bf16.msra.mxu0 %v3269_v27  ;;  %1874 = vmatprep.subr.bf16.mxu1 %v3280_v8  ;;  %v3451_v27 = vld [vmem:[#allocation6 + $0x4] ss:$8 sps:$4 sm:$0xff]   ;;  %v3361_v8 = vld [vmem:[#allocation2 + $0x44c] ss:$16 sps:$4 sm:$0xff]  }
  0xe6   :  { %1792 = vmatprep.subr.bf16.mxu0 %v3277_v29  ;;  %v3454_v29 = vld [vmem:[#allocation6 + $0x14] ss:$8 sps:$4 sm:$0xff]  }
  0xe8   :  { %1875 = vmatpush1.bf16.msra.mxu1 %v3278_v31  ;;  %v3457_v31 = vld [vmem:[#allocation6 + $0x24] ss:$8 sps:$4 sm:$0xff]  }
  0xe9   :  { %1793 = vmatpush1.bf16.msra.mxu0 %v3275_v30  ;;  %1876 = vmatprep.subr.bf16.mxu1 %v3286_v33  ;;  %v3452_v30 = vld [vmem:[#allocation6 + $0x10] ss:$8 sps:$4 sm:$0xff]  }
  0xea   :  { %1794 = vmatprep.subr.bf16.mxu0 %v3283_v32  ;;  %v3359_v32 = vld [vmem:[#allocation2 + $0x448] ss:$16 sps:$4 sm:$0xff]   ;;  %v3364_v33 = vld [vmem:[#allocation2 + $0x46c] ss:$16 sps:$4 sm:$0xff]  }
  0xec   :  { %1877 = vmatpush1.bf16.msra.mxu1 %v3284_v35  ;;  %v3367_v35 = vld [vmem:[#allocation2 + $0x48c] ss:$16 sps:$4 sm:$0xff]  }
  0xed   :  { %1795 = vmatpush1.bf16.msra.mxu0 %v3281_v34  ;;  %1878 = vmatprep.subr.bf16.mxu1 %v3292_v37  ;;  %v3362_v34 = vld [vmem:[#allocation2 + $0x468] ss:$16 sps:$4 sm:$0xff]  }
  0xee   :  { %1796 = vmatprep.subr.bf16.mxu0 %v3289_v52  ;;  %v3460_v52 = vld [vmem:[#allocation6 + $0x34] ss:$8 sps:$4 sm:$0xff]   ;;  %v3463_v37 = vld [vmem:[#allocation6 + $0x44] ss:$8 sps:$4 sm:$0xff]  }
  0xf0   :  { %1879 = vmatpush1.bf16.msra.mxu1 %v3290_v39  ;;  %v3370_v39 = vld [vmem:[#allocation2 + $0x4ac] ss:$16 sps:$4 sm:$0xff]  }
  0xf1   :  { %1797 = vmatpush1.bf16.msra.mxu0 %v3287_v38  ;;  %1880 = vmatprep.subr.bf16.mxu1 %v3298_v41  ;;  %v3365_v38 = vld [vmem:[#allocation2 + $0x488] ss:$16 sps:$4 sm:$0xff]  }
  0xf2   :  { %1798 = vmatprep.subr.bf16.mxu0 %v3295_v40  ;;  %v3461_v40 = vld [vmem:[#allocation6 + $0x40] ss:$8 sps:$4 sm:$0xff]   ;;  %v3466_v41 = vld [vmem:[#allocation6 + $0x54] ss:$8 sps:$4 sm:$0xff]  }
  0xf4   :  { %1881 = vmatpush1.bf16.msra.mxu1 %v3296_v43  ;;  %v3373_v43 = vld [vmem:[#allocation2 + $0x4cc] ss:$16 sps:$4 sm:$0xff]  }
  0xf5   :  { %1799 = vmatpush1.bf16.msra.mxu0 %v3293_v42  ;;  %1882 = vmatprep.subr.bf16.mxu1 %v3304_v45  ;;  %v3368_v42 = vld [vmem:[#allocation2 + $0x4a8] ss:$16 sps:$4 sm:$0xff]  }
  0xf6   :  { %1800 = vmatprep.subr.bf16.mxu0 %v3301_v44  ;;  %v3464_v44 = vld [vmem:[#allocation6 + $0x50] ss:$8 sps:$4 sm:$0xff]   ;;  %v3469_v45 = vld [vmem:[#allocation6 + $0x64] ss:$8 sps:$4 sm:$0xff]  }
  0xf8   :  { %1883 = vmatpush1.bf16.msra.mxu1 %v3302_v47  ;;  %v3376_v47 = vld [vmem:[#allocation2 + $0x4ec] ss:$16 sps:$4 sm:$0xff]  }
  0xf9   :  { %1801 = vmatpush1.bf16.msra.mxu0 %v3299_v46  ;;  %1884 = vmatprep.subr.bf16.mxu1 %v3310_v49  ;;  %v3371_v46 = vld [vmem:[#allocation2 + $0x4c8] ss:$16 sps:$4 sm:$0xff]  }
  0xfa   :  { %1802 = vmatprep.subr.bf16.mxu0 %v3307_v48  ;;  %v3467_v48 = vld [vmem:[#allocation6 + $0x60] ss:$8 sps:$4 sm:$0xff]   ;;  %v3472_v49 = vld [vmem:[#allocation6 + $0x74] ss:$8 sps:$4 sm:$0xff]  }
  0xfc   :  { %1885 = vmatpush1.bf16.msra.mxu1 %v3308_v51  ;;  %v3379_v51 = vld [vmem:[#allocation2 + $0x50c] ss:$16 sps:$4 sm:$0xff]  }
  0xfd   :  { %1803 = vmatpush1.bf16.msra.mxu0 %v3305_v50  ;;  %1886 = vmatprep.subr.bf16.mxu1 %v3316_v54  ;;  %v3374_v50 = vld [vmem:[#allocation2 + $0x4e8] ss:$16 sps:$4 sm:$0xff]  }
  0xfe   :  { %1804 = vmatprep.subr.bf16.mxu0 %v3313_v53  ;;  %v3470_v53 = vld [vmem:[#allocation6 + $0x70] ss:$8 sps:$4 sm:$0xff]   ;;  %v3475_v54 = vld [vmem:[#allocation6 + $0x84] ss:$8 sps:$4 sm:$0xff]  }
 0x100   :  { %1887 = vmatpush1.bf16.msra.mxu1 %v3314_v56  ;;  %v3382_v56 = vld [vmem:[#allocation2 + $0x52c] ss:$16 sps:$4 sm:$0xff]  }
 0x101   :  { %1805 = vmatpush1.bf16.msra.mxu0 %v3311_v55  ;;  %1888 = vmatprep.subr.bf16.mxu1 %v3322_v58  ;;  %v3377_v55 = vld [vmem:[#allocation2 + $0x508] ss:$16 sps:$4 sm:$0xff]  }
 0x102   :  { %1806 = vmatprep.subr.bf16.mxu0 %v3319_v57  ;;  %v3473_v57 = vld [vmem:[#allocation6 + $0x80] ss:$8 sps:$4 sm:$0xff]   ;;  %v3478_v58 = vld [vmem:[#allocation6 + $0x94] ss:$8 sps:$4 sm:$0xff]  }
 0x104   :  { %1889 = vmatpush1.bf16.msra.mxu1 %v3320_v60  ;;  %v3385_v60 = vld [vmem:[#allocation2 + $0x54c] ss:$16 sps:$4 sm:$0xff]  }
 0x105   :  { %1807 = vmatpush1.bf16.msra.mxu0 %v3317_v59  ;;  %1890 = vmatprep.subr.bf16.mxu1 %v3328_v62  ;;  %v3380_v59 = vld [vmem:[#allocation2 + $0x528] ss:$16 sps:$4 sm:$0xff]  }
 0x106   :  { %1808 = vmatprep.subr.bf16.mxu0 %v3325_v61  ;;  %v3476_v61 = vld [vmem:[#allocation6 + $0x90] ss:$8 sps:$4 sm:$0xff]   ;;  %v3481_v62 = vld [vmem:[#allocation6 + $0xa4] ss:$8 sps:$4 sm:$0xff]  }
 0x108   :  { %1891 = vmatpush1.bf16.msra.mxu1 %v3326_v0  ;;  %v3388_v0 = vld [vmem:[#allocation2 + $0x56c] ss:$16 sps:$4 sm:$0xff]  }
 0x109   :  { %1809 = vmatpush1.bf16.msra.mxu0 %v3323_v63  ;;  %1892 = vmatprep.subr.bf16.mxu1 %v3334_v2  ;;  %v3383_v63 = vld [vmem:[#allocation2 + $0x548] ss:$16 sps:$4 sm:$0xff]  }
 0x10a   :  { %1810 = vmatprep.subr.bf16.mxu0 %v3331_v1  ;;  %v3479_v1 = vld [vmem:[#allocation6 + $0xa0] ss:$8 sps:$4 sm:$0xff]   ;;  %v3484_v2 = vld [vmem:[#allocation6 + $0xb4] ss:$8 sps:$4 sm:$0xff]  }
 0x10c   :  { %1893 = vmatpush1.bf16.msra.mxu1 %v3332_v4  ;;  %v3391_v4 = vld [vmem:[#allocation2 + $0x58c] ss:$16 sps:$4 sm:$0xff]  }
 0x10d   :  { %1811 = vmatpush1.bf16.msra.mxu0 %v3329_v3  ;;  %1894 = vmatprep.subr.bf16.mxu1 %v3340_v6  ;;  %v3386_v3 = vld [vmem:[#allocation2 + $0x568] ss:$16 sps:$4 sm:$0xff]  }
 0x10e   :  { %1812 = vmatprep.subr.bf16.mxu0 %v3337_v5  ;;  %v3482_v5 = vld [vmem:[#allocation6 + $0xb0] ss:$8 sps:$4 sm:$0xff]   ;;  %v3487_v6 = vld [vmem:[#allocation6 + $0xc4] ss:$8 sps:$4 sm:$0xff]  }
 0x110   :  { %1895 = vmatpush1.bf16.msra.mxu1 %v3338_v9  ;;  %v3394_v9 = vld [vmem:[#allocation2 + $0x5ac] ss:$16 sps:$4 sm:$0xff]  }
 0x111   :  { %1813 = vmatpush1.bf16.msra.mxu0 %v3335_v7  ;;  %1896 = vmatprep.subr.bf16.mxu1 %v3346_v12  ;;  %v3389_v7 = vld [vmem:[#allocation2 + $0x588] ss:$16 sps:$4 sm:$0xff]  }
 0x112   :  { %1814 = vmatprep.subr.bf16.mxu0 %v3343_v10  ;;  %v3485_v10 = vld [vmem:[#allocation6 + $0xc0] ss:$8 sps:$4 sm:$0xff]   ;;  %v3490_v12 = vld [vmem:[#allocation6 + $0xd4] ss:$8 sps:$4 sm:$0xff]  }
 0x114   :  { %1897 = vmatpush1.bf16.msra.mxu1 %v3344_v14  ;;  %v3397_v14 = vld [vmem:[#allocation2 + $0x5cc] ss:$16 sps:$4 sm:$0xff]  }
 0x115   :  { %1815 = vmatpush1.bf16.msra.mxu0 %v3341_v13  ;;  %1898 = vmatprep.subr.bf16.mxu1 %v3352_v17  ;;  %v3392_v13 = vld [vmem:[#allocation2 + $0x5a8] ss:$16 sps:$4 sm:$0xff]  }
 0x116   :  { %1816 = vmatprep.subr.bf16.mxu0 %v3349_v15  ;;  %v3488_v15 = vld [vmem:[#allocation6 + $0xd0] ss:$8 sps:$4 sm:$0xff]   ;;  %v3395_v17 = vld [vmem:[#allocation2 + $0x5c8] ss:$16 sps:$4 sm:$0xff]  }
 0x118   :  { %1899 = vmatpush1.bf16.msra.mxu1 %v3350_v19  ;;  %v3398_v19 = vld [vmem:[#allocation2 + $0x5e8] ss:$16 sps:$4 sm:$0xff]  }
 0x119   :  { %1817 = vmatpush1.bf16.msra.mxu0 %v3347_v18  ;;  %1909 = vmatprep.subr.bf16.mxu1 %v3355_v21  ;;  %v3400_v18 = vld [vmem:[#allocation2 + $0x5ec] ss:$16 sps:$4 sm:$0xff]   ;;  %v3401_v21 = vld [vmem:[#allocation2 + $0x608] ss:$16 sps:$4 sm:$0xff]  }
 0x11a   :  { %2395 = vmatprep.subr.bf16.mxu0 %v3451_v27  ;;  %v3407_v27 = vld [vmem:[#allocation2 + $0x648] ss:$16 sps:$4 sm:$0xff]  }
 0x11b   :  { %1901 = vmatmul.mubr.bf16.vlgmr.msra.gmra.mrb[4].mxu1 %v3806_v11  ;;  %v3455_v11 = vld [vmem:[#allocation6 + $0x20] ss:$8 sps:$4 sm:$0xff]  }
 0x11c   :  { %1819 = vmatmul.mubr.bf16.vlgmr.msra.gmra.mrb[0].mxu0 %v3834_v23  ;;  %1910 = vmatpush1.bf16.msra.mxu1 %v3353_v22  ;;  %v3406_v22 = vld [vmem:[#allocation2 + $0x62c] ss:$16 sps:$4 sm:$0xff]  }
 0x11d   :  { %1941 = vmatprep.mubr.bf16.mxu1 %v3814_v36  ;;  %1911 = vmatprep.subr.bf16.mxu1 %v3358_v25  ;;  %v3458_v36 = vld [vmem:[#allocation6 + $0x30] ss:$8 sps:$4 sm:$0xff]   ;;  %v3404_v25 = vld [vmem:[#allocation2 + $0x628] ss:$16 sps:$4 sm:$0xff]  }
 0x11e   :  { %2396 = vmatpush1.bf16.msra.mxu0 %v3449_v26  ;;  %v3409_v26 = vld [vmem:[#allocation2 + $0x64c] ss:$16 sps:$4 sm:$0xff]  }
 0x11f   :  { %2397 = vmatprep.subr.bf16.mxu0 %v3454_v29  ;;  %v3410_v29 = vld [vmem:[#allocation2 + $0x668] ss:$16 sps:$4 sm:$0xff]  }
 0x120   :  { %1912 = vmatpush1.bf16.msra.mxu1 %v3356_v28  ;;  %v3412_v28 = vld [vmem:[#allocation2 + $0x66c] ss:$16 sps:$4 sm:$0xff]  }
 0x121   :  { %1913 = vmatprep.subr.bf16.mxu1 %v3361_v8  ;;  %v3415_v8 = vld [vmem:[#allocation2 + $0x68c] ss:$16 sps:$4 sm:$0xff]  }
 0x122   :  { %2398 = vmatpush1.bf16.msra.mxu0 %v3452_v30  ;;  %v3413_v30 = vld [vmem:[#allocation2 + $0x688] ss:$16 sps:$4 sm:$0xff]  }
 0x123   :  { %2399 = vmatprep.subr.bf16.mxu0 %v3457_v31  ;;  %v3418_v31 = vld [vmem:[#allocation2 + $0x6ac] ss:$16 sps:$4 sm:$0xff]  }
 0x124   :  { %1914 = vmatpush1.bf16.msra.mxu1 %v3359_v32  ;;  %v3421_v32 = vld [vmem:[#allocation2 + $0x6cc] ss:$16 sps:$4 sm:$0xff]  }
 0x125   :  { %1915 = vmatprep.subr.bf16.mxu1 %v3364_v33  ;;  %v3493_v33 = vld [vmem:[#allocation6 + $0xe4] ss:$8 sps:$4 sm:$0xff]  }
 0x126   :  { %2400 = vmatpush1.bf16.msra.mxu0 %v3455_v11  ;;  %v3491_v11 = vld [vmem:[#allocation6 + $0xe0] ss:$8 sps:$4 sm:$0xff]  }
 0x127   :  { %2401 = vmatprep.subr.bf16.mxu0 %v3460_v52  ;;  %v3419_v52 = vld [vmem:[#allocation2 + $0x6c8] ss:$16 sps:$4 sm:$0xff]  }
 0x128   :  { %1916 = vmatpush1.bf16.msra.mxu1 %v3362_v34 }
 0x129   :  { %1917 = vmatprep.subr.bf16.mxu1 %v3367_v35 }
 0x12a   :  { %2402 = vmatpush1.bf16.msra.mxu0 %v3458_v36 }
 0x12b   :  { %2403 = vmatprep.subr.bf16.mxu0 %v3463_v37  ;;  %v3424_v37 = vld [vmem:[#allocation2 + $0x6ec] ss:$16 sps:$4 sm:$0xff]  }
 0x12c   :  { %1918 = vmatpush1.bf16.msra.mxu1 %v3365_v38  ;;  %v3496_v38 = vld [vmem:[#allocation6 + $0xf4] ss:$8 sps:$4 sm:$0xff]  }
 0x12d   :  { %1919 = vmatprep.subr.bf16.mxu1 %v3370_v39  ;;  %v3494_v39 = vld [vmem:[#allocation6 + $0xf0] ss:$8 sps:$4 sm:$0xff]  }
 0x12e   :  { %2404 = vmatpush1.bf16.msra.mxu0 %v3461_v40  ;;  %v3422_v40 = vld [vmem:[#allocation2 + $0x6e8] ss:$16 sps:$4 sm:$0xff]  }
 0x12f   :  { %2405 = vmatprep.subr.bf16.mxu0 %v3466_v41  ;;  %v3427_v41 = vld [vmem:[#allocation2 + $0x70c] ss:$16 sps:$4 sm:$0xff]  }
 0x130   :  { %1920 = vmatpush1.bf16.msra.mxu1 %v3368_v42  ;;  %v3499_v42 = vld [vmem:[#allocation6 + $0x104] ss:$8 sps:$4 sm:$0xff]  }
 0x131   :  { %1921 = vmatprep.subr.bf16.mxu1 %v3373_v43  ;;  %v3425_v43 = vld [vmem:[#allocation2 + $0x708] ss:$16 sps:$4 sm:$0xff]  }
 0x132   :  { %2406 = vmatpush1.bf16.msra.mxu0 %v3464_v44  ;;  %v3430_v44 = vld [vmem:[#allocation2 + $0x72c] ss:$16 sps:$4 sm:$0xff]  }
 0x133   :  { %2407 = vmatprep.subr.bf16.mxu0 %v3469_v45  ;;  %v3428_v45 = vld [vmem:[#allocation2 + $0x728] ss:$16 sps:$4 sm:$0xff]  }
 0x134   :  { %1922 = vmatpush1.bf16.msra.mxu1 %v3371_v46  ;;  %v3433_v46 = vld [vmem:[#allocation2 + $0x74c] ss:$16 sps:$4 sm:$0xff]  }
 0x135   :  { %1923 = vmatprep.subr.bf16.mxu1 %v3376_v47  ;;  %v3431_v47 = vld [vmem:[#allocation2 + $0x748] ss:$16 sps:$4 sm:$0xff]  }
 0x136   :  { %2408 = vmatpush1.bf16.msra.mxu0 %v3467_v48  ;;  %v3436_v48 = vld [vmem:[#allocation2 + $0x76c] ss:$16 sps:$4 sm:$0xff]  }
 0x137   :  { %2409 = vmatprep.subr.bf16.mxu0 %v3472_v49  ;;  %v3434_v49 = vld [vmem:[#allocation2 + $0x768] ss:$16 sps:$4 sm:$0xff]  }
 0x138   :  { %1924 = vmatpush1.bf16.msra.mxu1 %v3374_v50  ;;  %v3439_v50 = vld [vmem:[#allocation2 + $0x78c] ss:$16 sps:$4 sm:$0xff]  }
 0x139   :  { %1925 = vmatprep.subr.bf16.mxu1 %v3379_v51  ;;  %v3437_v51 = vld [vmem:[#allocation2 + $0x788] ss:$16 sps:$4 sm:$0xff]  }
 0x13a   :  { %2410 = vmatpush1.bf16.msra.mxu0 %v3470_v53  ;;  %v3442_v53 = vld [vmem:[#allocation2 + $0x7ac] ss:$16 sps:$4 sm:$0xff]  }
 0x13b   :  { %2411 = vmatprep.subr.bf16.mxu0 %v3475_v54  ;;  %v3440_v54 = vld [vmem:[#allocation2 + $0x7a8] ss:$16 sps:$4 sm:$0xff]  }
 0x13c   :  { %1926 = vmatpush1.bf16.msra.mxu1 %v3377_v55  ;;  %v3445_v55 = vld [vmem:[#allocation2 + $0x7cc] ss:$16 sps:$4 sm:$0xff]  }
 0x13d   :  { %1927 = vmatprep.subr.bf16.mxu1 %v3382_v56  ;;  %v3443_v56 = vld [vmem:[#allocation2 + $0x7c8] ss:$16 sps:$4 sm:$0xff]  }
 0x13e   :  { %2412 = vmatpush1.bf16.msra.mxu0 %v3473_v57  ;;  %v3448_v57 = vld [vmem:[#allocation2 + $0x7ec] ss:$16 sps:$4 sm:$0xff]  }
 0x13f   :  { %2413 = vmatprep.subr.bf16.mxu0 %v3478_v58  ;;  %v3446_v58 = vld [vmem:[#allocation2 + $0x7e8] ss:$16 sps:$4 sm:$0xff]  }
 0x140   :  { %1928 = vmatpush1.bf16.msra.mxu1 %v3380_v59  ;;  %v363_v59 = vlaneseq }
 0x141   :  { %1929 = vmatprep.subr.bf16.mxu1 %v3385_v60 }
 0x142   :  { %2414 = vmatpush1.bf16.msra.mxu0 %v3476_v61  ;;  %v3842_v60 = vshrl.u32 %v363_v59, 7 }
 0x143   :  { %2415 = vmatprep.subr.bf16.mxu0 %v3481_v62  ;;  %v3845_v62 = vld [vmem:[#allocation4] sm:$0xf] }
 0x144   :  { %1930 = vmatpush1.bf16.msra.mxu1 %v3383_v63  ;;  %v365_v61 = vsub.s32 0, %v3842_v60  ;;  %v369_v63 = vsub.s32 1, %v3842_v60 }
 0x145   :  { %1931 = vmatprep.subr.bf16.mxu1 %v3388_v0 }
 0x146   :  { %2416 = vmatpush1.bf16.msra.mxu0 %v3479_v1  ;;  %v366_v0 = vrot.slane %v3845_v62, %v365_v61  ;;  %v370_v1 = vrot.slane %v3845_v62, %v369_v63 }
 0x147   :  { %2417 = vmatprep.subr.bf16.mxu0 %v3484_v2 }
 0x148   :  { %1932 = vmatpush1.bf16.msra.mxu1 %v3386_v3 }
 0x149   :  { %1933 = vmatprep.subr.bf16.mxu1 %v3391_v4 }
 0x14a   :  { %2418 = vmatpush1.bf16.msra.mxu0 %v3482_v5 }
 0x14b   :  { %2419 = vmatprep.subr.bf16.mxu0 %v3487_v6 }
 0x14c   :  { %1934 = vmatpush1.bf16.msra.mxu1 %v3389_v7 }
 0x14d   :  { %1935 = vmatprep.subr.bf16.mxu1 %v3394_v9 }
 0x14e   :  { %2420 = vmatpush1.bf16.msra.mxu0 %v3485_v10 }
 0x14f   :  { %2421 = vmatprep.subr.bf16.mxu0 %v3490_v12 }
 0x150   :  { %1936 = vmatpush1.bf16.msra.mxu1 %v3392_v13 }
 0x151   :  { %1937 = vmatprep.subr.bf16.mxu1 %v3397_v14  ;;  %v3497_v14 = vld [vmem:[#allocation6 + $0x100] ss:$8 sps:$4 sm:$0xff]  }
 0x152   :  { %2422 = vmatpush1.bf16.msra.mxu0 %v3488_v15 }
 0x153   :  { %2423 = vmatprep.subr.bf16.mxu0 %v3493_v33  ;;  %v3509_v33 = vld [vmem:[#allocation6 + $0x140] ss:$8 sps:$4 sm:$0xff]  }
 0x154   :  { %1938 = vmatpush1.bf16.msra.mxu1 %v3395_v17  ;;  %v3502_v17 = vld [vmem:[#allocation6 + $0x114] ss:$8 sps:$4 sm:$0xff]  }
 0x155   :  { %1939 = vmatprep.subr.bf16.mxu1 %v3400_v18  ;;  %v3545_v18 = vld [vmem:[%s3918_s5 + $0x40] sm:$0xff]  }
 0x156   :  { %2424 = vmatpush1.bf16.msra.mxu0 %v3491_v11  ;;  %v3554_v11 = vld [vmem:[%s3918_s5 + $0x20] sm:$0xff]  }
 0x157   :  { %2425 = vmatprep.subr.bf16.mxu0 %v3496_v38  ;;  %v3520_v38 = vld [vmem:[#allocation6 + $0x174] ss:$8 sps:$4 sm:$0xff]  }
 0x158   :  { %1940 = vmatpush1.bf16.msra.mxu1 %v3398_v19  ;;  %v3546_v19 = vld [vmem:[%s3918_s5] sm:$0xff]  }
 0x159   :  { %1950 = vmatprep.subr.bf16.mxu1 %v3403_v20  ;;  %v3547_v20 = vld [vmem:[%s3918_s5 + $0x48] sm:$0xff]  }
 0x15a   :  { %2426 = vmatpush1.bf16.msra.mxu0 %v3494_v39  ;;  %v3518_v39 = vld [vmem:[#allocation6 + $0x170] ss:$8 sps:$4 sm:$0xff]  }
 0x15b   :  { %1942 = vmatmul.mubr.bf16.vlgmr.msra.gmra.mrb[4].mxu1 %v3820_v16  ;;  %v3416_v16 = vld [vmem:[#allocation2 + $0x6a8] ss:$16 sps:$4 sm:$0xff]   ;;  %2436 = vmatprep.subr.bf16.mxu0 %v3499_v42 }
 0x15c   :  { %1951 = vmatpush1.bf16.msra.mxu1 %v3401_v21  ;;  %1982 = vmatprep.mubr.bf16.mxu1 %v3827_v24  ;;  %v3500_v21 = vld [vmem:[#allocation6 + $0x110] ss:$8 sps:$4 sm:$0xff]   ;;  %v3526_v42 = vld [vmem:[#allocation6 + $0x194] ss:$8 sps:$4 sm:$0xff]  }
 0x15d   :  { %1952 = vmatprep.subr.bf16.mxu1 %v3406_v22  ;;  %v3505_v22 = vld [vmem:[#allocation6 + $0x124] ss:$8 sps:$4 sm:$0xff]  }
 0x160   :  { %1953 = vmatpush1.bf16.msra.mxu1 %v3404_v25  ;;  %v3548_v25 = vld [vmem:[%s3918_s5 + $0x8] sm:$0xff]  }
 0x161   :  { %1954 = vmatprep.subr.bf16.mxu1 %v3409_v26  ;;  %v3549_v26 = vld [vmem:[%s3918_s5 + $0x50] sm:$0xff]  }
 0x164   :  { %1955 = vmatpush1.bf16.msra.mxu1 %v3407_v27  ;;  %v3503_v27 = vld [vmem:[#allocation6 + $0x120] ss:$8 sps:$4 sm:$0xff]  }
 0x165   :  { %1956 = vmatprep.subr.bf16.mxu1 %v3412_v28  ;;  %v3508_v28 = vld [vmem:[#allocation6 + $0x134] ss:$8 sps:$4 sm:$0xff]  }
 0x168   :  { %1957 = vmatpush1.bf16.msra.mxu1 %v3410_v29  ;;  %v3550_v29 = vld [vmem:[%s3918_s5 + $0x10] sm:$0xff]  }
 0x169   :  { %1958 = vmatprep.subr.bf16.mxu1 %v3415_v8  ;;  %v3551_v8 = vld [vmem:[%s3918_s5 + $0x58] sm:$0xff]  }
 0x16c   :  { %1959 = vmatpush1.bf16.msra.mxu1 %v3413_v30  ;;  %v3506_v30 = vld [vmem:[#allocation6 + $0x130] ss:$8 sps:$4 sm:$0xff]  }
 0x16d   :  { %1960 = vmatprep.subr.bf16.mxu1 %v3418_v31  ;;  %v3511_v31 = vld [vmem:[#allocation6 + $0x144] ss:$8 sps:$4 sm:$0xff]  }
 0x16e   :  { %v1697_v24 = vpop.f32.mrb[0].mxu1 }
 0x16f   :  { %v1699_v34 = vpop.f32.mrb[1].mxu1  ;;  %v1698_v2 = vadd.f32 %v1697_v24, %v366_v0  ;;  %v3514_v24 = vld [vmem:[#allocation6 + $0x154] ss:$8 sps:$4 sm:$0xff]  }
 0x170   :  { %v1701_v35 = vpop.f32.mrb[2].mxu1  ;;  %1961 = vmatpush1.bf16.msra.mxu1 %v3416_v16  ;;  %v1700_v3 = vadd.f32 %v1699_v34, %v370_v1  ;;  %v3552_v16 = vld [vmem:[%s3918_s5 + $0x18] sm:$0xff]   ;;  %v3555_v34 = vld [vmem:[%s3918_s5 + $0x68] sm:$0xff]  }
 0x171   :  { %v1702_v36 = vpop.f32.mrb[3].mxu1  ;;  %1962 = vmatprep.subr.bf16.mxu1 %v3421_v32  ;;  %v3553_v32 = vld [vmem:[%s3918_s5 + $0x60] sm:$0xff]   ;;  %v3512_v35 = vld [vmem:[#allocation6 + $0x150] ss:$8 sps:$4 sm:$0xff]  }
 0x172   :  { %v3556_v36 = vld [vmem:[%s3918_s5 + $0x28] sm:$0xff]  }
 0x174   :  { %1963 = vmatpush1.bf16.msra.mxu1 %v3419_v52  ;;  %v3517_v52 = vld [vmem:[#allocation6 + $0x164] ss:$8 sps:$4 sm:$0xff]  }
 0x175   :  { %1964 = vmatprep.subr.bf16.mxu1 %v3424_v37  ;;  %v3515_v37 = vld [vmem:[#allocation6 + $0x160] ss:$8 sps:$4 sm:$0xff]  }
 0x178   :  { %1965 = vmatpush1.bf16.msra.mxu1 %v3422_v40  ;;  %v3523_v40 = vld [vmem:[#allocation6 + $0x184] ss:$8 sps:$4 sm:$0xff]  }
 0x179   :  { %1966 = vmatprep.subr.bf16.mxu1 %v3427_v41  ;;  %v3521_v41 = vld [vmem:[#allocation6 + $0x180] ss:$8 sps:$4 sm:$0xff]  }
 0x17c   :  { %1967 = vmatpush1.bf16.msra.mxu1 %v3425_v43  ;;  %v3524_v43 = vld [vmem:[#allocation6 + $0x190] ss:$8 sps:$4 sm:$0xff]  }
 0x17d   :  { %1968 = vmatprep.subr.bf16.mxu1 %v3430_v44  ;;  %v3529_v44 = vld [vmem:[#allocation6 + $0x1a4] ss:$8 sps:$4 sm:$0xff]  }
 0x180   :  { %1969 = vmatpush1.bf16.msra.mxu1 %v3428_v45  ;;  %v3527_v45 = vld [vmem:[#allocation6 + $0x1a0] ss:$8 sps:$4 sm:$0xff]  }
 0x181   :  { %1970 = vmatprep.subr.bf16.mxu1 %v3433_v46  ;;  %v3532_v46 = vld [vmem:[#allocation6 + $0x1b4] ss:$8 sps:$4 sm:$0xff]  }
 0x184   :  { %1971 = vmatpush1.bf16.msra.mxu1 %v3431_v47  ;;  %v3530_v47 = vld [vmem:[#allocation6 + $0x1b0] ss:$8 sps:$4 sm:$0xff]  }
 0x185   :  { %1972 = vmatprep.subr.bf16.mxu1 %v3436_v48  ;;  %v3535_v48 = vld [vmem:[#allocation6 + $0x1c4] ss:$8 sps:$4 sm:$0xff]  }
 0x188   :  { %1973 = vmatpush1.bf16.msra.mxu1 %v3434_v49  ;;  %v3533_v49 = vld [vmem:[#allocation6 + $0x1c0] ss:$8 sps:$4 sm:$0xff]  }
 0x189   :  { %1974 = vmatprep.subr.bf16.mxu1 %v3439_v50  ;;  %v3538_v50 = vld [vmem:[#allocation6 + $0x1d4] ss:$8 sps:$4 sm:$0xff]  }
 0x18c   :  { %1975 = vmatpush1.bf16.msra.mxu1 %v3437_v51  ;;  %v3536_v51 = vld [vmem:[#allocation6 + $0x1d0] ss:$8 sps:$4 sm:$0xff]  }
 0x18d   :  { %1976 = vmatprep.subr.bf16.mxu1 %v3442_v53  ;;  %v3541_v53 = vld [vmem:[#allocation6 + $0x1e4] ss:$8 sps:$4 sm:$0xff]  }
 0x190   :  { %1977 = vmatpush1.bf16.msra.mxu1 %v3440_v54  ;;  %v3539_v54 = vld [vmem:[#allocation6 + $0x1e0] ss:$8 sps:$4 sm:$0xff]  }
 0x191   :  { %1978 = vmatprep.subr.bf16.mxu1 %v3445_v55  ;;  %v3544_v55 = vld [vmem:[#allocation6 + $0x1f4] ss:$8 sps:$4 sm:$0xff]  }
 0x194   :  { %1979 = vmatpush1.bf16.msra.mxu1 %v3443_v56  ;;  %v3542_v56 = vld [vmem:[#allocation6 + $0x1f0] ss:$8 sps:$4 sm:$0xff]  }
 0x195   :  { %1980 = vmatprep.subr.bf16.mxu1 %v3448_v57  ;;  %v373_v57 = vsub.s32 2, %v3842_v60 }
 0x197   :  { %v374_v59 = vrot.slane %v3845_v62, %v373_v57 }
 0x198   :  { %1981 = vmatpush1.bf16.msra.mxu1 %v3446_v58  ;;  %v377_v58 = vsub.s32 3, %v3842_v60 }
 0x199   :  { %3002 = vmatprep.subr.bf16.mxu1 %v3545_v18 }
 0x19a   :  { %v378_v0 = vrot.slane %v3845_v62, %v377_v58  ;;  %v3558_v62 = vld [vmem:[%s3918_s5 + $0x30] sm:$0xff]  }
 0x19b   :  { %1983 = vmatmul.mubr.bf16.vlgmr.msra.gmra.mrb[4].mxu1 %v3834_v23 }
 0x19c   :  { %3003 = vmatpush3.bf16.msra.mxu1 %v3546_v19 }
 0x19d   :  { %3004 = vmatprep.subr.bf16.mxu1 %v3547_v20 }
 0x1a0   :  { %3005 = vmatpush3.bf16.msra.mxu1 %v3548_v25 }
 0x1a1   :  { %3006 = vmatprep.subr.bf16.mxu1 %v3549_v26 }
 0x1a4   :  { %3007 = vmatpush3.bf16.msra.mxu1 %v3550_v29 }
 0x1a5   :  { %3008 = vmatprep.subr.bf16.mxu1 %v3551_v8 }
 0x1a8   :  { %3009 = vmatpush3.bf16.msra.mxu1 %v3552_v16 }
 0x1a9   :  { %3010 = vmatprep.subr.bf16.mxu1 %v3553_v32 }
 0x1ac   :  { %3011 = vmatpush3.bf16.msra.mxu1 %v3554_v11 }
 0x1ad   :  { %3012 = vmatprep.subr.bf16.mxu1 %v3555_v34 }
 0x1b0   :  { %3013 = vmatpush3.bf16.msra.mxu1 %v3556_v36 }
 0x1ef   :  { %v1820_v23 = vpop.f32.mrb[0].mxu0 }
 0x1f0   :  { %v3025_v4 = vadd.f32 %v1820_v23, %v1698_v2  ;;  %v1822_v5 = vpop.f32.mrb[1].mxu0 }
 0x1f1   :  { %v3027_v6 = vadd.f32 %v1822_v5, %v1700_v3  ;;  %v1824_v7 = vpop.f32.mrb[2].mxu0 }
 0x1f2   :  { %v1991_v9 = vmax.f32 %v3025_v4, 0.0  ;;  %v1825_v10 = vpop.f32.mrb[3].mxu0 }
 0x1f3   :  { %v1992_v12 = vmax.f32 %v3027_v6, 0.0 }
 0x1f4   :  { %v1995_v15 = vpack.c.bf16 %v1991_v9, %v1991_v9 }
 0x1f5   :  { %v1996_v13 = vpack.c.bf16 %v1992_v12, %v1992_v12  ;;  %v3557_v12 = vld [vmem:[%s3918_s5 + $0x70] sm:$0xff]  }
 0x1f6   :  { %3014 = vmatprep.subr.bf16.mxu1 %v3557_v12 }
 0x1f7   :  { %2427 = vmatprep.mubr.bf16.mxu0 %v1996_v13  ;;  %3015 = vmatpush3.bf16.msra.mxu1 %v3558_v62  ;;  %v3559_v13 = vld [vmem:[%s3918_s5 + $0x78] sm:$0xff]  }
 0x1f8   :  { %2428 = vmatmul.mubr.bf16.vlgmr.msra.gmra.mrb[4].mxu0 %v1995_v15  ;;  %3016 = vmatprep.subr.bf16.mxu1 %v3559_v13  ;;  %v2063_v15 = vld [vmem:[#allocation7] sm:$0x3] }
 0x1f9   :  { %2437 = vmatpush1.bf16.msra.mxu0 %v3497_v14  ;;  %v3560_v14 = vld [vmem:[%s3918_s5 + $0x38] sm:$0xff]   ;;  %v2072_v18 = vrot.slane %v2063_v15, %v369_v63 }
 0x1fa   :  { %2438 = vmatprep.subr.bf16.mxu0 %v3502_v17  ;;  %v2068_v17 = vrot.slane %v2063_v15, %v365_v61 }
 0x1fb   :  { %3017 = vmatpush3.bf16.msra.mxu1 %v3560_v14 }
 0x1fd   :  { %2439 = vmatpush1.bf16.msra.mxu0 %v3500_v21 }
 0x1fe   :  { %2440 = vmatprep.subr.bf16.mxu0 %v3505_v22 }
 0x201   :  { %2441 = vmatpush1.bf16.msra.mxu0 %v3503_v27 }
 0x202   :  { %2442 = vmatprep.subr.bf16.mxu0 %v3508_v28 }
 0x205   :  { %2443 = vmatpush1.bf16.msra.mxu0 %v3506_v30 }
 0x206   :  { %2444 = vmatprep.subr.bf16.mxu0 %v3511_v31  ;;  %v2985_v31 = vld [vmem:[#allocation9] ss:$0 sm:$0xff] }
 0x209   :  { %2445 = vmatpush1.bf16.msra.mxu0 %v3509_v33 }
 0x20a   :  { %2446 = vmatprep.subr.bf16.mxu0 %v3514_v24 }
 0x20d   :  { %2447 = vmatpush1.bf16.msra.mxu0 %v3512_v35 }
 0x20e   :  { %2448 = vmatprep.subr.bf16.mxu0 %v3517_v52 }
 0x211   :  { %2449 = vmatpush1.bf16.msra.mxu0 %v3515_v37 }
 0x212   :  { %2450 = vmatprep.subr.bf16.mxu0 %v3520_v38 }
 0x215   :  { %2451 = vmatpush1.bf16.msra.mxu0 %v3518_v39 }
 0x216   :  { %2452 = vmatprep.subr.bf16.mxu0 %v3523_v40 }
 0x219   :  { %2453 = vmatpush1.bf16.msra.mxu0 %v3521_v41 }
 0x21a   :  { %2454 = vmatprep.subr.bf16.mxu0 %v3526_v42 }
 0x21d   :  { %2455 = vmatpush1.bf16.msra.mxu0 %v3524_v43 }
 0x21e   :  { %2456 = vmatprep.subr.bf16.mxu0 %v3529_v44 }
 0x221   :  { %2457 = vmatpush1.bf16.msra.mxu0 %v3527_v45 }
 0x222   :  { %2458 = vmatprep.subr.bf16.mxu0 %v3532_v46 }
 0x225   :  { %2459 = vmatpush1.bf16.msra.mxu0 %v3530_v47 }
 0x226   :  { %2460 = vmatprep.subr.bf16.mxu0 %v3535_v48 }
 0x229   :  { %2461 = vmatpush1.bf16.msra.mxu0 %v3533_v49 }
 0x22a   :  { %2462 = vmatprep.subr.bf16.mxu0 %v3538_v50 }
 0x22d   :  { %2463 = vmatpush1.bf16.msra.mxu0 %v3536_v51 }
 0x22e   :  { %2464 = vmatprep.subr.bf16.mxu0 %v3541_v53 }
 0x231   :  { %2465 = vmatpush1.bf16.msra.mxu0 %v3539_v54 }
 0x232   :  { %2466 = vmatprep.subr.bf16.mxu0 %v3544_v55 }
 0x235   :  { %2467 = vmatpush1.bf16.msra.mxu0 %v3542_v56 }
 0x26e   :  { %v1984_v1 = vpop.f32.mrb[4].mxu1 }
 0x26f   :  { %v3028_v2 = vadd.f32 %v1984_v1, %v374_v59  ;;  %v1986_v3 = vpop.f32.mrb[5].mxu1 }
 0x270   :  { %v3029_v23 = vadd.f32 %v1986_v3, %v378_v0  ;;  %v1988_v4 = vpop.f32.mrb[6].mxu1 }
 0x271   :  { %v1993_v5 = vmax.f32 %v3028_v2, 0.0  ;;  %v1989_v6 = vpop.f32.mrb[7].mxu1 }
 0x272   :  { %v1994_v7 = vmax.f32 %v3029_v23, 0.0 }
 0x273   :  { %v1997_v10 = vpack.c.bf16 %v1993_v5, %v1993_v5 }
 0x274   :  { %v1998_v9 = vpack.c.bf16 %v1994_v7, %v1994_v7 }
 0x276   :  { %2468 = vmatprep.mubr.bf16.mxu0 %v1998_v9 }
 0x277   :  { %2469 = vmatmul.mubr.bf16.vlgmr.msra.gmra.mrb[4].mxu0 %v1997_v10 }
 0x34a   :  { %v2470_v19 = vpop.f32.mrb[4].mxu0 }
 0x34b   :  { %v3030_v20 = vadd.f32 %v2470_v19, %v2068_v17  ;;  %v2472_v21 = vpop.f32.mrb[5].mxu0 }
 0x34c   :  { %v3031_v22 = vadd.f32 %v2472_v21, %v2072_v18  ;;  %v2474_v25 = vpop.f32.mrb[6].mxu0 }
 0x34d   :  { %v2477_v26 = vmax.f32 %v3030_v20, 0.0  ;;  %v2475_v27 = vpop.f32.mrb[7].mxu0 }
 0x34e   :  { %v2478_v28 = vmax.f32 %v3031_v22, 0.0 }
 0x34f   :  { %v2479_v8 = vpack.c.bf16 %v2477_v26, %v2477_v26 }
 0x350   :  { %v2480_v29 = vpack.c.bf16 %v2478_v28, %v2478_v28 }
 0x352   :  { %2648 = vmatprep.mubr.bf16.mxu1 %v2480_v29 }
 0x353   :  { %2649 = vmatmul.mubr.bf16.vlgmr.msra.gmra.mrb[8].mxu1 %v2479_v8 }
 0x426   :  { %v3018_v30 = vpop.f32.mrb[8].mxu1 }
 0x427   :  { %v3019_v16 = vpop.f32.mrb[9].mxu1 }
 0x428   :  { %v3020_v32 = vadd.f32 %v3019_v16, %v3018_v30  ;;  %v3021_v61 = vpop.f32.mrb[10].mxu1 }
 0x429   :  { %v3022_v60 = vpop.f32.mrb[11].mxu1 }
 0x42a   :  { %v2651_v63 = vadd.f32 %v3020_v32, %v2985_v31 }
 0x42c   :  { %2657 = vst.msk [vmem:[%s3920_s7] sm:$0xff] %vm2656_vm0, %v2651_v63 }
 0x42d   :  { %2662 = vsyncpa [#allocation3], 1 }
 0x42e   :  { %2663 = vsyncpa [#allocation5], 1 }
 0x42f   :  { %2664 = vsyncpa [#allocation8], 1 }

// kernel: pointnet_forward.10
= control target key start
LH: loop header
LB: loop body
LE: loop exit
PB: predicated region body
PF: predicated region fallthrough
CT: control target
= control target key end

     0   :  { %s1811_s24 = smov 0   ;;  %s1813_s25 = smov 0   ;;  %s2129_s0 = inlined_call_operand.vmem [shape: bf16[2,64,8], index: 0, kind: input, shape index: {}]   ;;  %s2130_s1 = inlined_call_operand.vmem [shape: bf16[2,8,64], index: 1, kind: input, shape index: {}]   ;;  %s2131_s2 = inlined_call_operand.vmem [shape: f32[1,64], index: 2, kind: input, shape index: {}]   ;;  %s2132_s3 = inlined_call_operand.vmem [shape: bf16[2,64,128], index: 3, kind: input, shape index: {}]   ;;  %s2133_s4 = inlined_call_operand.vmem [shape: f32[1,128], index: 4, kind: input, shape index: {}]   ;;  %s2134_s5 = inlined_call_operand.vmem [shape: bf16[128,1024], index: 5, kind: input, shape index: {}]   ;;  %s2135_s6 = inlined_call_operand.vmem [shape: f32[1,1024], index: 6, kind: input, shape index: {}]   ;;  %s2136_s7 = inlined_call_operand.vmem [shape: f32[2,1,1024], index: 7, kind: output, shape index: {}]  }
   0x1   :  { %s1815_s26 = smov 0  }
   0x2 LB: > { %s36_s27 = sadd.s32 1, %s1763_s25  ;;  %p1577_p0 = scmp.ge.s32.totalorder %s1767_s26, 1  ;;  %s1767_s26 = sphi %s1815_s26, %s17_s26   ;;  %s1763_s25 = sphi %s1813_s25, %s2138_s25   ;;  %s1759_s24 = sphi %s1811_s24, %s2137_s24  }
   0x3   : > { %p38_p1 = scmp.ge.s32.totalorder %s36_s27, 2  ;;  %p288_p2 = scmp.lt.s32.totalorder %s1767_s26, 3 }
   0x5   : > { %s2140_s27 = smov (%p38_p1, %s36_s27), 0  ;;  %p289_p3 = pnand %p1577_p0, %p288_p2 }
   0x6   : > { %p336_p4 = scmp.lt.s32.totalorder (!%p289_p3), %s1759_s24, 1  ;;  %vm416_vm0 = vcmask (!%p289_p3), 1043456   ;;  %vm403_vm1 = vcmask (!%p289_p3), 64512   ;;  %v626_v10 = vld [vmem:[%s2134_s5] sm:$0xff] (!%p289_p3)  ;;  %v1855_v12 = vld [vmem:[%s2134_s5 + $0x8] sm:$0xff] (!%p289_p3)  ;;  %vm536_vm2 = vcmask (!%p289_p3), 523264  }
   0x7   : > { %292 = sbr.rel (%p289_p3) target bundleno = 765 (0x2fd), region = 48  ;;  %v630_v11 = vld [vmem:[%s2134_s5 + $0x20] sm:$0xff] (!%p289_p3)  ;;  %v1860_v15 = vld [vmem:[%s2134_s5 + $0x28] sm:$0xff] (!%p289_p3) }
   0x8   : > { %v1602_v13 = vcombine.low (!%p289_p3), %v626_v10, %v630_v11  ;;  %v1603_v14 = vcombine.high (!%p289_p3), %v626_v10, %v630_v11  ;;  %v634_v16 = vld [vmem:[%s2134_s5 + $0x40] sm:$0xff] (!%p289_p3)  ;;  %v1604_v18 = vcombine.low (!%p289_p3), %v1855_v12, %v1860_v15  ;;  %v1605_v19 = vcombine.high (!%p289_p3), %v1855_v12, %v1860_v15  ;;  %v635_v51 = vld [vmem:[%s2134_s5 + $0x48] sm:$0xff] (!%p289_p3) }
   0x9   : > { %v638_v17 = vld [vmem:[%s2134_s5 + $0x60] sm:$0xff] (!%p289_p3)  ;;  %v639_v52 = vld [vmem:[%s2134_s5 + $0x68] sm:$0xff] (!%p289_p3) }
   0xa   : > { %v1611_v20 = vcombine.high (!%p289_p3), %v634_v16, %v638_v17  ;;  %v642_v21 = vld [vmem:[%s2134_s5 + $0x80] sm:$0xff] (!%p289_p3)  ;;  %v1610_v23 = vcombine.low (!%p289_p3), %v634_v16, %v638_v17  ;;  %v1613_v58 = vcombine.high (!%p289_p3), %v635_v51, %v639_v52  ;;  %v643_v61 = vld [vmem:[%s2134_s5 + $0x88] sm:$0xff] (!%p289_p3) }
   0xb   : > { %v646_v22 = vld [vmem:[%s2134_s5 + $0xa0] sm:$0xff] (!%p289_p3)  ;;  %v647_v62 = vld [vmem:[%s2134_s5 + $0xa8] sm:$0xff] (!%p289_p3) }
   0xc   : > { %v1619_v24 = vcombine.high (!%p289_p3), %v642_v21, %v646_v22  ;;  %v650_v25 = vld [vmem:[%s2134_s5 + $0xc0] sm:$0xff] (!%p289_p3)  ;;  %v1618_v27 = vcombine.low (!%p289_p3), %v642_v21, %v646_v22  ;;  %v663_v15 = vld [vmem:[%s2134_s5 + $0x128] sm:$0xff] (!%p289_p3) }
   0xd   : > { %v654_v26 = vld [vmem:[%s2134_s5 + $0xe0] sm:$0xff] (!%p289_p3) }
   0xe   : > { %s2142_s24 = smov (!%p336_p4, %s1759_s24), 1  ;;  %v1627_v28 = vcombine.high %v650_v25, %v654_v26  ;;  %v658_v29 = vld [vmem:[%s2134_s5 + $0x100] sm:$0xff]  ;;  %v1626_v31 = vcombine.low %v650_v25, %v654_v26  ;;  %v675_v25 = vld [vmem:[%s2134_s5 + $0x188] sm:$0xff] }
   0xf   : > { %s1668_s28 = sshll.u32 %s2142_s24, 5  ;;  %s1580_s29 = sshll.u32 %s2142_s24, 2  ;;  %v662_v30 = vld [vmem:[%s2134_s5 + $0x120] sm:$0xff] }
  0x10   : > { %s343_s9 = scalar_lea.vmem %s2129_s0, %s1668_s28  ;;  %s349_s12 = scalar_lea.vmem %s2130_s1, %s1580_s29  ;;  %v1635_v32 = vcombine.high %v658_v29, %v662_v30  ;;  %v666_v33 = vld [vmem:[%s2134_s5 + $0x140] sm:$0xff]  ;;  %v1634_v35 = vcombine.low %v658_v29, %v662_v30 }
  0x11   : > { %v375_v0 = vld [vmem:[%s349_s12] sm:$0xf]  ;;  %v1738_v3 = vld [vmem:[%s343_s9 + $0x8] sm:$0xff]   ;;  %s354_s15 = scalar_lea.vmem %s2132_s3, %s1668_s28  ;;  %v1739_v4 = vld [vmem:[%s343_s9 + $0x10] sm:$0xff]   ;;  %s1583_s17 = sshll.u32 %s2142_s24, 3 }
  0x12   : > { %v1737_v1 = vld [vmem:[%s343_s9] sm:$0xff]   ;;  %1709 = vmatprep.subr.msk.bf16.mxu0 %vm416_vm0, %v375_v0  ;;  %v418_v2 = vsel %vm416_vm0, %v375_v0, 0  ;;  %v1742_v6 = vld [vmem:[%s354_s15 + $0x8] sm:$0xff]   ;;  %v1740_v7 = vld [vmem:[%s343_s9 + $0x18] sm:$0xff]   ;;  %s359_s20 = scalar_lea.vmem %s2136_s7, %s1583_s17 }
  0x13   : > { %1684 = vmatpush3.bf16.msra.mxu0 %v418_v2  ;;  %1685 = vmatprep.mubr.msk.bf16.mxu0 %vm403_vm1, %v1737_v1  ;;  %v1741_v5 = vld [vmem:[%s354_s15] sm:$0xff]   ;;  %v1743_v8 = vld [vmem:[%s354_s15 + $0x10] sm:$0xff]   ;;  %v1744_v9 = vld [vmem:[%s354_s15 + $0x18] sm:$0xff]  }
  0x14   : > { %1693 = vmatprep.subr.bf16.mxu1 %v1741_v5  ;;  %1010 = vmatprep.subr.bf16.mxu0 %v1603_v14  ;;  %v670_v34 = vld [vmem:[%s2134_s5 + $0x160] sm:$0xff]  ;;  %v659_v14 = vld [vmem:[%s2134_s5 + $0x108] sm:$0xff] }
  0x15   : > { %1694 = vmatpush3.bf16.msra.mxu1 %v1741_v5  ;;  %v1643_v36 = vcombine.high %v666_v33, %v670_v34  ;;  %v1642_v37 = vcombine.low %v666_v33, %v670_v34  ;;  %v1584_v38 = vld [vmem:[%s2131_s2] ss:$0 sm:$0xff]  ;;  %v1637_v17 = vcombine.high %v659_v14, %v663_v15  ;;  %v683_v33 = vld [vmem:[%s2134_s5 + $0x1c8] sm:$0xff] }
  0x16   : > { %1686 = vmatmul.mubr.msk.bf16.vlgmr.msra.gmra.mrb[0].mxu0 %vm403_vm1, %v1738_v3  ;;  %1695 = vmatprep.subr.bf16.mxu1 %v1742_v6 }
  0x17   : > { %1689 = vmatprep.mubr.msk.bf16.mxu0 %vm403_vm1, %v1739_v4  ;;  %1011 = vmatpush1.bf16.msra.mxu0 %v1602_v13  ;;  %v1612_v4 = vcombine.low %v635_v51, %v639_v52  ;;  %v1620_v13 = vcombine.low %v643_v61, %v647_v62 }
  0x18   : > { %1012 = vmatprep.subr.bf16.mxu0 %v1611_v20  ;;  %v1636_v20 = vcombine.low %v659_v14, %v663_v15 }
  0x19   : > { %1696 = vmatpush3.bf16.msra.mxu1 %v1742_v6  ;;  %v1621_v6 = vcombine.high %v643_v61, %v647_v62  ;;  %v637_v61 = vld [vmem:[%s2134_s5 + $0x58] sm:$0xff] }
  0x1a   : > { %1697 = vmatprep.subr.bf16.mxu1 %v1743_v8  ;;  %v641_v62 = vld [vmem:[%s2134_s5 + $0x78] sm:$0xff] }
  0x1b   : > { %1013 = vmatpush1.bf16.msra.mxu0 %v1610_v23  ;;  %v674_v23 = vld [vmem:[%s2134_s5 + $0x180] sm:$0xff] }
  0x1c   : > { %1014 = vmatprep.subr.bf16.mxu0 %v1619_v24  ;;  %v678_v24 = vld [vmem:[%s2134_s5 + $0x1a0] sm:$0xff] }
  0x1d   : > { %1698 = vmatpush3.bf16.msra.mxu1 %v1743_v8  ;;  %v651_v8 = vld [vmem:[%s2134_s5 + $0xc8] sm:$0xff]  ;;  %v1651_v26 = vcombine.high %v674_v23, %v678_v24 }
  0x1e   : > { %1690 = vmatmul.mubr.msk.bf16.gmra.mrb[4].mxu0 %vm403_vm1, %v1740_v7  ;;  %1699 = vmatprep.subr.bf16.mxu1 %v1744_v9 }
  0x1f   : > { %1015 = vmatpush1.bf16.msra.mxu0 %v1618_v27  ;;  %v679_v27 = vld [vmem:[%s2134_s5 + $0x1a8] sm:$0xff] }
  0x20   : > { %1016 = vmatprep.subr.bf16.mxu0 %v1627_v28  ;;  %v1650_v28 = vcombine.low %v674_v23, %v678_v24  ;;  %v1652_v29 = vcombine.low %v675_v25, %v679_v27  ;;  %v1653_v30 = vcombine.high %v675_v25, %v679_v27  ;;  %v652_v23 = vld [vmem:[%s2134_s5 + $0xd0] sm:$0xff]  ;;  %v657_v27 = vld [vmem:[%s2134_s5 + $0xf8] sm:$0xff] }
  0x21   : > { %1700 = vmatpush3.bf16.msra.mxu1 %v1744_v9  ;;  %v655_v9 = vld [vmem:[%s2134_s5 + $0xe8] sm:$0xff]  ;;  %v656_v25 = vld [vmem:[%s2134_s5 + $0xf0] sm:$0xff] }
  0x22   : > { %1083 = vmatprep.subr.bf16.mxu1 %v1605_v19  ;;  %v1629_v12 = vcombine.high %v651_v8, %v655_v9  ;;  %v1628_v16 = vcombine.low %v651_v8, %v655_v9  ;;  %v671_v19 = vld [vmem:[%s2134_s5 + $0x168] sm:$0xff]  ;;  %v648_v9 = vld [vmem:[%s2134_s5 + $0xb0] sm:$0xff] }
  0x23   : > { %1017 = vmatpush1.bf16.msra.mxu0 %v1626_v31  ;;  %v682_v31 = vld [vmem:[%s2134_s5 + $0x1c0] sm:$0xff] }
  0x24   : > { %1018 = vmatprep.subr.bf16.mxu0 %v1635_v32  ;;  %v686_v32 = vld [vmem:[%s2134_s5 + $0x1e0] sm:$0xff] }
  0x25   : > { %v1659_v34 = vcombine.high %v682_v31, %v686_v32 }
  0x27   : > { %1019 = vmatpush1.bf16.msra.mxu0 %v1634_v35  ;;  %v687_v35 = vld [vmem:[%s2134_s5 + $0x1e8] sm:$0xff] }
  0x28   : > { %1020 = vmatprep.subr.bf16.mxu0 %v1643_v36  ;;  %v1658_v36 = vcombine.low %v682_v31, %v686_v32 }
  0x2b   : > { %1021 = vmatpush1.bf16.msra.mxu0 %v1642_v37  ;;  %v1660_v37 = vcombine.low %v683_v33, %v687_v35 }
  0x2c   : > { %1022 = vmatprep.subr.bf16.mxu0 %v1651_v26  ;;  %v653_v26 = vld [vmem:[%s2134_s5 + $0xd8] sm:$0xff] }
  0x2f   : > { %1023 = vmatpush1.bf16.msra.mxu0 %v1650_v28 }
  0x30   : > { %1024 = vmatprep.subr.bf16.mxu0 %v1659_v34  ;;  %v1633_v34 = vcombine.high %v653_v26, %v657_v27 }
  0x33   : > { %1025 = vmatpush1.bf16.msra.mxu0 %v1658_v36  ;;  %v664_v36 = vld [vmem:[%s2134_s5 + $0x130] sm:$0xff] }
  0xe9   : > { %v1687_v39 = vpop.f32.mrb[0].mxu0 }
  0xea   : > { %v463_v40 = vadd.f32 %v1687_v39, %v1584_v38  ;;  %v454_v41 = vpop.f32.mrb[1].mxu0  ;;  %v628_v39 = vld [vmem:[%s2134_s5 + $0x10] sm:$0xff] }
  0xeb   : > { %v455_v42 = vadd.f32 %v1584_v38, %v454_v41  ;;  %v1688_v43 = vpop.f32.mrb[2].mxu0  ;;  %v629_v41 = vld [vmem:[%s2134_s5 + $0x18] sm:$0xff] }
  0xec   : > { %v466_v44 = vadd.f32 %v1688_v43, %v1584_v38  ;;  %v457_v45 = vpop.f32.mrb[3].mxu0  ;;  %v487_v47 = vmax.f32 %v463_v40, 0.0  ;;  %v632_v40 = vld [vmem:[%s2134_s5 + $0x30] sm:$0xff]  ;;  %v633_v43 = vld [vmem:[%s2134_s5 + $0x38] sm:$0xff] }
  0xed   : > { %v458_v46 = vadd.f32 %v1584_v38, %v457_v45  ;;  %v485_v49 = vmax.f32 %v455_v42, 0.0  ;;  %v1607_v42 = vcombine.high %v628_v39, %v632_v40  ;;  %v1606_v45 = vcombine.low %v628_v39, %v632_v40 }
  0xee   : > { %v488_v48 = vmax.f32 %v466_v44, 0.0  ;;  %v1769_v44 = vmov 0   ;;  %v1630_v39 = vcombine.low %v652_v23, %v656_v25  ;;  %v1632_v40 = vcombine.low %v653_v26, %v657_v27 }
  0xef   : > { %v486_v50 = vmax.f32 %v458_v46, 0.0  ;;  %1042 = vmatprep.mubr.bf16.mxu0 %v1769_v44  ;;  %v1608_v46 = vcombine.low %v629_v41, %v633_v43  ;;  %1156 = vmatprep.subr.bf16.mxu0 %v1607_v42 }
  0xf0   : > { %v494_v53 = vpack.c.bf16 %v488_v48, %v487_v47  ;;  %v1609_v47 = vcombine.high %v629_v41, %v633_v43  ;;  %v1593_v48 = vld [vmem:[%s2133_s4] ss:$0 sm:$0xff]  ;;  %v668_v43 = vld [vmem:[%s2134_s5 + $0x150] sm:$0xff] }
  0xf1   : > { %v1691_v54 = vpop.f32.mrb[4].mxu0  ;;  %v493_v55 = vpack.c.bf16 %v486_v50, %v485_v49 }
  0xf2   : > { %v479_v56 = vadd.f32 %v1691_v54, %v1584_v38  ;;  %v470_v57 = vpop.f32.mrb[5].mxu0 }
  0xf3   : > { %v471_v59 = vadd.f32 %v1584_v38, %v470_v57  ;;  %1701 = vmatprep.mubr.msk.bf16.mxu1 %vm536_vm2, %v493_v55  ;;  %v1692_v60 = vpop.f32.mrb[6].mxu0  ;;  %v636_v57 = vld [vmem:[%s2134_s5 + $0x50] sm:$0xff] }
  0xf4   : > { %v491_v63 = vmax.f32 %v479_v56, 0.0  ;;  %v482_v0 = vadd.f32 %v1692_v60, %v1584_v38  ;;  %1702 = vmatmul.mubr.msk.bf16.vlgmr.msra.gmra.mrb[0].mxu1 %vm536_vm2, %v494_v53  ;;  %v473_v1 = vpop.f32.mrb[7].mxu0  ;;  %v640_v60 = vld [vmem:[%s2134_s5 + $0x70] sm:$0xff] }
  0xf5   : > { %v489_v2 = vmax.f32 %v471_v59, 0.0  ;;  %v474_v3 = vadd.f32 %v1584_v38, %v473_v1  ;;  %1084 = vmatpush1.bf16.msra.mxu1 %v1604_v18  ;;  %v667_v18 = vld [vmem:[%s2134_s5 + $0x148] sm:$0xff]  ;;  %v1661_v38 = vcombine.high %v683_v33, %v687_v35  ;;  %v1631_v33 = vcombine.high %v652_v23, %v656_v25  ;;  %v660_v35 = vld [vmem:[%s2134_s5 + $0x110] sm:$0xff] }
  0xf6   : > { %v492_v5 = vmax.f32 %v482_v0, 0.0  ;;  %1085 = vmatprep.subr.bf16.mxu1 %v1613_v58  ;;  %v1645_v21 = vcombine.high %v667_v18, %v671_v19  ;;  %v1644_v22 = vcombine.low %v667_v18, %v671_v19  ;;  %v1616_v18 = vcombine.low %v637_v61, %v641_v62 }
  0xf7   : > { %v490_v7 = vmax.f32 %v474_v3, 0.0  ;;  %v1639_v41 = vcombine.high %v660_v35, %v664_v36 }
  0xf8   : > { %v496_v10 = vpack.c.bf16 %v492_v5, %v491_v63  ;;  %v1617_v5 = vcombine.high %v637_v61, %v641_v62  ;;  %v688_v61 = vld [vmem:[%s2134_s5 + $0x1f0] sm:$0xff]  ;;  %v685_v62 = vld [vmem:[%s2134_s5 + $0x1d8] sm:$0xff] }
  0xf9   : > { %v495_v11 = vpack.c.bf16 %v490_v7, %v489_v2  ;;  %1086 = vmatpush1.bf16.msra.mxu1 %v1612_v4  ;;  %v1615_v4 = vcombine.high %v636_v57, %v640_v60 }
  0xfa   : > { %1087 = vmatprep.subr.bf16.mxu1 %v1621_v6  ;;  %v644_v6 = vld [vmem:[%s2134_s5 + $0x90] sm:$0xff] }
  0xfb   : > { %1705 = vmatprep.mubr.msk.bf16.mxu1 %vm536_vm2, %v495_v11  ;;  %v649_v11 = vld [vmem:[%s2134_s5 + $0xb8] sm:$0xff] }
  0xfc   : > { %1706 = vmatmul.mubr.msk.bf16.gmra.mrb[4].mxu1 %vm536_vm2, %v496_v10  ;;  %v645_v10 = vld [vmem:[%s2134_s5 + $0x98] sm:$0xff] }
  0xfd   : > { %1088 = vmatpush1.bf16.msra.mxu1 %v1620_v13  ;;  %1115 = vmatprep.mubr.bf16.mxu1 %v1769_v44  ;;  %v1624_v31 = vcombine.low %v645_v10, %v649_v11 }
  0xfe   : > { %1089 = vmatprep.subr.bf16.mxu1 %v1629_v12 }
 0x101   : > { %1090 = vmatpush1.bf16.msra.mxu1 %v1628_v16 }
 0x102   : > { %1091 = vmatprep.subr.bf16.mxu1 %v1637_v17  ;;  %v1614_v17 = vcombine.low %v636_v57, %v640_v60  ;;  %v684_v60 = vld [vmem:[%s2134_s5 + $0x1d0] sm:$0xff] }
 0x105   : > { %1092 = vmatpush1.bf16.msra.mxu1 %v1636_v20 }
 0x106   : > { %1093 = vmatprep.subr.bf16.mxu1 %v1645_v21  ;;  %v1623_v21 = vcombine.high %v644_v6, %v648_v9 }
 0x109   : > { %1094 = vmatpush1.bf16.msra.mxu1 %v1644_v22  ;;  %v1625_v22 = vcombine.high %v645_v10, %v649_v11 }
 0x10a   : > { %1095 = vmatprep.subr.bf16.mxu1 %v1653_v30  ;;  %v1622_v30 = vcombine.low %v644_v6, %v648_v9  ;;  %v1662_v6 = vcombine.low %v684_v60, %v688_v61 }
 0x10d   : > { %1096 = vmatpush1.bf16.msra.mxu1 %v1652_v29 }
 0x10e   : > { %1097 = vmatprep.subr.bf16.mxu1 %v1661_v38  ;;  %v665_v38 = vld [vmem:[%s2134_s5 + $0x138] sm:$0xff] }
 0x111   : > { %1098 = vmatpush1.bf16.msra.mxu1 %v1660_v37  ;;  %v661_v37 = vld [vmem:[%s2134_s5 + $0x118] sm:$0xff] }
 0x112   : > { %1229 = vmatprep.subr.bf16.mxu1 %v1609_v47  ;;  %v1641_v42 = vcombine.high %v661_v37, %v665_v38  ;;  %v673_v47 = vld [vmem:[%s2134_s5 + $0x178] sm:$0xff] }
 0x1c7   : > { %v1703_v49 = vpop.f32.mrb[0].mxu1 }
 0x1c8   : > { %v592_v50 = vadd.f32 %v1703_v49, %v1593_v48  ;;  %v583_v51 = vpop.f32.mrb[1].mxu1  ;;  %v1640_v49 = vcombine.low %v661_v37, %v665_v38 }
 0x1c9   : > { %v584_v52 = vadd.f32 %v1593_v48, %v583_v51  ;;  %v1704_v53 = vpop.f32.mrb[2].mxu1 }
 0x1ca   : > { %v595_v54 = vadd.f32 %v1704_v53, %v1593_v48  ;;  %v586_v55 = vpop.f32.mrb[3].mxu1  ;;  %v616_v58 = vmax.f32 %v592_v50, 0.0  ;;  %v680_v53 = vld [vmem:[%s2134_s5 + $0x1b0] sm:$0xff] }
 0x1cb   : > { %v587_v56 = vadd.f32 %v1593_v48, %v586_v55  ;;  %v614_v63 = vmax.f32 %v584_v52, 0.0  ;;  %v676_v52 = vld [vmem:[%s2134_s5 + $0x190] sm:$0xff]  ;;  %v681_v55 = vld [vmem:[%s2134_s5 + $0x1b8] sm:$0xff] }
 0x1cc   : > { %v617_v59 = vmax.f32 %v595_v54, 0.0  ;;  %v677_v54 = vld [vmem:[%s2134_s5 + $0x198] sm:$0xff] }
 0x1cd   : > { %v615_v0 = vmax.f32 %v587_v56, 0.0 }
 0x1ce   : > { %v1989_v1 = vpack.c.bf16 %v617_v59, %v616_v58  ;;  %v1655_v58 = vcombine.high %v676_v52, %v680_v53  ;;  %v1657_v59 = vcombine.high %v677_v54, %v681_v55 }
 0x1cf   : > { %v1991_v2 = vpack.c.bf16 %v615_v0, %v614_v63  ;;  %v1707_v3 = vpop.f32.mrb[4].mxu1  ;;  %v689_v63 = vld [vmem:[%s2134_s5 + $0x1f8] sm:$0xff]  ;;  %v1654_v0 = vcombine.low %v676_v52, %v680_v53 }
 0x1d0   : > { %v608_v7 = vadd.f32 %v1707_v3, %v1593_v48  ;;  %v599_v8 = vpop.f32.mrb[5].mxu1  ;;  %v1656_v3 = vcombine.low %v677_v54, %v681_v55 }
 0x1d1   : > { %v600_v13 = vadd.f32 %v1593_v48, %v599_v8  ;;  %1043 = vmatmul.mubr.bf16.vlgmr.msra.gmra.mrb[8].mxu0 %v1991_v2  ;;  %1116 = vmatmul.mubr.bf16.vlgmr.msra.gmra.mrb[8].mxu1 %v1991_v2  ;;  %v1708_v12 = vpop.f32.mrb[6].mxu1 }
 0x1d2   : > { %v620_v14 = vmax.f32 %v608_v7, 0.0  ;;  %1157 = vmatpush1.bf16.msra.mxu0 %v1606_v45  ;;  %1230 = vmatpush1.bf16.msra.mxu1 %v1608_v46  ;;  %v611_v15 = vadd.f32 %v1708_v12, %v1593_v48  ;;  %v602_v16 = vpop.f32.mrb[7].mxu1  ;;  %v672_v45 = vld [vmem:[%s2134_s5 + $0x170] sm:$0xff]  ;;  %v669_v46 = vld [vmem:[%s2134_s5 + $0x158] sm:$0xff]  ;;  %v1664_v7 = vcombine.low %v685_v62, %v689_v63 }
 0x1d3   : > { %v618_v19 = vmax.f32 %v600_v13, 0.0  ;;  %v603_v20 = vadd.f32 %v1593_v48, %v602_v16  ;;  %1158 = vmatprep.subr.bf16.mxu0 %v1615_v4  ;;  %1231 = vmatprep.subr.bf16.mxu1 %v1617_v5  ;;  %v1638_v48 = vcombine.low %v660_v35, %v664_v36  ;;  %v1647_v50 = vcombine.high %v668_v43, %v672_v45 }
 0x1d4   : > { %v621_v24 = vmax.f32 %v611_v15, 0.0  ;;  %1052 = vmatprep.mubr.bf16.mxu0 %v1769_v44  ;;  %1125 = vmatprep.mubr.bf16.mxu1 %v1769_v44  ;;  %v1649_v51 = vcombine.high %v669_v46, %v673_v47  ;;  %v1646_v56 = vcombine.low %v668_v43, %v672_v45  ;;  %v1648_v57 = vcombine.low %v669_v46, %v673_v47 }
 0x1d5   : > { %v619_v28 = vmax.f32 %v603_v20, 0.0  ;;  %v1663_v4 = vcombine.high %v684_v60, %v688_v61  ;;  %v1665_v5 = vcombine.high %v685_v62, %v689_v63 }
 0x1d6   : > { %v2021_v29 = vpack.c.bf16 %v621_v24, %v620_v14  ;;  %1159 = vmatpush1.bf16.msra.mxu0 %v1614_v17  ;;  %1232 = vmatpush1.bf16.msra.mxu1 %v1616_v18 }
 0x1d7   : > { %v2023_v32 = vpack.c.bf16 %v619_v28, %v618_v19  ;;  %1160 = vmatprep.subr.bf16.mxu0 %v1623_v21  ;;  %1233 = vmatprep.subr.bf16.mxu1 %v1625_v22 }
 0x1d9   : > { %1053 = vmatmul.mubr.bf16.gmra.mrb[12].mxu0 %v1989_v1  ;;  %1126 = vmatmul.mubr.bf16.gmra.mrb[12].mxu1 %v1989_v1 }
 0x1da   : > { %1161 = vmatpush1.bf16.msra.mxu0 %v1622_v30  ;;  %1234 = vmatpush1.bf16.msra.mxu1 %v1624_v31 }
 0x1db   : > { %1162 = vmatprep.subr.bf16.mxu0 %v1631_v33  ;;  %1235 = vmatprep.subr.bf16.mxu1 %v1633_v34 }
 0x1dc   : > { %1062 = vmatprep.mubr.bf16.mxu0 %v1769_v44  ;;  %1135 = vmatprep.mubr.bf16.mxu1 %v1769_v44 }
 0x1de   : > { %1163 = vmatpush1.bf16.msra.mxu0 %v1630_v39  ;;  %1236 = vmatpush1.bf16.msra.mxu1 %v1632_v40 }
 0x1df   : > { %1164 = vmatprep.subr.bf16.mxu0 %v1639_v41  ;;  %1237 = vmatprep.subr.bf16.mxu1 %v1641_v42 }
 0x1e1   : > { %1063 = vmatmul.mubr.bf16.gmra.mrb[16].mxu0 %v2023_v32  ;;  %1136 = vmatmul.mubr.bf16.gmra.mrb[16].mxu1 %v2023_v32 }
 0x1e2   : > { %1165 = vmatpush1.bf16.msra.mxu0 %v1638_v48  ;;  %1238 = vmatpush1.bf16.msra.mxu1 %v1640_v49 }
 0x1e3   : > { %1166 = vmatprep.subr.bf16.mxu0 %v1647_v50  ;;  %1239 = vmatprep.subr.bf16.mxu1 %v1649_v51 }
 0x1e4   : > { %1072 = vmatprep.mubr.bf16.mxu0 %v1769_v44  ;;  %1145 = vmatprep.mubr.bf16.mxu1 %v1769_v44 }
 0x1e6   : > { %1167 = vmatpush1.bf16.msra.mxu0 %v1646_v56  ;;  %1240 = vmatpush1.bf16.msra.mxu1 %v1648_v57 }
 0x1e7   : > { %1168 = vmatprep.subr.bf16.mxu0 %v1655_v58  ;;  %1241 = vmatprep.subr.bf16.mxu1 %v1657_v59 }
 0x1e9   : > { %1073 = vmatmul.mubr.bf16.gmra.mrb[20].mxu0 %v2021_v29  ;;  %1146 = vmatmul.mubr.bf16.gmra.mrb[20].mxu1 %v2021_v29 }
 0x1ea   : > { %1169 = vmatpush1.bf16.msra.mxu0 %v1654_v0  ;;  %1242 = vmatpush1.bf16.msra.mxu1 %v1656_v3 }
 0x1eb   : > { %1170 = vmatprep.subr.bf16.mxu0 %v1663_v4  ;;  %1243 = vmatprep.subr.bf16.mxu1 %v1665_v5 }
 0x1ec   : > { %1188 = vmatprep.mubr.bf16.mxu0 %v1769_v44  ;;  %1261 = vmatprep.mubr.bf16.mxu1 %v1769_v44 }
 0x1ee   : > { %1171 = vmatpush1.bf16.msra.mxu0 %v1662_v6  ;;  %1244 = vmatpush1.bf16.msra.mxu1 %v1664_v7  ;;  %v1770_v7 = vmov 1966171168  }
 0x1f1   : > { %1189 = vmatmul.mubr.bf16.vlgmr.msra.gmra.mrb[24].mxu0 %v1991_v2  ;;  %1262 = vmatmul.mubr.bf16.vlgmr.msra.gmra.mrb[24].mxu1 %v1991_v2 }
 0x1f2   : > { %1198 = vmatprep.mubr.bf16.mxu0 %v1769_v44  ;;  %1271 = vmatprep.mubr.bf16.mxu1 %v1769_v44 }
 0x1f9   : > { %1199 = vmatmul.mubr.bf16.gmra.mrb[28].mxu0 %v1989_v1  ;;  %1272 = vmatmul.mubr.bf16.gmra.mrb[28].mxu1 %v1989_v1 }
 0x1fa   : > { %1208 = vmatprep.mubr.bf16.mxu0 %v1769_v44  ;;  %1281 = vmatprep.mubr.bf16.mxu1 %v1769_v44 }
 0x201   : > { %1209 = vmatmul.mubr.bf16.gmra.mrb[32].mxu0 %v2023_v32  ;;  %1282 = vmatmul.mubr.bf16.gmra.mrb[32].mxu1 %v2023_v32 }
 0x202   : > { %1218 = vmatprep.mubr.bf16.mxu0 %v1769_v44  ;;  %1291 = vmatprep.mubr.bf16.mxu1 %v1769_v44 }
 0x209   : > { %1219 = vmatmul.mubr.bf16.gmra.mrb[36].mxu0 %v2021_v29  ;;  %1292 = vmatmul.mubr.bf16.gmra.mrb[36].mxu1 %v2021_v29 }
 0x2a4   : > { %v1044_v2 = vpop.f32.mrb[8].mxu0  ;;  %v1117_v8 = vpop.f32.mrb[8].mxu1 }
 0x2a5   : > { %v1046_v9 = vpop.f32.mrb[9].mxu0  ;;  %v1119_v1 = vpop.f32.mrb[9].mxu1 }
 0x2a6   : > { %v1048_v10 = vpop.f32.mrb[10].mxu0  ;;  %v1121_v11 = vpop.f32.mrb[10].mxu1 }
 0x2a7   : > { %v1303_v13 = vmax.f32 %v1044_v2, %v1048_v10  ;;  %v1329_v12 = vmax.f32 %v1117_v8, %v1121_v11  ;;  %v1050_v14 = vpop.f32.mrb[11].mxu0  ;;  %v1123_v15 = vpop.f32.mrb[11].mxu1  ;;  %v1420_v2 = vunpack.c.l.s4 %v1770_v7  ;;  %v1422_v8 = vlaneseq }
 0x2a8   : > { %v1316_v16 = vmax.f32 %v1046_v9, %v1050_v14  ;;  %v1342_v17 = vmax.f32 %v1119_v1, %v1123_v15 }
 0x2ac   : > { %v1054_v18 = vpop.f32.mrb[12].mxu0  ;;  %v1127_v19 = vpop.f32.mrb[12].mxu1 }
 0x2ad   : > { %v1304_v20 = vmax.f32 %v1303_v13, %v1054_v18  ;;  %v1330_v44 = vmax.f32 %v1329_v12, %v1127_v19  ;;  %v1056_v21 = vpop.f32.mrb[13].mxu0  ;;  %v1129_v22 = vpop.f32.mrb[13].mxu1 }
 0x2ae   : > { %v1317_v23 = vmax.f32 %v1316_v16, %v1056_v21  ;;  %v1343_v24 = vmax.f32 %v1342_v17, %v1129_v22  ;;  %v1058_v25 = vpop.f32.mrb[14].mxu0  ;;  %v1131_v26 = vpop.f32.mrb[14].mxu1 }
 0x2af   : > { %v1305_v27 = vmax.f32 %v1304_v20, %v1058_v25  ;;  %v1331_v28 = vmax.f32 %v1330_v44, %v1131_v26  ;;  %v1060_v29 = vpop.f32.mrb[15].mxu0  ;;  %v1133_v30 = vpop.f32.mrb[15].mxu1  ;;  %v1421_v20 = vunpack.c.0.s8 %v1420_v2  ;;  %v1423_v44 = vshrl.u32 %v1422_v8, 7 }
 0x2b0   : > { %v1318_v31 = vmax.f32 %v1317_v23, %v1060_v29  ;;  %v1344_v32 = vmax.f32 %v1343_v24, %v1133_v30 }
 0x2b4   : > { %v1064_v33 = vpop.f32.mrb[16].mxu0  ;;  %v1137_v34 = vpop.f32.mrb[16].mxu1 }
 0x2b5   : > { %v1306_v35 = vmax.f32 %v1305_v27, %v1064_v33  ;;  %v1332_v36 = vmax.f32 %v1331_v28, %v1137_v34  ;;  %v1066_v37 = vpop.f32.mrb[17].mxu0  ;;  %v1139_v38 = vpop.f32.mrb[17].mxu1 }
 0x2b6   : > { %v1319_v39 = vmax.f32 %v1318_v31, %v1066_v37  ;;  %v1345_v40 = vmax.f32 %v1344_v32, %v1139_v38  ;;  %v1068_v41 = vpop.f32.mrb[18].mxu0  ;;  %v1141_v42 = vpop.f32.mrb[18].mxu1 }
 0x2b7   : > { %v1307_v43 = vmax.f32 %v1306_v35, %v1068_v41  ;;  %v1333_v45 = vmax.f32 %v1332_v36, %v1141_v42  ;;  %v1070_v46 = vpop.f32.mrb[19].mxu0  ;;  %v1143_v47 = vpop.f32.mrb[19].mxu1  ;;  %v2099_v41 = vsub.s32 %v1421_v20, %v1423_v44 }
 0x2b8   : > { %v1320_v48 = vmax.f32 %v1319_v39, %v1070_v46  ;;  %v1346_v49 = vmax.f32 %v1345_v40, %v1143_v47 }
 0x2bc   : > { %v1074_v50 = vpop.f32.mrb[20].mxu0  ;;  %v1147_v51 = vpop.f32.mrb[20].mxu1 }
 0x2bd   : > { %v1308_v52 = vmax.f32 %v1307_v43, %v1074_v50  ;;  %v1334_v53 = vmax.f32 %v1333_v45, %v1147_v51  ;;  %v1076_v54 = vpop.f32.mrb[21].mxu0  ;;  %v1149_v55 = vpop.f32.mrb[21].mxu1 }
 0x2be   : > { %v1321_v56 = vmax.f32 %v1320_v48, %v1076_v54  ;;  %v1347_v57 = vmax.f32 %v1346_v49, %v1149_v55  ;;  %v1078_v58 = vpop.f32.mrb[22].mxu0  ;;  %v1151_v59 = vpop.f32.mrb[22].mxu1 }
 0x2bf   : > { %v1309_v60 = vmax.f32 %v1308_v52, %v1078_v58  ;;  %v1335_v61 = vmax.f32 %v1334_v53, %v1151_v59  ;;  %v1080_v62 = vpop.f32.mrb[23].mxu0  ;;  %v1153_v63 = vpop.f32.mrb[23].mxu1 }
 0x2c0   : > { %v1322_v0 = vmax.f32 %v1321_v56, %v1080_v62  ;;  %v1348_v3 = vmax.f32 %v1347_v57, %v1153_v63 }
 0x2c1   : > { %v1310_v4 = vrot.slane %v1309_v60, 4  ;;  %v1336_v5 = vrot.slane %v1335_v61, 4 }
 0x2c2   : > { %v1323_v6 = vrot.slane %v1322_v0, 4  ;;  %v1349_v9 = vrot.slane %v1348_v3, 4 }
 0x2c3   : > { %v1311_v1 = vmax.f32 %v1309_v60, %v1310_v4  ;;  %v1337_v10 = vmax.f32 %v1335_v61, %v1336_v5 }
 0x2c4   : > { %v1324_v11 = vmax.f32 %v1322_v0, %v1323_v6  ;;  %v1350_v13 = vmax.f32 %v1348_v3, %v1349_v9  ;;  %v1190_v12 = vpop.f32.mrb[24].mxu0  ;;  %v1263_v14 = vpop.f32.mrb[24].mxu1 }
 0x2c5   : > { %v1312_v15 = vrot.slane %v1311_v1, 2  ;;  %v1338_v16 = vrot.slane %v1337_v10, 2  ;;  %v1192_v17 = vpop.f32.mrb[25].mxu0  ;;  %v1265_v18 = vpop.f32.mrb[25].mxu1 }
 0x2c6   : > { %v1325_v19 = vrot.slane %v1324_v11, 2  ;;  %v1351_v21 = vrot.slane %v1350_v13, 2  ;;  %v1194_v22 = vpop.f32.mrb[26].mxu0  ;;  %v1267_v23 = vpop.f32.mrb[26].mxu1 }
 0x2c7   : > { %v1313_v24 = vmax.f32 %v1311_v1, %v1312_v15  ;;  %v1339_v25 = vmax.f32 %v1337_v10, %v1338_v16  ;;  %v1355_v26 = vmax.f32 %v1190_v12, %v1194_v22  ;;  %v1381_v27 = vmax.f32 %v1263_v14, %v1267_v23  ;;  %v1196_v28 = vpop.f32.mrb[27].mxu0  ;;  %v1269_v29 = vpop.f32.mrb[27].mxu1 }
 0x2c8   : > { %v1326_v30 = vmax.f32 %v1324_v11, %v1325_v19  ;;  %v1352_v31 = vmax.f32 %v1350_v13, %v1351_v21  ;;  %v1368_v32 = vmax.f32 %v1192_v17, %v1196_v28  ;;  %v1394_v33 = vmax.f32 %v1265_v18, %v1269_v29 }
 0x2c9   : > { %v1314_v34 = vrot.slane %v1313_v24, 1  ;;  %v1340_v35 = vrot.slane %v1339_v25, 1 }
 0x2ca   : > { %v1327_v36 = vrot.slane %v1326_v30, 1  ;;  %v1353_v37 = vrot.slane %v1352_v31, 1 }
 0x2cb   : > { %v1315_v38 = vmax.f32 %v1313_v24, %v1314_v34  ;;  %v1341_v39 = vmax.f32 %v1339_v25, %v1340_v35 }
 0x2cc   : > { %v1328_v40 = vmax.f32 %v1326_v30, %v1327_v36  ;;  %v1354_v42 = vmax.f32 %v1352_v31, %v1353_v37  ;;  %v1200_v43 = vpop.f32.mrb[28].mxu0  ;;  %v1273_v45 = vpop.f32.mrb[28].mxu1 }
 0x2cd   : > { %v1356_v46 = vmax.f32 %v1355_v26, %v1200_v43  ;;  %v1382_v47 = vmax.f32 %v1381_v27, %v1273_v45  ;;  %v1202_v48 = vpop.f32.mrb[29].mxu0  ;;  %v1275_v49 = vpop.f32.mrb[29].mxu1 }
 0x2ce   : > { %v1415_v50 = vcombine.low %v1315_v38, %v1328_v40  ;;  %v1416_v51 = vcombine.low %v1341_v39, %v1354_v42  ;;  %v1369_v52 = vmax.f32 %v1368_v32, %v1202_v48  ;;  %v1395_v53 = vmax.f32 %v1394_v33, %v1275_v49  ;;  %v1204_v54 = vpop.f32.mrb[30].mxu0  ;;  %v1277_v55 = vpop.f32.mrb[30].mxu1 }
 0x2cf   : > { %v1357_v56 = vmax.f32 %v1356_v46, %v1204_v54  ;;  %v1383_v57 = vmax.f32 %v1382_v47, %v1277_v55  ;;  %v1206_v58 = vpop.f32.mrb[31].mxu0  ;;  %v1279_v59 = vpop.f32.mrb[31].mxu1 }
 0x2d0   : > { %v2102_v60 = vrot.slane %v1415_v50, %v2099_v41  ;;  %v2105_v61 = vrot.slane %v1416_v51, %v2099_v41  ;;  %v1370_v62 = vmax.f32 %v1369_v52, %v1206_v58  ;;  %v1396_v63 = vmax.f32 %v1395_v53, %v1279_v59 }
 0x2d2   : > { %v1447_v0 = vcombine.low %v2102_v60, %v2105_v61 }
 0x2d4   : > { %v1210_v3 = vpop.f32.mrb[32].mxu0  ;;  %v1283_v4 = vpop.f32.mrb[32].mxu1 }
 0x2d5   : > { %v1358_v5 = vmax.f32 %v1357_v56, %v1210_v3  ;;  %v1384_v6 = vmax.f32 %v1383_v57, %v1283_v4  ;;  %v1212_v7 = vpop.f32.mrb[33].mxu0  ;;  %v1285_v2 = vpop.f32.mrb[33].mxu1 }
 0x2d6   : > { %v1371_v8 = vmax.f32 %v1370_v62, %v1212_v7  ;;  %v1397_v9 = vmax.f32 %v1396_v63, %v1285_v2  ;;  %v1214_v1 = vpop.f32.mrb[34].mxu0  ;;  %v1287_v10 = vpop.f32.mrb[34].mxu1  ;;  %v1455_v63 = vrot.slane %v1447_v0, %v2099_v41 }
 0x2d7   : > { %v1359_v11 = vmax.f32 %v1358_v5, %v1214_v1  ;;  %v1385_v13 = vmax.f32 %v1384_v6, %v1287_v10  ;;  %v1216_v12 = vpop.f32.mrb[35].mxu0  ;;  %v1289_v14 = vpop.f32.mrb[35].mxu1  ;;  %v1471_v5 = vld [vmem:[%s2135_s6] sm:$0xff] }
 0x2d8   : > { %v1372_v15 = vmax.f32 %v1371_v8, %v1216_v12  ;;  %v1398_v16 = vmax.f32 %v1397_v9, %v1289_v14 }
 0x2dc   : > { %v1220_v17 = vpop.f32.mrb[36].mxu0  ;;  %v1293_v18 = vpop.f32.mrb[36].mxu1 }
 0x2dd   : > { %v1360_v19 = vmax.f32 %v1359_v11, %v1220_v17  ;;  %v1386_v20 = vmax.f32 %v1385_v13, %v1293_v18  ;;  %v1222_v44 = vpop.f32.mrb[37].mxu0  ;;  %v1295_v21 = vpop.f32.mrb[37].mxu1 }
 0x2de   : > { %v1373_v22 = vmax.f32 %v1372_v15, %v1222_v44  ;;  %v1399_v23 = vmax.f32 %v1398_v16, %v1295_v21  ;;  %v1224_v24 = vpop.f32.mrb[38].mxu0  ;;  %v1297_v25 = vpop.f32.mrb[38].mxu1 }
 0x2df   : > { %v1361_v26 = vmax.f32 %v1360_v19, %v1224_v24  ;;  %v1387_v27 = vmax.f32 %v1386_v20, %v1297_v25  ;;  %v1226_v28 = vpop.f32.mrb[39].mxu0  ;;  %v1299_v29 = vpop.f32.mrb[39].mxu1 }
 0x2e0   : > { %v1374_v30 = vmax.f32 %v1373_v22, %v1226_v28  ;;  %v1400_v31 = vmax.f32 %v1399_v23, %v1299_v29 }
 0x2e1   : > { %v1362_v32 = vrot.slane %v1361_v26, 4  ;;  %v1388_v33 = vrot.slane %v1387_v27, 4 }
 0x2e2   : > { %v1375_v34 = vrot.slane %v1374_v30, 4  ;;  %v1401_v35 = vrot.slane %v1400_v31, 4 }
 0x2e3   : > { %v1363_v36 = vmax.f32 %v1361_v26, %v1362_v32  ;;  %v1389_v37 = vmax.f32 %v1387_v27, %v1388_v33 }
 0x2e4   : > { %v1376_v38 = vmax.f32 %v1374_v30, %v1375_v34  ;;  %v1402_v39 = vmax.f32 %v1400_v31, %v1401_v35 }
 0x2e5   : > { %v1364_v40 = vrot.slane %v1363_v36, 2  ;;  %v1390_v42 = vrot.slane %v1389_v37, 2 }
 0x2e6   : > { %v1377_v43 = vrot.slane %v1376_v38, 2  ;;  %v1403_v45 = vrot.slane %v1402_v39, 2 }
 0x2e7   : > { %v1365_v46 = vmax.f32 %v1363_v36, %v1364_v40  ;;  %v1391_v47 = vmax.f32 %v1389_v37, %v1390_v42 }
 0x2e8   : > { %v1378_v48 = vmax.f32 %v1376_v38, %v1377_v43  ;;  %v1404_v49 = vmax.f32 %v1402_v39, %v1403_v45 }
 0x2e9   : > { %v1366_v50 = vrot.slane %v1365_v46, 1  ;;  %v1392_v51 = vrot.slane %v1391_v47, 1 }
 0x2ea   : > { %v1379_v52 = vrot.slane %v1378_v48, 1  ;;  %v1405_v53 = vrot.slane %v1404_v49, 1 }
 0x2eb   : > { %v1367_v54 = vmax.f32 %v1365_v46, %v1366_v50  ;;  %v1393_v55 = vmax.f32 %v1391_v47, %v1392_v51 }
 0x2ec   : > { %v1380_v56 = vmax.f32 %v1378_v48, %v1379_v52  ;;  %v1406_v57 = vmax.f32 %v1404_v49, %v1405_v53 }
 0x2ee   : > { %v1417_v58 = vcombine.low %v1367_v54, %v1380_v56  ;;  %v1418_v59 = vcombine.low %v1393_v55, %v1406_v57 }
 0x2f0   : > { %v1439_v60 = vrot.slane %v1417_v58, %v2099_v41  ;;  %v1446_v61 = vrot.slane %v1418_v59, %v2099_v41 }
 0x2f2   : > { %v1448_v62 = vcombine.low %v1439_v60, %v1446_v61 }
 0x2f4   : > { %v1462_v3 = vrot.slane %v1448_v62, %v2099_v41 }
 0x2f6   : > { %v1463_v4 = vcombine.low %v1455_v63, %v1462_v3 }
 0x2f8   : > { %v1472_v6 = vadd.f32 %v1471_v5, %v1463_v4 }
 0x2fa   : > { %v1473_v7 = vmax.f32 %v1472_v6, 0.0 }
 0x2fc   : > { %1474 = vst [vmem:[%s359_s20] sm:$0xff] %v1473_v7 }
 0x2fd PF: > { %s17_s26 = sadd.s32 1, %s1767_s26   ;;  %s2137_s24 = smov %s1763_s25 }
 0x2fe   : > { %p14_p5 = scmp.ge.s32.totalorder %s17_s26, 4   ;;  %s2138_s25 = smov %s2140_s27 }
 0x300   :  { %16 = sbr.rel (!%p14_p5) target bundleno = 2 (0x2), region = 92 }

// kernel: pointnet_forward.11
= control target key start
LH: loop header
LB: loop body
LE: loop exit
PB: predicated region body
PF: predicated region fallthrough
CT: control target
= control target key end

     0   :  { %vm2594_vm0 = vcmask 818176   ;;  %s4623_s1 = inlined_call_operand.vmem [shape: bf16[1024,512], index: 1, kind: input, shape index: {}]   ;;  %s4624_s0 = inlined_call_operand.vmem [shape: f32[8,1024], index: 0, kind: input, shape index: {}]   ;;  %s4625_s3 = inlined_call_operand.vmem [shape: bf16[512,256], index: 3, kind: input, shape index: {}]   ;;  %s4626_s2 = inlined_call_operand.vmem [shape: f32[1,512], index: 2, kind: input, shape index: {}]   ;;  %s4627_s5 = inlined_call_operand.vmem [shape: bf16[256,100], index: 5, kind: input, shape index: {}]   ;;  %s4628_s4 = inlined_call_operand.vmem [shape: f32[1,256], index: 4, kind: input, shape index: {}]   ;;  %s4629_s6 = inlined_call_operand.vmem [shape: f32[1,100], index: 6, kind: input, shape index: {}]   ;;  %s4630_s7 = inlined_call_operand.vmem [shape: f32[8,100], index: 7, kind: output, shape index: {}]  }
   0x1   :  { %v2991_v0 = vld [vmem:[%s4623_s1 + $0x4] ss:$16 sps:$4 sm:$0xff]   ;;  %v2995_v2 = vld [vmem:[%s4623_s1] ss:$16 sps:$4 sm:$0xff]   ;;  %v28_v46 = vld [vmem:[%s4624_s0 + $0x8] sm:$0xff] }
   0x2   :  { %v2993_v1 = vld [vmem:[%s4623_s1 + $0x204] ss:$16 sps:$4 sm:$0xff]   ;;  %1601 = vmatprep.subr.bf16.mxu1 %v2991_v0  ;;  %v2996_v3 = vld [vmem:[%s4623_s1 + $0x200] ss:$16 sps:$4 sm:$0xff]   ;;  %v3671_v48 = vpack.c.bf16 %v28_v46, %v28_v46  ;;  %v30_v49 = vld [vmem:[%s4624_s0 + $0x18] sm:$0xff] }
   0x3   :  { %1642 = vmatprep.subr.bf16.mxu0 %v2993_v1  ;;  %v2997_v4 = vld [vmem:[%s4623_s1 + $0x24] ss:$16 sps:$4 sm:$0xff]   ;;  %1602 = vmatpush1.bf16.msra.mxu1 %v2995_v2  ;;  %v3001_v6 = vld [vmem:[%s4623_s1 + $0x20] ss:$16 sps:$4 sm:$0xff]   ;;  %v3682_v52 = vpack.c.bf16 %v30_v49, %v30_v49  ;;  %v3144_v49 = vld [vmem:[%s4623_s1 + $0x128] ss:$16 sps:$4 sm:$0xff]  }
   0x4   :  { %1643 = vmatpush1.bf16.msra.mxu0 %v2996_v3  ;;  %v2999_v5 = vld [vmem:[%s4623_s1 + $0x224] ss:$16 sps:$4 sm:$0xff]   ;;  %1603 = vmatprep.subr.bf16.mxu1 %v2997_v4  ;;  %v3002_v7 = vld [vmem:[%s4623_s1 + $0x220] ss:$16 sps:$4 sm:$0xff]  }
   0x5   :  { %1644 = vmatprep.subr.bf16.mxu0 %v2999_v5  ;;  %v3003_v8 = vld [vmem:[%s4623_s1 + $0x44] ss:$16 sps:$4 sm:$0xff]   ;;  %v3007_v10 = vld [vmem:[%s4623_s1 + $0x40] ss:$16 sps:$4 sm:$0xff]   ;;  %1633 = vmatprep.mubr.bf16.mxu1 %v3671_v48 }
   0x6   :  { %v3005_v9 = vld [vmem:[%s4623_s1 + $0x244] ss:$16 sps:$4 sm:$0xff]   ;;  %v3008_v11 = vld [vmem:[%s4623_s1 + $0x240] ss:$16 sps:$4 sm:$0xff]   ;;  %1674 = vmatprep.mubr.bf16.mxu0 %v3682_v52 }
   0x7   :  { %1604 = vmatpush1.bf16.msra.mxu1 %v3001_v6  ;;  %v3009_v12 = vld [vmem:[%s4623_s1 + $0x64] ss:$16 sps:$4 sm:$0xff]   ;;  %v3013_v14 = vld [vmem:[%s4623_s1 + $0x60] ss:$16 sps:$4 sm:$0xff]  }
   0x8   :  { %1645 = vmatpush1.bf16.msra.mxu0 %v3002_v7  ;;  %1605 = vmatprep.subr.bf16.mxu1 %v3003_v8  ;;  %v3011_v13 = vld [vmem:[%s4623_s1 + $0x264] ss:$16 sps:$4 sm:$0xff]   ;;  %v3014_v15 = vld [vmem:[%s4623_s1 + $0x260] ss:$16 sps:$4 sm:$0xff]   ;;  %v3092_v7 = vld [vmem:[%s4623_s1 + $0xc] ss:$16 sps:$4 sm:$0xff]  }
   0x9   :  { %1646 = vmatprep.subr.bf16.mxu0 %v3005_v9  ;;  %v3015_v16 = vld [vmem:[%s4623_s1 + $0x84] ss:$16 sps:$4 sm:$0xff]   ;;  %v3019_v18 = vld [vmem:[%s4623_s1 + $0x80] ss:$16 sps:$4 sm:$0xff]  }
   0xa   :  { %v3017_v17 = vld [vmem:[%s4623_s1 + $0x284] ss:$16 sps:$4 sm:$0xff]   ;;  %v3020_v19 = vld [vmem:[%s4623_s1 + $0x280] ss:$16 sps:$4 sm:$0xff]  }
   0xb   :  { %1606 = vmatpush1.bf16.msra.mxu1 %v3007_v10  ;;  %v3021_v20 = vld [vmem:[%s4623_s1 + $0xa4] ss:$16 sps:$4 sm:$0xff]   ;;  %v3025_v22 = vld [vmem:[%s4623_s1 + $0xa0] ss:$16 sps:$4 sm:$0xff]   ;;  %v3090_v10 = vld [vmem:[%s4623_s1 + $0x8] ss:$16 sps:$4 sm:$0xff]  }
   0xc   :  { %1647 = vmatpush1.bf16.msra.mxu0 %v3008_v11  ;;  %1607 = vmatprep.subr.bf16.mxu1 %v3009_v12  ;;  %v3023_v21 = vld [vmem:[%s4623_s1 + $0x2a4] ss:$16 sps:$4 sm:$0xff]   ;;  %v3026_v23 = vld [vmem:[%s4623_s1 + $0x2a0] ss:$16 sps:$4 sm:$0xff]  }
   0xd   :  { %1648 = vmatprep.subr.bf16.mxu0 %v3011_v13  ;;  %v3027_v24 = vld [vmem:[%s4623_s1 + $0xc4] ss:$16 sps:$4 sm:$0xff]   ;;  %v3031_v26 = vld [vmem:[%s4623_s1 + $0xc0] ss:$16 sps:$4 sm:$0xff]   ;;  %v3098_v13 = vld [vmem:[%s4623_s1 + $0x2c] ss:$16 sps:$4 sm:$0xff]  }
   0xe   :  { %v3029_v25 = vld [vmem:[%s4623_s1 + $0x2c4] ss:$16 sps:$4 sm:$0xff]   ;;  %v3032_v27 = vld [vmem:[%s4623_s1 + $0x2c0] ss:$16 sps:$4 sm:$0xff]  }
   0xf   :  { %1608 = vmatpush1.bf16.msra.mxu1 %v3013_v14  ;;  %v3033_v28 = vld [vmem:[%s4623_s1 + $0xe4] ss:$16 sps:$4 sm:$0xff]   ;;  %v3037_v30 = vld [vmem:[%s4623_s1 + $0xe0] ss:$16 sps:$4 sm:$0xff]  }
  0x10   :  { %1649 = vmatpush1.bf16.msra.mxu0 %v3014_v15  ;;  %1609 = vmatprep.subr.bf16.mxu1 %v3015_v16  ;;  %v3035_v29 = vld [vmem:[%s4623_s1 + $0x2e4] ss:$16 sps:$4 sm:$0xff]   ;;  %v3038_v31 = vld [vmem:[%s4623_s1 + $0x2e0] ss:$16 sps:$4 sm:$0xff]   ;;  %v3096_v15 = vld [vmem:[%s4623_s1 + $0x28] ss:$16 sps:$4 sm:$0xff]  }
  0x11   :  { %1650 = vmatprep.subr.bf16.mxu0 %v3017_v17  ;;  %v3039_v32 = vld [vmem:[%s4623_s1 + $0x104] ss:$16 sps:$4 sm:$0xff]   ;;  %v3043_v34 = vld [vmem:[%s4623_s1 + $0x100] ss:$16 sps:$4 sm:$0xff]   ;;  %v3104_v17 = vld [vmem:[%s4623_s1 + $0x4c] ss:$16 sps:$4 sm:$0xff]  }
  0x12   :  { %v3041_v33 = vld [vmem:[%s4623_s1 + $0x304] ss:$16 sps:$4 sm:$0xff]   ;;  %v3044_v35 = vld [vmem:[%s4623_s1 + $0x300] ss:$16 sps:$4 sm:$0xff]  }
  0x13   :  { %1610 = vmatpush1.bf16.msra.mxu1 %v3019_v18  ;;  %v3045_v36 = vld [vmem:[%s4623_s1 + $0x124] ss:$16 sps:$4 sm:$0xff]   ;;  %v3049_v38 = vld [vmem:[%s4623_s1 + $0x120] ss:$16 sps:$4 sm:$0xff]  }
  0x14   :  { %1651 = vmatpush1.bf16.msra.mxu0 %v3020_v19  ;;  %1611 = vmatprep.subr.bf16.mxu1 %v3021_v20  ;;  %v3047_v37 = vld [vmem:[%s4623_s1 + $0x324] ss:$16 sps:$4 sm:$0xff]   ;;  %v3050_v39 = vld [vmem:[%s4623_s1 + $0x320] ss:$16 sps:$4 sm:$0xff]   ;;  %v3102_v19 = vld [vmem:[%s4623_s1 + $0x48] ss:$16 sps:$4 sm:$0xff]  }
  0x15   :  { %1652 = vmatprep.subr.bf16.mxu0 %v3023_v21  ;;  %v3051_v40 = vld [vmem:[%s4623_s1 + $0x144] ss:$16 sps:$4 sm:$0xff]   ;;  %v3055_v42 = vld [vmem:[%s4623_s1 + $0x140] ss:$16 sps:$4 sm:$0xff]   ;;  %v3110_v21 = vld [vmem:[%s4623_s1 + $0x6c] ss:$16 sps:$4 sm:$0xff]  }
  0x16   :  { %v3053_v41 = vld [vmem:[%s4623_s1 + $0x344] ss:$16 sps:$4 sm:$0xff]   ;;  %v3056_v43 = vld [vmem:[%s4623_s1 + $0x340] ss:$16 sps:$4 sm:$0xff]  }
  0x17   :  { %1612 = vmatpush1.bf16.msra.mxu1 %v3025_v22  ;;  %v3057_v44 = vld [vmem:[%s4623_s1 + $0x164] ss:$16 sps:$4 sm:$0xff]   ;;  %v3061_v47 = vld [vmem:[%s4623_s1 + $0x160] ss:$16 sps:$4 sm:$0xff]  }
  0x18   :  { %1653 = vmatpush1.bf16.msra.mxu0 %v3026_v23  ;;  %1613 = vmatprep.subr.bf16.mxu1 %v3027_v24  ;;  %v3059_v45 = vld [vmem:[%s4623_s1 + $0x364] ss:$16 sps:$4 sm:$0xff]   ;;  %v3062_v50 = vld [vmem:[%s4623_s1 + $0x360] ss:$16 sps:$4 sm:$0xff]   ;;  %v3108_v23 = vld [vmem:[%s4623_s1 + $0x68] ss:$16 sps:$4 sm:$0xff]  }
  0x19   :  { %1654 = vmatprep.subr.bf16.mxu0 %v3029_v25  ;;  %v3063_v51 = vld [vmem:[%s4623_s1 + $0x184] ss:$16 sps:$4 sm:$0xff]   ;;  %v3067_v54 = vld [vmem:[%s4623_s1 + $0x180] ss:$16 sps:$4 sm:$0xff]   ;;  %v3116_v25 = vld [vmem:[%s4623_s1 + $0x8c] ss:$16 sps:$4 sm:$0xff]  }
  0x1a   :  { %v3065_v53 = vld [vmem:[%s4623_s1 + $0x384] ss:$16 sps:$4 sm:$0xff]   ;;  %v3068_v55 = vld [vmem:[%s4623_s1 + $0x380] ss:$16 sps:$4 sm:$0xff]  }
  0x1b   :  { %1614 = vmatpush1.bf16.msra.mxu1 %v3031_v26  ;;  %v3069_v56 = vld [vmem:[%s4623_s1 + $0x1a4] ss:$16 sps:$4 sm:$0xff]   ;;  %v3073_v58 = vld [vmem:[%s4623_s1 + $0x1a0] ss:$16 sps:$4 sm:$0xff]  }
  0x1c   :  { %1655 = vmatpush1.bf16.msra.mxu0 %v3032_v27  ;;  %1615 = vmatprep.subr.bf16.mxu1 %v3033_v28  ;;  %v3071_v57 = vld [vmem:[%s4623_s1 + $0x3a4] ss:$16 sps:$4 sm:$0xff]   ;;  %v3074_v59 = vld [vmem:[%s4623_s1 + $0x3a0] ss:$16 sps:$4 sm:$0xff]   ;;  %v3114_v27 = vld [vmem:[%s4623_s1 + $0x88] ss:$16 sps:$4 sm:$0xff]  }
  0x1d   :  { %1656 = vmatprep.subr.bf16.mxu0 %v3035_v29  ;;  %v3075_v60 = vld [vmem:[%s4623_s1 + $0x1c4] ss:$16 sps:$4 sm:$0xff]   ;;  %v3079_v62 = vld [vmem:[%s4623_s1 + $0x1c0] ss:$16 sps:$4 sm:$0xff]   ;;  %v3122_v29 = vld [vmem:[%s4623_s1 + $0xac] ss:$16 sps:$4 sm:$0xff]  }
  0x1e   :  { %v3077_v61 = vld [vmem:[%s4623_s1 + $0x3c4] ss:$16 sps:$4 sm:$0xff]   ;;  %v3080_v63 = vld [vmem:[%s4623_s1 + $0x3c0] ss:$16 sps:$4 sm:$0xff]  }
  0x1f   :  { %1616 = vmatpush1.bf16.msra.mxu1 %v3037_v30  ;;  %v3081_v0 = vld [vmem:[%s4623_s1 + $0x1e4] ss:$16 sps:$4 sm:$0xff]   ;;  %v3085_v2 = vld [vmem:[%s4623_s1 + $0x1e0] ss:$16 sps:$4 sm:$0xff]  }
  0x20   :  { %1657 = vmatpush1.bf16.msra.mxu0 %v3038_v31  ;;  %1617 = vmatprep.subr.bf16.mxu1 %v3039_v32  ;;  %v3083_v1 = vld [vmem:[%s4623_s1 + $0x3e4] ss:$16 sps:$4 sm:$0xff]   ;;  %v3086_v3 = vld [vmem:[%s4623_s1 + $0x3e0] ss:$16 sps:$4 sm:$0xff]   ;;  %v3120_v31 = vld [vmem:[%s4623_s1 + $0xa8] ss:$16 sps:$4 sm:$0xff]  }
  0x21   :  { %1658 = vmatprep.subr.bf16.mxu0 %v3041_v33  ;;  %v27_v4 = vld [vmem:[%s4624_s0] sm:$0xff]  ;;  %v29_v6 = vld [vmem:[%s4624_s0 + $0x10] sm:$0xff]  ;;  %v3128_v33 = vld [vmem:[%s4623_s1 + $0xcc] ss:$16 sps:$4 sm:$0xff]  }
  0x22   :  { %v3089_v5 = vld [vmem:[%s4623_s1 + $0x404] ss:$16 sps:$4 sm:$0xff]   ;;  %v3743_v8 = vpack.c.bf16 %v27_v4, %v27_v4  ;;  %v3087_v9 = vld [vmem:[%s4623_s1 + $0x400] ss:$16 sps:$4 sm:$0xff]   ;;  %v3751_v11 = vpack.c.bf16 %v29_v6, %v29_v6  ;;  %v3176_v4 = vld [vmem:[%s4623_s1 + $0x1cc] ss:$16 sps:$4 sm:$0xff]  }
  0x23   :  { %1618 = vmatpush1.bf16.msra.mxu1 %v3043_v34  ;;  %v3095_v12 = vld [vmem:[%s4623_s1 + $0x424] ss:$16 sps:$4 sm:$0xff]   ;;  %v3093_v14 = vld [vmem:[%s4623_s1 + $0x420] ss:$16 sps:$4 sm:$0xff]   ;;  %v32_v34 = vld [vmem:[%s4624_s0 + $0x28] sm:$0xff] }
  0x24   :  { %1659 = vmatpush1.bf16.msra.mxu0 %v3044_v35  ;;  %1619 = vmatprep.subr.bf16.mxu1 %v3045_v36  ;;  %v3101_v16 = vld [vmem:[%s4623_s1 + $0x444] ss:$16 sps:$4 sm:$0xff]   ;;  %v3099_v18 = vld [vmem:[%s4623_s1 + $0x440] ss:$16 sps:$4 sm:$0xff]   ;;  %v3828_v36 = vpack.c.bf16 %v32_v34, %v32_v34  ;;  %v3174_v6 = vld [vmem:[%s4623_s1 + $0x1c8] ss:$16 sps:$4 sm:$0xff]  }
  0x25   :  { %1660 = vmatprep.subr.bf16.mxu0 %v3047_v37  ;;  %v3107_v20 = vld [vmem:[%s4623_s1 + $0x464] ss:$16 sps:$4 sm:$0xff]   ;;  %v3105_v22 = vld [vmem:[%s4623_s1 + $0x460] ss:$16 sps:$4 sm:$0xff]   ;;  %v3126_v37 = vld [vmem:[%s4623_s1 + $0xc8] ss:$16 sps:$4 sm:$0xff]  }
  0x26   :  { %v3113_v24 = vld [vmem:[%s4623_s1 + $0x484] ss:$16 sps:$4 sm:$0xff]   ;;  %v3111_v26 = vld [vmem:[%s4623_s1 + $0x480] ss:$16 sps:$4 sm:$0xff]   ;;  %v3210_v34 = vld [vmem:[%s4623_s1 + $0x288] ss:$16 sps:$4 sm:$0xff]  }
  0x27   :  { %1620 = vmatpush1.bf16.msra.mxu1 %v3049_v38  ;;  %v3119_v28 = vld [vmem:[%s4623_s1 + $0x4a4] ss:$16 sps:$4 sm:$0xff]   ;;  %v3117_v30 = vld [vmem:[%s4623_s1 + $0x4a0] ss:$16 sps:$4 sm:$0xff]  }
  0x28   :  { %1661 = vmatpush1.bf16.msra.mxu0 %v3050_v39  ;;  %1621 = vmatprep.subr.bf16.mxu1 %v3051_v40  ;;  %v3125_v32 = vld [vmem:[%s4623_s1 + $0x4c4] ss:$16 sps:$4 sm:$0xff]   ;;  %v3123_v35 = vld [vmem:[%s4623_s1 + $0x4c0] ss:$16 sps:$4 sm:$0xff]   ;;  %v3134_v39 = vld [vmem:[%s4623_s1 + $0xec] ss:$16 sps:$4 sm:$0xff]  }
  0x29   :  { %1662 = vmatprep.subr.bf16.mxu0 %v3053_v41  ;;  %v3131_v38 = vld [vmem:[%s4623_s1 + $0x4e4] ss:$16 sps:$4 sm:$0xff]   ;;  %v3129_v40 = vld [vmem:[%s4623_s1 + $0x4e0] ss:$16 sps:$4 sm:$0xff]   ;;  %v3132_v41 = vld [vmem:[%s4623_s1 + $0xe8] ss:$16 sps:$4 sm:$0xff]  }
  0x2a   :  { %v3143_v46 = vld [vmem:[%s4623_s1 + $0x524] ss:$16 sps:$4 sm:$0xff]  }
  0x2b   :  { %1622 = vmatpush1.bf16.msra.mxu1 %v3055_v42  ;;  %v3137_v42 = vld [vmem:[%s4623_s1 + $0x504] ss:$16 sps:$4 sm:$0xff]  }
  0x2c   :  { %1663 = vmatpush1.bf16.msra.mxu0 %v3056_v43  ;;  %1623 = vmatprep.subr.bf16.mxu1 %v3057_v44  ;;  %v3140_v43 = vld [vmem:[%s4623_s1 + $0x10c] ss:$16 sps:$4 sm:$0xff]   ;;  %v3135_v44 = vld [vmem:[%s4623_s1 + $0x500] ss:$16 sps:$4 sm:$0xff]  }
  0x2d   :  { %1664 = vmatprep.subr.bf16.mxu0 %v3059_v45  ;;  %v3138_v45 = vld [vmem:[%s4623_s1 + $0x108] ss:$16 sps:$4 sm:$0xff]  }
  0x2f   :  { %1624 = vmatpush1.bf16.msra.mxu1 %v3061_v47  ;;  %v3146_v47 = vld [vmem:[%s4623_s1 + $0x12c] ss:$16 sps:$4 sm:$0xff]  }
  0x30   :  { %1665 = vmatpush1.bf16.msra.mxu0 %v3062_v50  ;;  %1625 = vmatprep.subr.bf16.mxu1 %v3063_v51  ;;  %v3149_v50 = vld [vmem:[%s4623_s1 + $0x544] ss:$16 sps:$4 sm:$0xff]   ;;  %v3152_v51 = vld [vmem:[%s4623_s1 + $0x14c] ss:$16 sps:$4 sm:$0xff]  }
  0x31   :  { %1666 = vmatprep.subr.bf16.mxu0 %v3065_v53  ;;  %v3147_v53 = vld [vmem:[%s4623_s1 + $0x540] ss:$16 sps:$4 sm:$0xff]  }
  0x33   :  { %1626 = vmatpush1.bf16.msra.mxu1 %v3067_v54  ;;  %v3150_v54 = vld [vmem:[%s4623_s1 + $0x148] ss:$16 sps:$4 sm:$0xff]  }
  0x34   :  { %1667 = vmatpush1.bf16.msra.mxu0 %v3068_v55  ;;  %1627 = vmatprep.subr.bf16.mxu1 %v3069_v56  ;;  %v3155_v55 = vld [vmem:[%s4623_s1 + $0x564] ss:$16 sps:$4 sm:$0xff]   ;;  %v3158_v56 = vld [vmem:[%s4623_s1 + $0x16c] ss:$16 sps:$4 sm:$0xff]  }
  0x35   :  { %1668 = vmatprep.subr.bf16.mxu0 %v3071_v57  ;;  %v3153_v57 = vld [vmem:[%s4623_s1 + $0x560] ss:$16 sps:$4 sm:$0xff]  }
  0x37   :  { %1628 = vmatpush1.bf16.msra.mxu1 %v3073_v58  ;;  %v3156_v58 = vld [vmem:[%s4623_s1 + $0x168] ss:$16 sps:$4 sm:$0xff]  }
  0x38   :  { %1669 = vmatpush1.bf16.msra.mxu0 %v3074_v59  ;;  %1629 = vmatprep.subr.bf16.mxu1 %v3075_v60  ;;  %v3161_v59 = vld [vmem:[%s4623_s1 + $0x584] ss:$16 sps:$4 sm:$0xff]   ;;  %v3164_v60 = vld [vmem:[%s4623_s1 + $0x18c] ss:$16 sps:$4 sm:$0xff]  }
  0x39   :  { %1670 = vmatprep.subr.bf16.mxu0 %v3077_v61  ;;  %v3159_v61 = vld [vmem:[%s4623_s1 + $0x580] ss:$16 sps:$4 sm:$0xff]  }
  0x3b   :  { %1630 = vmatpush1.bf16.msra.mxu1 %v3079_v62  ;;  %v3162_v62 = vld [vmem:[%s4623_s1 + $0x188] ss:$16 sps:$4 sm:$0xff]  }
  0x3c   :  { %1671 = vmatpush1.bf16.msra.mxu0 %v3080_v63  ;;  %1631 = vmatprep.subr.bf16.mxu1 %v3081_v0  ;;  %v3167_v63 = vld [vmem:[%s4623_s1 + $0x5a4] ss:$16 sps:$4 sm:$0xff]   ;;  %v3170_v0 = vld [vmem:[%s4623_s1 + $0x1ac] ss:$16 sps:$4 sm:$0xff]  }
  0x3d   :  { %1672 = vmatprep.subr.bf16.mxu0 %v3083_v1  ;;  %v3165_v1 = vld [vmem:[%s4623_s1 + $0x5a0] ss:$16 sps:$4 sm:$0xff]  }
  0x3f   :  { %1632 = vmatpush1.bf16.msra.mxu1 %v3085_v2  ;;  %v3168_v2 = vld [vmem:[%s4623_s1 + $0x1a8] ss:$16 sps:$4 sm:$0xff]  }
  0x40   :  { %1673 = vmatpush1.bf16.msra.mxu0 %v3086_v3  ;;  %1765 = vmatprep.subr.bf16.mxu1 %v3092_v7  ;;  %v3173_v3 = vld [vmem:[%s4623_s1 + $0x5c4] ss:$16 sps:$4 sm:$0xff]  }
  0x41   :  { %1683 = vmatprep.subr.bf16.mxu0 %v3089_v5  ;;  %v3171_v5 = vld [vmem:[%s4623_s1 + $0x5c0] ss:$16 sps:$4 sm:$0xff]   ;;  %v3179_v7 = vld [vmem:[%s4623_s1 + $0x5e4] ss:$16 sps:$4 sm:$0xff]  }
  0x42   :  { %1634 = vmatmul.mubr.bf16.vlgmr.msra.gmra.mrb[0].mxu1 %v3743_v8 }
  0x43   :  { %1675 = vmatmul.mubr.bf16.vlgmr.msra.gmra.mrb[0].mxu0 %v3751_v11  ;;  %1766 = vmatpush1.bf16.msra.mxu1 %v3090_v10  ;;  %v3177_v10 = vld [vmem:[%s4623_s1 + $0x5e0] ss:$16 sps:$4 sm:$0xff]  }
  0x44   :  { %1684 = vmatpush1.bf16.msra.mxu0 %v3087_v9  ;;  %1767 = vmatprep.subr.bf16.mxu1 %v3098_v13  ;;  %v3182_v9 = vld [vmem:[%s4623_s1 + $0x1ec] ss:$16 sps:$4 sm:$0xff]   ;;  %v31_v13 = vld [vmem:[%s4624_s0 + $0x20] sm:$0xff] }
  0x45   :  { %1685 = vmatprep.subr.bf16.mxu0 %v3095_v12  ;;  %1797 = vmatprep.mubr.bf16.mxu1 %v3671_v48  ;;  %v3141_v48 = vld [vmem:[%s4623_s1 + $0x520] ss:$16 sps:$4 sm:$0xff]   ;;  %v3180_v12 = vld [vmem:[%s4623_s1 + $0x1e8] ss:$16 sps:$4 sm:$0xff]  }
  0x46   :  { %1715 = vmatprep.mubr.bf16.mxu0 %v3828_v36 }
  0x47   :  { %1768 = vmatpush1.bf16.msra.mxu1 %v3096_v15  ;;  %v3188_v15 = vld [vmem:[%s4623_s1 + $0x20c] ss:$16 sps:$4 sm:$0xff]  }
  0x48   :  { %1686 = vmatpush1.bf16.msra.mxu0 %v3093_v14  ;;  %1769 = vmatprep.subr.bf16.mxu1 %v3104_v17  ;;  %v3185_v14 = vld [vmem:[%s4623_s1 + $0x604] ss:$16 sps:$4 sm:$0xff]   ;;  %v3183_v17 = vld [vmem:[%s4623_s1 + $0x600] ss:$16 sps:$4 sm:$0xff]  }
  0x49   :  { %1687 = vmatprep.subr.bf16.mxu0 %v3101_v16  ;;  %v3951_v16 = vpack.c.bf16 %v31_v13, %v31_v13  ;;  %v3267_v13 = vld [vmem:[%s4623_s1 + $0x7c0] ss:$16 sps:$4 sm:$0xff]  }
  0x4b   :  { %1770 = vmatpush1.bf16.msra.mxu1 %v3102_v19  ;;  %v3191_v19 = vld [vmem:[%s4623_s1 + $0x624] ss:$16 sps:$4 sm:$0xff]  }
  0x4c   :  { %1688 = vmatpush1.bf16.msra.mxu0 %v3099_v18  ;;  %1771 = vmatprep.subr.bf16.mxu1 %v3110_v21  ;;  %v3186_v18 = vld [vmem:[%s4623_s1 + $0x208] ss:$16 sps:$4 sm:$0xff]  }
  0x4d   :  { %1689 = vmatprep.subr.bf16.mxu0 %v3107_v20  ;;  %v3194_v20 = vld [vmem:[%s4623_s1 + $0x22c] ss:$16 sps:$4 sm:$0xff]  }
  0x4e   :  { %v34_v21 = vld [vmem:[%s4624_s0 + $0x38] sm:$0xff] }
  0x4f   :  { %1772 = vmatpush1.bf16.msra.mxu1 %v3108_v23  ;;  %v3192_v23 = vld [vmem:[%s4623_s1 + $0x228] ss:$16 sps:$4 sm:$0xff]  }
  0x50   :  { %1690 = vmatpush1.bf16.msra.mxu0 %v3105_v22  ;;  %1773 = vmatprep.subr.bf16.mxu1 %v3116_v25  ;;  %v3189_v22 = vld [vmem:[%s4623_s1 + $0x620] ss:$16 sps:$4 sm:$0xff]   ;;  %v3197_v25 = vld [vmem:[%s4623_s1 + $0x644] ss:$16 sps:$4 sm:$0xff]  }
  0x51   :  { %1691 = vmatprep.subr.bf16.mxu0 %v3113_v24  ;;  %v3976_v24 = vpack.c.bf16 %v34_v21, %v34_v21  ;;  %v3281_v21 = vld [vmem:[%s4623_s1 + $0x40c] ss:$16 sps:$4 sm:$0xff]  }
  0x53   :  { %1774 = vmatpush1.bf16.msra.mxu1 %v3114_v27  ;;  %v3198_v27 = vld [vmem:[%s4623_s1 + $0x248] ss:$16 sps:$4 sm:$0xff]  }
  0x54   :  { %1692 = vmatpush1.bf16.msra.mxu0 %v3111_v26  ;;  %1775 = vmatprep.subr.bf16.mxu1 %v3122_v29  ;;  %v3195_v26 = vld [vmem:[%s4623_s1 + $0x640] ss:$16 sps:$4 sm:$0xff]  }
  0x55   :  { %1693 = vmatprep.subr.bf16.mxu0 %v3119_v28  ;;  %v3203_v28 = vld [vmem:[%s4623_s1 + $0x664] ss:$16 sps:$4 sm:$0xff]   ;;  %v3201_v29 = vld [vmem:[%s4623_s1 + $0x660] ss:$16 sps:$4 sm:$0xff]  }
  0x57   :  { %1776 = vmatpush1.bf16.msra.mxu1 %v3120_v31  ;;  %v3209_v31 = vld [vmem:[%s4623_s1 + $0x684] ss:$16 sps:$4 sm:$0xff]  }
  0x58   :  { %1694 = vmatpush1.bf16.msra.mxu0 %v3117_v30  ;;  %1777 = vmatprep.subr.bf16.mxu1 %v3128_v33  ;;  %v3204_v30 = vld [vmem:[%s4623_s1 + $0x268] ss:$16 sps:$4 sm:$0xff]   ;;  %v3207_v33 = vld [vmem:[%s4623_s1 + $0x680] ss:$16 sps:$4 sm:$0xff]  }
  0x59   :  { %1695 = vmatprep.subr.bf16.mxu0 %v3125_v32  ;;  %v3212_v32 = vld [vmem:[%s4623_s1 + $0x28c] ss:$16 sps:$4 sm:$0xff]  }
  0x5b   :  { %1778 = vmatpush1.bf16.msra.mxu1 %v3126_v37  ;;  %v3218_v37 = vld [vmem:[%s4623_s1 + $0x2ac] ss:$16 sps:$4 sm:$0xff]  }
  0x5c   :  { %1696 = vmatpush1.bf16.msra.mxu0 %v3123_v35  ;;  %1779 = vmatprep.subr.bf16.mxu1 %v3134_v39  ;;  %v3215_v35 = vld [vmem:[%s4623_s1 + $0x6a4] ss:$16 sps:$4 sm:$0xff]   ;;  %v3216_v39 = vld [vmem:[%s4623_s1 + $0x2a8] ss:$16 sps:$4 sm:$0xff]  }
  0x5d   :  { %1697 = vmatprep.subr.bf16.mxu0 %v3131_v38  ;;  %v3213_v38 = vld [vmem:[%s4623_s1 + $0x6a0] ss:$16 sps:$4 sm:$0xff]  }
  0x5f   :  { %1780 = vmatpush1.bf16.msra.mxu1 %v3132_v41  ;;  %v3224_v41 = vld [vmem:[%s4623_s1 + $0x2cc] ss:$16 sps:$4 sm:$0xff]  }
  0x60   :  { %1698 = vmatpush1.bf16.msra.mxu0 %v3129_v40  ;;  %1781 = vmatprep.subr.bf16.mxu1 %v3140_v43  ;;  %v3221_v40 = vld [vmem:[%s4623_s1 + $0x6c4] ss:$16 sps:$4 sm:$0xff]   ;;  %v3222_v43 = vld [vmem:[%s4623_s1 + $0x2c8] ss:$16 sps:$4 sm:$0xff]  }
  0x61   :  { %1699 = vmatprep.subr.bf16.mxu0 %v3137_v42  ;;  %v3219_v42 = vld [vmem:[%s4623_s1 + $0x6c0] ss:$16 sps:$4 sm:$0xff]  }
  0x63   :  { %1782 = vmatpush1.bf16.msra.mxu1 %v3138_v45  ;;  %v3230_v45 = vld [vmem:[%s4623_s1 + $0x2ec] ss:$16 sps:$4 sm:$0xff]  }
  0x64   :  { %1700 = vmatpush1.bf16.msra.mxu0 %v3135_v44  ;;  %1783 = vmatprep.subr.bf16.mxu1 %v3146_v47  ;;  %v3227_v44 = vld [vmem:[%s4623_s1 + $0x6e4] ss:$16 sps:$4 sm:$0xff]   ;;  %v3228_v47 = vld [vmem:[%s4623_s1 + $0x2e8] ss:$16 sps:$4 sm:$0xff]  }
  0x65   :  { %1701 = vmatprep.subr.bf16.mxu0 %v3143_v46  ;;  %v3225_v46 = vld [vmem:[%s4623_s1 + $0x6e0] ss:$16 sps:$4 sm:$0xff]  }
  0x67   :  { %1784 = vmatpush1.bf16.msra.mxu1 %v3144_v49  ;;  %v3236_v49 = vld [vmem:[%s4623_s1 + $0x30c] ss:$16 sps:$4 sm:$0xff]  }
  0x68   :  { %1702 = vmatpush1.bf16.msra.mxu0 %v3141_v48  ;;  %1785 = vmatprep.subr.bf16.mxu1 %v3152_v51  ;;  %v3233_v48 = vld [vmem:[%s4623_s1 + $0x704] ss:$16 sps:$4 sm:$0xff]   ;;  %v3234_v51 = vld [vmem:[%s4623_s1 + $0x308] ss:$16 sps:$4 sm:$0xff]  }
  0x69   :  { %1703 = vmatprep.subr.bf16.mxu0 %v3149_v50  ;;  %v3231_v50 = vld [vmem:[%s4623_s1 + $0x700] ss:$16 sps:$4 sm:$0xff]  }
  0x6b   :  { %1786 = vmatpush1.bf16.msra.mxu1 %v3150_v54  ;;  %v3242_v54 = vld [vmem:[%s4623_s1 + $0x32c] ss:$16 sps:$4 sm:$0xff]  }
  0x6c   :  { %1704 = vmatpush1.bf16.msra.mxu0 %v3147_v53  ;;  %1787 = vmatprep.subr.bf16.mxu1 %v3158_v56  ;;  %v3239_v53 = vld [vmem:[%s4623_s1 + $0x724] ss:$16 sps:$4 sm:$0xff]   ;;  %v3240_v56 = vld [vmem:[%s4623_s1 + $0x328] ss:$16 sps:$4 sm:$0xff]  }
  0x6d   :  { %1705 = vmatprep.subr.bf16.mxu0 %v3155_v55  ;;  %v3237_v55 = vld [vmem:[%s4623_s1 + $0x720] ss:$16 sps:$4 sm:$0xff]  }
  0x6f   :  { %1788 = vmatpush1.bf16.msra.mxu1 %v3156_v58  ;;  %v3248_v58 = vld [vmem:[%s4623_s1 + $0x34c] ss:$16 sps:$4 sm:$0xff]  }
  0x70   :  { %1706 = vmatpush1.bf16.msra.mxu0 %v3153_v57  ;;  %1789 = vmatprep.subr.bf16.mxu1 %v3164_v60  ;;  %v3245_v57 = vld [vmem:[%s4623_s1 + $0x744] ss:$16 sps:$4 sm:$0xff]   ;;  %v3246_v60 = vld [vmem:[%s4623_s1 + $0x348] ss:$16 sps:$4 sm:$0xff]  }
  0x71   :  { %1707 = vmatprep.subr.bf16.mxu0 %v3161_v59  ;;  %v3243_v59 = vld [vmem:[%s4623_s1 + $0x740] ss:$16 sps:$4 sm:$0xff]  }
  0x73   :  { %1790 = vmatpush1.bf16.msra.mxu1 %v3162_v62  ;;  %v3254_v62 = vld [vmem:[%s4623_s1 + $0x36c] ss:$16 sps:$4 sm:$0xff]  }
  0x74   :  { %1708 = vmatpush1.bf16.msra.mxu0 %v3159_v61  ;;  %1791 = vmatprep.subr.bf16.mxu1 %v3170_v0  ;;  %v3251_v61 = vld [vmem:[%s4623_s1 + $0x764] ss:$16 sps:$4 sm:$0xff]   ;;  %v3252_v0 = vld [vmem:[%s4623_s1 + $0x368] ss:$16 sps:$4 sm:$0xff]  }
  0x75   :  { %1709 = vmatprep.subr.bf16.mxu0 %v3167_v63  ;;  %v3249_v63 = vld [vmem:[%s4623_s1 + $0x760] ss:$16 sps:$4 sm:$0xff]  }
  0x77   :  { %1792 = vmatpush1.bf16.msra.mxu1 %v3168_v2  ;;  %v3260_v2 = vld [vmem:[%s4623_s1 + $0x38c] ss:$16 sps:$4 sm:$0xff]  }
  0x78   :  { %1710 = vmatpush1.bf16.msra.mxu0 %v3165_v1  ;;  %1793 = vmatprep.subr.bf16.mxu1 %v3176_v4  ;;  %v3257_v1 = vld [vmem:[%s4623_s1 + $0x784] ss:$16 sps:$4 sm:$0xff]   ;;  %v3258_v4 = vld [vmem:[%s4623_s1 + $0x388] ss:$16 sps:$4 sm:$0xff]  }
  0x79   :  { %1711 = vmatprep.subr.bf16.mxu0 %v3173_v3  ;;  %v3255_v3 = vld [vmem:[%s4623_s1 + $0x780] ss:$16 sps:$4 sm:$0xff]  }
  0x7b   :  { %1794 = vmatpush1.bf16.msra.mxu1 %v3174_v6  ;;  %v3266_v6 = vld [vmem:[%s4623_s1 + $0x3ac] ss:$16 sps:$4 sm:$0xff]  }
  0x7c   :  { %1712 = vmatpush1.bf16.msra.mxu0 %v3171_v5  ;;  %1795 = vmatprep.subr.bf16.mxu1 %v3182_v9  ;;  %v3263_v5 = vld [vmem:[%s4623_s1 + $0x7a4] ss:$16 sps:$4 sm:$0xff]   ;;  %v3264_v9 = vld [vmem:[%s4623_s1 + $0x3a8] ss:$16 sps:$4 sm:$0xff]  }
  0x7d   :  { %1713 = vmatprep.subr.bf16.mxu0 %v3179_v7  ;;  %v3261_v7 = vld [vmem:[%s4623_s1 + $0x7a0] ss:$16 sps:$4 sm:$0xff]  }
  0x7f   :  { %1796 = vmatpush1.bf16.msra.mxu1 %v3180_v12  ;;  %v3272_v12 = vld [vmem:[%s4623_s1 + $0x3cc] ss:$16 sps:$4 sm:$0xff]  }
  0x80   :  { %1714 = vmatpush1.bf16.msra.mxu0 %v3177_v10  ;;  %1806 = vmatprep.subr.bf16.mxu1 %v3188_v15  ;;  %v3269_v10 = vld [vmem:[%s4623_s1 + $0x7c4] ss:$16 sps:$4 sm:$0xff]  }
  0x81   :  { %1724 = vmatprep.subr.bf16.mxu0 %v3185_v14  ;;  %v3270_v14 = vld [vmem:[%s4623_s1 + $0x3c8] ss:$16 sps:$4 sm:$0xff]   ;;  %v3275_v15 = vld [vmem:[%s4623_s1 + $0x7e4] ss:$16 sps:$4 sm:$0xff]  }
  0x82   :  { %1798 = vmatmul.mubr.bf16.vlgmr.msra.gmra.mrb[4].mxu1 %v3743_v8  ;;  %v3200_v8 = vld [vmem:[%s4623_s1 + $0x24c] ss:$16 sps:$4 sm:$0xff]  }
  0x83   :  { %1716 = vmatmul.mubr.bf16.vlgmr.msra.gmra.mrb[0].mxu0 %v3951_v16  ;;  %1807 = vmatpush1.bf16.msra.mxu1 %v3186_v18  ;;  %v3273_v18 = vld [vmem:[%s4623_s1 + $0x7e0] ss:$16 sps:$4 sm:$0xff]  }
  0x84   :  { %1725 = vmatpush1.bf16.msra.mxu0 %v3183_v17  ;;  %1808 = vmatprep.subr.bf16.mxu1 %v3194_v20  ;;  %v3278_v17 = vld [vmem:[%s4623_s1 + $0x3ec] ss:$16 sps:$4 sm:$0xff]   ;;  %v33_v20 = vld [vmem:[%s4624_s0 + $0x30] sm:$0xff] }
  0x85   :  { %1726 = vmatprep.subr.bf16.mxu0 %v3191_v19  ;;  %1756 = vmatprep.mubr.bf16.mxu0 %v3976_v24  ;;  %v3276_v19 = vld [vmem:[%s4623_s1 + $0x3e8] ss:$16 sps:$4 sm:$0xff]  }
  0x86   :  { %1838 = vmatprep.mubr.bf16.mxu1 %v3682_v52  ;;  %v3206_v52 = vld [vmem:[%s4623_s1 + $0x26c] ss:$16 sps:$4 sm:$0xff]  }
  0x87   :  { %1809 = vmatpush1.bf16.msra.mxu1 %v3192_v23  ;;  %v3279_v23 = vld [vmem:[%s4623_s1 + $0x408] ss:$16 sps:$4 sm:$0xff]  }
  0x88   :  { %1727 = vmatpush1.bf16.msra.mxu0 %v3189_v22  ;;  %1810 = vmatprep.subr.bf16.mxu1 %v3200_v8  ;;  %v4154_v22 = vpack.c.bf16 %v33_v20, %v33_v20  ;;  %v3282_v8 = vld [vmem:[%s4623_s1 + $0x428] ss:$16 sps:$4 sm:$0xff]   ;;  %v3329_v20 = vld [vmem:[%s4623_s1 + $0x60c] ss:$16 sps:$4 sm:$0xff]  }
  0x89   :  { %1728 = vmatprep.subr.bf16.mxu0 %v3197_v25  ;;  %v3284_v25 = vld [vmem:[%s4623_s1 + $0x42c] ss:$16 sps:$4 sm:$0xff]  }
  0x8b   :  { %1811 = vmatpush1.bf16.msra.mxu1 %v3198_v27  ;;  %v3375_v27 = vld [vmem:[%s4625_s3] ss:$8 sps:$4 sm:$0xff]  }
  0x8c   :  { %1729 = vmatpush1.bf16.msra.mxu0 %v3195_v26  ;;  %1812 = vmatprep.subr.bf16.mxu1 %v3206_v52  ;;  %v3287_v26 = vld [vmem:[%s4623_s1 + $0x44c] ss:$16 sps:$4 sm:$0xff]   ;;  %v3285_v52 = vld [vmem:[%s4623_s1 + $0x448] ss:$16 sps:$4 sm:$0xff]  }
  0x8d   :  { %1730 = vmatprep.subr.bf16.mxu0 %v3203_v28  ;;  %v3380_v28 = vld [vmem:[%s4625_s3 + $0x14] ss:$8 sps:$4 sm:$0xff]  }
  0x8f   :  { %1813 = vmatpush1.bf16.msra.mxu1 %v3204_v30  ;;  %v3383_v30 = vld [vmem:[%s4625_s3 + $0x24] ss:$8 sps:$4 sm:$0xff]  }
  0x90   :  { %1731 = vmatpush1.bf16.msra.mxu0 %v3201_v29  ;;  %1814 = vmatprep.subr.bf16.mxu1 %v3212_v32  ;;  %v3378_v29 = vld [vmem:[%s4625_s3 + $0x10] ss:$8 sps:$4 sm:$0xff]   ;;  %v3293_v32 = vld [vmem:[%s4623_s1 + $0x48c] ss:$16 sps:$4 sm:$0xff]  }
  0x91   :  { %1732 = vmatprep.subr.bf16.mxu0 %v3209_v31  ;;  %v3288_v31 = vld [vmem:[%s4623_s1 + $0x468] ss:$16 sps:$4 sm:$0xff]  }
  0x93   :  { %1815 = vmatpush1.bf16.msra.mxu1 %v3210_v34  ;;  %v3386_v34 = vld [vmem:[%s4625_s3 + $0x34] ss:$8 sps:$4 sm:$0xff]  }
  0x94   :  { %1733 = vmatpush1.bf16.msra.mxu0 %v3207_v33  ;;  %1816 = vmatprep.subr.bf16.mxu1 %v3218_v37  ;;  %v3381_v33 = vld [vmem:[%s4625_s3 + $0x20] ss:$8 sps:$4 sm:$0xff]   ;;  %v3296_v37 = vld [vmem:[%s4623_s1 + $0x4ac] ss:$16 sps:$4 sm:$0xff]  }
  0x95   :  { %1734 = vmatprep.subr.bf16.mxu0 %v3215_v35  ;;  %v3291_v35 = vld [vmem:[%s4623_s1 + $0x488] ss:$16 sps:$4 sm:$0xff]  }
  0x97   :  { %1817 = vmatpush1.bf16.msra.mxu1 %v3216_v39  ;;  %v3389_v39 = vld [vmem:[%s4625_s3 + $0x44] ss:$8 sps:$4 sm:$0xff]  }
  0x98   :  { %1735 = vmatpush1.bf16.msra.mxu0 %v3213_v38  ;;  %1818 = vmatprep.subr.bf16.mxu1 %v3224_v41  ;;  %v3384_v38 = vld [vmem:[%s4625_s3 + $0x30] ss:$8 sps:$4 sm:$0xff]   ;;  %v3299_v41 = vld [vmem:[%s4623_s1 + $0x4cc] ss:$16 sps:$4 sm:$0xff]  }
  0x99   :  { %1736 = vmatprep.subr.bf16.mxu0 %v3221_v40  ;;  %v3294_v40 = vld [vmem:[%s4623_s1 + $0x4a8] ss:$16 sps:$4 sm:$0xff]  }
  0x9b   :  { %1819 = vmatpush1.bf16.msra.mxu1 %v3222_v43  ;;  %v3392_v43 = vld [vmem:[%s4625_s3 + $0x54] ss:$8 sps:$4 sm:$0xff]  }
  0x9c   :  { %1737 = vmatpush1.bf16.msra.mxu0 %v3219_v42  ;;  %1820 = vmatprep.subr.bf16.mxu1 %v3230_v45  ;;  %v3387_v42 = vld [vmem:[%s4625_s3 + $0x40] ss:$8 sps:$4 sm:$0xff]   ;;  %v3390_v45 = vld [vmem:[%s4625_s3 + $0x50] ss:$8 sps:$4 sm:$0xff]  }
  0x9d   :  { %1738 = vmatprep.subr.bf16.mxu0 %v3227_v44  ;;  %v3297_v44 = vld [vmem:[%s4623_s1 + $0x4c8] ss:$16 sps:$4 sm:$0xff]  }
  0x9f   :  { %1821 = vmatpush1.bf16.msra.mxu1 %v3228_v47  ;;  %v3395_v47 = vld [vmem:[%s4625_s3 + $0x64] ss:$8 sps:$4 sm:$0xff]  }
  0xa0   :  { %1739 = vmatpush1.bf16.msra.mxu0 %v3225_v46  ;;  %1822 = vmatprep.subr.bf16.mxu1 %v3236_v49  ;;  %v3302_v46 = vld [vmem:[%s4623_s1 + $0x4ec] ss:$16 sps:$4 sm:$0xff]   ;;  %v3393_v49 = vld [vmem:[%s4625_s3 + $0x60] ss:$8 sps:$4 sm:$0xff]  }
  0xa1   :  { %1740 = vmatprep.subr.bf16.mxu0 %v3233_v48  ;;  %v3300_v48 = vld [vmem:[%s4623_s1 + $0x4e8] ss:$16 sps:$4 sm:$0xff]  }
  0xa3   :  { %1823 = vmatpush1.bf16.msra.mxu1 %v3234_v51  ;;  %v3398_v51 = vld [vmem:[%s4625_s3 + $0x74] ss:$8 sps:$4 sm:$0xff]  }
  0xa4   :  { %1741 = vmatpush1.bf16.msra.mxu0 %v3231_v50  ;;  %1824 = vmatprep.subr.bf16.mxu1 %v3242_v54  ;;  %v3305_v50 = vld [vmem:[%s4623_s1 + $0x50c] ss:$16 sps:$4 sm:$0xff]   ;;  %v3396_v54 = vld [vmem:[%s4625_s3 + $0x70] ss:$8 sps:$4 sm:$0xff]  }
  0xa5   :  { %1742 = vmatprep.subr.bf16.mxu0 %v3239_v53  ;;  %v3303_v53 = vld [vmem:[%s4623_s1 + $0x508] ss:$16 sps:$4 sm:$0xff]  }
  0xa7   :  { %1825 = vmatpush1.bf16.msra.mxu1 %v3240_v56  ;;  %v3401_v56 = vld [vmem:[%s4625_s3 + $0x84] ss:$8 sps:$4 sm:$0xff]  }
  0xa8   :  { %1743 = vmatpush1.bf16.msra.mxu0 %v3237_v55  ;;  %1826 = vmatprep.subr.bf16.mxu1 %v3248_v58  ;;  %v3308_v55 = vld [vmem:[%s4623_s1 + $0x52c] ss:$16 sps:$4 sm:$0xff]   ;;  %v3399_v58 = vld [vmem:[%s4625_s3 + $0x80] ss:$8 sps:$4 sm:$0xff]  }
  0xa9   :  { %1744 = vmatprep.subr.bf16.mxu0 %v3245_v57  ;;  %v3306_v57 = vld [vmem:[%s4623_s1 + $0x528] ss:$16 sps:$4 sm:$0xff]  }
  0xab   :  { %1827 = vmatpush1.bf16.msra.mxu1 %v3246_v60  ;;  %v3404_v60 = vld [vmem:[%s4625_s3 + $0x94] ss:$8 sps:$4 sm:$0xff]  }
  0xac   :  { %1745 = vmatpush1.bf16.msra.mxu0 %v3243_v59  ;;  %1828 = vmatprep.subr.bf16.mxu1 %v3254_v62  ;;  %v3311_v59 = vld [vmem:[%s4623_s1 + $0x54c] ss:$16 sps:$4 sm:$0xff]   ;;  %v3402_v62 = vld [vmem:[%s4625_s3 + $0x90] ss:$8 sps:$4 sm:$0xff]  }
  0xad   :  { %1746 = vmatprep.subr.bf16.mxu0 %v3251_v61  ;;  %v3309_v61 = vld [vmem:[%s4623_s1 + $0x548] ss:$16 sps:$4 sm:$0xff]  }
  0xaf   :  { %1829 = vmatpush1.bf16.msra.mxu1 %v3252_v0  ;;  %v3407_v0 = vld [vmem:[%s4625_s3 + $0xa4] ss:$8 sps:$4 sm:$0xff]  }
  0xb0   :  { %1747 = vmatpush1.bf16.msra.mxu0 %v3249_v63  ;;  %1830 = vmatprep.subr.bf16.mxu1 %v3260_v2  ;;  %v3314_v63 = vld [vmem:[%s4623_s1 + $0x56c] ss:$16 sps:$4 sm:$0xff]   ;;  %v3405_v2 = vld [vmem:[%s4625_s3 + $0xa0] ss:$8 sps:$4 sm:$0xff]  }
  0xb1   :  { %1748 = vmatprep.subr.bf16.mxu0 %v3257_v1  ;;  %v3312_v1 = vld [vmem:[%s4623_s1 + $0x568] ss:$16 sps:$4 sm:$0xff]  }
  0xb3   :  { %1831 = vmatpush1.bf16.msra.mxu1 %v3258_v4  ;;  %v3410_v4 = vld [vmem:[%s4625_s3 + $0xb4] ss:$8 sps:$4 sm:$0xff]  }
  0xb4   :  { %1749 = vmatpush1.bf16.msra.mxu0 %v3255_v3  ;;  %1832 = vmatprep.subr.bf16.mxu1 %v3266_v6  ;;  %v3317_v3 = vld [vmem:[%s4623_s1 + $0x58c] ss:$16 sps:$4 sm:$0xff]   ;;  %v3408_v6 = vld [vmem:[%s4625_s3 + $0xb0] ss:$8 sps:$4 sm:$0xff]  }
  0xb5   :  { %1750 = vmatprep.subr.bf16.mxu0 %v3263_v5  ;;  %v3315_v5 = vld [vmem:[%s4623_s1 + $0x588] ss:$16 sps:$4 sm:$0xff]  }
  0xb7   :  { %1833 = vmatpush1.bf16.msra.mxu1 %v3264_v9  ;;  %v3413_v9 = vld [vmem:[%s4625_s3 + $0xc4] ss:$8 sps:$4 sm:$0xff]  }
  0xb8   :  { %1751 = vmatpush1.bf16.msra.mxu0 %v3261_v7  ;;  %1834 = vmatprep.subr.bf16.mxu1 %v3272_v12  ;;  %v3320_v7 = vld [vmem:[%s4623_s1 + $0x5ac] ss:$16 sps:$4 sm:$0xff]   ;;  %v3411_v12 = vld [vmem:[%s4625_s3 + $0xc0] ss:$8 sps:$4 sm:$0xff]  }
  0xb9   :  { %1752 = vmatprep.subr.bf16.mxu0 %v3269_v10  ;;  %v3318_v10 = vld [vmem:[%s4623_s1 + $0x5a8] ss:$16 sps:$4 sm:$0xff]  }
  0xbb   :  { %1835 = vmatpush1.bf16.msra.mxu1 %v3270_v14  ;;  %v3416_v14 = vld [vmem:[%s4625_s3 + $0xd4] ss:$8 sps:$4 sm:$0xff]  }
  0xbc   :  { %1753 = vmatpush1.bf16.msra.mxu0 %v3267_v13  ;;  %1836 = vmatprep.subr.bf16.mxu1 %v3278_v17  ;;  %v3323_v13 = vld [vmem:[%s4623_s1 + $0x5cc] ss:$16 sps:$4 sm:$0xff]   ;;  %v3414_v17 = vld [vmem:[%s4625_s3 + $0xd0] ss:$8 sps:$4 sm:$0xff]  }
  0xbd   :  { %1754 = vmatprep.subr.bf16.mxu0 %v3275_v15  ;;  %v3321_v15 = vld [vmem:[%s4623_s1 + $0x5c8] ss:$16 sps:$4 sm:$0xff]  }
  0xbf   :  { %1837 = vmatpush1.bf16.msra.mxu1 %v3276_v19  ;;  %v3324_v19 = vld [vmem:[%s4623_s1 + $0x5e8] ss:$16 sps:$4 sm:$0xff]  }
  0xc0   :  { %1755 = vmatpush1.bf16.msra.mxu0 %v3273_v18  ;;  %1847 = vmatprep.subr.bf16.mxu1 %v3281_v21  ;;  %v3326_v18 = vld [vmem:[%s4623_s1 + $0x5ec] ss:$16 sps:$4 sm:$0xff]   ;;  %v3327_v21 = vld [vmem:[%s4623_s1 + $0x608] ss:$16 sps:$4 sm:$0xff]  }
  0xc2   :  { %1839 = vmatmul.mubr.bf16.vlgmr.msra.gmra.mrb[4].mxu1 %v3751_v11  ;;  %v3377_v11 = vld [vmem:[%s4625_s3 + $0x4] ss:$8 sps:$4 sm:$0xff]  }
  0xc3   :  { %1757 = vmatmul.mubr.bf16.vlgmr.msra.gmra.mrb[0].mxu0 %v4154_v22  ;;  %1848 = vmatpush1.bf16.msra.mxu1 %v3279_v23  ;;  %v3332_v23 = vld [vmem:[%s4623_s1 + $0x62c] ss:$16 sps:$4 sm:$0xff]  }
  0xc4   :  { %1879 = vmatprep.mubr.bf16.mxu1 %v3828_v36  ;;  %1849 = vmatprep.subr.bf16.mxu1 %v3284_v25  ;;  %v3290_v36 = vld [vmem:[%s4623_s1 + $0x46c] ss:$16 sps:$4 sm:$0xff]   ;;  %v3330_v25 = vld [vmem:[%s4623_s1 + $0x628] ss:$16 sps:$4 sm:$0xff]  }
  0xc5   :  { %2333 = vmatprep.subr.bf16.mxu0 %v3377_v11  ;;  %v3339_v11 = vld [vmem:[%s4623_s1 + $0x688] ss:$16 sps:$4 sm:$0xff]  }
  0xc6   :  { %2334 = vmatpush1.bf16.msra.mxu0 %v3375_v27  ;;  %v3341_v27 = vld [vmem:[%s4623_s1 + $0x68c] ss:$16 sps:$4 sm:$0xff]  }
  0xc7   :  { %1850 = vmatpush1.bf16.msra.mxu1 %v3282_v8  ;;  %2335 = vmatprep.subr.bf16.mxu0 %v3380_v28  ;;  %v3335_v8 = vld [vmem:[%s4623_s1 + $0x64c] ss:$16 sps:$4 sm:$0xff]  }
  0xc8   :  { %1851 = vmatprep.subr.bf16.mxu1 %v3287_v26  ;;  %v3333_v26 = vld [vmem:[%s4623_s1 + $0x648] ss:$16 sps:$4 sm:$0xff]   ;;  %v3344_v28 = vld [vmem:[%s4623_s1 + $0x6ac] ss:$16 sps:$4 sm:$0xff]  }
  0xca   :  { %2336 = vmatpush1.bf16.msra.mxu0 %v3378_v29  ;;  %v3419_v29 = vld [vmem:[%s4625_s3 + $0xe4] ss:$8 sps:$4 sm:$0xff]  }
  0xcb   :  { %1852 = vmatpush1.bf16.msra.mxu1 %v3285_v52  ;;  %2337 = vmatprep.subr.bf16.mxu0 %v3383_v30  ;;  %v3342_v52 = vld [vmem:[%s4623_s1 + $0x6a8] ss:$16 sps:$4 sm:$0xff]  }
  0xcc   :  { %1853 = vmatprep.subr.bf16.mxu1 %v3290_v36  ;;  %v3347_v36 = vld [vmem:[%s4623_s1 + $0x6cc] ss:$16 sps:$4 sm:$0xff]  }
  0xce   :  { %2338 = vmatpush1.bf16.msra.mxu0 %v3381_v33 }
  0xcf   :  { %1854 = vmatpush1.bf16.msra.mxu1 %v3288_v31  ;;  %2339 = vmatprep.subr.bf16.mxu0 %v3386_v34  ;;  %v3417_v31 = vld [vmem:[%s4625_s3 + $0xe0] ss:$8 sps:$4 sm:$0xff]  }
  0xd0   :  { %1855 = vmatprep.subr.bf16.mxu1 %v3293_v32  ;;  %v3345_v34 = vld [vmem:[%s4623_s1 + $0x6c8] ss:$16 sps:$4 sm:$0xff]  }
  0xd2   :  { %2340 = vmatpush1.bf16.msra.mxu0 %v3384_v38  ;;  %v3422_v38 = vld [vmem:[%s4625_s3 + $0xf4] ss:$8 sps:$4 sm:$0xff]  }
  0xd3   :  { %1856 = vmatpush1.bf16.msra.mxu1 %v3291_v35  ;;  %2341 = vmatprep.subr.bf16.mxu0 %v3389_v39  ;;  %v3420_v39 = vld [vmem:[%s4625_s3 + $0xf0] ss:$8 sps:$4 sm:$0xff]  }
  0xd4   :  { %1857 = vmatprep.subr.bf16.mxu1 %v3296_v37  ;;  %v3350_v37 = vld [vmem:[%s4623_s1 + $0x6ec] ss:$16 sps:$4 sm:$0xff]  }
  0xd6   :  { %2342 = vmatpush1.bf16.msra.mxu0 %v3387_v42  ;;  %v3425_v42 = vld [vmem:[%s4625_s3 + $0x104] ss:$8 sps:$4 sm:$0xff]  }
  0xd7   :  { %1858 = vmatpush1.bf16.msra.mxu1 %v3294_v40  ;;  %2343 = vmatprep.subr.bf16.mxu0 %v3392_v43  ;;  %v3348_v40 = vld [vmem:[%s4623_s1 + $0x6e8] ss:$16 sps:$4 sm:$0xff]  }
  0xd8   :  { %1859 = vmatprep.subr.bf16.mxu1 %v3299_v41  ;;  %v3353_v41 = vld [vmem:[%s4623_s1 + $0x70c] ss:$16 sps:$4 sm:$0xff]   ;;  %v3351_v43 = vld [vmem:[%s4623_s1 + $0x708] ss:$16 sps:$4 sm:$0xff]  }
  0xda   :  { %2344 = vmatpush1.bf16.msra.mxu0 %v3390_v45  ;;  %v3354_v45 = vld [vmem:[%s4623_s1 + $0x728] ss:$16 sps:$4 sm:$0xff]  }
  0xdb   :  { %1860 = vmatpush1.bf16.msra.mxu1 %v3297_v44  ;;  %2345 = vmatprep.subr.bf16.mxu0 %v3395_v47  ;;  %v3356_v44 = vld [vmem:[%s4623_s1 + $0x72c] ss:$16 sps:$4 sm:$0xff]   ;;  %v3357_v47 = vld [vmem:[%s4623_s1 + $0x748] ss:$16 sps:$4 sm:$0xff]  }
  0xdc   :  { %1861 = vmatprep.subr.bf16.mxu1 %v3302_v46  ;;  %v3359_v46 = vld [vmem:[%s4623_s1 + $0x74c] ss:$16 sps:$4 sm:$0xff]  }
  0xde   :  { %2346 = vmatpush1.bf16.msra.mxu0 %v3393_v49  ;;  %v3360_v49 = vld [vmem:[%s4623_s1 + $0x768] ss:$16 sps:$4 sm:$0xff]  }
  0xdf   :  { %1862 = vmatpush1.bf16.msra.mxu1 %v3300_v48  ;;  %2347 = vmatprep.subr.bf16.mxu0 %v3398_v51  ;;  %v3362_v48 = vld [vmem:[%s4623_s1 + $0x76c] ss:$16 sps:$4 sm:$0xff]   ;;  %v3363_v51 = vld [vmem:[%s4623_s1 + $0x788] ss:$16 sps:$4 sm:$0xff]  }
  0xe0   :  { %1863 = vmatprep.subr.bf16.mxu1 %v3305_v50  ;;  %v3365_v50 = vld [vmem:[%s4623_s1 + $0x78c] ss:$16 sps:$4 sm:$0xff]  }
  0xe2   :  { %2348 = vmatpush1.bf16.msra.mxu0 %v3396_v54  ;;  %v3366_v54 = vld [vmem:[%s4623_s1 + $0x7a8] ss:$16 sps:$4 sm:$0xff]  }
  0xe3   :  { %1864 = vmatpush1.bf16.msra.mxu1 %v3303_v53  ;;  %2349 = vmatprep.subr.bf16.mxu0 %v3401_v56  ;;  %v3368_v53 = vld [vmem:[%s4623_s1 + $0x7ac] ss:$16 sps:$4 sm:$0xff]   ;;  %v3369_v56 = vld [vmem:[%s4623_s1 + $0x7c8] ss:$16 sps:$4 sm:$0xff]  }
  0xe4   :  { %1865 = vmatprep.subr.bf16.mxu1 %v3308_v55  ;;  %v3371_v55 = vld [vmem:[%s4623_s1 + $0x7cc] ss:$16 sps:$4 sm:$0xff]  }
  0xe6   :  { %2350 = vmatpush1.bf16.msra.mxu0 %v3399_v58  ;;  %v3372_v58 = vld [vmem:[%s4623_s1 + $0x7e8] ss:$16 sps:$4 sm:$0xff]  }
  0xe7   :  { %1866 = vmatpush1.bf16.msra.mxu1 %v3306_v57  ;;  %2351 = vmatprep.subr.bf16.mxu0 %v3404_v60  ;;  %v3374_v57 = vld [vmem:[%s4623_s1 + $0x7ec] ss:$16 sps:$4 sm:$0xff]  }
  0xe8   :  { %1867 = vmatprep.subr.bf16.mxu1 %v3311_v59  ;;  %v301_v59 = vlaneseq }
  0xea   :  { %2352 = vmatpush1.bf16.msra.mxu0 %v3402_v62  ;;  %v4450_v60 = vshrl.u32 %v301_v59, 7  ;;  %v4456_v62 = vld [vmem:[%s4626_s2] sm:$0xf] }
  0xeb   :  { %1868 = vmatpush1.bf16.msra.mxu1 %v3309_v61  ;;  %2353 = vmatprep.subr.bf16.mxu0 %v3407_v0 }
  0xec   :  { %1869 = vmatprep.subr.bf16.mxu1 %v3314_v63  ;;  %v303_v61 = vsub.s32 0, %v4450_v60  ;;  %v307_v63 = vsub.s32 1, %v4450_v60 }
  0xee   :  { %2354 = vmatpush1.bf16.msra.mxu0 %v3405_v2  ;;  %v304_v0 = vrot.slane %v4456_v62, %v303_v61 }
  0xef   :  { %1870 = vmatpush1.bf16.msra.mxu1 %v3312_v1  ;;  %2355 = vmatprep.subr.bf16.mxu0 %v3410_v4 }
  0xf0   :  { %1871 = vmatprep.subr.bf16.mxu1 %v3317_v3 }
  0xf2   :  { %2356 = vmatpush1.bf16.msra.mxu0 %v3408_v6 }
  0xf3   :  { %1872 = vmatpush1.bf16.msra.mxu1 %v3315_v5  ;;  %2357 = vmatprep.subr.bf16.mxu0 %v3413_v9 }
  0xf4   :  { %1873 = vmatprep.subr.bf16.mxu1 %v3320_v7 }
  0xf6   :  { %2358 = vmatpush1.bf16.msra.mxu0 %v3411_v12 }
  0xf7   :  { %1874 = vmatpush1.bf16.msra.mxu1 %v3318_v10  ;;  %2359 = vmatprep.subr.bf16.mxu0 %v3416_v14  ;;  %v3423_v14 = vld [vmem:[%s4625_s3 + $0x100] ss:$8 sps:$4 sm:$0xff]  }
  0xf8   :  { %1875 = vmatprep.subr.bf16.mxu1 %v3323_v13 }
  0xfa   :  { %2360 = vmatpush1.bf16.msra.mxu0 %v3414_v17  ;;  %v3428_v17 = vld [vmem:[%s4625_s3 + $0x114] ss:$8 sps:$4 sm:$0xff]  }
  0xfb   :  { %1876 = vmatpush1.bf16.msra.mxu1 %v3321_v15  ;;  %2361 = vmatprep.subr.bf16.mxu0 %v3419_v29  ;;  %v3478_v29 = vld [vmem:[%s4627_s5 + $0x18] sm:$0xff]  }
  0xfc   :  { %1877 = vmatprep.subr.bf16.mxu1 %v3326_v18  ;;  %v3426_v18 = vld [vmem:[%s4625_s3 + $0x110] ss:$8 sps:$4 sm:$0xff]  }
  0xfe   :  { %2362 = vmatpush1.bf16.msra.mxu0 %v3417_v31  ;;  %v3480_v31 = vld [vmem:[%s4627_s5 + $0x20] sm:$0xff]  }
  0xff   :  { %1878 = vmatpush1.bf16.msra.mxu1 %v3324_v19  ;;  %2363 = vmatprep.subr.bf16.mxu0 %v3422_v38  ;;  %v3431_v19 = vld [vmem:[%s4625_s3 + $0x124] ss:$8 sps:$4 sm:$0xff]   ;;  %v3446_v38 = vld [vmem:[%s4625_s3 + $0x174] ss:$8 sps:$4 sm:$0xff]  }
 0x100   :  { %1888 = vmatprep.subr.bf16.mxu1 %v3329_v20  ;;  %v3471_v20 = vld [vmem:[%s4627_s5 + $0x40] sm:$0xff]  }
 0x102   :  { %1880 = vmatmul.mubr.bf16.vlgmr.msra.gmra.mrb[4].mxu1 %v3951_v16  ;;  %v3338_v16 = vld [vmem:[%s4623_s1 + $0x66c] ss:$16 sps:$4 sm:$0xff]   ;;  %2364 = vmatpush1.bf16.msra.mxu0 %v3420_v39  ;;  %v3444_v39 = vld [vmem:[%s4625_s3 + $0x170] ss:$8 sps:$4 sm:$0xff]  }
 0x103   :  { %1889 = vmatpush1.bf16.msra.mxu1 %v3327_v21  ;;  %1920 = vmatprep.mubr.bf16.mxu1 %v3976_v24  ;;  %v3336_v24 = vld [vmem:[%s4623_s1 + $0x668] ss:$16 sps:$4 sm:$0xff]   ;;  %v3472_v21 = vld [vmem:[%s4627_s5] sm:$0xff]  }
 0x104   :  { %1890 = vmatprep.subr.bf16.mxu1 %v3332_v23  ;;  %2374 = vmatprep.subr.bf16.mxu0 %v3425_v42  ;;  %v3429_v23 = vld [vmem:[%s4625_s3 + $0x120] ss:$8 sps:$4 sm:$0xff]   ;;  %v3452_v42 = vld [vmem:[%s4625_s3 + $0x194] ss:$8 sps:$4 sm:$0xff]  }
 0x107   :  { %1891 = vmatpush1.bf16.msra.mxu1 %v3330_v25  ;;  %v3473_v25 = vld [vmem:[%s4627_s5 + $0x48] sm:$0xff]  }
 0x108   :  { %1892 = vmatprep.subr.bf16.mxu1 %v3335_v8  ;;  %v3474_v8 = vld [vmem:[%s4627_s5 + $0x8] sm:$0xff]  }
 0x10b   :  { %1893 = vmatpush1.bf16.msra.mxu1 %v3333_v26  ;;  %v3475_v26 = vld [vmem:[%s4627_s5 + $0x50] sm:$0xff]  }
 0x10c   :  { %1894 = vmatprep.subr.bf16.mxu1 %v3338_v16  ;;  %v3434_v16 = vld [vmem:[%s4625_s3 + $0x134] ss:$8 sps:$4 sm:$0xff]  }
 0x10f   :  { %1895 = vmatpush1.bf16.msra.mxu1 %v3336_v24  ;;  %v3432_v24 = vld [vmem:[%s4625_s3 + $0x130] ss:$8 sps:$4 sm:$0xff]  }
 0x110   :  { %1896 = vmatprep.subr.bf16.mxu1 %v3341_v27  ;;  %v3476_v27 = vld [vmem:[%s4627_s5 + $0x10] sm:$0xff]  }
 0x113   :  { %1897 = vmatpush1.bf16.msra.mxu1 %v3339_v11  ;;  %v3477_v11 = vld [vmem:[%s4627_s5 + $0x58] sm:$0xff]  }
 0x114   :  { %1898 = vmatprep.subr.bf16.mxu1 %v3344_v28  ;;  %v3437_v28 = vld [vmem:[%s4625_s3 + $0x144] ss:$8 sps:$4 sm:$0xff]  }
 0x115   :  { %v1635_v30 = vpop.f32.mrb[0].mxu1 }
 0x116   :  { %v1637_v32 = vpop.f32.mrb[1].mxu1  ;;  %v1636_v1 = vadd.f32 %v1635_v30, %v304_v0  ;;  %v3479_v30 = vld [vmem:[%s4627_s5 + $0x60] sm:$0xff]  }
 0x117   :  { %v1639_v33 = vpop.f32.mrb[2].mxu1  ;;  %1899 = vmatpush1.bf16.msra.mxu1 %v3342_v52  ;;  %v3435_v52 = vld [vmem:[%s4625_s3 + $0x140] ss:$8 sps:$4 sm:$0xff]  }
 0x118   :  { %v1640_v35 = vpop.f32.mrb[3].mxu1  ;;  %1900 = vmatprep.subr.bf16.mxu1 %v3347_v36  ;;  %v3440_v36 = vld [vmem:[%s4625_s3 + $0x154] ss:$8 sps:$4 sm:$0xff]   ;;  %v3481_v33 = vld [vmem:[%s4627_s5 + $0x68] sm:$0xff]  }
 0x119   :  { %v3482_v35 = vld [vmem:[%s4627_s5 + $0x28] sm:$0xff]  }
 0x11b   :  { %1901 = vmatpush1.bf16.msra.mxu1 %v3345_v34  ;;  %v3443_v34 = vld [vmem:[%s4625_s3 + $0x164] ss:$8 sps:$4 sm:$0xff]  }
 0x11c   :  { %1902 = vmatprep.subr.bf16.mxu1 %v3350_v37  ;;  %v3441_v37 = vld [vmem:[%s4625_s3 + $0x160] ss:$8 sps:$4 sm:$0xff]  }
 0x11f   :  { %1903 = vmatpush1.bf16.msra.mxu1 %v3348_v40  ;;  %v3449_v40 = vld [vmem:[%s4625_s3 + $0x184] ss:$8 sps:$4 sm:$0xff]  }
 0x120   :  { %1904 = vmatprep.subr.bf16.mxu1 %v3353_v41  ;;  %v3447_v41 = vld [vmem:[%s4625_s3 + $0x180] ss:$8 sps:$4 sm:$0xff]  }
 0x123   :  { %1905 = vmatpush1.bf16.msra.mxu1 %v3351_v43  ;;  %v3450_v43 = vld [vmem:[%s4625_s3 + $0x190] ss:$8 sps:$4 sm:$0xff]  }
 0x124   :  { %1906 = vmatprep.subr.bf16.mxu1 %v3356_v44  ;;  %v3455_v44 = vld [vmem:[%s4625_s3 + $0x1a4] ss:$8 sps:$4 sm:$0xff]  }
 0x127   :  { %1907 = vmatpush1.bf16.msra.mxu1 %v3354_v45  ;;  %v3453_v45 = vld [vmem:[%s4625_s3 + $0x1a0] ss:$8 sps:$4 sm:$0xff]  }
 0x128   :  { %1908 = vmatprep.subr.bf16.mxu1 %v3359_v46  ;;  %v3458_v46 = vld [vmem:[%s4625_s3 + $0x1b4] ss:$8 sps:$4 sm:$0xff]  }
 0x12b   :  { %1909 = vmatpush1.bf16.msra.mxu1 %v3357_v47  ;;  %v3456_v47 = vld [vmem:[%s4625_s3 + $0x1b0] ss:$8 sps:$4 sm:$0xff]  }
 0x12c   :  { %1910 = vmatprep.subr.bf16.mxu1 %v3362_v48  ;;  %v3461_v48 = vld [vmem:[%s4625_s3 + $0x1c4] ss:$8 sps:$4 sm:$0xff]  }
 0x12f   :  { %1911 = vmatpush1.bf16.msra.mxu1 %v3360_v49  ;;  %v3459_v49 = vld [vmem:[%s4625_s3 + $0x1c0] ss:$8 sps:$4 sm:$0xff]  }
 0x130   :  { %1912 = vmatprep.subr.bf16.mxu1 %v3365_v50  ;;  %v3464_v50 = vld [vmem:[%s4625_s3 + $0x1d4] ss:$8 sps:$4 sm:$0xff]  }
 0x133   :  { %1913 = vmatpush1.bf16.msra.mxu1 %v3363_v51  ;;  %v3462_v51 = vld [vmem:[%s4625_s3 + $0x1d0] ss:$8 sps:$4 sm:$0xff]  }
 0x134   :  { %1914 = vmatprep.subr.bf16.mxu1 %v3368_v53  ;;  %v3467_v53 = vld [vmem:[%s4625_s3 + $0x1e4] ss:$8 sps:$4 sm:$0xff]  }
 0x137   :  { %1915 = vmatpush1.bf16.msra.mxu1 %v3366_v54  ;;  %v3465_v54 = vld [vmem:[%s4625_s3 + $0x1e0] ss:$8 sps:$4 sm:$0xff]  }
 0x138   :  { %1916 = vmatprep.subr.bf16.mxu1 %v3371_v55  ;;  %v3470_v55 = vld [vmem:[%s4625_s3 + $0x1f4] ss:$8 sps:$4 sm:$0xff]  }
 0x13b   :  { %1917 = vmatpush1.bf16.msra.mxu1 %v3369_v56  ;;  %v3468_v56 = vld [vmem:[%s4625_s3 + $0x1f0] ss:$8 sps:$4 sm:$0xff]  }
 0x13c   :  { %1918 = vmatprep.subr.bf16.mxu1 %v3374_v57  ;;  %v311_v57 = vsub.s32 2, %v4450_v60 }
 0x13e   :  { %v312_v59 = vrot.slane %v4456_v62, %v311_v57 }
 0x13f   :  { %1919 = vmatpush1.bf16.msra.mxu1 %v3372_v58  ;;  %v315_v58 = vsub.s32 3, %v4450_v60 }
 0x140   :  { %2937 = vmatprep.subr.bf16.mxu1 %v3471_v20 }
 0x141   :  { %v316_v0 = vrot.slane %v4456_v62, %v315_v58 }
 0x142   :  { %1921 = vmatmul.mubr.bf16.vlgmr.msra.gmra.mrb[4].mxu1 %v4154_v22  ;;  %v308_v22 = vrot.slane %v4456_v62, %v307_v63  ;;  %v3484_v62 = vld [vmem:[%s4627_s5 + $0x30] sm:$0xff]  }
 0x143   :  { %2938 = vmatpush3.bf16.msra.mxu1 %v3472_v21 }
 0x144   :  { %v1638_v2 = vadd.f32 %v1637_v32, %v308_v22  ;;  %2939 = vmatprep.subr.bf16.mxu1 %v3473_v25  ;;  %v3438_v32 = vld [vmem:[%s4625_s3 + $0x150] ss:$8 sps:$4 sm:$0xff]  }
 0x147   :  { %2940 = vmatpush3.bf16.msra.mxu1 %v3474_v8 }
 0x148   :  { %2941 = vmatprep.subr.bf16.mxu1 %v3475_v26 }
 0x14b   :  { %2942 = vmatpush3.bf16.msra.mxu1 %v3476_v27 }
 0x14c   :  { %2943 = vmatprep.subr.bf16.mxu1 %v3477_v11 }
 0x14f   :  { %2944 = vmatpush3.bf16.msra.mxu1 %v3478_v29 }
 0x150   :  { %2945 = vmatprep.subr.bf16.mxu1 %v3479_v30 }
 0x153   :  { %2946 = vmatpush3.bf16.msra.mxu1 %v3480_v31 }
 0x154   :  { %2947 = vmatprep.subr.bf16.mxu1 %v3481_v33 }
 0x157   :  { %2948 = vmatpush3.bf16.msra.mxu1 %v3482_v35 }
 0x196   :  { %v1758_v3 = vpop.f32.mrb[0].mxu0 }
 0x197   :  { %v2960_v4 = vadd.f32 %v1758_v3, %v1636_v1  ;;  %v1760_v5 = vpop.f32.mrb[1].mxu0 }
 0x198   :  { %v2962_v6 = vadd.f32 %v1760_v5, %v1638_v2  ;;  %v1762_v7 = vpop.f32.mrb[2].mxu0 }
 0x199   :  { %v1929_v9 = vmax.f32 %v2960_v4, 0.0  ;;  %v1763_v10 = vpop.f32.mrb[3].mxu0 }
 0x19a   :  { %v1930_v12 = vmax.f32 %v2962_v6, 0.0 }
 0x19b   :  { %v1933_v15 = vpack.c.bf16 %v1929_v9, %v1929_v9 }
 0x19c   :  { %v1934_v13 = vpack.c.bf16 %v1930_v12, %v1930_v12  ;;  %v3483_v12 = vld [vmem:[%s4627_s5 + $0x70] sm:$0xff]  }
 0x19d   :  { %2949 = vmatprep.subr.bf16.mxu1 %v3483_v12 }
 0x19e   :  { %2365 = vmatprep.mubr.bf16.mxu0 %v1934_v13  ;;  %2950 = vmatpush3.bf16.msra.mxu1 %v3484_v62  ;;  %v3485_v13 = vld [vmem:[%s4627_s5 + $0x78] sm:$0xff]  }
 0x19f   :  { %2366 = vmatmul.mubr.bf16.vlgmr.msra.gmra.mrb[4].mxu0 %v1933_v15  ;;  %2951 = vmatprep.subr.bf16.mxu1 %v3485_v13  ;;  %v2001_v15 = vld [vmem:[%s4628_s4] sm:$0x3] }
 0x1a0   :  { %2375 = vmatpush1.bf16.msra.mxu0 %v3423_v14  ;;  %v3486_v14 = vld [vmem:[%s4627_s5 + $0x38] sm:$0xff]  }
 0x1a1   :  { %2376 = vmatprep.subr.bf16.mxu0 %v3428_v17  ;;  %v2006_v17 = vrot.slane %v2001_v15, %v303_v61  ;;  %v2920_v61 = vld [vmem:[%s4629_s6] ss:$0 sm:$0xff] }
 0x1a2   :  { %2952 = vmatpush3.bf16.msra.mxu1 %v3486_v14 }
 0x1a4   :  { %2377 = vmatpush1.bf16.msra.mxu0 %v3426_v18  ;;  %v2010_v18 = vrot.slane %v2001_v15, %v307_v63 }
 0x1a5   :  { %2378 = vmatprep.subr.bf16.mxu0 %v3431_v19 }
 0x1a8   :  { %2379 = vmatpush1.bf16.msra.mxu0 %v3429_v23 }
 0x1a9   :  { %2380 = vmatprep.subr.bf16.mxu0 %v3434_v16 }
 0x1ac   :  { %2381 = vmatpush1.bf16.msra.mxu0 %v3432_v24 }
 0x1ad   :  { %2382 = vmatprep.subr.bf16.mxu0 %v3437_v28 }
 0x1b0   :  { %2383 = vmatpush1.bf16.msra.mxu0 %v3435_v52 }
 0x1b1   :  { %2384 = vmatprep.subr.bf16.mxu0 %v3440_v36 }
 0x1b4   :  { %2385 = vmatpush1.bf16.msra.mxu0 %v3438_v32 }
 0x1b5   :  { %2386 = vmatprep.subr.bf16.mxu0 %v3443_v34 }
 0x1b8   :  { %2387 = vmatpush1.bf16.msra.mxu0 %v3441_v37 }
 0x1b9   :  { %2388 = vmatprep.subr.bf16.mxu0 %v3446_v38 }
 0x1bc   :  { %2389 = vmatpush1.bf16.msra.mxu0 %v3444_v39 }
 0x1bd   :  { %2390 = vmatprep.subr.bf16.mxu0 %v3449_v40 }
 0x1c0   :  { %2391 = vmatpush1.bf16.msra.mxu0 %v3447_v41 }
 0x1c1   :  { %2392 = vmatprep.subr.bf16.mxu0 %v3452_v42 }
 0x1c4   :  { %2393 = vmatpush1.bf16.msra.mxu0 %v3450_v43 }
 0x1c5   :  { %2394 = vmatprep.subr.bf16.mxu0 %v3455_v44 }
 0x1c8   :  { %2395 = vmatpush1.bf16.msra.mxu0 %v3453_v45 }
 0x1c9   :  { %2396 = vmatprep.subr.bf16.mxu0 %v3458_v46 }
 0x1cc   :  { %2397 = vmatpush1.bf16.msra.mxu0 %v3456_v47 }
 0x1cd   :  { %2398 = vmatprep.subr.bf16.mxu0 %v3461_v48 }
 0x1d0   :  { %2399 = vmatpush1.bf16.msra.mxu0 %v3459_v49 }
 0x1d1   :  { %2400 = vmatprep.subr.bf16.mxu0 %v3464_v50 }
 0x1d4   :  { %2401 = vmatpush1.bf16.msra.mxu0 %v3462_v51 }
 0x1d5   :  { %2402 = vmatprep.subr.bf16.mxu0 %v3467_v53 }
 0x1d8   :  { %2403 = vmatpush1.bf16.msra.mxu0 %v3465_v54 }
 0x1d9   :  { %2404 = vmatprep.subr.bf16.mxu0 %v3470_v55 }
 0x1dc   :  { %2405 = vmatpush1.bf16.msra.mxu0 %v3468_v56 }
 0x215   :  { %v1922_v22 = vpop.f32.mrb[4].mxu1 }
 0x216   :  { %v2963_v1 = vadd.f32 %v1922_v22, %v312_v59  ;;  %v1924_v2 = vpop.f32.mrb[5].mxu1 }
 0x217   :  { %v2964_v3 = vadd.f32 %v1924_v2, %v316_v0  ;;  %v1926_v4 = vpop.f32.mrb[6].mxu1 }
 0x218   :  { %v1931_v5 = vmax.f32 %v2963_v1, 0.0  ;;  %v1927_v6 = vpop.f32.mrb[7].mxu1 }
 0x219   :  { %v1932_v7 = vmax.f32 %v2964_v3, 0.0 }
 0x21a   :  { %v1935_v10 = vpack.c.bf16 %v1931_v5, %v1931_v5 }
 0x21b   :  { %v1936_v9 = vpack.c.bf16 %v1932_v7, %v1932_v7 }
 0x21d   :  { %2406 = vmatprep.mubr.bf16.mxu0 %v1936_v9 }
 0x21e   :  { %2407 = vmatmul.mubr.bf16.vlgmr.msra.gmra.mrb[4].mxu0 %v1935_v10 }
 0x2f1   :  { %v2408_v19 = vpop.f32.mrb[4].mxu0 }
 0x2f2   :  { %v2965_v20 = vadd.f32 %v2408_v19, %v2006_v17  ;;  %v2410_v21 = vpop.f32.mrb[5].mxu0 }
 0x2f3   :  { %v2966_v23 = vadd.f32 %v2410_v21, %v2010_v18  ;;  %v2412_v25 = vpop.f32.mrb[6].mxu0 }
 0x2f4   :  { %v2415_v8 = vmax.f32 %v2965_v20, 0.0  ;;  %v2413_v26 = vpop.f32.mrb[7].mxu0 }
 0x2f5   :  { %v2416_v16 = vmax.f32 %v2966_v23, 0.0 }
 0x2f6   :  { %v2417_v27 = vpack.c.bf16 %v2415_v8, %v2415_v8 }
 0x2f7   :  { %v2418_v24 = vpack.c.bf16 %v2416_v16, %v2416_v16 }
 0x2f9   :  { %2586 = vmatprep.mubr.bf16.mxu1 %v2418_v24 }
 0x2fa   :  { %2587 = vmatmul.mubr.bf16.vlgmr.msra.gmra.mrb[8].mxu1 %v2417_v27 }
 0x3cd   :  { %v2953_v11 = vpop.f32.mrb[8].mxu1 }
 0x3ce   :  { %v2954_v28 = vpop.f32.mrb[9].mxu1 }
 0x3cf   :  { %v2955_v60 = vadd.f32 %v2954_v28, %v2953_v11  ;;  %v2956_v63 = vpop.f32.mrb[10].mxu1 }
 0x3d0   :  { %v2957_v52 = vpop.f32.mrb[11].mxu1 }
 0x3d1   :  { %v2589_v36 = vadd.f32 %v2955_v60, %v2920_v61 }
 0x3d3   :  { %2595 = vst.msk [vmem:[%s4630_s7] sm:$0xff] %vm2594_vm0, %v2589_v36 }

// kernel: pointnet_forward.9
= control target key start
LH: loop header
LB: loop body
LE: loop exit
PB: predicated region body
PF: predicated region fallthrough
CT: control target
= control target key end

     0   :  { %12 = vsyncpa [#allocation3], 0  ;;  %s7739_s24 = smov [#allocation2]   ;;  %s9800_s0 = inlined_call_operand.vmem [shape: f32[8,1024], index: 0, kind: input, shape index: {}]   ;;  %s9801_s1 = inlined_call_operand.hbm [shape: bf16[1024,512], index: 1, kind: input, shape index: {}]   ;;  %s9802_s2 = inlined_call_operand.vmem [shape: f32[1,512], index: 2, kind: input, shape index: {}]   ;;  %s9803_s3 = inlined_call_operand.vmem [shape: bf16[512,256], index: 3, kind: input, shape index: {}]   ;;  %s9804_s4 = inlined_call_operand.vmem [shape: f32[1,256], index: 4, kind: input, shape index: {}]   ;;  %s9805_s5 = inlined_call_operand.vmem [shape: bf16[256,4096], index: 5, kind: input, shape index: {}]   ;;  %s9806_s6 = inlined_call_operand.vmem [shape: f32[1,4096], index: 6, kind: input, shape index: {}]   ;;  %s9807_s7 = inlined_call_operand.vmem [shape: f32[8,4096], index: 7, kind: output, shape index: {}]  }
   0x1   :  { %s20_s25 = sshll.u32 %s7739_s24, 4  ;;  %s7715_s28 = scalar_lea.hbm %s9801_s1, 32768  ;;  %s21_s25 = int_to_ptr.vmem [resolvable:$true] %s20_s25 }
   0x2   :  { %p7716_p0 = scmp.ne.s32.totalorder %s9801_s1, %s7715_s28  ;;  %p7719_p1 = scmp.lt.u32.totalorder %s7715_s28, %s9801_s1 }
   0x4   :  { %p7721_p2 = pnand %p7719_p1, %p7716_p0 }
   0x6   :  { %7724 = shalt.err (!%p7721_p2)
}
   0x7   :  { %s7725_s10 = scalar_lea.vmem %s21_s25, 32768  ;;  %p7730_p4 = scmp.lt.s32.totalorder %s21_s25, %s21_s25 }
   0x8   :  { %p7726_p3 = scmp.ne.s32.totalorder %s21_s25, %s7725_s10  ;;  %p7731_p5 = scmp.lt.s32.totalorder %s7725_s10, %s7725_s10 }
   0xa   :  { %p7732_p6 = por %p7731_p5, %p7730_p4 }
   0xc   :  { %p7733_p7 = pnand %p7732_p6, %p7726_p3 }
   0xe   :  { %7736 = shalt.err (!%p7733_p7)
}
   0xf   :  { %s7740_s11 = smov 256   ;;  %s7741_s12 = smov 16  }
  0x10   :  { %26 = dma.hbm_to_vmem [thread:$0]  %s9801_s1, 32768, %s21_s25, [#allocation3], %s7740_s11, %s7740_s11, %s7741_s12  }
  0x11   :  { %7737 = dma.done.wait [#allocation3], 32768  }
  0x12   :  { %7738 = vsyncadd [#allocation3], 4294934528  ;;  %v7234_v0 = vld [vmem:[#allocation2 + $0x4] ss:$16 sps:$4 sm:$0xff]   ;;  %v7236_v1 = vld [vmem:[#allocation2 + $0xc] ss:$16 sps:$4 sm:$0xff]  }
  0x13   :  { %1614 = vmatprep.subr.bf16.mxu0 %v7234_v0  ;;  %v7238_v2 = vld [vmem:[#allocation2] ss:$16 sps:$4 sm:$0xff]   ;;  %v7239_v3 = vld [vmem:[#allocation2 + $0x8] ss:$16 sps:$4 sm:$0xff]   ;;  %1778 = vmatprep.subr.bf16.mxu1 %v7236_v1  ;;  %v7240_v4 = vld [vmem:[#allocation2 + $0x24] ss:$16 sps:$4 sm:$0xff]  }
  0x14   :  { %1615 = vmatpush1.bf16.msra.mxu0 %v7238_v2  ;;  %1779 = vmatpush1.bf16.msra.mxu1 %v7239_v3  ;;  %v7242_v5 = vld [vmem:[#allocation2 + $0x2c] ss:$16 sps:$4 sm:$0xff]   ;;  %v7244_v6 = vld [vmem:[#allocation2 + $0x20] ss:$16 sps:$4 sm:$0xff]   ;;  %v7245_v7 = vld [vmem:[#allocation2 + $0x28] ss:$16 sps:$4 sm:$0xff]  }
  0x15   :  { %1616 = vmatprep.subr.bf16.mxu0 %v7240_v4  ;;  %1780 = vmatprep.subr.bf16.mxu1 %v7242_v5  ;;  %v7246_v8 = vld [vmem:[#allocation2 + $0x44] ss:$16 sps:$4 sm:$0xff]   ;;  %v7248_v9 = vld [vmem:[#allocation2 + $0x4c] ss:$16 sps:$4 sm:$0xff]   ;;  %v7250_v10 = vld [vmem:[#allocation2 + $0x40] ss:$16 sps:$4 sm:$0xff]  }
  0x16   :  { %v7251_v11 = vld [vmem:[#allocation2 + $0x48] ss:$16 sps:$4 sm:$0xff]   ;;  %v7252_v12 = vld [vmem:[#allocation2 + $0x64] ss:$16 sps:$4 sm:$0xff]   ;;  %v7254_v13 = vld [vmem:[#allocation2 + $0x6c] ss:$16 sps:$4 sm:$0xff]  }
  0x17   :  { %v7256_v14 = vld [vmem:[#allocation2 + $0x60] ss:$16 sps:$4 sm:$0xff]   ;;  %v7257_v15 = vld [vmem:[#allocation2 + $0x68] ss:$16 sps:$4 sm:$0xff]   ;;  %v7258_v16 = vld [vmem:[#allocation2 + $0x84] ss:$16 sps:$4 sm:$0xff]  }
  0x18   :  { %1617 = vmatpush1.bf16.msra.mxu0 %v7244_v6  ;;  %1781 = vmatpush1.bf16.msra.mxu1 %v7245_v7  ;;  %v7260_v17 = vld [vmem:[#allocation2 + $0x8c] ss:$16 sps:$4 sm:$0xff]   ;;  %v7262_v18 = vld [vmem:[#allocation2 + $0x80] ss:$16 sps:$4 sm:$0xff]   ;;  %v7263_v19 = vld [vmem:[#allocation2 + $0x88] ss:$16 sps:$4 sm:$0xff]  }
  0x19   :  { %1618 = vmatprep.subr.bf16.mxu0 %v7246_v8  ;;  %1782 = vmatprep.subr.bf16.mxu1 %v7248_v9  ;;  %v7264_v20 = vld [vmem:[#allocation2 + $0xa4] ss:$16 sps:$4 sm:$0xff]   ;;  %v7266_v21 = vld [vmem:[#allocation2 + $0xac] ss:$16 sps:$4 sm:$0xff]   ;;  %v7268_v22 = vld [vmem:[#allocation2 + $0xa0] ss:$16 sps:$4 sm:$0xff]  }
  0x1a   :  { %v7269_v23 = vld [vmem:[#allocation2 + $0xa8] ss:$16 sps:$4 sm:$0xff]   ;;  %v7270_v24 = vld [vmem:[#allocation2 + $0xc4] ss:$16 sps:$4 sm:$0xff]   ;;  %v7272_v25 = vld [vmem:[#allocation2 + $0xcc] ss:$16 sps:$4 sm:$0xff]  }
  0x1b   :  { %v7274_v26 = vld [vmem:[#allocation2 + $0xc0] ss:$16 sps:$4 sm:$0xff]   ;;  %v7275_v27 = vld [vmem:[#allocation2 + $0xc8] ss:$16 sps:$4 sm:$0xff]   ;;  %v7276_v28 = vld [vmem:[#allocation2 + $0xe4] ss:$16 sps:$4 sm:$0xff]  }
  0x1c   :  { %1619 = vmatpush1.bf16.msra.mxu0 %v7250_v10  ;;  %1783 = vmatpush1.bf16.msra.mxu1 %v7251_v11  ;;  %v7278_v29 = vld [vmem:[#allocation2 + $0xec] ss:$16 sps:$4 sm:$0xff]   ;;  %v7280_v30 = vld [vmem:[#allocation2 + $0xe0] ss:$16 sps:$4 sm:$0xff]   ;;  %v7281_v31 = vld [vmem:[#allocation2 + $0xe8] ss:$16 sps:$4 sm:$0xff]  }
  0x1d   :  { %1620 = vmatprep.subr.bf16.mxu0 %v7252_v12  ;;  %1784 = vmatprep.subr.bf16.mxu1 %v7254_v13  ;;  %v7282_v32 = vld [vmem:[#allocation2 + $0x104] ss:$16 sps:$4 sm:$0xff]   ;;  %v7284_v33 = vld [vmem:[#allocation2 + $0x10c] ss:$16 sps:$4 sm:$0xff]   ;;  %v7286_v34 = vld [vmem:[#allocation2 + $0x100] ss:$16 sps:$4 sm:$0xff]  }
  0x1e   :  { %v7287_v35 = vld [vmem:[#allocation2 + $0x108] ss:$16 sps:$4 sm:$0xff]   ;;  %v7288_v36 = vld [vmem:[#allocation2 + $0x124] ss:$16 sps:$4 sm:$0xff]   ;;  %v7290_v37 = vld [vmem:[#allocation2 + $0x12c] ss:$16 sps:$4 sm:$0xff]  }
  0x1f   :  { %v7292_v38 = vld [vmem:[#allocation2 + $0x120] ss:$16 sps:$4 sm:$0xff]   ;;  %v7293_v39 = vld [vmem:[#allocation2 + $0x128] ss:$16 sps:$4 sm:$0xff]   ;;  %v7294_v40 = vld [vmem:[#allocation2 + $0x144] ss:$16 sps:$4 sm:$0xff]  }
  0x20   :  { %1621 = vmatpush1.bf16.msra.mxu0 %v7256_v14  ;;  %1785 = vmatpush1.bf16.msra.mxu1 %v7257_v15  ;;  %v7296_v41 = vld [vmem:[#allocation2 + $0x14c] ss:$16 sps:$4 sm:$0xff]   ;;  %v7298_v42 = vld [vmem:[#allocation2 + $0x140] ss:$16 sps:$4 sm:$0xff]   ;;  %v7299_v43 = vld [vmem:[#allocation2 + $0x148] ss:$16 sps:$4 sm:$0xff]  }
  0x21   :  { %1622 = vmatprep.subr.bf16.mxu0 %v7258_v16  ;;  %1786 = vmatprep.subr.bf16.mxu1 %v7260_v17  ;;  %v7300_v44 = vld [vmem:[#allocation2 + $0x164] ss:$16 sps:$4 sm:$0xff]   ;;  %v7302_v45 = vld [vmem:[#allocation2 + $0x16c] ss:$16 sps:$4 sm:$0xff]   ;;  %v7304_v47 = vld [vmem:[#allocation2 + $0x160] ss:$16 sps:$4 sm:$0xff]  }
  0x22   :  { %v41_v46 = vld [vmem:[%s9800_s0 + $0x8] sm:$0xff]  ;;  %v7306_v50 = vld [vmem:[#allocation2 + $0x184] ss:$16 sps:$4 sm:$0xff]   ;;  %v7310_v52 = vld [vmem:[#allocation2 + $0x180] ss:$16 sps:$4 sm:$0xff]  }
  0x23   :  { %v49_v48 = vpack.c.bf16 %v41_v46, %v41_v46  ;;  %v7305_v49 = vld [vmem:[#allocation2 + $0x168] ss:$16 sps:$4 sm:$0xff]   ;;  %v7308_v51 = vld [vmem:[#allocation2 + $0x18c] ss:$16 sps:$4 sm:$0xff]   ;;  %v7312_v54 = vld [vmem:[#allocation2 + $0x1a4] ss:$16 sps:$4 sm:$0xff]  }
  0x24   :  { %1623 = vmatpush1.bf16.msra.mxu0 %v7262_v18  ;;  %1787 = vmatpush1.bf16.msra.mxu1 %v7263_v19  ;;  %v7311_v53 = vld [vmem:[#allocation2 + $0x188] ss:$16 sps:$4 sm:$0xff]   ;;  %v7314_v55 = vld [vmem:[#allocation2 + $0x1ac] ss:$16 sps:$4 sm:$0xff]   ;;  %v7316_v56 = vld [vmem:[#allocation2 + $0x1a0] ss:$16 sps:$4 sm:$0xff]  }
  0x25   :  { %1624 = vmatprep.subr.bf16.mxu0 %v7264_v20  ;;  %1788 = vmatprep.subr.bf16.mxu1 %v7266_v21  ;;  %v7317_v57 = vld [vmem:[#allocation2 + $0x1a8] ss:$16 sps:$4 sm:$0xff]   ;;  %v7318_v58 = vld [vmem:[#allocation2 + $0x1c4] ss:$16 sps:$4 sm:$0xff]   ;;  %v7320_v59 = vld [vmem:[#allocation2 + $0x1cc] ss:$16 sps:$4 sm:$0xff]  }
  0x26   :  { %1646 = vmatprep.mubr.bf16.mxu0 %v49_v48  ;;  %1810 = vmatprep.mubr.bf16.mxu1 %v49_v48  ;;  %v7322_v60 = vld [vmem:[#allocation2 + $0x1c0] ss:$16 sps:$4 sm:$0xff]   ;;  %v7323_v61 = vld [vmem:[#allocation2 + $0x1c8] ss:$16 sps:$4 sm:$0xff]   ;;  %v7324_v62 = vld [vmem:[#allocation2 + $0x1e4] ss:$16 sps:$4 sm:$0xff]  }
  0x27   :  { %v7326_v63 = vld [vmem:[#allocation2 + $0x1ec] ss:$16 sps:$4 sm:$0xff]   ;;  %v7328_v0 = vld [vmem:[#allocation2 + $0x1e0] ss:$16 sps:$4 sm:$0xff]   ;;  %v7329_v1 = vld [vmem:[#allocation2 + $0x1e8] ss:$16 sps:$4 sm:$0xff]  }
  0x28   :  { %1625 = vmatpush1.bf16.msra.mxu0 %v7268_v22  ;;  %1789 = vmatpush1.bf16.msra.mxu1 %v7269_v23  ;;  %v40_v2 = vld [vmem:[%s9800_s0] sm:$0xff]  ;;  %v7335_v4 = vld [vmem:[#allocation2 + $0x20c] ss:$16 sps:$4 sm:$0xff]   ;;  %v7333_v7 = vld [vmem:[#allocation2 + $0x208] ss:$16 sps:$4 sm:$0xff]  }
  0x29   :  { %1626 = vmatprep.subr.bf16.mxu0 %v7270_v24  ;;  %1790 = vmatprep.subr.bf16.mxu1 %v7272_v25  ;;  %v7332_v3 = vld [vmem:[#allocation2 + $0x204] ss:$16 sps:$4 sm:$0xff]   ;;  %v48_v5 = vpack.c.bf16 %v40_v2, %v40_v2  ;;  %v7330_v6 = vld [vmem:[#allocation2 + $0x200] ss:$16 sps:$4 sm:$0xff]   ;;  %v7341_v9 = vld [vmem:[#allocation2 + $0x22c] ss:$16 sps:$4 sm:$0xff]  }
  0x2a   :  { %v7338_v8 = vld [vmem:[#allocation2 + $0x224] ss:$16 sps:$4 sm:$0xff]   ;;  %v7336_v10 = vld [vmem:[#allocation2 + $0x220] ss:$16 sps:$4 sm:$0xff]   ;;  %v7339_v11 = vld [vmem:[#allocation2 + $0x228] ss:$16 sps:$4 sm:$0xff]  }
  0x2b   :  { %v7344_v12 = vld [vmem:[#allocation2 + $0x244] ss:$16 sps:$4 sm:$0xff]   ;;  %v7347_v13 = vld [vmem:[#allocation2 + $0x24c] ss:$16 sps:$4 sm:$0xff]   ;;  %v7342_v14 = vld [vmem:[#allocation2 + $0x240] ss:$16 sps:$4 sm:$0xff]  }
  0x2c   :  { %1627 = vmatpush1.bf16.msra.mxu0 %v7274_v26  ;;  %1791 = vmatpush1.bf16.msra.mxu1 %v7275_v27  ;;  %v7345_v15 = vld [vmem:[#allocation2 + $0x248] ss:$16 sps:$4 sm:$0xff]   ;;  %v7350_v16 = vld [vmem:[#allocation2 + $0x264] ss:$16 sps:$4 sm:$0xff]   ;;  %v7353_v17 = vld [vmem:[#allocation2 + $0x26c] ss:$16 sps:$4 sm:$0xff]  }
  0x2d   :  { %1628 = vmatprep.subr.bf16.mxu0 %v7276_v28  ;;  %1792 = vmatprep.subr.bf16.mxu1 %v7278_v29  ;;  %v7348_v18 = vld [vmem:[#allocation2 + $0x260] ss:$16 sps:$4 sm:$0xff]   ;;  %v7351_v19 = vld [vmem:[#allocation2 + $0x268] ss:$16 sps:$4 sm:$0xff]   ;;  %v7356_v20 = vld [vmem:[#allocation2 + $0x284] ss:$16 sps:$4 sm:$0xff]  }
  0x2e   :  { %v7359_v21 = vld [vmem:[#allocation2 + $0x28c] ss:$16 sps:$4 sm:$0xff]   ;;  %v7354_v22 = vld [vmem:[#allocation2 + $0x280] ss:$16 sps:$4 sm:$0xff]   ;;  %v7357_v23 = vld [vmem:[#allocation2 + $0x288] ss:$16 sps:$4 sm:$0xff]  }
  0x2f   :  { %v7362_v24 = vld [vmem:[#allocation2 + $0x2a4] ss:$16 sps:$4 sm:$0xff]   ;;  %v7365_v25 = vld [vmem:[#allocation2 + $0x2ac] ss:$16 sps:$4 sm:$0xff]   ;;  %v7360_v26 = vld [vmem:[#allocation2 + $0x2a0] ss:$16 sps:$4 sm:$0xff]  }
  0x30   :  { %1629 = vmatpush1.bf16.msra.mxu0 %v7280_v30  ;;  %1793 = vmatpush1.bf16.msra.mxu1 %v7281_v31  ;;  %v7363_v27 = vld [vmem:[#allocation2 + $0x2a8] ss:$16 sps:$4 sm:$0xff]   ;;  %v7368_v28 = vld [vmem:[#allocation2 + $0x2c4] ss:$16 sps:$4 sm:$0xff]   ;;  %v7371_v29 = vld [vmem:[#allocation2 + $0x2cc] ss:$16 sps:$4 sm:$0xff]  }
  0x31   :  { %1630 = vmatprep.subr.bf16.mxu0 %v7282_v32  ;;  %1794 = vmatprep.subr.bf16.mxu1 %v7284_v33  ;;  %v43_v30 = vld [vmem:[%s9800_s0 + $0x18] sm:$0xff]  ;;  %v7366_v31 = vld [vmem:[#allocation2 + $0x2c0] ss:$16 sps:$4 sm:$0xff]   ;;  %v7392_v46 = vld [vmem:[#allocation2 + $0x344] ss:$16 sps:$4 sm:$0xff]  }
  0x32   :  { %v51_v32 = vpack.c.bf16 %v43_v30, %v43_v30  ;;  %v7369_v33 = vld [vmem:[#allocation2 + $0x2c8] ss:$16 sps:$4 sm:$0xff]   ;;  %v7390_v48 = vld [vmem:[#allocation2 + $0x340] ss:$16 sps:$4 sm:$0xff]   ;;  %v7422_v2 = vld [vmem:[#allocation2 + $0x3e4] ss:$16 sps:$4 sm:$0xff]  }
  0x33   :  { %v7458_v30 = vld [vmem:[#allocation2 + $0x4a4] ss:$16 sps:$4 sm:$0xff]  }
  0x34   :  { %1631 = vmatpush1.bf16.msra.mxu0 %v7286_v34  ;;  %1795 = vmatpush1.bf16.msra.mxu1 %v7287_v35  ;;  %v7374_v34 = vld [vmem:[#allocation2 + $0x2e4] ss:$16 sps:$4 sm:$0xff]   ;;  %v7377_v35 = vld [vmem:[#allocation2 + $0x2ec] ss:$16 sps:$4 sm:$0xff]  }
  0x35   :  { %1632 = vmatprep.subr.bf16.mxu0 %v7288_v36  ;;  %1796 = vmatprep.subr.bf16.mxu1 %v7290_v37  ;;  %v7372_v36 = vld [vmem:[#allocation2 + $0x2e0] ss:$16 sps:$4 sm:$0xff]   ;;  %v7375_v37 = vld [vmem:[#allocation2 + $0x2e8] ss:$16 sps:$4 sm:$0xff]  }
  0x38   :  { %1633 = vmatpush1.bf16.msra.mxu0 %v7292_v38  ;;  %1797 = vmatpush1.bf16.msra.mxu1 %v7293_v39  ;;  %v7380_v38 = vld [vmem:[#allocation2 + $0x304] ss:$16 sps:$4 sm:$0xff]   ;;  %v7383_v39 = vld [vmem:[#allocation2 + $0x30c] ss:$16 sps:$4 sm:$0xff]  }
  0x39   :  { %1634 = vmatprep.subr.bf16.mxu0 %v7294_v40  ;;  %1798 = vmatprep.subr.bf16.mxu1 %v7296_v41  ;;  %v7378_v40 = vld [vmem:[#allocation2 + $0x300] ss:$16 sps:$4 sm:$0xff]   ;;  %v7381_v41 = vld [vmem:[#allocation2 + $0x308] ss:$16 sps:$4 sm:$0xff]  }
  0x3c   :  { %1635 = vmatpush1.bf16.msra.mxu0 %v7298_v42  ;;  %1799 = vmatpush1.bf16.msra.mxu1 %v7299_v43  ;;  %v7386_v42 = vld [vmem:[#allocation2 + $0x324] ss:$16 sps:$4 sm:$0xff]   ;;  %v7389_v43 = vld [vmem:[#allocation2 + $0x32c] ss:$16 sps:$4 sm:$0xff]  }
  0x3d   :  { %1636 = vmatprep.subr.bf16.mxu0 %v7300_v44  ;;  %1800 = vmatprep.subr.bf16.mxu1 %v7302_v45  ;;  %v7384_v44 = vld [vmem:[#allocation2 + $0x320] ss:$16 sps:$4 sm:$0xff]   ;;  %v7387_v45 = vld [vmem:[#allocation2 + $0x328] ss:$16 sps:$4 sm:$0xff]  }
  0x40   :  { %1637 = vmatpush1.bf16.msra.mxu0 %v7304_v47  ;;  %1801 = vmatpush1.bf16.msra.mxu1 %v7305_v49  ;;  %v7395_v47 = vld [vmem:[#allocation2 + $0x34c] ss:$16 sps:$4 sm:$0xff]   ;;  %v7393_v49 = vld [vmem:[#allocation2 + $0x348] ss:$16 sps:$4 sm:$0xff]  }
  0x41   :  { %1638 = vmatprep.subr.bf16.mxu0 %v7306_v50  ;;  %1802 = vmatprep.subr.bf16.mxu1 %v7308_v51  ;;  %v7398_v50 = vld [vmem:[#allocation2 + $0x364] ss:$16 sps:$4 sm:$0xff]   ;;  %v7401_v51 = vld [vmem:[#allocation2 + $0x36c] ss:$16 sps:$4 sm:$0xff]  }
  0x44   :  { %1639 = vmatpush1.bf16.msra.mxu0 %v7310_v52  ;;  %1803 = vmatpush1.bf16.msra.mxu1 %v7311_v53  ;;  %v7396_v52 = vld [vmem:[#allocation2 + $0x360] ss:$16 sps:$4 sm:$0xff]   ;;  %v7399_v53 = vld [vmem:[#allocation2 + $0x368] ss:$16 sps:$4 sm:$0xff]  }
  0x45   :  { %1640 = vmatprep.subr.bf16.mxu0 %v7312_v54  ;;  %1804 = vmatprep.subr.bf16.mxu1 %v7314_v55  ;;  %v7404_v54 = vld [vmem:[#allocation2 + $0x384] ss:$16 sps:$4 sm:$0xff]   ;;  %v7407_v55 = vld [vmem:[#allocation2 + $0x38c] ss:$16 sps:$4 sm:$0xff]  }
  0x48   :  { %1641 = vmatpush1.bf16.msra.mxu0 %v7316_v56  ;;  %1805 = vmatpush1.bf16.msra.mxu1 %v7317_v57  ;;  %v7402_v56 = vld [vmem:[#allocation2 + $0x380] ss:$16 sps:$4 sm:$0xff]   ;;  %v7405_v57 = vld [vmem:[#allocation2 + $0x388] ss:$16 sps:$4 sm:$0xff]  }
  0x49   :  { %1642 = vmatprep.subr.bf16.mxu0 %v7318_v58  ;;  %1806 = vmatprep.subr.bf16.mxu1 %v7320_v59  ;;  %v7410_v58 = vld [vmem:[#allocation2 + $0x3a4] ss:$16 sps:$4 sm:$0xff]   ;;  %v7413_v59 = vld [vmem:[#allocation2 + $0x3ac] ss:$16 sps:$4 sm:$0xff]  }
  0x4c   :  { %1643 = vmatpush1.bf16.msra.mxu0 %v7322_v60  ;;  %1807 = vmatpush1.bf16.msra.mxu1 %v7323_v61  ;;  %v7408_v60 = vld [vmem:[#allocation2 + $0x3a0] ss:$16 sps:$4 sm:$0xff]   ;;  %v7411_v61 = vld [vmem:[#allocation2 + $0x3a8] ss:$16 sps:$4 sm:$0xff]  }
  0x4d   :  { %1644 = vmatprep.subr.bf16.mxu0 %v7324_v62  ;;  %1808 = vmatprep.subr.bf16.mxu1 %v7326_v63  ;;  %v7416_v62 = vld [vmem:[#allocation2 + $0x3c4] ss:$16 sps:$4 sm:$0xff]   ;;  %v7419_v63 = vld [vmem:[#allocation2 + $0x3cc] ss:$16 sps:$4 sm:$0xff]  }
  0x50   :  { %1645 = vmatpush1.bf16.msra.mxu0 %v7328_v0  ;;  %1809 = vmatpush1.bf16.msra.mxu1 %v7329_v1  ;;  %v7414_v0 = vld [vmem:[#allocation2 + $0x3c0] ss:$16 sps:$4 sm:$0xff]   ;;  %v7417_v1 = vld [vmem:[#allocation2 + $0x3c8] ss:$16 sps:$4 sm:$0xff]  }
  0x51   :  { %1655 = vmatprep.subr.bf16.mxu0 %v7332_v3  ;;  %1819 = vmatprep.subr.bf16.mxu1 %v7335_v4  ;;  %v7425_v3 = vld [vmem:[#allocation2 + $0x3ec] ss:$16 sps:$4 sm:$0xff]   ;;  %v7420_v4 = vld [vmem:[#allocation2 + $0x3e0] ss:$16 sps:$4 sm:$0xff]  }
  0x53   :  { %1647 = vmatmul.mubr.bf16.vlgmr.msra.gmra.mrb[0].mxu0 %v48_v5  ;;  %1811 = vmatmul.mubr.bf16.vlgmr.msra.gmra.mrb[0].mxu1 %v48_v5  ;;  %v7423_v5 = vld [vmem:[#allocation2 + $0x3e8] ss:$16 sps:$4 sm:$0xff]  }
  0x54   :  { %1656 = vmatpush1.bf16.msra.mxu0 %v7330_v6  ;;  %1820 = vmatpush1.bf16.msra.mxu1 %v7333_v7  ;;  %v7428_v6 = vld [vmem:[#allocation2 + $0x404] ss:$16 sps:$4 sm:$0xff]  }
  0x55   :  { %1657 = vmatprep.subr.bf16.mxu0 %v7338_v8  ;;  %1821 = vmatprep.subr.bf16.mxu1 %v7341_v9  ;;  %v42_v7 = vld [vmem:[%s9800_s0 + $0x10] sm:$0xff]  ;;  %v7431_v8 = vld [vmem:[#allocation2 + $0x40c] ss:$16 sps:$4 sm:$0xff]  }
  0x56   :  { %1687 = vmatprep.mubr.bf16.mxu0 %v51_v32  ;;  %1851 = vmatprep.mubr.bf16.mxu1 %v51_v32  ;;  %v7426_v9 = vld [vmem:[#allocation2 + $0x400] ss:$16 sps:$4 sm:$0xff]  }
  0x57   :  { %v7456_v32 = vld [vmem:[#allocation2 + $0x4a0] ss:$16 sps:$4 sm:$0xff]  }
  0x58   :  { %1658 = vmatpush1.bf16.msra.mxu0 %v7336_v10  ;;  %1822 = vmatpush1.bf16.msra.mxu1 %v7339_v11  ;;  %v7429_v10 = vld [vmem:[#allocation2 + $0x408] ss:$16 sps:$4 sm:$0xff]   ;;  %v50_v11 = vpack.c.bf16 %v42_v7, %v42_v7  ;;  %v7521_v7 = vld [vmem:[#allocation2 + $0x5ec] ss:$16 sps:$4 sm:$0xff]  }
  0x59   :  { %1659 = vmatprep.subr.bf16.mxu0 %v7344_v12  ;;  %1823 = vmatprep.subr.bf16.mxu1 %v7347_v13  ;;  %v7434_v12 = vld [vmem:[#allocation2 + $0x424] ss:$16 sps:$4 sm:$0xff]   ;;  %v7437_v13 = vld [vmem:[#allocation2 + $0x42c] ss:$16 sps:$4 sm:$0xff]  }
  0x5c   :  { %1660 = vmatpush1.bf16.msra.mxu0 %v7342_v14  ;;  %1824 = vmatpush1.bf16.msra.mxu1 %v7345_v15  ;;  %v45_v14 = vld [vmem:[%s9800_s0 + $0x28] sm:$0xff] }
  0x5d   :  { %1661 = vmatprep.subr.bf16.mxu0 %v7350_v16  ;;  %1825 = vmatprep.subr.bf16.mxu1 %v7353_v17  ;;  %v53_v15 = vpack.c.bf16 %v45_v14, %v45_v14  ;;  %v7432_v16 = vld [vmem:[#allocation2 + $0x420] ss:$16 sps:$4 sm:$0xff]   ;;  %v7435_v17 = vld [vmem:[#allocation2 + $0x428] ss:$16 sps:$4 sm:$0xff]  }
  0x5e   :  { %v7525_v14 = vld [vmem:[#allocation2 + $0x608] ss:$16 sps:$4 sm:$0xff]  }
  0x60   :  { %1662 = vmatpush1.bf16.msra.mxu0 %v7348_v18  ;;  %1826 = vmatpush1.bf16.msra.mxu1 %v7351_v19  ;;  %v7440_v18 = vld [vmem:[#allocation2 + $0x444] ss:$16 sps:$4 sm:$0xff]   ;;  %v7443_v19 = vld [vmem:[#allocation2 + $0x44c] ss:$16 sps:$4 sm:$0xff]  }
  0x61   :  { %1663 = vmatprep.subr.bf16.mxu0 %v7356_v20  ;;  %1827 = vmatprep.subr.bf16.mxu1 %v7359_v21  ;;  %v7438_v20 = vld [vmem:[#allocation2 + $0x440] ss:$16 sps:$4 sm:$0xff]   ;;  %v7441_v21 = vld [vmem:[#allocation2 + $0x448] ss:$16 sps:$4 sm:$0xff]  }
  0x64   :  { %1664 = vmatpush1.bf16.msra.mxu0 %v7354_v22  ;;  %1828 = vmatpush1.bf16.msra.mxu1 %v7357_v23  ;;  %v7446_v22 = vld [vmem:[#allocation2 + $0x464] ss:$16 sps:$4 sm:$0xff]   ;;  %v7449_v23 = vld [vmem:[#allocation2 + $0x46c] ss:$16 sps:$4 sm:$0xff]  }
  0x65   :  { %1665 = vmatprep.subr.bf16.mxu0 %v7362_v24  ;;  %1829 = vmatprep.subr.bf16.mxu1 %v7365_v25  ;;  %v7444_v24 = vld [vmem:[#allocation2 + $0x460] ss:$16 sps:$4 sm:$0xff]   ;;  %v7447_v25 = vld [vmem:[#allocation2 + $0x468] ss:$16 sps:$4 sm:$0xff]  }
  0x68   :  { %1666 = vmatpush1.bf16.msra.mxu0 %v7360_v26  ;;  %1830 = vmatpush1.bf16.msra.mxu1 %v7363_v27  ;;  %v7452_v26 = vld [vmem:[#allocation2 + $0x484] ss:$16 sps:$4 sm:$0xff]   ;;  %v7455_v27 = vld [vmem:[#allocation2 + $0x48c] ss:$16 sps:$4 sm:$0xff]  }
  0x69   :  { %1667 = vmatprep.subr.bf16.mxu0 %v7368_v28  ;;  %1831 = vmatprep.subr.bf16.mxu1 %v7371_v29  ;;  %v7450_v28 = vld [vmem:[#allocation2 + $0x480] ss:$16 sps:$4 sm:$0xff]   ;;  %v7453_v29 = vld [vmem:[#allocation2 + $0x488] ss:$16 sps:$4 sm:$0xff]  }
  0x6c   :  { %1668 = vmatpush1.bf16.msra.mxu0 %v7366_v31  ;;  %1832 = vmatpush1.bf16.msra.mxu1 %v7369_v33  ;;  %v7461_v31 = vld [vmem:[#allocation2 + $0x4ac] ss:$16 sps:$4 sm:$0xff]   ;;  %v7459_v33 = vld [vmem:[#allocation2 + $0x4a8] ss:$16 sps:$4 sm:$0xff]  }
  0x6d   :  { %1669 = vmatprep.subr.bf16.mxu0 %v7374_v34  ;;  %1833 = vmatprep.subr.bf16.mxu1 %v7377_v35  ;;  %v7464_v34 = vld [vmem:[#allocation2 + $0x4c4] ss:$16 sps:$4 sm:$0xff]   ;;  %v7467_v35 = vld [vmem:[#allocation2 + $0x4cc] ss:$16 sps:$4 sm:$0xff]  }
  0x70   :  { %1670 = vmatpush1.bf16.msra.mxu0 %v7372_v36  ;;  %1834 = vmatpush1.bf16.msra.mxu1 %v7375_v37  ;;  %v7462_v36 = vld [vmem:[#allocation2 + $0x4c0] ss:$16 sps:$4 sm:$0xff]   ;;  %v7465_v37 = vld [vmem:[#allocation2 + $0x4c8] ss:$16 sps:$4 sm:$0xff]  }
  0x71   :  { %1671 = vmatprep.subr.bf16.mxu0 %v7380_v38  ;;  %1835 = vmatprep.subr.bf16.mxu1 %v7383_v39  ;;  %v7470_v38 = vld [vmem:[#allocation2 + $0x4e4] ss:$16 sps:$4 sm:$0xff]   ;;  %v7473_v39 = vld [vmem:[#allocation2 + $0x4ec] ss:$16 sps:$4 sm:$0xff]  }
  0x74   :  { %1672 = vmatpush1.bf16.msra.mxu0 %v7378_v40  ;;  %1836 = vmatpush1.bf16.msra.mxu1 %v7381_v41  ;;  %v7468_v40 = vld [vmem:[#allocation2 + $0x4e0] ss:$16 sps:$4 sm:$0xff]   ;;  %v7471_v41 = vld [vmem:[#allocation2 + $0x4e8] ss:$16 sps:$4 sm:$0xff]  }
  0x75   :  { %1673 = vmatprep.subr.bf16.mxu0 %v7386_v42  ;;  %1837 = vmatprep.subr.bf16.mxu1 %v7389_v43  ;;  %v7476_v42 = vld [vmem:[#allocation2 + $0x504] ss:$16 sps:$4 sm:$0xff]   ;;  %v7479_v43 = vld [vmem:[#allocation2 + $0x50c] ss:$16 sps:$4 sm:$0xff]  }
  0x78   :  { %1674 = vmatpush1.bf16.msra.mxu0 %v7384_v44  ;;  %1838 = vmatpush1.bf16.msra.mxu1 %v7387_v45  ;;  %v7474_v44 = vld [vmem:[#allocation2 + $0x500] ss:$16 sps:$4 sm:$0xff]   ;;  %v7477_v45 = vld [vmem:[#allocation2 + $0x508] ss:$16 sps:$4 sm:$0xff]  }
  0x79   :  { %1675 = vmatprep.subr.bf16.mxu0 %v7392_v46  ;;  %1839 = vmatprep.subr.bf16.mxu1 %v7395_v47  ;;  %v7482_v46 = vld [vmem:[#allocation2 + $0x524] ss:$16 sps:$4 sm:$0xff]   ;;  %v7485_v47 = vld [vmem:[#allocation2 + $0x52c] ss:$16 sps:$4 sm:$0xff]  }
  0x7c   :  { %1676 = vmatpush1.bf16.msra.mxu0 %v7390_v48  ;;  %1840 = vmatpush1.bf16.msra.mxu1 %v7393_v49  ;;  %v7480_v48 = vld [vmem:[#allocation2 + $0x520] ss:$16 sps:$4 sm:$0xff]   ;;  %v7483_v49 = vld [vmem:[#allocation2 + $0x528] ss:$16 sps:$4 sm:$0xff]  }
  0x7d   :  { %1677 = vmatprep.subr.bf16.mxu0 %v7398_v50  ;;  %1841 = vmatprep.subr.bf16.mxu1 %v7401_v51  ;;  %v7488_v50 = vld [vmem:[#allocation2 + $0x544] ss:$16 sps:$4 sm:$0xff]   ;;  %v7491_v51 = vld [vmem:[#allocation2 + $0x54c] ss:$16 sps:$4 sm:$0xff]  }
  0x80   :  { %1678 = vmatpush1.bf16.msra.mxu0 %v7396_v52  ;;  %1842 = vmatpush1.bf16.msra.mxu1 %v7399_v53  ;;  %v7486_v52 = vld [vmem:[#allocation2 + $0x540] ss:$16 sps:$4 sm:$0xff]   ;;  %v7489_v53 = vld [vmem:[#allocation2 + $0x548] ss:$16 sps:$4 sm:$0xff]  }
  0x81   :  { %1679 = vmatprep.subr.bf16.mxu0 %v7404_v54  ;;  %1843 = vmatprep.subr.bf16.mxu1 %v7407_v55  ;;  %v7494_v54 = vld [vmem:[#allocation2 + $0x564] ss:$16 sps:$4 sm:$0xff]   ;;  %v7497_v55 = vld [vmem:[#allocation2 + $0x56c] ss:$16 sps:$4 sm:$0xff]  }
  0x84   :  { %1680 = vmatpush1.bf16.msra.mxu0 %v7402_v56  ;;  %1844 = vmatpush1.bf16.msra.mxu1 %v7405_v57  ;;  %v7492_v56 = vld [vmem:[#allocation2 + $0x560] ss:$16 sps:$4 sm:$0xff]   ;;  %v7495_v57 = vld [vmem:[#allocation2 + $0x568] ss:$16 sps:$4 sm:$0xff]  }
  0x85   :  { %1681 = vmatprep.subr.bf16.mxu0 %v7410_v58  ;;  %1845 = vmatprep.subr.bf16.mxu1 %v7413_v59  ;;  %v7500_v58 = vld [vmem:[#allocation2 + $0x584] ss:$16 sps:$4 sm:$0xff]   ;;  %v7503_v59 = vld [vmem:[#allocation2 + $0x58c] ss:$16 sps:$4 sm:$0xff]  }
  0x88   :  { %1682 = vmatpush1.bf16.msra.mxu0 %v7408_v60  ;;  %1846 = vmatpush1.bf16.msra.mxu1 %v7411_v61  ;;  %v7498_v60 = vld [vmem:[#allocation2 + $0x580] ss:$16 sps:$4 sm:$0xff]   ;;  %v7501_v61 = vld [vmem:[#allocation2 + $0x588] ss:$16 sps:$4 sm:$0xff]  }
  0x89   :  { %1683 = vmatprep.subr.bf16.mxu0 %v7416_v62  ;;  %1847 = vmatprep.subr.bf16.mxu1 %v7419_v63  ;;  %v7506_v62 = vld [vmem:[#allocation2 + $0x5a4] ss:$16 sps:$4 sm:$0xff]   ;;  %v7509_v63 = vld [vmem:[#allocation2 + $0x5ac] ss:$16 sps:$4 sm:$0xff]  }
  0x8c   :  { %1684 = vmatpush1.bf16.msra.mxu0 %v7414_v0  ;;  %1848 = vmatpush1.bf16.msra.mxu1 %v7417_v1  ;;  %v7504_v0 = vld [vmem:[#allocation2 + $0x5a0] ss:$16 sps:$4 sm:$0xff]   ;;  %v7507_v1 = vld [vmem:[#allocation2 + $0x5a8] ss:$16 sps:$4 sm:$0xff]  }
  0x8d   :  { %1685 = vmatprep.subr.bf16.mxu0 %v7422_v2  ;;  %1849 = vmatprep.subr.bf16.mxu1 %v7425_v3  ;;  %v7512_v2 = vld [vmem:[#allocation2 + $0x5c4] ss:$16 sps:$4 sm:$0xff]   ;;  %v7515_v3 = vld [vmem:[#allocation2 + $0x5cc] ss:$16 sps:$4 sm:$0xff]  }
  0x90   :  { %1686 = vmatpush1.bf16.msra.mxu0 %v7420_v4  ;;  %1850 = vmatpush1.bf16.msra.mxu1 %v7423_v5  ;;  %v7510_v4 = vld [vmem:[#allocation2 + $0x5c0] ss:$16 sps:$4 sm:$0xff]   ;;  %v7513_v5 = vld [vmem:[#allocation2 + $0x5c8] ss:$16 sps:$4 sm:$0xff]  }
  0x91   :  { %1696 = vmatprep.subr.bf16.mxu0 %v7428_v6  ;;  %1860 = vmatprep.subr.bf16.mxu1 %v7431_v8  ;;  %v7518_v6 = vld [vmem:[#allocation2 + $0x5e4] ss:$16 sps:$4 sm:$0xff]   ;;  %v7516_v8 = vld [vmem:[#allocation2 + $0x5e0] ss:$16 sps:$4 sm:$0xff]  }
  0x93   :  { %1688 = vmatmul.mubr.bf16.vlgmr.msra.gmra.mrb[0].mxu0 %v50_v11  ;;  %1852 = vmatmul.mubr.bf16.vlgmr.msra.gmra.mrb[0].mxu1 %v50_v11  ;;  %v44_v11 = vld [vmem:[%s9800_s0 + $0x20] sm:$0xff] }
  0x94   :  { %1697 = vmatpush1.bf16.msra.mxu0 %v7426_v9  ;;  %1861 = vmatpush1.bf16.msra.mxu1 %v7429_v10  ;;  %v7519_v9 = vld [vmem:[#allocation2 + $0x5e8] ss:$16 sps:$4 sm:$0xff]   ;;  %v7524_v10 = vld [vmem:[#allocation2 + $0x604] ss:$16 sps:$4 sm:$0xff]  }
  0x95   :  { %1698 = vmatprep.subr.bf16.mxu0 %v7434_v12  ;;  %1862 = vmatprep.subr.bf16.mxu1 %v7437_v13  ;;  %v7527_v12 = vld [vmem:[#allocation2 + $0x60c] ss:$16 sps:$4 sm:$0xff]   ;;  %v7522_v13 = vld [vmem:[#allocation2 + $0x600] ss:$16 sps:$4 sm:$0xff]  }
  0x96   :  { %1728 = vmatprep.mubr.bf16.mxu0 %v53_v15  ;;  %1892 = vmatprep.mubr.bf16.mxu1 %v53_v15  ;;  %v52_v15 = vpack.c.bf16 %v44_v11, %v44_v11  ;;  %v7617_v11 = vld [vmem:[#allocation2 + $0x7ec] ss:$16 sps:$4 sm:$0xff]  }
  0x98   :  { %1699 = vmatpush1.bf16.msra.mxu0 %v7432_v16  ;;  %1863 = vmatpush1.bf16.msra.mxu1 %v7435_v17  ;;  %v7530_v16 = vld [vmem:[#allocation2 + $0x624] ss:$16 sps:$4 sm:$0xff]   ;;  %v47_v17 = vld [vmem:[%s9800_s0 + $0x38] sm:$0xff] }
  0x99   :  { %1700 = vmatprep.subr.bf16.mxu0 %v7440_v18  ;;  %1864 = vmatprep.subr.bf16.mxu1 %v7443_v19  ;;  %v7533_v18 = vld [vmem:[#allocation2 + $0x62c] ss:$16 sps:$4 sm:$0xff]   ;;  %v7528_v19 = vld [vmem:[#allocation2 + $0x620] ss:$16 sps:$4 sm:$0xff]  }
  0x9c   :  { %1701 = vmatpush1.bf16.msra.mxu0 %v7438_v20  ;;  %1865 = vmatpush1.bf16.msra.mxu1 %v7441_v21  ;;  %v7531_v20 = vld [vmem:[#allocation2 + $0x628] ss:$16 sps:$4 sm:$0xff]   ;;  %v55_v21 = vpack.c.bf16 %v47_v17, %v47_v17 }
  0x9d   :  { %1702 = vmatprep.subr.bf16.mxu0 %v7446_v22  ;;  %1866 = vmatprep.subr.bf16.mxu1 %v7449_v23  ;;  %v7536_v22 = vld [vmem:[#allocation2 + $0x644] ss:$16 sps:$4 sm:$0xff]   ;;  %v7539_v23 = vld [vmem:[#allocation2 + $0x64c] ss:$16 sps:$4 sm:$0xff]   ;;  %v7618_v17 = vld [vmem:[%s9803_s3] ss:$8 sps:$4 sm:$0xff]  }
  0xa0   :  { %1703 = vmatpush1.bf16.msra.mxu0 %v7444_v24  ;;  %1867 = vmatpush1.bf16.msra.mxu1 %v7447_v25  ;;  %v7534_v24 = vld [vmem:[#allocation2 + $0x640] ss:$16 sps:$4 sm:$0xff]   ;;  %v7537_v25 = vld [vmem:[#allocation2 + $0x648] ss:$16 sps:$4 sm:$0xff]  }
  0xa1   :  { %1704 = vmatprep.subr.bf16.mxu0 %v7452_v26  ;;  %1868 = vmatprep.subr.bf16.mxu1 %v7455_v27  ;;  %v7542_v26 = vld [vmem:[#allocation2 + $0x664] ss:$16 sps:$4 sm:$0xff]   ;;  %v7545_v27 = vld [vmem:[#allocation2 + $0x66c] ss:$16 sps:$4 sm:$0xff]  }
  0xa4   :  { %1705 = vmatpush1.bf16.msra.mxu0 %v7450_v28  ;;  %1869 = vmatpush1.bf16.msra.mxu1 %v7453_v29  ;;  %v7540_v28 = vld [vmem:[#allocation2 + $0x660] ss:$16 sps:$4 sm:$0xff]   ;;  %v7543_v29 = vld [vmem:[#allocation2 + $0x668] ss:$16 sps:$4 sm:$0xff]  }
  0xa5   :  { %1706 = vmatprep.subr.bf16.mxu0 %v7458_v30  ;;  %1870 = vmatprep.subr.bf16.mxu1 %v7461_v31  ;;  %v7548_v30 = vld [vmem:[#allocation2 + $0x684] ss:$16 sps:$4 sm:$0xff]   ;;  %v7551_v31 = vld [vmem:[#allocation2 + $0x68c] ss:$16 sps:$4 sm:$0xff]  }
  0xa8   :  { %1707 = vmatpush1.bf16.msra.mxu0 %v7456_v32  ;;  %1871 = vmatpush1.bf16.msra.mxu1 %v7459_v33  ;;  %v7546_v32 = vld [vmem:[#allocation2 + $0x680] ss:$16 sps:$4 sm:$0xff]   ;;  %v7549_v33 = vld [vmem:[#allocation2 + $0x688] ss:$16 sps:$4 sm:$0xff]  }
  0xa9   :  { %1708 = vmatprep.subr.bf16.mxu0 %v7464_v34  ;;  %1872 = vmatprep.subr.bf16.mxu1 %v7467_v35  ;;  %v7554_v34 = vld [vmem:[#allocation2 + $0x6a4] ss:$16 sps:$4 sm:$0xff]   ;;  %v7557_v35 = vld [vmem:[#allocation2 + $0x6ac] ss:$16 sps:$4 sm:$0xff]  }
  0xac   :  { %1709 = vmatpush1.bf16.msra.mxu0 %v7462_v36  ;;  %1873 = vmatpush1.bf16.msra.mxu1 %v7465_v37  ;;  %v7552_v36 = vld [vmem:[#allocation2 + $0x6a0] ss:$16 sps:$4 sm:$0xff]   ;;  %v7555_v37 = vld [vmem:[#allocation2 + $0x6a8] ss:$16 sps:$4 sm:$0xff]  }
  0xad   :  { %1710 = vmatprep.subr.bf16.mxu0 %v7470_v38  ;;  %1874 = vmatprep.subr.bf16.mxu1 %v7473_v39  ;;  %v7560_v38 = vld [vmem:[#allocation2 + $0x6c4] ss:$16 sps:$4 sm:$0xff]   ;;  %v7563_v39 = vld [vmem:[#allocation2 + $0x6cc] ss:$16 sps:$4 sm:$0xff]  }
  0xb0   :  { %1711 = vmatpush1.bf16.msra.mxu0 %v7468_v40  ;;  %1875 = vmatpush1.bf16.msra.mxu1 %v7471_v41  ;;  %v7558_v40 = vld [vmem:[#allocation2 + $0x6c0] ss:$16 sps:$4 sm:$0xff]   ;;  %v7561_v41 = vld [vmem:[#allocation2 + $0x6c8] ss:$16 sps:$4 sm:$0xff]  }
  0xb1   :  { %1712 = vmatprep.subr.bf16.mxu0 %v7476_v42  ;;  %1876 = vmatprep.subr.bf16.mxu1 %v7479_v43  ;;  %v7566_v42 = vld [vmem:[#allocation2 + $0x6e4] ss:$16 sps:$4 sm:$0xff]   ;;  %v7569_v43 = vld [vmem:[#allocation2 + $0x6ec] ss:$16 sps:$4 sm:$0xff]  }
  0xb4   :  { %1713 = vmatpush1.bf16.msra.mxu0 %v7474_v44  ;;  %1877 = vmatpush1.bf16.msra.mxu1 %v7477_v45  ;;  %v7564_v44 = vld [vmem:[#allocation2 + $0x6e0] ss:$16 sps:$4 sm:$0xff]   ;;  %v7567_v45 = vld [vmem:[#allocation2 + $0x6e8] ss:$16 sps:$4 sm:$0xff]  }
  0xb5   :  { %1714 = vmatprep.subr.bf16.mxu0 %v7482_v46  ;;  %1878 = vmatprep.subr.bf16.mxu1 %v7485_v47  ;;  %v7572_v46 = vld [vmem:[#allocation2 + $0x704] ss:$16 sps:$4 sm:$0xff]   ;;  %v7575_v47 = vld [vmem:[#allocation2 + $0x70c] ss:$16 sps:$4 sm:$0xff]  }
  0xb8   :  { %1715 = vmatpush1.bf16.msra.mxu0 %v7480_v48  ;;  %1879 = vmatpush1.bf16.msra.mxu1 %v7483_v49  ;;  %v7570_v48 = vld [vmem:[#allocation2 + $0x700] ss:$16 sps:$4 sm:$0xff]   ;;  %v7573_v49 = vld [vmem:[#allocation2 + $0x708] ss:$16 sps:$4 sm:$0xff]  }
  0xb9   :  { %1716 = vmatprep.subr.bf16.mxu0 %v7488_v50  ;;  %1880 = vmatprep.subr.bf16.mxu1 %v7491_v51  ;;  %v7578_v50 = vld [vmem:[#allocation2 + $0x724] ss:$16 sps:$4 sm:$0xff]   ;;  %v7581_v51 = vld [vmem:[#allocation2 + $0x72c] ss:$16 sps:$4 sm:$0xff]  }
  0xbc   :  { %1717 = vmatpush1.bf16.msra.mxu0 %v7486_v52  ;;  %1881 = vmatpush1.bf16.msra.mxu1 %v7489_v53  ;;  %v7576_v52 = vld [vmem:[#allocation2 + $0x720] ss:$16 sps:$4 sm:$0xff]   ;;  %v7579_v53 = vld [vmem:[#allocation2 + $0x728] ss:$16 sps:$4 sm:$0xff]  }
  0xbd   :  { %1718 = vmatprep.subr.bf16.mxu0 %v7494_v54  ;;  %1882 = vmatprep.subr.bf16.mxu1 %v7497_v55  ;;  %v7584_v54 = vld [vmem:[#allocation2 + $0x744] ss:$16 sps:$4 sm:$0xff]   ;;  %v7587_v55 = vld [vmem:[#allocation2 + $0x74c] ss:$16 sps:$4 sm:$0xff]  }
  0xc0   :  { %1719 = vmatpush1.bf16.msra.mxu0 %v7492_v56  ;;  %1883 = vmatpush1.bf16.msra.mxu1 %v7495_v57  ;;  %v7582_v56 = vld [vmem:[#allocation2 + $0x740] ss:$16 sps:$4 sm:$0xff]   ;;  %v7585_v57 = vld [vmem:[#allocation2 + $0x748] ss:$16 sps:$4 sm:$0xff]  }
  0xc1   :  { %1720 = vmatprep.subr.bf16.mxu0 %v7500_v58  ;;  %1884 = vmatprep.subr.bf16.mxu1 %v7503_v59  ;;  %v7590_v58 = vld [vmem:[#allocation2 + $0x764] ss:$16 sps:$4 sm:$0xff]   ;;  %v7593_v59 = vld [vmem:[#allocation2 + $0x76c] ss:$16 sps:$4 sm:$0xff]  }
  0xc4   :  { %1721 = vmatpush1.bf16.msra.mxu0 %v7498_v60  ;;  %1885 = vmatpush1.bf16.msra.mxu1 %v7501_v61  ;;  %v7588_v60 = vld [vmem:[#allocation2 + $0x760] ss:$16 sps:$4 sm:$0xff]   ;;  %v7591_v61 = vld [vmem:[#allocation2 + $0x768] ss:$16 sps:$4 sm:$0xff]  }
  0xc5   :  { %1722 = vmatprep.subr.bf16.mxu0 %v7506_v62  ;;  %1886 = vmatprep.subr.bf16.mxu1 %v7509_v63  ;;  %v7596_v62 = vld [vmem:[#allocation2 + $0x784] ss:$16 sps:$4 sm:$0xff]   ;;  %v7599_v63 = vld [vmem:[#allocation2 + $0x78c] ss:$16 sps:$4 sm:$0xff]  }
  0xc8   :  { %1723 = vmatpush1.bf16.msra.mxu0 %v7504_v0  ;;  %1887 = vmatpush1.bf16.msra.mxu1 %v7507_v1  ;;  %v7594_v0 = vld [vmem:[#allocation2 + $0x780] ss:$16 sps:$4 sm:$0xff]   ;;  %v7597_v1 = vld [vmem:[#allocation2 + $0x788] ss:$16 sps:$4 sm:$0xff]  }
  0xc9   :  { %1724 = vmatprep.subr.bf16.mxu0 %v7512_v2  ;;  %1888 = vmatprep.subr.bf16.mxu1 %v7515_v3  ;;  %v7602_v2 = vld [vmem:[#allocation2 + $0x7a4] ss:$16 sps:$4 sm:$0xff]   ;;  %v7605_v3 = vld [vmem:[#allocation2 + $0x7ac] ss:$16 sps:$4 sm:$0xff]  }
  0xcc   :  { %1725 = vmatpush1.bf16.msra.mxu0 %v7510_v4  ;;  %1889 = vmatpush1.bf16.msra.mxu1 %v7513_v5  ;;  %v7600_v4 = vld [vmem:[#allocation2 + $0x7a0] ss:$16 sps:$4 sm:$0xff]   ;;  %v7603_v5 = vld [vmem:[#allocation2 + $0x7a8] ss:$16 sps:$4 sm:$0xff]  }
  0xcd   :  { %1726 = vmatprep.subr.bf16.mxu0 %v7518_v6  ;;  %1890 = vmatprep.subr.bf16.mxu1 %v7521_v7  ;;  %v7608_v6 = vld [vmem:[#allocation2 + $0x7c4] ss:$16 sps:$4 sm:$0xff]   ;;  %v7611_v7 = vld [vmem:[#allocation2 + $0x7cc] ss:$16 sps:$4 sm:$0xff]  }
  0xd0   :  { %1727 = vmatpush1.bf16.msra.mxu0 %v7516_v8  ;;  %1891 = vmatpush1.bf16.msra.mxu1 %v7519_v9  ;;  %v7606_v8 = vld [vmem:[#allocation2 + $0x7c0] ss:$16 sps:$4 sm:$0xff]   ;;  %v7609_v9 = vld [vmem:[#allocation2 + $0x7c8] ss:$16 sps:$4 sm:$0xff]  }
  0xd1   :  { %1737 = vmatprep.subr.bf16.mxu0 %v7524_v10  ;;  %1901 = vmatprep.subr.bf16.mxu1 %v7527_v12  ;;  %v7614_v10 = vld [vmem:[#allocation2 + $0x7e4] ss:$16 sps:$4 sm:$0xff]   ;;  %v7612_v12 = vld [vmem:[#allocation2 + $0x7e0] ss:$16 sps:$4 sm:$0xff]  }
  0xd3   :  { %1729 = vmatmul.mubr.bf16.vlgmr.msra.gmra.mrb[0].mxu0 %v52_v15  ;;  %1893 = vmatmul.mubr.bf16.vlgmr.msra.gmra.mrb[0].mxu1 %v52_v15  ;;  %v7620_v15 = vld [vmem:[%s9803_s3 + $0x4] ss:$8 sps:$4 sm:$0xff]  }
  0xd4   :  { %1738 = vmatpush1.bf16.msra.mxu0 %v7522_v13  ;;  %1902 = vmatpush1.bf16.msra.mxu1 %v7525_v14  ;;  %v7615_v13 = vld [vmem:[#allocation2 + $0x7e8] ss:$16 sps:$4 sm:$0xff]   ;;  %v46_v14 = vld [vmem:[%s9800_s0 + $0x30] sm:$0xff] }
  0xd5   :  { %1739 = vmatprep.subr.bf16.mxu0 %v7530_v16  ;;  %1903 = vmatprep.subr.bf16.mxu1 %v7533_v18  ;;  %v54_v16 = vpack.c.bf16 %v46_v14, %v46_v14  ;;  %v7623_v18 = vld [vmem:[%s9803_s3 + $0x14] ss:$8 sps:$4 sm:$0xff]   ;;  %v2672_v14 = vld [vmem:[%s9805_s5 + $0x780] sm:$0xff] }
  0xd6   :  { %1769 = vmatprep.mubr.bf16.mxu0 %v55_v21  ;;  %1933 = vmatprep.mubr.bf16.mxu1 %v55_v21  ;;  %v7624_v21 = vld [vmem:[%s9803_s3 + $0x20] ss:$8 sps:$4 sm:$0xff]  }
  0xd8   :  { %1740 = vmatpush1.bf16.msra.mxu0 %v7528_v19  ;;  %1904 = vmatpush1.bf16.msra.mxu1 %v7531_v20  ;;  %v7621_v19 = vld [vmem:[%s9803_s3 + $0x10] ss:$8 sps:$4 sm:$0xff]   ;;  %v7626_v20 = vld [vmem:[%s9803_s3 + $0x24] ss:$8 sps:$4 sm:$0xff]  }
  0xd9   :  { %1741 = vmatprep.subr.bf16.mxu0 %v7536_v22  ;;  %1905 = vmatprep.subr.bf16.mxu1 %v7539_v23  ;;  %v7629_v22 = vld [vmem:[%s9803_s3 + $0x34] ss:$8 sps:$4 sm:$0xff]   ;;  %v7627_v23 = vld [vmem:[%s9803_s3 + $0x30] ss:$8 sps:$4 sm:$0xff]  }
  0xdc   :  { %1742 = vmatpush1.bf16.msra.mxu0 %v7534_v24  ;;  %1906 = vmatpush1.bf16.msra.mxu1 %v7537_v25  ;;  %v7632_v24 = vld [vmem:[%s9803_s3 + $0x44] ss:$8 sps:$4 sm:$0xff]   ;;  %v7630_v25 = vld [vmem:[%s9803_s3 + $0x40] ss:$8 sps:$4 sm:$0xff]  }
  0xdd   :  { %1743 = vmatprep.subr.bf16.mxu0 %v7542_v26  ;;  %1907 = vmatprep.subr.bf16.mxu1 %v7545_v27  ;;  %v7635_v26 = vld [vmem:[%s9803_s3 + $0x54] ss:$8 sps:$4 sm:$0xff]   ;;  %v7633_v27 = vld [vmem:[%s9803_s3 + $0x50] ss:$8 sps:$4 sm:$0xff]  }
  0xe0   :  { %1744 = vmatpush1.bf16.msra.mxu0 %v7540_v28  ;;  %1908 = vmatpush1.bf16.msra.mxu1 %v7543_v29  ;;  %v7638_v28 = vld [vmem:[%s9803_s3 + $0x64] ss:$8 sps:$4 sm:$0xff]   ;;  %v7636_v29 = vld [vmem:[%s9803_s3 + $0x60] ss:$8 sps:$4 sm:$0xff]  }
  0xe1   :  { %1745 = vmatprep.subr.bf16.mxu0 %v7548_v30  ;;  %1909 = vmatprep.subr.bf16.mxu1 %v7551_v31  ;;  %v7641_v30 = vld [vmem:[%s9803_s3 + $0x74] ss:$8 sps:$4 sm:$0xff]   ;;  %v7639_v31 = vld [vmem:[%s9803_s3 + $0x70] ss:$8 sps:$4 sm:$0xff]  }
  0xe4   :  { %1746 = vmatpush1.bf16.msra.mxu0 %v7546_v32  ;;  %1910 = vmatpush1.bf16.msra.mxu1 %v7549_v33  ;;  %v7644_v32 = vld [vmem:[%s9803_s3 + $0x84] ss:$8 sps:$4 sm:$0xff]   ;;  %v7642_v33 = vld [vmem:[%s9803_s3 + $0x80] ss:$8 sps:$4 sm:$0xff]  }
  0xe5   :  { %1747 = vmatprep.subr.bf16.mxu0 %v7554_v34  ;;  %1911 = vmatprep.subr.bf16.mxu1 %v7557_v35  ;;  %v7647_v34 = vld [vmem:[%s9803_s3 + $0x94] ss:$8 sps:$4 sm:$0xff]   ;;  %v7645_v35 = vld [vmem:[%s9803_s3 + $0x90] ss:$8 sps:$4 sm:$0xff]  }
  0xe8   :  { %1748 = vmatpush1.bf16.msra.mxu0 %v7552_v36  ;;  %1912 = vmatpush1.bf16.msra.mxu1 %v7555_v37  ;;  %v7650_v36 = vld [vmem:[%s9803_s3 + $0xa4] ss:$8 sps:$4 sm:$0xff]   ;;  %v7648_v37 = vld [vmem:[%s9803_s3 + $0xa0] ss:$8 sps:$4 sm:$0xff]  }
  0xe9   :  { %1749 = vmatprep.subr.bf16.mxu0 %v7560_v38  ;;  %1913 = vmatprep.subr.bf16.mxu1 %v7563_v39  ;;  %v7653_v38 = vld [vmem:[%s9803_s3 + $0xb4] ss:$8 sps:$4 sm:$0xff]   ;;  %v7651_v39 = vld [vmem:[%s9803_s3 + $0xb0] ss:$8 sps:$4 sm:$0xff]  }
  0xec   :  { %1750 = vmatpush1.bf16.msra.mxu0 %v7558_v40  ;;  %1914 = vmatpush1.bf16.msra.mxu1 %v7561_v41  ;;  %v7656_v40 = vld [vmem:[%s9803_s3 + $0xc4] ss:$8 sps:$4 sm:$0xff]   ;;  %v7654_v41 = vld [vmem:[%s9803_s3 + $0xc0] ss:$8 sps:$4 sm:$0xff]  }
  0xed   :  { %1751 = vmatprep.subr.bf16.mxu0 %v7566_v42  ;;  %1915 = vmatprep.subr.bf16.mxu1 %v7569_v43  ;;  %v7659_v42 = vld [vmem:[%s9803_s3 + $0xd4] ss:$8 sps:$4 sm:$0xff]   ;;  %v7657_v43 = vld [vmem:[%s9803_s3 + $0xd0] ss:$8 sps:$4 sm:$0xff]  }
  0xf0   :  { %1752 = vmatpush1.bf16.msra.mxu0 %v7564_v44  ;;  %1916 = vmatpush1.bf16.msra.mxu1 %v7567_v45  ;;  %v7662_v44 = vld [vmem:[%s9803_s3 + $0xe4] ss:$8 sps:$4 sm:$0xff]   ;;  %v7660_v45 = vld [vmem:[%s9803_s3 + $0xe0] ss:$8 sps:$4 sm:$0xff]  }
  0xf1   :  { %1753 = vmatprep.subr.bf16.mxu0 %v7572_v46  ;;  %1917 = vmatprep.subr.bf16.mxu1 %v7575_v47  ;;  %v7665_v46 = vld [vmem:[%s9803_s3 + $0xf4] ss:$8 sps:$4 sm:$0xff]   ;;  %v7663_v47 = vld [vmem:[%s9803_s3 + $0xf0] ss:$8 sps:$4 sm:$0xff]  }
  0xf4   :  { %1754 = vmatpush1.bf16.msra.mxu0 %v7570_v48  ;;  %1918 = vmatpush1.bf16.msra.mxu1 %v7573_v49  ;;  %v7668_v48 = vld [vmem:[%s9803_s3 + $0x104] ss:$8 sps:$4 sm:$0xff]  }
  0xf5   :  { %1755 = vmatprep.subr.bf16.mxu0 %v7578_v50  ;;  %1919 = vmatprep.subr.bf16.mxu1 %v7581_v51  ;;  %v2432_v49 = vld [vmem:[%s9805_s5] sm:$0xff] }
  0xf6   :  { %v2448_v50 = vld [vmem:[%s9805_s5 + $0x80] sm:$0xff] }
  0xf7   :  { %v6685_v51 = vcombine.low %v2432_v49, %v2448_v50 }
  0xf8   :  { %1756 = vmatpush1.bf16.msra.mxu0 %v7576_v52  ;;  %1920 = vmatpush1.bf16.msra.mxu1 %v7579_v53  ;;  %v6686_v52 = vcombine.high %v2432_v49, %v2448_v50  ;;  %v2464_v53 = vld [vmem:[%s9805_s5 + $0x100] sm:$0xff] }
  0xf9   :  { %1757 = vmatprep.subr.bf16.mxu0 %v7584_v54  ;;  %1921 = vmatprep.subr.bf16.mxu1 %v7587_v55  ;;  %v2480_v54 = vld [vmem:[%s9805_s5 + $0x180] sm:$0xff] }
  0xfa   :  { %v6718_v55 = vcombine.high %v2464_v53, %v2480_v54 }
  0xfc   :  { %1758 = vmatpush1.bf16.msra.mxu0 %v7582_v56  ;;  %1922 = vmatpush1.bf16.msra.mxu1 %v7585_v57  ;;  %v6717_v56 = vcombine.low %v2464_v53, %v2480_v54  ;;  %v2496_v57 = vld [vmem:[%s9805_s5 + $0x200] sm:$0xff] }
  0xfd   :  { %1759 = vmatprep.subr.bf16.mxu0 %v7590_v58  ;;  %1923 = vmatprep.subr.bf16.mxu1 %v7593_v59  ;;  %v2512_v58 = vld [vmem:[%s9805_s5 + $0x280] sm:$0xff] }
  0xfe   :  { %v6750_v59 = vcombine.high %v2496_v57, %v2512_v58 }
 0x100   :  { %1760 = vmatpush1.bf16.msra.mxu0 %v7588_v60  ;;  %1924 = vmatpush1.bf16.msra.mxu1 %v7591_v61  ;;  %v6749_v60 = vcombine.low %v2496_v57, %v2512_v58  ;;  %v2528_v61 = vld [vmem:[%s9805_s5 + $0x300] sm:$0xff] }
 0x101   :  { %1761 = vmatprep.subr.bf16.mxu0 %v7596_v62  ;;  %1925 = vmatprep.subr.bf16.mxu1 %v7599_v63  ;;  %v2544_v62 = vld [vmem:[%s9805_s5 + $0x380] sm:$0xff] }
 0x102   :  { %v6782_v63 = vcombine.high %v2528_v61, %v2544_v62 }
 0x104   :  { %1762 = vmatpush1.bf16.msra.mxu0 %v7594_v0  ;;  %1926 = vmatpush1.bf16.msra.mxu1 %v7597_v1  ;;  %v6781_v0 = vcombine.low %v2528_v61, %v2544_v62  ;;  %v2560_v1 = vld [vmem:[%s9805_s5 + $0x400] sm:$0xff] }
 0x105   :  { %1763 = vmatprep.subr.bf16.mxu0 %v7602_v2  ;;  %1927 = vmatprep.subr.bf16.mxu1 %v7605_v3  ;;  %v2576_v2 = vld [vmem:[%s9805_s5 + $0x480] sm:$0xff] }
 0x106   :  { %v6814_v3 = vcombine.high %v2560_v1, %v2576_v2 }
 0x108   :  { %1764 = vmatpush1.bf16.msra.mxu0 %v7600_v4  ;;  %1928 = vmatpush1.bf16.msra.mxu1 %v7603_v5  ;;  %v6813_v4 = vcombine.low %v2560_v1, %v2576_v2  ;;  %v2592_v5 = vld [vmem:[%s9805_s5 + $0x500] sm:$0xff] }
 0x109   :  { %1765 = vmatprep.subr.bf16.mxu0 %v7608_v6  ;;  %1929 = vmatprep.subr.bf16.mxu1 %v7611_v7  ;;  %v2608_v6 = vld [vmem:[%s9805_s5 + $0x580] sm:$0xff] }
 0x10a   :  { %v6846_v7 = vcombine.high %v2592_v5, %v2608_v6  ;;  %v7666_v1 = vld [vmem:[%s9803_s3 + $0x100] ss:$8 sps:$4 sm:$0xff]  }
 0x10c   :  { %1766 = vmatpush1.bf16.msra.mxu0 %v7606_v8  ;;  %1930 = vmatpush1.bf16.msra.mxu1 %v7609_v9  ;;  %v6845_v8 = vcombine.low %v2592_v5, %v2608_v6  ;;  %v2624_v9 = vld [vmem:[%s9805_s5 + $0x600] sm:$0xff]  ;;  %v7669_v5 = vld [vmem:[%s9803_s3 + $0x110] ss:$8 sps:$4 sm:$0xff]  }
 0x10d   :  { %1767 = vmatprep.subr.bf16.mxu0 %v7614_v10  ;;  %1931 = vmatprep.subr.bf16.mxu1 %v7617_v11  ;;  %v2640_v10 = vld [vmem:[%s9805_s5 + $0x680] sm:$0xff] }
 0x10e   :  { %v6878_v11 = vcombine.high %v2624_v9, %v2640_v10  ;;  %v7674_v6 = vld [vmem:[%s9803_s3 + $0x124] ss:$8 sps:$4 sm:$0xff]  }
 0x110   :  { %1768 = vmatpush1.bf16.msra.mxu0 %v7612_v12  ;;  %1932 = vmatpush1.bf16.msra.mxu1 %v7615_v13  ;;  %v6877_v12 = vcombine.low %v2624_v9, %v2640_v10  ;;  %v2656_v13 = vld [vmem:[%s9805_s5 + $0x700] sm:$0xff]  ;;  %v7675_v9 = vld [vmem:[%s9803_s3 + $0x130] ss:$8 sps:$4 sm:$0xff]  }
 0x111   :  { %2346 = vmatprep.subr.bf16.mxu0 %v7620_v15  ;;  %5672 = vmatprep.subr.bf16.mxu1 %v6686_v52  ;;  %v6910_v15 = vcombine.high %v2656_v13, %v2672_v14  ;;  %v7680_v10 = vld [vmem:[%s9803_s3 + $0x144] ss:$8 sps:$4 sm:$0xff]  }
 0x113   :  { %1770 = vmatmul.mubr.bf16.vlgmr.msra.gmra.mrb[0].mxu0 %v54_v16  ;;  %1934 = vmatmul.mubr.bf16.vlgmr.msra.gmra.mrb[0].mxu1 %v54_v16  ;;  %v6909_v16 = vcombine.low %v2656_v13, %v2672_v14  ;;  %v7681_v13 = vld [vmem:[%s9803_s3 + $0x150] ss:$8 sps:$4 sm:$0xff]   ;;  %v7686_v14 = vld [vmem:[%s9803_s3 + $0x164] ss:$8 sps:$4 sm:$0xff]  }
 0x114   :  { %2347 = vmatpush1.bf16.msra.mxu0 %v7618_v17  ;;  %5673 = vmatpush1.bf16.msra.mxu1 %v6685_v51  ;;  %v2688_v17 = vld [vmem:[%s9805_s5 + $0x800] sm:$0xff] }
 0x115   :  { %2348 = vmatprep.subr.bf16.mxu0 %v7623_v18  ;;  %5674 = vmatprep.subr.bf16.mxu1 %v6718_v55  ;;  %v2704_v18 = vld [vmem:[%s9805_s5 + $0x880] sm:$0xff] }
 0x118   :  { %2349 = vmatpush1.bf16.msra.mxu0 %v7621_v19  ;;  %5675 = vmatpush1.bf16.msra.mxu1 %v6717_v56  ;;  %v6942_v19 = vcombine.high %v2688_v17, %v2704_v18 }
 0x119   :  { %2350 = vmatprep.subr.bf16.mxu0 %v7626_v20  ;;  %5676 = vmatprep.subr.bf16.mxu1 %v6750_v59  ;;  %v6941_v20 = vcombine.low %v2688_v17, %v2704_v18  ;;  %v7687_v17 = vld [vmem:[%s9803_s3 + $0x170] ss:$8 sps:$4 sm:$0xff]   ;;  %v7692_v18 = vld [vmem:[%s9803_s3 + $0x184] ss:$8 sps:$4 sm:$0xff]  }
 0x11c   :  { %2351 = vmatpush1.bf16.msra.mxu0 %v7624_v21  ;;  %5677 = vmatpush1.bf16.msra.mxu1 %v6749_v60  ;;  %v2720_v21 = vld [vmem:[%s9805_s5 + $0x900] sm:$0xff] }
 0x11d   :  { %2352 = vmatprep.subr.bf16.mxu0 %v7629_v22  ;;  %5678 = vmatprep.subr.bf16.mxu1 %v6782_v63  ;;  %v2736_v22 = vld [vmem:[%s9805_s5 + $0x980] sm:$0xff] }
 0x120   :  { %2353 = vmatpush1.bf16.msra.mxu0 %v7627_v23  ;;  %5679 = vmatpush1.bf16.msra.mxu1 %v6781_v0  ;;  %v6974_v23 = vcombine.high %v2720_v21, %v2736_v22 }
 0x121   :  { %2354 = vmatprep.subr.bf16.mxu0 %v7632_v24  ;;  %5680 = vmatprep.subr.bf16.mxu1 %v6814_v3  ;;  %v6973_v24 = vcombine.low %v2720_v21, %v2736_v22  ;;  %v7671_v3 = vld [vmem:[%s9803_s3 + $0x114] ss:$8 sps:$4 sm:$0xff]   ;;  %v7693_v21 = vld [vmem:[%s9803_s3 + $0x190] ss:$8 sps:$4 sm:$0xff]   ;;  %v7698_v22 = vld [vmem:[%s9803_s3 + $0x1a4] ss:$8 sps:$4 sm:$0xff]  }
 0x124   :  { %2355 = vmatpush1.bf16.msra.mxu0 %v7630_v25  ;;  %5681 = vmatpush1.bf16.msra.mxu1 %v6813_v4  ;;  %v2752_v25 = vld [vmem:[%s9805_s5 + $0xa00] sm:$0xff] }
 0x125   :  { %2356 = vmatprep.subr.bf16.mxu0 %v7635_v26  ;;  %5682 = vmatprep.subr.bf16.mxu1 %v6846_v7  ;;  %v2768_v26 = vld [vmem:[%s9805_s5 + $0xa80] sm:$0xff] }
 0x126   :  { %v7672_v7 = vld [vmem:[%s9803_s3 + $0x120] ss:$8 sps:$4 sm:$0xff]  }
 0x128   :  { %2357 = vmatpush1.bf16.msra.mxu0 %v7633_v27  ;;  %5683 = vmatpush1.bf16.msra.mxu1 %v6845_v8  ;;  %v7006_v27 = vcombine.high %v2752_v25, %v2768_v26  ;;  %v7677_v8 = vld [vmem:[%s9803_s3 + $0x134] ss:$8 sps:$4 sm:$0xff]  }
 0x129   :  { %2358 = vmatprep.subr.bf16.mxu0 %v7638_v28  ;;  %5684 = vmatprep.subr.bf16.mxu1 %v6878_v11  ;;  %v314_v28 = vlaneseq  ;;  %v7678_v11 = vld [vmem:[%s9803_s3 + $0x140] ss:$8 sps:$4 sm:$0xff]  }
 0x12c   :  { %2359 = vmatpush1.bf16.msra.mxu0 %v7636_v29  ;;  %5685 = vmatpush1.bf16.msra.mxu1 %v6877_v12  ;;  %v7005_v29 = vcombine.low %v2752_v25, %v2768_v26  ;;  %v7683_v12 = vld [vmem:[%s9803_s3 + $0x154] ss:$8 sps:$4 sm:$0xff]   ;;  %v7699_v25 = vld [vmem:[%s9803_s3 + $0x1b0] ss:$8 sps:$4 sm:$0xff]   ;;  %v7704_v26 = vld [vmem:[%s9803_s3 + $0x1c4] ss:$8 sps:$4 sm:$0xff]  }
 0x12d   :  { %2360 = vmatprep.subr.bf16.mxu0 %v7641_v30  ;;  %5686 = vmatprep.subr.bf16.mxu1 %v6910_v15  ;;  %v2784_v30 = vld [vmem:[%s9805_s5 + $0xb00] sm:$0xff] }
 0x12e   :  { %v7684_v15 = vld [vmem:[%s9803_s3 + $0x160] ss:$8 sps:$4 sm:$0xff]  }
 0x130   :  { %2361 = vmatpush1.bf16.msra.mxu0 %v7639_v31  ;;  %5687 = vmatpush1.bf16.msra.mxu1 %v6909_v16  ;;  %v2800_v31 = vld [vmem:[%s9805_s5 + $0xb80] sm:$0xff]  ;;  %v7689_v16 = vld [vmem:[%s9803_s3 + $0x174] ss:$8 sps:$4 sm:$0xff]  }
 0x131   :  { %2362 = vmatprep.subr.bf16.mxu0 %v7644_v32  ;;  %5688 = vmatprep.subr.bf16.mxu1 %v6942_v19  ;;  %v7038_v32 = vcombine.high %v2784_v30, %v2800_v31  ;;  %v7690_v19 = vld [vmem:[%s9803_s3 + $0x180] ss:$8 sps:$4 sm:$0xff]  }
 0x134   :  { %2363 = vmatpush1.bf16.msra.mxu0 %v7642_v33  ;;  %5689 = vmatpush1.bf16.msra.mxu1 %v6941_v20  ;;  %v7989_v33 = vshrl.u32 %v314_v28, 7  ;;  %v7695_v20 = vld [vmem:[%s9803_s3 + $0x194] ss:$8 sps:$4 sm:$0xff]  }
 0x135   :  { %2364 = vmatprep.subr.bf16.mxu0 %v7647_v34  ;;  %5690 = vmatprep.subr.bf16.mxu1 %v6974_v23  ;;  %v7037_v34 = vcombine.low %v2784_v30, %v2800_v31  ;;  %v7696_v23 = vld [vmem:[%s9803_s3 + $0x1a0] ss:$8 sps:$4 sm:$0xff]   ;;  %v7705_v30 = vld [vmem:[%s9803_s3 + $0x1d0] ss:$8 sps:$4 sm:$0xff]  }
 0x136   :  { %v8101_v28 = vsub.s32 2, %v7989_v33 }
 0x138   :  { %2365 = vmatpush1.bf16.msra.mxu0 %v7645_v35  ;;  %5691 = vmatpush1.bf16.msra.mxu1 %v6973_v24  ;;  %v2816_v35 = vld [vmem:[%s9805_s5 + $0xc00] sm:$0xff]  ;;  %v7701_v24 = vld [vmem:[%s9803_s3 + $0x1b4] ss:$8 sps:$4 sm:$0xff]  }
 0x139   :  { %2366 = vmatprep.subr.bf16.mxu0 %v7650_v36  ;;  %5692 = vmatprep.subr.bf16.mxu1 %v7006_v27  ;;  %v2832_v36 = vld [vmem:[%s9805_s5 + $0xc80] sm:$0xff] }
 0x13a   :  { %v7702_v27 = vld [vmem:[%s9803_s3 + $0x1c0] ss:$8 sps:$4 sm:$0xff]  }
 0x13c   :  { %2367 = vmatpush1.bf16.msra.mxu0 %v7648_v37  ;;  %5693 = vmatpush1.bf16.msra.mxu1 %v7005_v29  ;;  %v7070_v37 = vcombine.high %v2816_v35, %v2832_v36  ;;  %v7707_v29 = vld [vmem:[%s9803_s3 + $0x1d4] ss:$8 sps:$4 sm:$0xff]  }
 0x13d   :  { %2368 = vmatprep.subr.bf16.mxu0 %v7653_v38  ;;  %5694 = vmatprep.subr.bf16.mxu1 %v7038_v32  ;;  %v7998_v38 = vsub.s32 0, %v7989_v33  ;;  %v7710_v32 = vld [vmem:[%s9803_s3 + $0x1e4] ss:$8 sps:$4 sm:$0xff]  }
 0x140   :  { %2369 = vmatpush1.bf16.msra.mxu0 %v7651_v39  ;;  %5695 = vmatpush1.bf16.msra.mxu1 %v7037_v34  ;;  %v7069_v39 = vcombine.low %v2816_v35, %v2832_v36  ;;  %v7708_v34 = vld [vmem:[%s9803_s3 + $0x1e0] ss:$8 sps:$4 sm:$0xff]   ;;  %v7713_v36 = vld [vmem:[%s9803_s3 + $0x1f4] ss:$8 sps:$4 sm:$0xff]  }
 0x141   :  { %2370 = vmatprep.subr.bf16.mxu0 %v7656_v40  ;;  %v8003_v40 = vld [vmem:[%s9802_s2] sm:$0xf]  ;;  %5696 = vmatprep.subr.bf16.mxu1 %v7070_v37  ;;  %v2434_v37 = vld [vmem:[%s9805_s5 + $0x10] sm:$0xff] }
 0x142   :  { %v325_v31 = vrot.slane %v8003_v40, %v8101_v28 }
 0x144   :  { %2371 = vmatpush1.bf16.msra.mxu0 %v7654_v41  ;;  %v8006_v41 = vsub.s32 1, %v7989_v33  ;;  %5697 = vmatpush1.bf16.msra.mxu1 %v7069_v39  ;;  %v2450_v39 = vld [vmem:[%s9805_s5 + $0x90] sm:$0xff] }
 0x145   :  { %2372 = vmatprep.subr.bf16.mxu0 %v7659_v42  ;;  %v8009_v42 = vsub.s32 3, %v7989_v33 }
 0x147   :  { %v329_v49 = vrot.slane %v8003_v40, %v8009_v42 }
 0x148   :  { %2373 = vmatpush1.bf16.msra.mxu0 %v7657_v43  ;;  %v2848_v43 = vld [vmem:[%s9805_s5 + $0xd00] sm:$0xff] }
 0x149   :  { %2374 = vmatprep.subr.bf16.mxu0 %v7662_v44  ;;  %v2864_v44 = vld [vmem:[%s9805_s5 + $0xd80] sm:$0xff] }
 0x14c   :  { %2375 = vmatpush1.bf16.msra.mxu0 %v7660_v45  ;;  %v7102_v45 = vcombine.high %v2848_v43, %v2864_v44 }
 0x14d   :  { %2376 = vmatprep.subr.bf16.mxu0 %v7665_v46  ;;  %v317_v46 = vrot.slane %v8003_v40, %v7998_v38 }
 0x14e   :  { %5698 = vmatprep.subr.bf16.mxu1 %v7102_v45  ;;  %v2466_v45 = vld [vmem:[%s9805_s5 + $0x110] sm:$0xff] }
 0x150   :  { %2377 = vmatpush1.bf16.msra.mxu0 %v7663_v47  ;;  %v7101_v47 = vcombine.low %v2848_v43, %v2864_v44  ;;  %v6690_v44 = vcombine.high %v2434_v37, %v2450_v39 }
 0x151   :  { %2387 = vmatprep.subr.bf16.mxu0 %v7668_v48  ;;  %v321_v48 = vrot.slane %v8003_v40, %v8006_v41  ;;  %v7711_v40 = vld [vmem:[%s9803_s3 + $0x1f0] ss:$8 sps:$4 sm:$0xff]  }
 0x152   :  { %5699 = vmatpush1.bf16.msra.mxu1 %v7101_v47  ;;  %v6689_v47 = vcombine.low %v2434_v37, %v2450_v39  ;;  %v2880_v37 = vld [vmem:[%s9805_s5 + $0xe00] sm:$0xff] }
 0x153   :  { %v2896_v39 = vld [vmem:[%s9805_s5 + $0xe80] sm:$0xff] }
 0x1e6   :  { %v1771_v50 = vpop.f32.mrb[0].mxu0  ;;  %v8023_v51 = vpop.f32.mrb[0].mxu1 }
 0x1e7   :  { %v7197_v52 = vadd.f32 %v1771_v50, %v317_v46  ;;  %v1773_v53 = vpop.f32.mrb[1].mxu0  ;;  %v1937_v54 = vpop.f32.mrb[1].mxu1  ;;  %v7199_v35 = vadd.f32 %v8023_v51, %v325_v31  ;;  %v2482_v46 = vld [vmem:[%s9805_s5 + $0x190] sm:$0xff] }
 0x1e8   :  { %v7198_v55 = vadd.f32 %v1773_v53, %v321_v48  ;;  %v7200_v56 = vadd.f32 %v1937_v54, %v329_v49  ;;  %v1775_v57 = vpop.f32.mrb[2].mxu0  ;;  %v1939_v58 = vpop.f32.mrb[2].mxu1  ;;  %v6722_v49 = vcombine.high %v2466_v45, %v2482_v46  ;;  %v2498_v50 = vld [vmem:[%s9805_s5 + $0x210] sm:$0xff] }
 0x1e9   :  { %v1942_v59 = vmax.f32 %v7197_v52, 0.0  ;;  %v1776_v60 = vpop.f32.mrb[3].mxu0  ;;  %v1940_v61 = vpop.f32.mrb[3].mxu1  ;;  %v1944_v43 = vmax.f32 %v7199_v35, 0.0  ;;  %v2514_v51 = vld [vmem:[%s9805_s5 + $0x290] sm:$0xff]  ;;  %v6721_v52 = vcombine.low %v2466_v45, %v2482_v46  ;;  %v7133_v45 = vcombine.low %v2880_v37, %v2896_v39 }
 0x1ea   :  { %v1943_v62 = vmax.f32 %v7198_v55, 0.0  ;;  %v1945_v63 = vmax.f32 %v7200_v56, 0.0  ;;  %v6754_v53 = vcombine.high %v2498_v50, %v2514_v51  ;;  %v2530_v54 = vld [vmem:[%s9805_s5 + $0x310] sm:$0xff]  ;;  %v6753_v56 = vcombine.low %v2498_v50, %v2514_v51 }
 0x1eb   :  { %v1946_v2 = vpack.c.bf16 %v1942_v59, %v1942_v59  ;;  %v1948_v48 = vpack.c.bf16 %v1944_v43, %v1944_v43  ;;  %v2546_v55 = vld [vmem:[%s9805_s5 + $0x390] sm:$0xff]  ;;  %v7134_v43 = vcombine.high %v2880_v37, %v2896_v39  ;;  %v2561_v37 = vld [vmem:[%s9805_s5 + $0x408] sm:$0xff] }
 0x1ec   :  { %v1947_v0 = vpack.c.bf16 %v1943_v62, %v1943_v62  ;;  %v1949_v4 = vpack.c.bf16 %v1945_v63, %v1945_v63  ;;  %v6786_v57 = vcombine.high %v2530_v54, %v2546_v55  ;;  %v2562_v58 = vld [vmem:[%s9805_s5 + $0x410] sm:$0xff]  ;;  %v6785_v60 = vcombine.low %v2530_v54, %v2546_v55  ;;  %v2577_v39 = vld [vmem:[%s9805_s5 + $0x488] sm:$0xff] }
 0x1ed   :  { %v2578_v59 = vld [vmem:[%s9805_s5 + $0x490] sm:$0xff]  ;;  %5700 = vmatprep.subr.bf16.mxu1 %v7134_v43  ;;  %v2580_v43 = vld [vmem:[%s9805_s5 + $0x4a0] sm:$0xff] }
 0x1ee   :  { %2378 = vmatprep.mubr.bf16.mxu0 %v1947_v0  ;;  %v6818_v61 = vcombine.high %v2562_v58, %v2578_v59  ;;  %v2594_v62 = vld [vmem:[%s9805_s5 + $0x510] sm:$0xff]  ;;  %v6817_v0 = vcombine.low %v2562_v58, %v2578_v59  ;;  %5701 = vmatpush1.bf16.msra.mxu1 %v7133_v45  ;;  %v2436_v58 = vld [vmem:[%s9805_s5 + $0x20] sm:$0xff] }
 0x1ef   :  { %2379 = vmatmul.mubr.bf16.vlgmr.msra.gmra.mrb[4].mxu0 %v1946_v2  ;;  %v2610_v63 = vld [vmem:[%s9805_s5 + $0x590] sm:$0xff] }
 0x1f0   :  { %2388 = vmatpush1.bf16.msra.mxu0 %v7666_v1  ;;  %2419 = vmatprep.mubr.bf16.mxu0 %v1949_v4  ;;  %v6850_v1 = vcombine.high %v2594_v62, %v2610_v63  ;;  %v2626_v2 = vld [vmem:[%s9805_s5 + $0x610] sm:$0xff]  ;;  %v6849_v4 = vcombine.low %v2594_v62, %v2610_v63 }
 0x1f1   :  { %2389 = vmatprep.subr.bf16.mxu0 %v7671_v3  ;;  %v2642_v3 = vld [vmem:[%s9805_s5 + $0x690] sm:$0xff] }
 0x1f2   :  { %v2850_v31 = vld [vmem:[%s9805_s5 + $0xd10] sm:$0xff] }
 0x1f3   :  { %v2914_v50 = vld [vmem:[%s9805_s5 + $0xf10] sm:$0xff] }
 0x1f4   :  { %2390 = vmatpush1.bf16.msra.mxu0 %v7669_v5  ;;  %v6882_v5 = vcombine.high %v2626_v2, %v2642_v3 }
 0x1f5   :  { %2391 = vmatprep.subr.bf16.mxu0 %v7674_v6  ;;  %v2658_v6 = vld [vmem:[%s9805_s5 + $0x710] sm:$0xff] }
 0x1f8   :  { %2392 = vmatpush1.bf16.msra.mxu0 %v7672_v7  ;;  %v2674_v7 = vld [vmem:[%s9805_s5 + $0x790] sm:$0xff] }
 0x1f9   :  { %2393 = vmatprep.subr.bf16.mxu0 %v7677_v8  ;;  %v6881_v8 = vcombine.low %v2626_v2, %v2642_v3 }
 0x1fc   :  { %2394 = vmatpush1.bf16.msra.mxu0 %v7675_v9  ;;  %v6914_v9 = vcombine.high %v2658_v6, %v2674_v7 }
 0x1fd   :  { %2395 = vmatprep.subr.bf16.mxu0 %v7680_v10  ;;  %v2690_v10 = vld [vmem:[%s9805_s5 + $0x810] sm:$0xff] }
 0x200   :  { %2396 = vmatpush1.bf16.msra.mxu0 %v7678_v11  ;;  %v2706_v11 = vld [vmem:[%s9805_s5 + $0x890] sm:$0xff] }
 0x201   :  { %2397 = vmatprep.subr.bf16.mxu0 %v7683_v12  ;;  %v6913_v12 = vcombine.low %v2658_v6, %v2674_v7 }
 0x204   :  { %2398 = vmatpush1.bf16.msra.mxu0 %v7681_v13  ;;  %v6946_v13 = vcombine.high %v2690_v10, %v2706_v11 }
 0x205   :  { %2399 = vmatprep.subr.bf16.mxu0 %v7686_v14  ;;  %v2722_v14 = vld [vmem:[%s9805_s5 + $0x910] sm:$0xff] }
 0x208   :  { %2400 = vmatpush1.bf16.msra.mxu0 %v7684_v15  ;;  %v2738_v15 = vld [vmem:[%s9805_s5 + $0x990] sm:$0xff] }
 0x209   :  { %2401 = vmatprep.subr.bf16.mxu0 %v7689_v16  ;;  %v6945_v16 = vcombine.low %v2690_v10, %v2706_v11  ;;  %v2465_v11 = vld [vmem:[%s9805_s5 + $0x108] sm:$0xff] }
 0x20c   :  { %2402 = vmatpush1.bf16.msra.mxu0 %v7687_v17  ;;  %v6978_v17 = vcombine.high %v2722_v14, %v2738_v15 }
 0x20d   :  { %2403 = vmatprep.subr.bf16.mxu0 %v7692_v18  ;;  %v2754_v18 = vld [vmem:[%s9805_s5 + $0xa10] sm:$0xff] }
 0x210   :  { %2404 = vmatpush1.bf16.msra.mxu0 %v7690_v19  ;;  %v2770_v19 = vld [vmem:[%s9805_s5 + $0xa90] sm:$0xff] }
 0x211   :  { %2405 = vmatprep.subr.bf16.mxu0 %v7695_v20  ;;  %v6977_v20 = vcombine.low %v2722_v14, %v2738_v15  ;;  %v2484_v14 = vld [vmem:[%s9805_s5 + $0x1a0] sm:$0xff] }
 0x214   :  { %2406 = vmatpush1.bf16.msra.mxu0 %v7693_v21  ;;  %v7010_v21 = vcombine.high %v2754_v18, %v2770_v19 }
 0x215   :  { %2407 = vmatprep.subr.bf16.mxu0 %v7698_v22  ;;  %v2786_v22 = vld [vmem:[%s9805_s5 + $0xb10] sm:$0xff] }
 0x218   :  { %2408 = vmatpush1.bf16.msra.mxu0 %v7696_v23  ;;  %v2802_v23 = vld [vmem:[%s9805_s5 + $0xb90] sm:$0xff] }
 0x219   :  { %2409 = vmatprep.subr.bf16.mxu0 %v7701_v24  ;;  %v7009_v24 = vcombine.low %v2754_v18, %v2770_v19 }
 0x21c   :  { %2410 = vmatpush1.bf16.msra.mxu0 %v7699_v25  ;;  %v7042_v25 = vcombine.high %v2786_v22, %v2802_v23 }
 0x21d   :  { %2411 = vmatprep.subr.bf16.mxu0 %v7704_v26  ;;  %v2818_v26 = vld [vmem:[%s9805_s5 + $0xc10] sm:$0xff] }
 0x220   :  { %2412 = vmatpush1.bf16.msra.mxu0 %v7702_v27  ;;  %v2834_v27 = vld [vmem:[%s9805_s5 + $0xc90] sm:$0xff] }
 0x221   :  { %2413 = vmatprep.subr.bf16.mxu0 %v7707_v29  ;;  %v7041_v29 = vcombine.low %v2786_v22, %v2802_v23  ;;  %v2516_v22 = vld [vmem:[%s9805_s5 + $0x2a0] sm:$0xff] }
 0x224   :  { %2414 = vmatpush1.bf16.msra.mxu0 %v7705_v30  ;;  %v7074_v30 = vcombine.high %v2818_v26, %v2834_v27 }
 0x225   :  { %2415 = vmatprep.subr.bf16.mxu0 %v7710_v32  ;;  %v2866_v32 = vld [vmem:[%s9805_s5 + $0xd90] sm:$0xff] }
 0x226   :  { %v7106_v35 = vcombine.high %v2850_v31, %v2866_v32 }
 0x228   :  { %2416 = vmatpush1.bf16.msra.mxu0 %v7708_v34  ;;  %v7073_v34 = vcombine.low %v2818_v26, %v2834_v27  ;;  %v2529_v27 = vld [vmem:[%s9805_s5 + $0x308] sm:$0xff] }
 0x229   :  { %2417 = vmatprep.subr.bf16.mxu0 %v7713_v36  ;;  %v7105_v36 = vcombine.low %v2850_v31, %v2866_v32  ;;  %v2548_v31 = vld [vmem:[%s9805_s5 + $0x3a0] sm:$0xff] }
 0x22c   :  { %2418 = vmatpush1.bf16.msra.mxu0 %v7711_v40  ;;  %v2882_v40 = vld [vmem:[%s9805_s5 + $0xe10] sm:$0xff] }
 0x22d   :  { %5754 = vmatprep.subr.bf16.mxu0 %v6690_v44  ;;  %v2898_v44 = vld [vmem:[%s9805_s5 + $0xe90] sm:$0xff] }
 0x22e   :  { %v7137_v46 = vcombine.low %v2882_v40, %v2898_v44 }
 0x22f   :  { %2420 = vmatmul.mubr.bf16.vlgmr.msra.gmra.mrb[4].mxu0 %v1948_v48  ;;  %v2912_v48 = vld [vmem:[%s9805_s5 + $0xf00] sm:$0xff] }
 0x230   :  { %5755 = vmatpush1.bf16.msra.mxu0 %v6689_v47  ;;  %v7138_v47 = vcombine.high %v2882_v40, %v2898_v44  ;;  %v2564_v40 = vld [vmem:[%s9805_s5 + $0x420] sm:$0xff] }
 0x231   :  { %5756 = vmatprep.subr.bf16.mxu0 %v6722_v49  ;;  %v2928_v49 = vld [vmem:[%s9805_s5 + $0xf80] sm:$0xff] }
 0x232   :  { %v7166_v51 = vcombine.high %v2912_v48, %v2928_v49 }
 0x234   :  { %5757 = vmatpush1.bf16.msra.mxu0 %v6721_v52  ;;  %v2930_v52 = vld [vmem:[%s9805_s5 + $0xf90] sm:$0xff]  ;;  %5702 = vmatprep.subr.bf16.mxu1 %v7166_v51  ;;  %v2612_v51 = vld [vmem:[%s9805_s5 + $0x5a0] sm:$0xff] }
 0x235   :  { %5758 = vmatprep.subr.bf16.mxu0 %v6754_v53  ;;  %v7165_v53 = vcombine.low %v2912_v48, %v2928_v49  ;;  %v7169_v54 = vcombine.low %v2914_v50, %v2930_v52  ;;  %v7170_v55 = vcombine.high %v2914_v50, %v2930_v52  ;;  %v2593_v48 = vld [vmem:[%s9805_s5 + $0x508] sm:$0xff]  ;;  %v2596_v50 = vld [vmem:[%s9805_s5 + $0x520] sm:$0xff]  ;;  %v6815_v52 = vcombine.low %v2561_v37, %v2577_v39 }
 0x236   :  { %v2609_v49 = vld [vmem:[%s9805_s5 + $0x588] sm:$0xff] }
 0x237   :  { %5703 = vmatpush1.bf16.msra.mxu1 %v7165_v53  ;;  %v6821_v53 = vcombine.low %v2564_v40, %v2580_v43 }
 0x238   :  { %5759 = vmatpush1.bf16.msra.mxu0 %v6753_v56  ;;  %v2433_v56 = vld [vmem:[%s9805_s5 + $0x8] sm:$0xff] }
 0x239   :  { %5760 = vmatprep.subr.bf16.mxu0 %v6786_v57  ;;  %v2449_v57 = vld [vmem:[%s9805_s5 + $0x88] sm:$0xff] }
 0x23a   :  { %v6688_v59 = vcombine.high %v2433_v56, %v2449_v57 }
 0x23c   :  { %5761 = vmatpush1.bf16.msra.mxu0 %v6785_v60  ;;  %v2452_v60 = vld [vmem:[%s9805_s5 + $0xa0] sm:$0xff]  ;;  %5713 = vmatprep.subr.bf16.mxu1 %v6688_v59 }
 0x23d   :  { %5762 = vmatprep.subr.bf16.mxu0 %v6818_v61  ;;  %v6687_v61 = vcombine.low %v2433_v56, %v2449_v57  ;;  %v6693_v62 = vcombine.low %v2436_v58, %v2452_v60  ;;  %v6694_v63 = vcombine.high %v2436_v58, %v2452_v60  ;;  %v2625_v56 = vld [vmem:[%s9805_s5 + $0x608] sm:$0xff]  ;;  %v2628_v58 = vld [vmem:[%s9805_s5 + $0x620] sm:$0xff]  ;;  %v6847_v60 = vcombine.low %v2593_v48, %v2609_v49 }
 0x23e   :  { %v2641_v57 = vld [vmem:[%s9805_s5 + $0x688] sm:$0xff]  ;;  %v2644_v59 = vld [vmem:[%s9805_s5 + $0x6a0] sm:$0xff] }
 0x240   :  { %5763 = vmatpush1.bf16.msra.mxu0 %v6817_v0  ;;  %v2014_v0 = vld [vmem:[%s9804_s4] sm:$0x3] }
 0x241   :  { %5764 = vmatprep.subr.bf16.mxu0 %v6850_v1  ;;  %v2019_v1 = vrot.slane %v2014_v0, %v7998_v38  ;;  %v2023_v2 = vrot.slane %v2014_v0, %v8006_v41  ;;  %v2657_v0 = vld [vmem:[%s9805_s5 + $0x708] sm:$0xff] }
 0x244   :  { %5765 = vmatpush1.bf16.msra.mxu0 %v6849_v4 }
 0x245   :  { %5766 = vmatprep.subr.bf16.mxu0 %v6882_v5 }
 0x248   :  { %5767 = vmatpush1.bf16.msra.mxu0 %v6881_v8 }
 0x249   :  { %5768 = vmatprep.subr.bf16.mxu0 %v6914_v9 }
 0x24c   :  { %5769 = vmatpush1.bf16.msra.mxu0 %v6913_v12  ;;  %v2481_v12 = vld [vmem:[%s9805_s5 + $0x188] sm:$0xff] }
 0x24d   :  { %5770 = vmatprep.subr.bf16.mxu0 %v6946_v13  ;;  %v2468_v13 = vld [vmem:[%s9805_s5 + $0x120] sm:$0xff]  ;;  %v6720_v18 = vcombine.high %v2465_v11, %v2481_v12  ;;  %v6719_v23 = vcombine.low %v2465_v11, %v2481_v12 }
 0x24e   :  { %v6726_v19 = vcombine.high %v2468_v13, %v2484_v14  ;;  %v2708_v11 = vld [vmem:[%s9805_s5 + $0x8a0] sm:$0xff] }
 0x250   :  { %5771 = vmatpush1.bf16.msra.mxu0 %v6945_v16 }
 0x251   :  { %5772 = vmatprep.subr.bf16.mxu0 %v6978_v17  ;;  %v2497_v17 = vld [vmem:[%s9805_s5 + $0x208] sm:$0xff] }
 0x254   :  { %5773 = vmatpush1.bf16.msra.mxu0 %v6977_v20  ;;  %v2513_v20 = vld [vmem:[%s9805_s5 + $0x288] sm:$0xff] }
 0x255   :  { %5774 = vmatprep.subr.bf16.mxu0 %v7010_v21  ;;  %v2500_v21 = vld [vmem:[%s9805_s5 + $0x220] sm:$0xff]  ;;  %v6751_v32 = vcombine.low %v2497_v17, %v2513_v20 }
 0x256   :  { %v6758_v26 = vcombine.high %v2500_v21, %v2516_v22 }
 0x258   :  { %5775 = vmatpush1.bf16.msra.mxu0 %v7009_v24  ;;  %v6725_v24 = vcombine.low %v2468_v13, %v2484_v14 }
 0x259   :  { %5776 = vmatprep.subr.bf16.mxu0 %v7042_v25  ;;  %v6752_v25 = vcombine.high %v2497_v17, %v2513_v20  ;;  %v2724_v20 = vld [vmem:[%s9805_s5 + $0x920] sm:$0xff] }
 0x25c   :  { %5777 = vmatpush1.bf16.msra.mxu0 %v7041_v29  ;;  %v2545_v29 = vld [vmem:[%s9805_s5 + $0x388] sm:$0xff] }
 0x25d   :  { %5778 = vmatprep.subr.bf16.mxu0 %v7074_v30  ;;  %v2532_v30 = vld [vmem:[%s9805_s5 + $0x320] sm:$0xff]  ;;  %v6783_v44 = vcombine.low %v2529_v27, %v2545_v29 }
 0x25e   :  { %v6789_v45 = vcombine.low %v2532_v30, %v2548_v31 }
 0x260   :  { %5779 = vmatpush1.bf16.msra.mxu0 %v7073_v34  ;;  %v6757_v34 = vcombine.low %v2500_v21, %v2516_v22  ;;  %v2740_v21 = vld [vmem:[%s9805_s5 + $0x9a0] sm:$0xff] }
 0x261   :  { %5780 = vmatprep.subr.bf16.mxu0 %v7106_v35  ;;  %v6784_v35 = vcombine.high %v2529_v27, %v2545_v29  ;;  %v2769_v27 = vld [vmem:[%s9805_s5 + $0xa88] sm:$0xff]  ;;  %v2756_v29 = vld [vmem:[%s9805_s5 + $0xa20] sm:$0xff] }
 0x264   :  { %5781 = vmatpush1.bf16.msra.mxu0 %v7105_v36  ;;  %v6790_v36 = vcombine.high %v2532_v30, %v2548_v31  ;;  %v2772_v30 = vld [vmem:[%s9805_s5 + $0xaa0] sm:$0xff] }
 0x265   :  { %5782 = vmatprep.subr.bf16.mxu0 %v7138_v47  ;;  %v6822_v47 = vcombine.high %v2564_v40, %v2580_v43  ;;  %v2804_v40 = vld [vmem:[%s9805_s5 + $0xba0] sm:$0xff] }
 0x268   :  { %5783 = vmatpush1.bf16.msra.mxu0 %v7137_v46  ;;  %v6816_v46 = vcombine.high %v2561_v37, %v2577_v39  ;;  %v2801_v37 = vld [vmem:[%s9805_s5 + $0xb88] sm:$0xff]  ;;  %v2788_v39 = vld [vmem:[%s9805_s5 + $0xb20] sm:$0xff] }
 0x269   :  { %5784 = vmatprep.subr.bf16.mxu0 %v7170_v55  ;;  %v6854_v55 = vcombine.high %v2596_v50, %v2612_v51 }
 0x26c   :  { %5785 = vmatpush1.bf16.msra.mxu0 %v7169_v54  ;;  %v6848_v54 = vcombine.high %v2593_v48, %v2609_v49  ;;  %v2833_v48 = vld [vmem:[%s9805_s5 + $0xc88] sm:$0xff]  ;;  %v2820_v49 = vld [vmem:[%s9805_s5 + $0xc20] sm:$0xff] }
 0x26d   :  { %5836 = vmatprep.subr.bf16.mxu0 %v6694_v63  ;;  %v6886_v63 = vcombine.high %v2628_v58, %v2644_v59 }
 0x302   :  { %v2421_v3 = vpop.f32.mrb[4].mxu0 }
 0x303   :  { %v7201_v4 = vadd.f32 %v2421_v3, %v2019_v1  ;;  %v2423_v5 = vpop.f32.mrb[5].mxu0  ;;  %v2673_v1 = vld [vmem:[%s9805_s5 + $0x788] sm:$0xff]  ;;  %v2676_v3 = vld [vmem:[%s9805_s5 + $0x7a0] sm:$0xff] }
 0x304   :  { %v7202_v6 = vadd.f32 %v2423_v5, %v2023_v2  ;;  %v2425_v7 = vpop.f32.mrb[6].mxu0  ;;  %v2660_v2 = vld [vmem:[%s9805_s5 + $0x720] sm:$0xff]  ;;  %v6885_v5 = vcombine.low %v2628_v58, %v2644_v59  ;;  %v6911_v12 = vcombine.low %v2657_v0, %v2673_v1 }
 0x305   :  { %v2428_v8 = vmax.f32 %v7201_v4, 0.0  ;;  %v2426_v9 = vpop.f32.mrb[7].mxu0  ;;  %v6879_v4 = vcombine.low %v2625_v56, %v2641_v57  ;;  %v6918_v7 = vcombine.high %v2660_v2, %v2676_v3  ;;  %v6917_v13 = vcombine.low %v2660_v2, %v2676_v3  ;;  %v2868_v58 = vld [vmem:[%s9805_s5 + $0xda0] sm:$0xff] }
 0x306   :  { %v2429_v10 = vmax.f32 %v7202_v6, 0.0  ;;  %v6912_v6 = vcombine.high %v2657_v0, %v2673_v1  ;;  %v2705_v9 = vld [vmem:[%s9805_s5 + $0x888] sm:$0xff]  ;;  %v2884_v1 = vld [vmem:[%s9805_s5 + $0xe20] sm:$0xff] }
 0x307   :  { %v8263_v16 = vpack.c.bf16 %v2428_v8, %v2428_v8  ;;  %v2689_v8 = vld [vmem:[%s9805_s5 + $0x808] sm:$0xff]  ;;  %v2900_v2 = vld [vmem:[%s9805_s5 + $0xea0] sm:$0xff] }
 0x308   :  { %v8261_v15 = vpack.c.bf16 %v2429_v10, %v2429_v10  ;;  %v2692_v10 = vld [vmem:[%s9805_s5 + $0x820] sm:$0xff]  ;;  %v6944_v14 = vcombine.high %v2689_v8, %v2705_v9  ;;  %v6943_v22 = vcombine.low %v2689_v8, %v2705_v9  ;;  %v2897_v0 = vld [vmem:[%s9805_s5 + $0xe88] sm:$0xff] }
 0x309   :  { %v6950_v17 = vcombine.high %v2692_v10, %v2708_v11  ;;  %v2929_v8 = vld [vmem:[%s9805_s5 + $0xf88] sm:$0xff]  ;;  %v2916_v9 = vld [vmem:[%s9805_s5 + $0xf20] sm:$0xff] }
 0x30a   :  { %5704 = vmatprep.mubr.bf16.mxu1 %v8261_v15  ;;  %5786 = vmatprep.mubr.bf16.mxu0 %v8261_v15 }
 0x30b   :  { %5705 = vmatmul.mubr.bf16.vlgmr.msra.gmra.mrb[4].mxu1 %v8263_v16  ;;  %5787 = vmatmul.mubr.bf16.vlgmr.msra.gmra.mrb[8].mxu0 %v8263_v16 }
 0x30c   :  { %5714 = vmatpush1.bf16.msra.mxu1 %v6687_v61  ;;  %5837 = vmatpush1.bf16.msra.mxu0 %v6693_v62  ;;  %v6853_v61 = vcombine.low %v2596_v50, %v2612_v51  ;;  %v6880_v62 = vcombine.high %v2625_v56, %v2641_v57  ;;  %v2836_v50 = vld [vmem:[%s9805_s5 + $0xca0] sm:$0xff]  ;;  %v2865_v56 = vld [vmem:[%s9805_s5 + $0xd88] sm:$0xff] }
 0x30d   :  { %5745 = vmatprep.mubr.bf16.mxu1 %v8261_v15  ;;  %5868 = vmatprep.mubr.bf16.mxu0 %v8261_v15  ;;  %v2852_v57 = vld [vmem:[%s9805_s5 + $0xd20] sm:$0xff] }
 0x30e   :  { %5715 = vmatprep.subr.bf16.mxu1 %v6720_v18  ;;  %5838 = vmatprep.subr.bf16.mxu0 %v6726_v19  ;;  %v2721_v18 = vld [vmem:[%s9805_s5 + $0x908] sm:$0xff] }
 0x30f   :  { %v2737_v19 = vld [vmem:[%s9805_s5 + $0x988] sm:$0xff] }
 0x310   :  { %5716 = vmatpush1.bf16.msra.mxu1 %v6719_v23  ;;  %5839 = vmatpush1.bf16.msra.mxu0 %v6725_v24  ;;  %v6949_v23 = vcombine.low %v2692_v10, %v2708_v11  ;;  %v6976_v24 = vcombine.high %v2721_v18, %v2737_v19  ;;  %v6975_v31 = vcombine.low %v2721_v18, %v2737_v19  ;;  %v2932_v10 = vld [vmem:[%s9805_s5 + $0xfa0] sm:$0xff]  ;;  %v2451_v18 = vld [vmem:[%s9805_s5 + $0x98] sm:$0xff]  ;;  %v2438_v19 = vld [vmem:[%s9805_s5 + $0x30] sm:$0xff] }
 0x311   :  { %5717 = vmatprep.subr.bf16.mxu1 %v6752_v25  ;;  %5840 = vmatprep.subr.bf16.mxu0 %v6758_v26  ;;  %v6982_v25 = vcombine.high %v2724_v20, %v2740_v21  ;;  %v2753_v26 = vld [vmem:[%s9805_s5 + $0xa08] sm:$0xff] }
 0x312   :  { %v7007_v43 = vcombine.low %v2753_v26, %v2769_v27 }
 0x314   :  { %5718 = vmatpush1.bf16.msra.mxu1 %v6751_v32  ;;  %5841 = vmatpush1.bf16.msra.mxu0 %v6757_v34  ;;  %v6981_v32 = vcombine.low %v2724_v20, %v2740_v21  ;;  %v7008_v34 = vcombine.high %v2753_v26, %v2769_v27  ;;  %v2454_v20 = vld [vmem:[%s9805_s5 + $0xb0] sm:$0xff]  ;;  %v2483_v26 = vld [vmem:[%s9805_s5 + $0x198] sm:$0xff] }
 0x315   :  { %5719 = vmatprep.subr.bf16.mxu1 %v6784_v35  ;;  %5842 = vmatprep.subr.bf16.mxu0 %v6790_v36  ;;  %v7014_v35 = vcombine.high %v2756_v29, %v2772_v30  ;;  %v2785_v36 = vld [vmem:[%s9805_s5 + $0xb08] sm:$0xff]  ;;  %v2470_v27 = vld [vmem:[%s9805_s5 + $0x130] sm:$0xff] }
 0x316   :  { %v7039_v51 = vcombine.low %v2785_v36, %v2801_v37 }
 0x318   :  { %5720 = vmatpush1.bf16.msra.mxu1 %v6783_v44  ;;  %5843 = vmatpush1.bf16.msra.mxu0 %v6789_v45  ;;  %v7013_v44 = vcombine.low %v2756_v29, %v2772_v30  ;;  %v7040_v45 = vcombine.high %v2785_v36, %v2801_v37  ;;  %v2486_v29 = vld [vmem:[%s9805_s5 + $0x1b0] sm:$0xff]  ;;  %v2515_v36 = vld [vmem:[%s9805_s5 + $0x298] sm:$0xff] }
 0x319   :  { %5721 = vmatprep.subr.bf16.mxu1 %v6816_v46  ;;  %5844 = vmatprep.subr.bf16.mxu0 %v6822_v47  ;;  %v7046_v46 = vcombine.high %v2788_v39, %v2804_v40  ;;  %v2817_v47 = vld [vmem:[%s9805_s5 + $0xc08] sm:$0xff]  ;;  %v2502_v37 = vld [vmem:[%s9805_s5 + $0x230] sm:$0xff] }
 0x31a   :  { %v7071_v59 = vcombine.low %v2817_v47, %v2833_v48 }
 0x31c   :  { %5722 = vmatpush1.bf16.msra.mxu1 %v6815_v52  ;;  %5845 = vmatpush1.bf16.msra.mxu0 %v6821_v53  ;;  %v7045_v52 = vcombine.low %v2788_v39, %v2804_v40  ;;  %v7072_v53 = vcombine.high %v2817_v47, %v2833_v48  ;;  %v2518_v39 = vld [vmem:[%s9805_s5 + $0x2b0] sm:$0xff]  ;;  %v2547_v47 = vld [vmem:[%s9805_s5 + $0x398] sm:$0xff] }
 0x31d   :  { %5723 = vmatprep.subr.bf16.mxu1 %v6848_v54  ;;  %5846 = vmatprep.subr.bf16.mxu0 %v6854_v55  ;;  %v7078_v54 = vcombine.high %v2820_v49, %v2836_v50  ;;  %v2849_v55 = vld [vmem:[%s9805_s5 + $0xd08] sm:$0xff]  ;;  %v2534_v48 = vld [vmem:[%s9805_s5 + $0x330] sm:$0xff] }
 0x31e   :  { %v7103_v3 = vcombine.low %v2849_v55, %v2865_v56 }
 0x320   :  { %5724 = vmatpush1.bf16.msra.mxu1 %v6847_v60  ;;  %5847 = vmatpush1.bf16.msra.mxu0 %v6853_v61  ;;  %v7077_v60 = vcombine.low %v2820_v49, %v2836_v50  ;;  %v7104_v61 = vcombine.high %v2849_v55, %v2865_v56  ;;  %v2550_v49 = vld [vmem:[%s9805_s5 + $0x3b0] sm:$0xff]  ;;  %v2579_v55 = vld [vmem:[%s9805_s5 + $0x498] sm:$0xff] }
 0x321   :  { %5725 = vmatprep.subr.bf16.mxu1 %v6880_v62  ;;  %5848 = vmatprep.subr.bf16.mxu0 %v6886_v63  ;;  %v7110_v62 = vcombine.high %v2852_v57, %v2868_v58  ;;  %v2881_v63 = vld [vmem:[%s9805_s5 + $0xe08] sm:$0xff]  ;;  %v2566_v56 = vld [vmem:[%s9805_s5 + $0x430] sm:$0xff] }
 0x322   :  { %v7135_v11 = vcombine.low %v2881_v63, %v2897_v0 }
 0x324   :  { %5726 = vmatpush1.bf16.msra.mxu1 %v6879_v4  ;;  %5849 = vmatpush1.bf16.msra.mxu0 %v6885_v5  ;;  %v7109_v4 = vcombine.low %v2852_v57, %v2868_v58  ;;  %v7136_v5 = vcombine.high %v2881_v63, %v2897_v0  ;;  %v2582_v57 = vld [vmem:[%s9805_s5 + $0x4b0] sm:$0xff]  ;;  %v2611_v63 = vld [vmem:[%s9805_s5 + $0x598] sm:$0xff] }
 0x325   :  { %5727 = vmatprep.subr.bf16.mxu1 %v6912_v6  ;;  %5850 = vmatprep.subr.bf16.mxu0 %v6918_v7  ;;  %v7142_v6 = vcombine.high %v2884_v1, %v2900_v2  ;;  %v2913_v7 = vld [vmem:[%s9805_s5 + $0xf08] sm:$0xff]  ;;  %v2598_v0 = vld [vmem:[%s9805_s5 + $0x530] sm:$0xff] }
 0x326   :  { %v7167_v21 = vcombine.low %v2913_v7, %v2929_v8 }
 0x328   :  { %5728 = vmatpush1.bf16.msra.mxu1 %v6911_v12  ;;  %5851 = vmatpush1.bf16.msra.mxu0 %v6917_v13  ;;  %v7141_v12 = vcombine.low %v2884_v1, %v2900_v2  ;;  %v7168_v13 = vcombine.high %v2913_v7, %v2929_v8  ;;  %v2614_v1 = vld [vmem:[%s9805_s5 + $0x5b0] sm:$0xff]  ;;  %v2643_v7 = vld [vmem:[%s9805_s5 + $0x698] sm:$0xff] }
 0x329   :  { %5729 = vmatprep.subr.bf16.mxu1 %v6944_v14  ;;  %5852 = vmatprep.subr.bf16.mxu0 %v6950_v17  ;;  %v7174_v14 = vcombine.high %v2916_v9, %v2932_v10  ;;  %v2435_v17 = vld [vmem:[%s9805_s5 + $0x18] sm:$0xff]  ;;  %v2630_v8 = vld [vmem:[%s9805_s5 + $0x630] sm:$0xff] }
 0x32a   :  { %v6691_v30 = vcombine.low %v2435_v17, %v2451_v18 }
 0x32c   :  { %5730 = vmatpush1.bf16.msra.mxu1 %v6943_v22  ;;  %5853 = vmatpush1.bf16.msra.mxu0 %v6949_v23  ;;  %v7173_v22 = vcombine.low %v2916_v9, %v2932_v10  ;;  %v6692_v23 = vcombine.high %v2435_v17, %v2451_v18  ;;  %v2646_v9 = vld [vmem:[%s9805_s5 + $0x6b0] sm:$0xff]  ;;  %v2675_v17 = vld [vmem:[%s9805_s5 + $0x798] sm:$0xff] }
 0x32d   :  { %5731 = vmatprep.subr.bf16.mxu1 %v6976_v24  ;;  %5854 = vmatprep.subr.bf16.mxu0 %v6982_v25  ;;  %v6698_v24 = vcombine.high %v2438_v19, %v2454_v20  ;;  %v2467_v25 = vld [vmem:[%s9805_s5 + $0x118] sm:$0xff]  ;;  %v2662_v18 = vld [vmem:[%s9805_s5 + $0x730] sm:$0xff] }
 0x32e   :  { %v6723_v40 = vcombine.low %v2467_v25, %v2483_v26 }
 0x330   :  { %5732 = vmatpush1.bf16.msra.mxu1 %v6975_v31  ;;  %5855 = vmatpush1.bf16.msra.mxu0 %v6981_v32  ;;  %v6697_v31 = vcombine.low %v2438_v19, %v2454_v20  ;;  %v6724_v32 = vcombine.high %v2467_v25, %v2483_v26  ;;  %v2678_v19 = vld [vmem:[%s9805_s5 + $0x7b0] sm:$0xff]  ;;  %v2707_v25 = vld [vmem:[%s9805_s5 + $0x898] sm:$0xff] }
 0x331   :  { %5733 = vmatprep.subr.bf16.mxu1 %v7008_v34  ;;  %5856 = vmatprep.subr.bf16.mxu0 %v7014_v35  ;;  %v6730_v34 = vcombine.high %v2470_v27, %v2486_v29  ;;  %v2499_v35 = vld [vmem:[%s9805_s5 + $0x218] sm:$0xff]  ;;  %v2694_v26 = vld [vmem:[%s9805_s5 + $0x830] sm:$0xff] }
 0x332   :  { %v6755_v50 = vcombine.low %v2499_v35, %v2515_v36 }
 0x334   :  { %5734 = vmatpush1.bf16.msra.mxu1 %v7007_v43  ;;  %5857 = vmatpush1.bf16.msra.mxu0 %v7013_v44  ;;  %v6729_v43 = vcombine.low %v2470_v27, %v2486_v29  ;;  %v6756_v44 = vcombine.high %v2499_v35, %v2515_v36  ;;  %v2710_v27 = vld [vmem:[%s9805_s5 + $0x8b0] sm:$0xff]  ;;  %v2739_v35 = vld [vmem:[%s9805_s5 + $0x998] sm:$0xff] }
 0x335   :  { %5735 = vmatprep.subr.bf16.mxu1 %v7040_v45  ;;  %5858 = vmatprep.subr.bf16.mxu0 %v7046_v46  ;;  %v6762_v45 = vcombine.high %v2502_v37, %v2518_v39  ;;  %v2531_v46 = vld [vmem:[%s9805_s5 + $0x318] sm:$0xff]  ;;  %v2726_v36 = vld [vmem:[%s9805_s5 + $0x930] sm:$0xff] }
 0x336   :  { %v6787_v58 = vcombine.low %v2531_v46, %v2547_v47 }
 0x338   :  { %5736 = vmatpush1.bf16.msra.mxu1 %v7039_v51  ;;  %5859 = vmatpush1.bf16.msra.mxu0 %v7045_v52  ;;  %v6761_v51 = vcombine.low %v2502_v37, %v2518_v39  ;;  %v6788_v52 = vcombine.high %v2531_v46, %v2547_v47  ;;  %v2742_v37 = vld [vmem:[%s9805_s5 + $0x9b0] sm:$0xff]  ;;  %v2771_v46 = vld [vmem:[%s9805_s5 + $0xa98] sm:$0xff] }
 0x339   :  { %5737 = vmatprep.subr.bf16.mxu1 %v7072_v53  ;;  %5860 = vmatprep.subr.bf16.mxu0 %v7078_v54  ;;  %v6794_v53 = vcombine.high %v2534_v48, %v2550_v49  ;;  %v2563_v54 = vld [vmem:[%s9805_s5 + $0x418] sm:$0xff]  ;;  %v2758_v47 = vld [vmem:[%s9805_s5 + $0xa30] sm:$0xff] }
 0x33a   :  { %v6819_v2 = vcombine.low %v2563_v54, %v2579_v55 }
 0x33c   :  { %5738 = vmatpush1.bf16.msra.mxu1 %v7071_v59  ;;  %5861 = vmatpush1.bf16.msra.mxu0 %v7077_v60  ;;  %v6793_v59 = vcombine.low %v2534_v48, %v2550_v49  ;;  %v6820_v60 = vcombine.high %v2563_v54, %v2579_v55  ;;  %v2774_v48 = vld [vmem:[%s9805_s5 + $0xab0] sm:$0xff]  ;;  %v2803_v54 = vld [vmem:[%s9805_s5 + $0xb98] sm:$0xff] }
 0x33d   :  { %5739 = vmatprep.subr.bf16.mxu1 %v7104_v61  ;;  %5862 = vmatprep.subr.bf16.mxu0 %v7110_v62  ;;  %v6826_v61 = vcombine.high %v2566_v56, %v2582_v57  ;;  %v2595_v62 = vld [vmem:[%s9805_s5 + $0x518] sm:$0xff]  ;;  %v2790_v55 = vld [vmem:[%s9805_s5 + $0xb30] sm:$0xff] }
 0x33e   :  { %v6851_v10 = vcombine.low %v2595_v62, %v2611_v63 }
 0x340   :  { %5740 = vmatpush1.bf16.msra.mxu1 %v7103_v3  ;;  %5863 = vmatpush1.bf16.msra.mxu0 %v7109_v4  ;;  %v6825_v3 = vcombine.low %v2566_v56, %v2582_v57  ;;  %v6852_v4 = vcombine.high %v2595_v62, %v2611_v63  ;;  %v2806_v56 = vld [vmem:[%s9805_s5 + $0xbb0] sm:$0xff]  ;;  %v2835_v62 = vld [vmem:[%s9805_s5 + $0xc98] sm:$0xff] }
 0x341   :  { %5741 = vmatprep.subr.bf16.mxu1 %v7136_v5  ;;  %5864 = vmatprep.subr.bf16.mxu0 %v7142_v6  ;;  %v6858_v5 = vcombine.high %v2598_v0, %v2614_v1  ;;  %v2627_v6 = vld [vmem:[%s9805_s5 + $0x618] sm:$0xff]  ;;  %v2822_v63 = vld [vmem:[%s9805_s5 + $0xc30] sm:$0xff] }
 0x342   :  { %v6883_v20 = vcombine.low %v2627_v6, %v2643_v7 }
 0x344   :  { %5742 = vmatpush1.bf16.msra.mxu1 %v7135_v11  ;;  %5865 = vmatpush1.bf16.msra.mxu0 %v7141_v12  ;;  %v6857_v11 = vcombine.low %v2598_v0, %v2614_v1  ;;  %v6884_v12 = vcombine.high %v2627_v6, %v2643_v7  ;;  %v2838_v0 = vld [vmem:[%s9805_s5 + $0xcb0] sm:$0xff]  ;;  %v2867_v6 = vld [vmem:[%s9805_s5 + $0xd98] sm:$0xff] }
 0x345   :  { %5743 = vmatprep.subr.bf16.mxu1 %v7168_v13  ;;  %5866 = vmatprep.subr.bf16.mxu0 %v7174_v14  ;;  %v6890_v13 = vcombine.high %v2630_v8, %v2646_v9  ;;  %v2659_v14 = vld [vmem:[%s9805_s5 + $0x718] sm:$0xff]  ;;  %v2854_v7 = vld [vmem:[%s9805_s5 + $0xd30] sm:$0xff] }
 0x346   :  { %v6915_v29 = vcombine.low %v2659_v14, %v2675_v17 }
 0x348   :  { %5744 = vmatpush1.bf16.msra.mxu1 %v7167_v21  ;;  %5867 = vmatpush1.bf16.msra.mxu0 %v7173_v22  ;;  %v6889_v21 = vcombine.low %v2630_v8, %v2646_v9  ;;  %v6916_v22 = vcombine.high %v2659_v14, %v2675_v17  ;;  %v2870_v8 = vld [vmem:[%s9805_s5 + $0xdb0] sm:$0xff]  ;;  %v2899_v14 = vld [vmem:[%s9805_s5 + $0xe98] sm:$0xff] }
 0x349   :  { %5795 = vmatprep.subr.bf16.mxu1 %v6692_v23  ;;  %5918 = vmatprep.subr.bf16.mxu0 %v6698_v24  ;;  %v6922_v23 = vcombine.high %v2662_v18, %v2678_v19  ;;  %v2691_v24 = vld [vmem:[%s9805_s5 + $0x818] sm:$0xff]  ;;  %v2886_v17 = vld [vmem:[%s9805_s5 + $0xe30] sm:$0xff] }
 0x34a   :  { %v6947_v39 = vcombine.low %v2691_v24, %v2707_v25 }
 0x34b   :  { %5746 = vmatmul.mubr.bf16.vlgmr.msra.gmra.mrb[8].mxu1 %v8263_v16  ;;  %5869 = vmatmul.mubr.bf16.vlgmr.msra.gmra.mrb[12].mxu0 %v8263_v16 }
 0x34c   :  { %5796 = vmatpush1.bf16.msra.mxu1 %v6691_v30  ;;  %5827 = vmatprep.mubr.bf16.mxu1 %v8261_v15  ;;  %v6921_v30 = vcombine.low %v2662_v18, %v2678_v19  ;;  %v2902_v18 = vld [vmem:[%s9805_s5 + $0xeb0] sm:$0xff] }
 0x34d   :  { %5919 = vmatpush1.bf16.msra.mxu0 %v6697_v31  ;;  %5950 = vmatprep.mubr.bf16.mxu0 %v8261_v15  ;;  %v6948_v31 = vcombine.high %v2691_v24, %v2707_v25  ;;  %v2931_v24 = vld [vmem:[%s9805_s5 + $0xf98] sm:$0xff]  ;;  %v2918_v25 = vld [vmem:[%s9805_s5 + $0xf30] sm:$0xff] }
 0x34e   :  { %5797 = vmatprep.subr.bf16.mxu1 %v6724_v32  ;;  %5920 = vmatprep.subr.bf16.mxu0 %v6730_v34  ;;  %v6954_v32 = vcombine.high %v2694_v26, %v2710_v27  ;;  %v2723_v34 = vld [vmem:[%s9805_s5 + $0x918] sm:$0xff] }
 0x34f   :  { %v6979_v49 = vcombine.low %v2723_v34, %v2739_v35 }
 0x350   :  { %5798 = vmatpush1.bf16.msra.mxu1 %v6723_v40  ;;  %v6953_v40 = vcombine.low %v2694_v26, %v2710_v27  ;;  %v2934_v26 = vld [vmem:[%s9805_s5 + $0xfb0] sm:$0xff] }
 0x351   :  { %5921 = vmatpush1.bf16.msra.mxu0 %v6729_v43  ;;  %5799 = vmatprep.subr.bf16.mxu1 %v6756_v44  ;;  %v6980_v43 = vcombine.high %v2723_v34, %v2739_v35  ;;  %v6986_v44 = vcombine.high %v2726_v36, %v2742_v37  ;;  %v2453_v34 = vld [vmem:[%s9805_s5 + $0xa8] sm:$0xff]  ;;  %v2440_v35 = vld [vmem:[%s9805_s5 + $0x40] sm:$0xff] }
 0x352   :  { %5922 = vmatprep.subr.bf16.mxu0 %v6762_v45  ;;  %v2755_v45 = vld [vmem:[%s9805_s5 + $0xa18] sm:$0xff] }
 0x353   :  { %v7011_v57 = vcombine.low %v2755_v45, %v2771_v46 }
 0x354   :  { %5800 = vmatpush1.bf16.msra.mxu1 %v6755_v50  ;;  %v6985_v50 = vcombine.low %v2726_v36, %v2742_v37  ;;  %v2456_v36 = vld [vmem:[%s9805_s5 + $0xc0] sm:$0xff] }
 0x355   :  { %5923 = vmatpush1.bf16.msra.mxu0 %v6761_v51  ;;  %5801 = vmatprep.subr.bf16.mxu1 %v6788_v52  ;;  %v7012_v51 = vcombine.high %v2755_v45, %v2771_v46  ;;  %v7018_v52 = vcombine.high %v2758_v47, %v2774_v48  ;;  %v2485_v45 = vld [vmem:[%s9805_s5 + $0x1a8] sm:$0xff] }
 0x356   :  { %5924 = vmatprep.subr.bf16.mxu0 %v6794_v53  ;;  %v2787_v53 = vld [vmem:[%s9805_s5 + $0xb18] sm:$0xff] }
 0x357   :  { %v7043_v1 = vcombine.low %v2787_v53, %v2803_v54 }
 0x358   :  { %5802 = vmatpush1.bf16.msra.mxu1 %v6787_v58  ;;  %v7017_v58 = vcombine.low %v2758_v47, %v2774_v48  ;;  %v2472_v47 = vld [vmem:[%s9805_s5 + $0x140] sm:$0xff] }
 0x359   :  { %5925 = vmatpush1.bf16.msra.mxu0 %v6793_v59  ;;  %5803 = vmatprep.subr.bf16.mxu1 %v6820_v60  ;;  %v7044_v59 = vcombine.high %v2787_v53, %v2803_v54  ;;  %v7050_v60 = vcombine.high %v2790_v55, %v2806_v56  ;;  %v2488_v48 = vld [vmem:[%s9805_s5 + $0x1c0] sm:$0xff] }
 0x35a   :  { %5926 = vmatprep.subr.bf16.mxu0 %v6826_v61  ;;  %v2819_v61 = vld [vmem:[%s9805_s5 + $0xc18] sm:$0xff]  ;;  %v6734_v53 = vcombine.high %v2472_v47, %v2488_v48  ;;  %v2504_v54 = vld [vmem:[%s9805_s5 + $0x240] sm:$0xff] }
 0x35b   :  { %v7075_v9 = vcombine.low %v2819_v61, %v2835_v62 }
 0x35c   :  { %5804 = vmatpush1.bf16.msra.mxu1 %v6819_v2  ;;  %v7049_v2 = vcombine.low %v2790_v55, %v2806_v56  ;;  %v2520_v55 = vld [vmem:[%s9805_s5 + $0x2c0] sm:$0xff] }
 0x35d   :  { %5927 = vmatpush1.bf16.msra.mxu0 %v6825_v3  ;;  %5805 = vmatprep.subr.bf16.mxu1 %v6852_v4  ;;  %v7076_v3 = vcombine.high %v2819_v61, %v2835_v62  ;;  %v7082_v4 = vcombine.high %v2822_v63, %v2838_v0  ;;  %v2549_v61 = vld [vmem:[%s9805_s5 + $0x3a8] sm:$0xff]  ;;  %v2536_v62 = vld [vmem:[%s9805_s5 + $0x340] sm:$0xff] }
 0x35e   :  { %5928 = vmatprep.subr.bf16.mxu0 %v6858_v5  ;;  %v2851_v5 = vld [vmem:[%s9805_s5 + $0xd18] sm:$0xff] }
 0x35f   :  { %v7107_v19 = vcombine.low %v2851_v5, %v2867_v6 }
 0x360   :  { %5806 = vmatpush1.bf16.msra.mxu1 %v6851_v10  ;;  %v7081_v10 = vcombine.low %v2822_v63, %v2838_v0  ;;  %v2552_v63 = vld [vmem:[%s9805_s5 + $0x3c0] sm:$0xff] }
 0x361   :  { %5929 = vmatpush1.bf16.msra.mxu0 %v6857_v11  ;;  %5807 = vmatprep.subr.bf16.mxu1 %v6884_v12  ;;  %v7108_v11 = vcombine.high %v2851_v5, %v2867_v6  ;;  %v7114_v12 = vcombine.high %v2854_v7, %v2870_v8  ;;  %v2581_v5 = vld [vmem:[%s9805_s5 + $0x4a8] sm:$0xff]  ;;  %v2568_v6 = vld [vmem:[%s9805_s5 + $0x440] sm:$0xff] }
 0x362   :  { %5930 = vmatprep.subr.bf16.mxu0 %v6890_v13  ;;  %v2883_v13 = vld [vmem:[%s9805_s5 + $0xe18] sm:$0xff] }
 0x363   :  { %v7139_v27 = vcombine.low %v2883_v13, %v2899_v14 }
 0x364   :  { %5808 = vmatpush1.bf16.msra.mxu1 %v6883_v20  ;;  %v7113_v20 = vcombine.low %v2854_v7, %v2870_v8  ;;  %v2584_v7 = vld [vmem:[%s9805_s5 + $0x4c0] sm:$0xff] }
 0x365   :  { %5931 = vmatpush1.bf16.msra.mxu0 %v6889_v21  ;;  %5809 = vmatprep.subr.bf16.mxu1 %v6916_v22  ;;  %v7140_v21 = vcombine.high %v2883_v13, %v2899_v14  ;;  %v7146_v22 = vcombine.high %v2886_v17, %v2902_v18  ;;  %v2613_v13 = vld [vmem:[%s9805_s5 + $0x5a8] sm:$0xff]  ;;  %v2600_v14 = vld [vmem:[%s9805_s5 + $0x540] sm:$0xff] }
 0x366   :  { %5932 = vmatprep.subr.bf16.mxu0 %v6922_v23  ;;  %v2915_v23 = vld [vmem:[%s9805_s5 + $0xf18] sm:$0xff] }
 0x367   :  { %v7171_v37 = vcombine.low %v2915_v23, %v2931_v24 }
 0x368   :  { %5810 = vmatpush1.bf16.msra.mxu1 %v6915_v29  ;;  %v7145_v29 = vcombine.low %v2886_v17, %v2902_v18  ;;  %v2616_v17 = vld [vmem:[%s9805_s5 + $0x5c0] sm:$0xff] }
 0x369   :  { %5933 = vmatpush1.bf16.msra.mxu0 %v6921_v30  ;;  %5811 = vmatprep.subr.bf16.mxu1 %v6948_v31  ;;  %v7172_v30 = vcombine.high %v2915_v23, %v2931_v24  ;;  %v7178_v31 = vcombine.high %v2918_v25, %v2934_v26  ;;  %v2645_v23 = vld [vmem:[%s9805_s5 + $0x6a8] sm:$0xff]  ;;  %v2632_v24 = vld [vmem:[%s9805_s5 + $0x640] sm:$0xff] }
 0x36a   :  { %5934 = vmatprep.subr.bf16.mxu0 %v6954_v32  ;;  %v2437_v32 = vld [vmem:[%s9805_s5 + $0x28] sm:$0xff] }
 0x36b   :  { %v6695_v46 = vcombine.low %v2437_v32, %v2453_v34 }
 0x36c   :  { %5812 = vmatpush1.bf16.msra.mxu1 %v6947_v39  ;;  %v7177_v39 = vcombine.low %v2918_v25, %v2934_v26  ;;  %v2648_v25 = vld [vmem:[%s9805_s5 + $0x6c0] sm:$0xff] }
 0x36d   :  { %5935 = vmatpush1.bf16.msra.mxu0 %v6953_v40  ;;  %5813 = vmatprep.subr.bf16.mxu1 %v6980_v43  ;;  %v6696_v40 = vcombine.high %v2437_v32, %v2453_v34  ;;  %v6702_v43 = vcombine.high %v2440_v35, %v2456_v36  ;;  %v2677_v32 = vld [vmem:[%s9805_s5 + $0x7a8] sm:$0xff]  ;;  %v2664_v34 = vld [vmem:[%s9805_s5 + $0x740] sm:$0xff] }
 0x36e   :  { %5936 = vmatprep.subr.bf16.mxu0 %v6986_v44  ;;  %v2469_v44 = vld [vmem:[%s9805_s5 + $0x128] sm:$0xff] }
 0x36f   :  { %v6727_v56 = vcombine.low %v2469_v44, %v2485_v45 }
 0x370   :  { %5814 = vmatpush1.bf16.msra.mxu1 %v6979_v49  ;;  %v6701_v49 = vcombine.low %v2440_v35, %v2456_v36  ;;  %v2680_v35 = vld [vmem:[%s9805_s5 + $0x7c0] sm:$0xff] }
 0x371   :  { %5937 = vmatpush1.bf16.msra.mxu0 %v6985_v50  ;;  %5815 = vmatprep.subr.bf16.mxu1 %v7012_v51  ;;  %v6728_v50 = vcombine.high %v2469_v44, %v2485_v45  ;;  %v2501_v51 = vld [vmem:[%s9805_s5 + $0x228] sm:$0xff]  ;;  %v2696_v45 = vld [vmem:[%s9805_s5 + $0x840] sm:$0xff] }
 0x372   :  { %5938 = vmatprep.subr.bf16.mxu0 %v7018_v52  ;;  %v2517_v52 = vld [vmem:[%s9805_s5 + $0x2a8] sm:$0xff] }
 0x373   :  { %v6759_v0 = vcombine.low %v2501_v51, %v2517_v52  ;;  %v2709_v44 = vld [vmem:[%s9805_s5 + $0x8a8] sm:$0xff] }
 0x374   :  { %5816 = vmatpush1.bf16.msra.mxu1 %v7011_v57  ;;  %v6733_v57 = vcombine.low %v2472_v47, %v2488_v48  ;;  %v6925_v48 = vcombine.low %v2664_v34, %v2680_v35 }
 0x375   :  { %5939 = vmatpush1.bf16.msra.mxu0 %v7017_v58  ;;  %5817 = vmatprep.subr.bf16.mxu1 %v7044_v59  ;;  %v6760_v58 = vcombine.high %v2501_v51, %v2517_v52  ;;  %v6766_v59 = vcombine.high %v2504_v54, %v2520_v55  ;;  %v2725_v51 = vld [vmem:[%s9805_s5 + $0x928] sm:$0xff] }
 0x376   :  { %5940 = vmatprep.subr.bf16.mxu0 %v7050_v60  ;;  %v2533_v60 = vld [vmem:[%s9805_s5 + $0x328] sm:$0xff] }
 0x377   :  { %v6791_v8 = vcombine.low %v2533_v60, %v2549_v61  ;;  %v2741_v52 = vld [vmem:[%s9805_s5 + $0x9a8] sm:$0xff] }
 0x378   :  { %5818 = vmatpush1.bf16.msra.mxu1 %v7043_v1  ;;  %v6765_v1 = vcombine.low %v2504_v54, %v2520_v55  ;;  %v2744_v54 = vld [vmem:[%s9805_s5 + $0x9c0] sm:$0xff] }
 0x379   :  { %5941 = vmatpush1.bf16.msra.mxu0 %v7049_v2  ;;  %5819 = vmatprep.subr.bf16.mxu1 %v7076_v3  ;;  %v6792_v2 = vcombine.high %v2533_v60, %v2549_v61  ;;  %v6798_v3 = vcombine.high %v2536_v62, %v2552_v63  ;;  %v2773_v60 = vld [vmem:[%s9805_s5 + $0xaa8] sm:$0xff]  ;;  %v2760_v61 = vld [vmem:[%s9805_s5 + $0xa40] sm:$0xff] }
 0x37a   :  { %5942 = vmatprep.subr.bf16.mxu0 %v7082_v4  ;;  %v2565_v4 = vld [vmem:[%s9805_s5 + $0x428] sm:$0xff] }
 0x37b   :  { %v6823_v18 = vcombine.low %v2565_v4, %v2581_v5 }
 0x37c   :  { %5820 = vmatpush1.bf16.msra.mxu1 %v7075_v9  ;;  %v6797_v9 = vcombine.low %v2536_v62, %v2552_v63  ;;  %v2776_v62 = vld [vmem:[%s9805_s5 + $0xac0] sm:$0xff]  ;;  %v6983_v63 = vcombine.low %v2725_v51, %v2741_v52 }
 0x37d   :  { %5943 = vmatpush1.bf16.msra.mxu0 %v7081_v10  ;;  %5821 = vmatprep.subr.bf16.mxu1 %v7108_v11  ;;  %v6824_v10 = vcombine.high %v2565_v4, %v2581_v5  ;;  %v6830_v11 = vcombine.high %v2568_v6, %v2584_v7  ;;  %v2805_v4 = vld [vmem:[%s9805_s5 + $0xba8] sm:$0xff]  ;;  %v2792_v5 = vld [vmem:[%s9805_s5 + $0xb40] sm:$0xff] }
 0x37e   :  { %5944 = vmatprep.subr.bf16.mxu0 %v7114_v12  ;;  %v2597_v12 = vld [vmem:[%s9805_s5 + $0x528] sm:$0xff] }
 0x37f   :  { %v6855_v26 = vcombine.low %v2597_v12, %v2613_v13 }
 0x380   :  { %5822 = vmatpush1.bf16.msra.mxu1 %v7107_v19  ;;  %v6829_v19 = vcombine.low %v2568_v6, %v2584_v7  ;;  %v2808_v6 = vld [vmem:[%s9805_s5 + $0xbc0] sm:$0xff] }
 0x381   :  { %5945 = vmatpush1.bf16.msra.mxu0 %v7113_v20  ;;  %5823 = vmatprep.subr.bf16.mxu1 %v7140_v21  ;;  %v6856_v20 = vcombine.high %v2597_v12, %v2613_v13  ;;  %v6862_v21 = vcombine.high %v2600_v14, %v2616_v17  ;;  %v2837_v12 = vld [vmem:[%s9805_s5 + $0xca8] sm:$0xff]  ;;  %v2824_v13 = vld [vmem:[%s9805_s5 + $0xc40] sm:$0xff] }
 0x382   :  { %5946 = vmatprep.subr.bf16.mxu0 %v7146_v22  ;;  %v2629_v22 = vld [vmem:[%s9805_s5 + $0x628] sm:$0xff] }
 0x383   :  { %v6887_v36 = vcombine.low %v2629_v22, %v2645_v23 }
 0x384   :  { %5824 = vmatpush1.bf16.msra.mxu1 %v7139_v27  ;;  %v6861_v27 = vcombine.low %v2600_v14, %v2616_v17  ;;  %v2840_v14 = vld [vmem:[%s9805_s5 + $0xcc0] sm:$0xff] }
 0x385   :  { %5947 = vmatpush1.bf16.msra.mxu0 %v7145_v29  ;;  %5825 = vmatprep.subr.bf16.mxu1 %v7172_v30  ;;  %v6888_v29 = vcombine.high %v2629_v22, %v2645_v23  ;;  %v6894_v30 = vcombine.high %v2632_v24, %v2648_v25  ;;  %v2869_v22 = vld [vmem:[%s9805_s5 + $0xda8] sm:$0xff]  ;;  %v2856_v23 = vld [vmem:[%s9805_s5 + $0xd40] sm:$0xff] }
 0x386   :  { %5948 = vmatprep.subr.bf16.mxu0 %v7178_v31  ;;  %v2661_v31 = vld [vmem:[%s9805_s5 + $0x728] sm:$0xff] }
 0x387   :  { %v6919_v47 = vcombine.low %v2661_v31, %v2677_v32 }
 0x388   :  { %5826 = vmatpush1.bf16.msra.mxu1 %v7171_v37  ;;  %v6893_v37 = vcombine.low %v2632_v24, %v2648_v25  ;;  %v2872_v24 = vld [vmem:[%s9805_s5 + $0xdc0] sm:$0xff] }
 0x389   :  { %5949 = vmatpush1.bf16.msra.mxu0 %v7177_v39  ;;  %5877 = vmatprep.subr.bf16.mxu1 %v6696_v40  ;;  %v6920_v39 = vcombine.high %v2661_v31, %v2677_v32  ;;  %v6926_v40 = vcombine.high %v2664_v34, %v2680_v35  ;;  %v2901_v31 = vld [vmem:[%s9805_s5 + $0xea8] sm:$0xff]  ;;  %v2888_v32 = vld [vmem:[%s9805_s5 + $0xe40] sm:$0xff] }
 0x38a   :  { %6000 = vmatprep.subr.bf16.mxu0 %v6702_v43  ;;  %v2693_v43 = vld [vmem:[%s9805_s5 + $0x828] sm:$0xff]  ;;  %v2904_v34 = vld [vmem:[%s9805_s5 + $0xec0] sm:$0xff] }
 0x38b   :  { %5828 = vmatmul.mubr.bf16.vlgmr.msra.gmra.mrb[12].mxu1 %v8263_v16  ;;  %v6951_v55 = vcombine.low %v2693_v43, %v2709_v44 }
 0x38c   :  { %5951 = vmatmul.mubr.bf16.vlgmr.msra.gmra.mrb[16].mxu0 %v8263_v16  ;;  %5878 = vmatpush1.bf16.msra.mxu1 %v6695_v46  ;;  %v2712_v46 = vld [vmem:[%s9805_s5 + $0x8c0] sm:$0xff] }
 0x38d   :  { %5909 = vmatprep.mubr.bf16.mxu1 %v8261_v15  ;;  %6001 = vmatpush1.bf16.msra.mxu0 %v6701_v49  ;;  %v6952_v49 = vcombine.high %v2693_v43, %v2709_v44  ;;  %v2933_v43 = vld [vmem:[%s9805_s5 + $0xfa8] sm:$0xff]  ;;  %v2920_v44 = vld [vmem:[%s9805_s5 + $0xf40] sm:$0xff] }
 0x38e   :  { %6032 = vmatprep.mubr.bf16.mxu0 %v8261_v15  ;;  %5879 = vmatprep.subr.bf16.mxu1 %v6728_v50  ;;  %v6958_v50 = vcombine.high %v2696_v45, %v2712_v46 }
 0x38f   :  { %6002 = vmatprep.subr.bf16.mxu0 %v6734_v53  ;;  %v2728_v53 = vld [vmem:[%s9805_s5 + $0x940] sm:$0xff] }
 0x390   :  { %5880 = vmatpush1.bf16.msra.mxu1 %v6727_v56  ;;  %v6957_v56 = vcombine.low %v2696_v45, %v2712_v46  ;;  %v2936_v45 = vld [vmem:[%s9805_s5 + $0xfc0] sm:$0xff] }
 0x391   :  { %6003 = vmatpush1.bf16.msra.mxu0 %v6733_v57  ;;  %5881 = vmatprep.subr.bf16.mxu1 %v6760_v58  ;;  %v6984_v57 = vcombine.high %v2725_v51, %v2741_v52  ;;  %v6990_v58 = vcombine.high %v2728_v53, %v2744_v54  ;;  %v2455_v51 = vld [vmem:[%s9805_s5 + $0xb8] sm:$0xff]  ;;  %v2442_v52 = vld [vmem:[%s9805_s5 + $0x50] sm:$0xff] }
 0x392   :  { %6004 = vmatprep.subr.bf16.mxu0 %v6766_v59  ;;  %v2757_v59 = vld [vmem:[%s9805_s5 + $0xa28] sm:$0xff] }
 0x393   :  { %v7015_v7 = vcombine.low %v2757_v59, %v2773_v60 }
 0x394   :  { %5882 = vmatpush1.bf16.msra.mxu1 %v6759_v0  ;;  %v6989_v0 = vcombine.low %v2728_v53, %v2744_v54  ;;  %v2458_v53 = vld [vmem:[%s9805_s5 + $0xd0] sm:$0xff] }
 0x395   :  { %6005 = vmatpush1.bf16.msra.mxu0 %v6765_v1  ;;  %5883 = vmatprep.subr.bf16.mxu1 %v6792_v2  ;;  %v7016_v1 = vcombine.high %v2757_v59, %v2773_v60  ;;  %v7022_v2 = vcombine.high %v2760_v61, %v2776_v62  ;;  %v2487_v59 = vld [vmem:[%s9805_s5 + $0x1b8] sm:$0xff] }
 0x396   :  { %6006 = vmatprep.subr.bf16.mxu0 %v6798_v3  ;;  %v2789_v3 = vld [vmem:[%s9805_s5 + $0xb28] sm:$0xff] }
 0x397   :  { %v7047_v17 = vcombine.low %v2789_v3, %v2805_v4 }
 0x398   :  { %5884 = vmatpush1.bf16.msra.mxu1 %v6791_v8  ;;  %v7021_v8 = vcombine.low %v2760_v61, %v2776_v62  ;;  %v2474_v61 = vld [vmem:[%s9805_s5 + $0x150] sm:$0xff] }
 0x399   :  { %6007 = vmatpush1.bf16.msra.mxu0 %v6797_v9  ;;  %5885 = vmatprep.subr.bf16.mxu1 %v6824_v10  ;;  %v7048_v9 = vcombine.high %v2789_v3, %v2805_v4  ;;  %v7054_v10 = vcombine.high %v2792_v5, %v2808_v6  ;;  %v2490_v62 = vld [vmem:[%s9805_s5 + $0x1d0] sm:$0xff] }
 0x39a   :  { %6008 = vmatprep.subr.bf16.mxu0 %v6830_v11  ;;  %v2821_v11 = vld [vmem:[%s9805_s5 + $0xc28] sm:$0xff]  ;;  %v6738_v3 = vcombine.high %v2474_v61, %v2490_v62  ;;  %v2506_v4 = vld [vmem:[%s9805_s5 + $0x250] sm:$0xff] }
 0x39b   :  { %v7079_v25 = vcombine.low %v2821_v11, %v2837_v12 }
 0x39c   :  { %5886 = vmatpush1.bf16.msra.mxu1 %v6823_v18  ;;  %v7053_v18 = vcombine.low %v2792_v5, %v2808_v6  ;;  %v2522_v5 = vld [vmem:[%s9805_s5 + $0x2d0] sm:$0xff] }
 0x39d   :  { %6009 = vmatpush1.bf16.msra.mxu0 %v6829_v19  ;;  %5887 = vmatprep.subr.bf16.mxu1 %v6856_v20  ;;  %v7080_v19 = vcombine.high %v2821_v11, %v2837_v12  ;;  %v7086_v20 = vcombine.high %v2824_v13, %v2840_v14  ;;  %v2551_v11 = vld [vmem:[%s9805_s5 + $0x3b8] sm:$0xff]  ;;  %v2538_v12 = vld [vmem:[%s9805_s5 + $0x350] sm:$0xff] }
 0x39e   :  { %6010 = vmatprep.subr.bf16.mxu0 %v6862_v21  ;;  %v2853_v21 = vld [vmem:[%s9805_s5 + $0xd28] sm:$0xff] }
 0x39f   :  { %v7111_v35 = vcombine.low %v2853_v21, %v2869_v22 }
 0x3a0   :  { %5888 = vmatpush1.bf16.msra.mxu1 %v6855_v26  ;;  %v7085_v26 = vcombine.low %v2824_v13, %v2840_v14  ;;  %v2554_v13 = vld [vmem:[%s9805_s5 + $0x3d0] sm:$0xff] }
 0x3a1   :  { %6011 = vmatpush1.bf16.msra.mxu0 %v6861_v27  ;;  %5889 = vmatprep.subr.bf16.mxu1 %v6888_v29  ;;  %v7112_v27 = vcombine.high %v2853_v21, %v2869_v22  ;;  %v7118_v29 = vcombine.high %v2856_v23, %v2872_v24  ;;  %v2583_v21 = vld [vmem:[%s9805_s5 + $0x4b8] sm:$0xff]  ;;  %v2570_v22 = vld [vmem:[%s9805_s5 + $0x450] sm:$0xff] }
 0x3a2   :  { %6012 = vmatprep.subr.bf16.mxu0 %v6894_v30  ;;  %v2885_v30 = vld [vmem:[%s9805_s5 + $0xe28] sm:$0xff] }
 0x3a3   :  { %v7143_v46 = vcombine.low %v2885_v30, %v2901_v31 }
 0x3a4   :  { %5890 = vmatpush1.bf16.msra.mxu1 %v6887_v36  ;;  %v7117_v36 = vcombine.low %v2856_v23, %v2872_v24  ;;  %v2586_v23 = vld [vmem:[%s9805_s5 + $0x4d0] sm:$0xff] }
 0x3a5   :  { %6013 = vmatpush1.bf16.msra.mxu0 %v6893_v37  ;;  %5891 = vmatprep.subr.bf16.mxu1 %v6920_v39  ;;  %v7144_v37 = vcombine.high %v2885_v30, %v2901_v31  ;;  %v7150_v39 = vcombine.high %v2888_v32, %v2904_v34  ;;  %v2615_v30 = vld [vmem:[%s9805_s5 + $0x5b8] sm:$0xff]  ;;  %v8902_v31 = vsub.s32 4, %v7989_v33 }
 0x3a6   :  { %6014 = vmatprep.subr.bf16.mxu0 %v6926_v40  ;;  %v2917_v40 = vld [vmem:[%s9805_s5 + $0xf28] sm:$0xff] }
 0x3a7   :  { %v7175_v54 = vcombine.low %v2917_v40, %v2933_v43 }
 0x3a8   :  { %5892 = vmatpush1.bf16.msra.mxu1 %v6919_v47  ;;  %v7149_v47 = vcombine.low %v2888_v32, %v2904_v34  ;;  %v2602_v32 = vld [vmem:[%s9805_s5 + $0x550] sm:$0xff] }
 0x3a9   :  { %6015 = vmatpush1.bf16.msra.mxu0 %v6925_v48  ;;  %5893 = vmatprep.subr.bf16.mxu1 %v6952_v49  ;;  %v7176_v48 = vcombine.high %v2917_v40, %v2933_v43  ;;  %v7182_v49 = vcombine.high %v2920_v44, %v2936_v45  ;;  %v2618_v34 = vld [vmem:[%s9805_s5 + $0x5d0] sm:$0xff] }
 0x3aa   :  { %6016 = vmatprep.subr.bf16.mxu0 %v6958_v50  ;;  %v2439_v50 = vld [vmem:[%s9805_s5 + $0x38] sm:$0xff]  ;;  %v6866_v43 = vcombine.high %v2602_v32, %v2618_v34 }
 0x3ab   :  { %v6699_v60 = vcombine.low %v2439_v50, %v2455_v51 }
 0x3ac   :  { %5894 = vmatpush1.bf16.msra.mxu1 %v6951_v55  ;;  %v7181_v55 = vcombine.low %v2920_v44, %v2936_v45  ;;  %v2631_v44 = vld [vmem:[%s9805_s5 + $0x638] sm:$0xff] }
 0x3ad   :  { %6017 = vmatpush1.bf16.msra.mxu0 %v6957_v56  ;;  %5895 = vmatprep.subr.bf16.mxu1 %v6984_v57  ;;  %v6700_v56 = vcombine.high %v2439_v50, %v2455_v51  ;;  %v6706_v57 = vcombine.high %v2442_v52, %v2458_v53  ;;  %v2647_v45 = vld [vmem:[%s9805_s5 + $0x6b8] sm:$0xff] }
 0x3ae   :  { %6018 = vmatprep.subr.bf16.mxu0 %v6990_v58  ;;  %v2471_v58 = vld [vmem:[%s9805_s5 + $0x138] sm:$0xff] }
 0x3af   :  { %v6731_v6 = vcombine.low %v2471_v58, %v2487_v59 }
 0x3b0   :  { %5896 = vmatpush1.bf16.msra.mxu1 %v6983_v63  ;;  %v6705_v63 = vcombine.low %v2442_v52, %v2458_v53  ;;  %v6865_v53 = vcombine.low %v2602_v32, %v2618_v34  ;;  %v2759_v32 = vld [vmem:[%s9805_s5 + $0xa38] sm:$0xff] }
 0x3b1   :  { %6019 = vmatpush1.bf16.msra.mxu0 %v6989_v0  ;;  %5897 = vmatprep.subr.bf16.mxu1 %v7016_v1  ;;  %v6732_v0 = vcombine.high %v2471_v58, %v2487_v59  ;;  %v2503_v1 = vld [vmem:[%s9805_s5 + $0x238] sm:$0xff] }
 0x3b2   :  { %6020 = vmatprep.subr.bf16.mxu0 %v7022_v2  ;;  %v2519_v2 = vld [vmem:[%s9805_s5 + $0x2b8] sm:$0xff] }
 0x3b3   :  { %v6763_v14 = vcombine.low %v2503_v1, %v2519_v2  ;;  %v2663_v58 = vld [vmem:[%s9805_s5 + $0x738] sm:$0xff] }
 0x3b4   :  { %5898 = vmatpush1.bf16.msra.mxu1 %v7015_v7  ;;  %v6737_v7 = vcombine.low %v2474_v61, %v2490_v62  ;;  %v2679_v59 = vld [vmem:[%s9805_s5 + $0x7b8] sm:$0xff] }
 0x3b5   :  { %6021 = vmatpush1.bf16.msra.mxu0 %v7021_v8  ;;  %5899 = vmatprep.subr.bf16.mxu1 %v7048_v9  ;;  %v6764_v8 = vcombine.high %v2503_v1, %v2519_v2  ;;  %v6770_v9 = vcombine.high %v2506_v4, %v2522_v5  ;;  %v2682_v1 = vld [vmem:[%s9805_s5 + $0x7d0] sm:$0xff]  ;;  %v2775_v34 = vld [vmem:[%s9805_s5 + $0xab8] sm:$0xff] }
 0x3b6   :  { %6022 = vmatprep.subr.bf16.mxu0 %v7054_v10  ;;  %v2535_v10 = vld [vmem:[%s9805_s5 + $0x338] sm:$0xff] }
 0x3b7   :  { %v6795_v24 = vcombine.low %v2535_v10, %v2551_v11 }
 0x3b8   :  { %5900 = vmatpush1.bf16.msra.mxu1 %v7047_v17  ;;  %v6769_v17 = vcombine.low %v2506_v4, %v2522_v5 }
 0x3b9   :  { %6023 = vmatpush1.bf16.msra.mxu0 %v7053_v18  ;;  %5901 = vmatprep.subr.bf16.mxu1 %v7080_v19  ;;  %v6796_v18 = vcombine.high %v2535_v10, %v2551_v11  ;;  %v6802_v19 = vcombine.high %v2538_v12, %v2554_v13  ;;  %v6924_v10 = vcombine.high %v2663_v58, %v2679_v59 }
 0x3ba   :  { %6024 = vmatprep.subr.bf16.mxu0 %v7086_v20  ;;  %v2567_v20 = vld [vmem:[%s9805_s5 + $0x438] sm:$0xff] }
 0x3bc   :  { %5902 = vmatpush1.bf16.msra.mxu1 %v7079_v25  ;;  %v6801_v25 = vcombine.low %v2538_v12, %v2554_v13  ;;  %v2695_v12 = vld [vmem:[%s9805_s5 + $0x838] sm:$0xff] }
 0x3bd   :  { %6025 = vmatpush1.bf16.msra.mxu0 %v7085_v26  ;;  %5903 = vmatprep.subr.bf16.mxu1 %v7112_v27  ;;  %v6828_v26 = vcombine.high %v2567_v20, %v2583_v21  ;;  %v6834_v27 = vcombine.high %v2570_v22, %v2586_v23  ;;  %v2711_v13 = vld [vmem:[%s9805_s5 + $0x8b8] sm:$0xff] }
 0x3be   :  { %6026 = vmatprep.subr.bf16.mxu0 %v7118_v29  ;;  %v2599_v29 = vld [vmem:[%s9805_s5 + $0x538] sm:$0xff] }
 0x3bf   :  { %v6860_v40 = vcombine.high %v2599_v29, %v2615_v30  ;;  %v6859_v50 = vcombine.low %v2599_v29, %v2615_v30 }
 0x3c0   :  { %5904 = vmatpush1.bf16.msra.mxu1 %v7111_v35  ;;  %v6827_v35 = vcombine.low %v2567_v20, %v2583_v21  ;;  %v6956_v20 = vcombine.high %v2695_v12, %v2711_v13 }
 0x3c1   :  { %6027 = vmatpush1.bf16.msra.mxu0 %v7117_v36  ;;  %5905 = vmatprep.subr.bf16.mxu1 %v7144_v37  ;;  %v8913_v36 = vld [vmem:[%s9806_s6] sm:$0xff]  ;;  %v8916_v37 = vsub.s32 5, %v7989_v33 }
 0x3c2   :  { %6028 = vmatprep.subr.bf16.mxu0 %v7150_v39  ;;  %v6833_v39 = vcombine.low %v2570_v22, %v2586_v23  ;;  %v2959_v51 = vrot.slane %v8913_v36, %v8006_v41  ;;  %v2727_v22 = vld [vmem:[%s9805_s5 + $0x938] sm:$0xff] }
 0x3c3   :  { %v2975_v52 = vrot.slane %v8913_v36, %v8916_v37  ;;  %v2743_v23 = vld [vmem:[%s9805_s5 + $0x9b8] sm:$0xff] }
 0x3c4   :  { %5906 = vmatpush1.bf16.msra.mxu1 %v7143_v46  ;;  %v2955_v46 = vrot.slane %v8913_v36, %v7998_v38  ;;  %v6988_v29 = vcombine.high %v2727_v22, %v2743_v23 }
 0x3c5   :  { %6029 = vmatpush1.bf16.msra.mxu0 %v7149_v47  ;;  %5907 = vmatprep.subr.bf16.mxu1 %v7176_v48  ;;  %v2971_v47 = vrot.slane %v8913_v36, %v8902_v31  ;;  %v2634_v48 = vld [vmem:[%s9805_s5 + $0x650] sm:$0xff] }
 0x3c6   :  { %6030 = vmatprep.subr.bf16.mxu0 %v7182_v49  ;;  %v2650_v49 = vld [vmem:[%s9805_s5 + $0x6d0] sm:$0xff] }
 0x3c8   :  { %5908 = vmatpush1.bf16.msra.mxu1 %v7175_v54  ;;  %v6892_v54 = vcombine.high %v2631_v44, %v2647_v45 }
 0x3c9   :  { %6031 = vmatpush1.bf16.msra.mxu0 %v7181_v55  ;;  %5959 = vmatprep.subr.bf16.mxu1 %v6700_v56 }
 0x3ca   :  { %6082 = vmatprep.subr.bf16.mxu0 %v6706_v57  ;;  %v6898_v57 = vcombine.high %v2634_v48, %v2650_v49 }
 0x3cb   :  { %5910 = vmatmul.mubr.bf16.vlgmr.msra.gmra.mrb[16].mxu1 %v8263_v16 }
 0x3cc   :  { %6033 = vmatmul.mubr.bf16.vlgmr.msra.gmra.mrb[20].mxu0 %v8263_v16  ;;  %5960 = vmatpush1.bf16.msra.mxu1 %v6699_v60 }
 0x3cd   :  { %5991 = vmatprep.mubr.bf16.mxu1 %v8261_v15  ;;  %6083 = vmatpush1.bf16.msra.mxu0 %v6705_v63 }
 0x3ce   :  { %6114 = vmatprep.mubr.bf16.mxu0 %v8261_v15  ;;  %5961 = vmatprep.subr.bf16.mxu1 %v6732_v0  ;;  %v2666_v0 = vld [vmem:[%s9805_s5 + $0x750] sm:$0xff] }
 0x3cf   :  { %6084 = vmatprep.subr.bf16.mxu0 %v6738_v3  ;;  %v6930_v11 = vcombine.high %v2666_v0, %v2682_v1 }
 0x3d0   :  { %5962 = vmatpush1.bf16.msra.mxu1 %v6731_v6  ;;  %v6891_v6 = vcombine.low %v2631_v44, %v2647_v45  ;;  %v7020_v44 = vcombine.high %v2759_v32, %v2775_v34 }
 0x3d1   :  { %6085 = vmatpush1.bf16.msra.mxu0 %v6737_v7  ;;  %5963 = vmatprep.subr.bf16.mxu1 %v6764_v8 }
 0x3d2   :  { %6086 = vmatprep.subr.bf16.mxu0 %v6770_v9  ;;  %v6897_v9 = vcombine.low %v2634_v48, %v2650_v49  ;;  %v2794_v48 = vld [vmem:[%s9805_s5 + $0xb50] sm:$0xff] }
 0x3d3   :  { %v2810_v49 = vld [vmem:[%s9805_s5 + $0xbd0] sm:$0xff] }
 0x3d4   :  { %5964 = vmatpush1.bf16.msra.mxu1 %v6763_v14  ;;  %v2698_v14 = vld [vmem:[%s9805_s5 + $0x850] sm:$0xff] }
 0x3d5   :  { %6087 = vmatpush1.bf16.msra.mxu0 %v6769_v17  ;;  %5965 = vmatprep.subr.bf16.mxu1 %v6796_v18  ;;  %v2714_v17 = vld [vmem:[%s9805_s5 + $0x8d0] sm:$0xff]  ;;  %v6923_v18 = vcombine.low %v2663_v58, %v2679_v59  ;;  %v7057_v59 = vcombine.low %v2794_v48, %v2810_v49 }
 0x3d6   :  { %6088 = vmatprep.subr.bf16.mxu0 %v6802_v19  ;;  %v6929_v19 = vcombine.low %v2666_v0, %v2682_v1  ;;  %v6962_v21 = vcombine.high %v2698_v14, %v2714_v17  ;;  %v2858_v0 = vld [vmem:[%s9805_s5 + $0xd50] sm:$0xff] }
 0x3d7   :  { %v2874_v1 = vld [vmem:[%s9805_s5 + $0xdd0] sm:$0xff] }
 0x3d8   :  { %5966 = vmatpush1.bf16.msra.mxu1 %v6795_v24  ;;  %v2730_v24 = vld [vmem:[%s9805_s5 + $0x950] sm:$0xff] }
 0x3d9   :  { %6089 = vmatpush1.bf16.msra.mxu0 %v6801_v25  ;;  %5967 = vmatprep.subr.bf16.mxu1 %v6828_v26  ;;  %v2746_v25 = vld [vmem:[%s9805_s5 + $0x9d0] sm:$0xff]  ;;  %v6955_v26 = vcombine.low %v2695_v12, %v2711_v13 }
 0x3da   :  { %6090 = vmatprep.subr.bf16.mxu0 %v6834_v27  ;;  %v6961_v27 = vcombine.low %v2698_v14, %v2714_v17  ;;  %v6994_v30 = vcombine.high %v2730_v24, %v2746_v25  ;;  %v2919_v14 = vld [vmem:[%s9805_s5 + $0xf38] sm:$0xff] }
 0x3db   :  { %v2935_v17 = vld [vmem:[%s9805_s5 + $0xfb8] sm:$0xff] }
 0x3dc   :  { %5968 = vmatpush1.bf16.msra.mxu1 %v6827_v35  ;;  %v2762_v35 = vld [vmem:[%s9805_s5 + $0xa50] sm:$0xff] }
 0x3dd   :  { %6091 = vmatpush1.bf16.msra.mxu0 %v6833_v39  ;;  %5969 = vmatprep.subr.bf16.mxu1 %v6860_v40  ;;  %v2778_v39 = vld [vmem:[%s9805_s5 + $0xad0] sm:$0xff]  ;;  %v6987_v40 = vcombine.low %v2727_v22, %v2743_v23  ;;  %v7180_v22 = vcombine.high %v2919_v14, %v2935_v17 }
 0x3de   :  { %v5706_v55 = vpop.f32.mrb[4].mxu1  ;;  %v5788_v56 = vpop.f32.mrb[8].mxu0  ;;  %6092 = vmatprep.subr.bf16.mxu0 %v6866_v43  ;;  %v6993_v43 = vcombine.low %v2730_v24, %v2746_v25  ;;  %v7026_v45 = vcombine.high %v2762_v35, %v2778_v39  ;;  %v2441_v24 = vld [vmem:[%s9805_s5 + $0x48] sm:$0xff] }
 0x3df   :  { %v5707_v60 = vadd.f32 %v5706_v55, %v2955_v46  ;;  %v5789_v61 = vadd.f32 %v5788_v56, %v2971_v47  ;;  %v5708_v62 = vpop.f32.mrb[5].mxu1  ;;  %v5790_v63 = vpop.f32.mrb[9].mxu0  ;;  %v2791_v46 = vld [vmem:[%s9805_s5 + $0xb38] sm:$0xff]  ;;  %v2826_v56 = vld [vmem:[%s9805_s5 + $0xc50] sm:$0xff]  ;;  %v2457_v25 = vld [vmem:[%s9805_s5 + $0xc8] sm:$0xff] }
 0x3e0   :  { %v5709_v2 = vadd.f32 %v5708_v62, %v2959_v51  ;;  %v5791_v3 = vadd.f32 %v5790_v63, %v2975_v52  ;;  %5970 = vmatpush1.bf16.msra.mxu1 %v6859_v50  ;;  %v5710_v4 = vpop.f32.mrb[6].mxu1  ;;  %v5792_v5 = vpop.f32.mrb[10].mxu0  ;;  %v2807_v47 = vld [vmem:[%s9805_s5 + $0xbb8] sm:$0xff]  ;;  %v7019_v50 = vcombine.low %v2759_v32, %v2775_v34  ;;  %v7025_v51 = vcombine.low %v2762_v35, %v2778_v39  ;;  %v2473_v35 = vld [vmem:[%s9805_s5 + $0x148] sm:$0xff] }
 0x3e1   :  { %6328 = vst [vmem:[%s9807_s7] sm:$0xff] %v5707_v60  ;;  %6332 = vst [vmem:[%s9807_s7 + $0x20] sm:$0xff] %v5789_v61  ;;  %6093 = vmatpush1.bf16.msra.mxu0 %v6865_v53  ;;  %v5711_v7 = vpop.f32.mrb[7].mxu1  ;;  %v5793_v8 = vpop.f32.mrb[11].mxu0  ;;  %5971 = vmatprep.subr.bf16.mxu1 %v6892_v54  ;;  %v7052_v52 = vcombine.high %v2791_v46, %v2807_v47  ;;  %v7058_v53 = vcombine.high %v2794_v48, %v2810_v49  ;;  %v2823_v54 = vld [vmem:[%s9805_s5 + $0xc38] sm:$0xff]  ;;  %v2489_v39 = vld [vmem:[%s9805_s5 + $0x1c8] sm:$0xff] }
 0x3e2   :  { %6329 = vst [vmem:[%s9807_s7 + $0x8] sm:$0xff] %v5709_v2  ;;  %6333 = vst [vmem:[%s9807_s7 + $0x28] sm:$0xff] %v5791_v3  ;;  %6094 = vmatprep.subr.bf16.mxu0 %v6898_v57  ;;  %v2839_v55 = vld [vmem:[%s9805_s5 + $0xcb8] sm:$0xff]  ;;  %v2842_v57 = vld [vmem:[%s9805_s5 + $0xcd0] sm:$0xff]  ;;  %v7051_v58 = vcombine.low %v2791_v46, %v2807_v47  ;;  %v7122_v5 = vcombine.high %v2858_v0, %v2874_v1  ;;  %v6704_v32 = vcombine.high %v2441_v24, %v2457_v25 }
 0x3e3   :  { %v7084_v60 = vcombine.high %v2823_v54, %v2839_v55  ;;  %v7090_v61 = vcombine.high %v2826_v56, %v2842_v57  ;;  %v2855_v62 = vld [vmem:[%s9805_s5 + $0xd38] sm:$0xff]  ;;  %v7083_v2 = vcombine.low %v2823_v54, %v2839_v55  ;;  %v7089_v3 = vcombine.low %v2826_v56, %v2842_v57  ;;  %v2890_v8 = vld [vmem:[%s9805_s5 + $0xe50] sm:$0xff]  ;;  %v2505_v47 = vld [vmem:[%s9805_s5 + $0x248] sm:$0xff] }
 0x3e4   :  { %5972 = vmatpush1.bf16.msra.mxu1 %v6891_v6  ;;  %v2871_v63 = vld [vmem:[%s9805_s5 + $0xdb8] sm:$0xff]  ;;  %v6736_v46 = vcombine.high %v2473_v35, %v2489_v39  ;;  %v2521_v48 = vld [vmem:[%s9805_s5 + $0x2c8] sm:$0xff] }
 0x3e5   :  { %6095 = vmatpush1.bf16.msra.mxu0 %v6897_v9  ;;  %5973 = vmatprep.subr.bf16.mxu1 %v6924_v10  ;;  %v7116_v4 = vcombine.high %v2855_v62, %v2871_v63  ;;  %v2887_v6 = vld [vmem:[%s9805_s5 + $0xe38] sm:$0xff]  ;;  %v2906_v9 = vld [vmem:[%s9805_s5 + $0xed0] sm:$0xff]  ;;  %v7115_v10 = vcombine.low %v2855_v62, %v2871_v63  ;;  %v6768_v54 = vcombine.high %v2505_v47, %v2521_v48  ;;  %v2537_v56 = vld [vmem:[%s9805_s5 + $0x348] sm:$0xff] }
 0x3e6   :  { %6096 = vmatprep.subr.bf16.mxu0 %v6930_v11  ;;  %v2903_v7 = vld [vmem:[%s9805_s5 + $0xeb8] sm:$0xff]  ;;  %v7121_v11 = vcombine.low %v2858_v0, %v2874_v1  ;;  %v7154_v13 = vcombine.high %v2890_v8, %v2906_v9  ;;  %v2553_v57 = vld [vmem:[%s9805_s5 + $0x3c8] sm:$0xff] }
 0x3e7   :  { %v7148_v12 = vcombine.high %v2887_v6, %v2903_v7  ;;  %v6800_v62 = vcombine.high %v2537_v56, %v2553_v57  ;;  %v2569_v0 = vld [vmem:[%s9805_s5 + $0x448] sm:$0xff] }
 0x3e8   :  { %5974 = vmatpush1.bf16.msra.mxu1 %v6923_v18  ;;  %v2922_v18 = vld [vmem:[%s9805_s5 + $0xf50] sm:$0xff]  ;;  %v2585_v1 = vld [vmem:[%s9805_s5 + $0x4c8] sm:$0xff] }
 0x3e9   :  { %6097 = vmatpush1.bf16.msra.mxu0 %v6929_v19  ;;  %5975 = vmatprep.subr.bf16.mxu1 %v6956_v20  ;;  %v2938_v19 = vld [vmem:[%s9805_s5 + $0xfd0] sm:$0xff]  ;;  %v7147_v20 = vcombine.low %v2887_v6, %v2903_v7  ;;  %v6832_v6 = vcombine.high %v2569_v0, %v2585_v1 }
 0x3ea   :  { %6098 = vmatprep.subr.bf16.mxu0 %v6962_v21  ;;  %v7153_v21 = vcombine.low %v2890_v8, %v2906_v9  ;;  %v7186_v23 = vcombine.high %v2922_v18, %v2938_v19  ;;  %v2601_v8 = vld [vmem:[%s9805_s5 + $0x548] sm:$0xff] }
 0x3eb   :  { %v2617_v9 = vld [vmem:[%s9805_s5 + $0x5c8] sm:$0xff] }
 0x3ec   :  { %5976 = vmatpush1.bf16.msra.mxu1 %v6955_v26  ;;  %v2444_v26 = vld [vmem:[%s9805_s5 + $0x60] sm:$0xff] }
 0x3ed   :  { %6099 = vmatpush1.bf16.msra.mxu0 %v6961_v27  ;;  %5977 = vmatprep.subr.bf16.mxu1 %v6988_v29  ;;  %v2460_v27 = vld [vmem:[%s9805_s5 + $0xe0] sm:$0xff]  ;;  %v7179_v29 = vcombine.low %v2919_v14, %v2935_v17  ;;  %v6864_v17 = vcombine.high %v2601_v8, %v2617_v9 }
 0x3ee   :  { %6100 = vmatprep.subr.bf16.mxu0 %v6994_v30  ;;  %v7185_v30 = vcombine.low %v2922_v18, %v2938_v19  ;;  %v6710_v34 = vcombine.high %v2444_v26, %v2460_v27  ;;  %v2633_v19 = vld [vmem:[%s9805_s5 + $0x648] sm:$0xff] }
 0x3f0   :  { %5978 = vmatpush1.bf16.msra.mxu1 %v6987_v40  ;;  %v6703_v40 = vcombine.low %v2441_v24, %v2457_v25  ;;  %v2652_v24 = vld [vmem:[%s9805_s5 + $0x6e0] sm:$0xff]  ;;  %v2967_v25 = vrot.slane %v8913_v36, %v8009_v42 }
 0x3f1   :  { %6101 = vmatpush1.bf16.msra.mxu0 %v6993_v43  ;;  %5979 = vmatprep.subr.bf16.mxu1 %v7020_v44  ;;  %v2476_v43 = vld [vmem:[%s9805_s5 + $0x160] sm:$0xff] }
 0x3f2   :  { %6102 = vmatprep.subr.bf16.mxu0 %v7026_v45  ;;  %v2492_v44 = vld [vmem:[%s9805_s5 + $0x1e0] sm:$0xff]  ;;  %v6709_v45 = vcombine.low %v2444_v26, %v2460_v27  ;;  %v6863_v27 = vcombine.low %v2601_v8, %v2617_v9 }
 0x3f3   :  { %v6742_v49 = vcombine.high %v2476_v43, %v2492_v44 }
 0x3f4   :  { %5980 = vmatpush1.bf16.msra.mxu1 %v7019_v50  ;;  %v2508_v50 = vld [vmem:[%s9805_s5 + $0x260] sm:$0xff] }
 0x3f5   :  { %6103 = vmatpush1.bf16.msra.mxu0 %v7025_v51  ;;  %5981 = vmatprep.subr.bf16.mxu1 %v7052_v52  ;;  %v2524_v51 = vld [vmem:[%s9805_s5 + $0x2e0] sm:$0xff]  ;;  %v6735_v52 = vcombine.low %v2473_v35, %v2489_v39  ;;  %v2665_v39 = vld [vmem:[%s9805_s5 + $0x748] sm:$0xff] }
 0x3f6   :  { %6104 = vmatprep.subr.bf16.mxu0 %v7058_v53  ;;  %v6741_v53 = vcombine.low %v2476_v43, %v2492_v44  ;;  %v6774_v55 = vcombine.high %v2508_v50, %v2524_v51 }
 0x3f8   :  { %5982 = vmatpush1.bf16.msra.mxu1 %v7051_v58  ;;  %v2540_v58 = vld [vmem:[%s9805_s5 + $0x360] sm:$0xff] }
 0x3f9   :  { %6105 = vmatpush1.bf16.msra.mxu0 %v7057_v59  ;;  %5983 = vmatprep.subr.bf16.mxu1 %v7084_v60  ;;  %v2556_v59 = vld [vmem:[%s9805_s5 + $0x3e0] sm:$0xff]  ;;  %v6767_v60 = vcombine.low %v2505_v47, %v2521_v48 }
 0x3fa   :  { %6106 = vmatprep.subr.bf16.mxu0 %v7090_v61  ;;  %v6773_v61 = vcombine.low %v2508_v50, %v2524_v51  ;;  %v6806_v63 = vcombine.high %v2540_v58, %v2556_v59  ;;  %v2668_v47 = vld [vmem:[%s9805_s5 + $0x760] sm:$0xff] }
 0x3fb   :  { %v2684_v48 = vld [vmem:[%s9805_s5 + $0x7e0] sm:$0xff] }
 0x3fc   :  { %5984 = vmatpush1.bf16.msra.mxu1 %v7083_v2  ;;  %v2572_v2 = vld [vmem:[%s9805_s5 + $0x460] sm:$0xff] }
 0x3fd   :  { %6107 = vmatpush1.bf16.msra.mxu0 %v7089_v3  ;;  %5985 = vmatprep.subr.bf16.mxu1 %v7116_v4  ;;  %v2588_v3 = vld [vmem:[%s9805_s5 + $0x4e0] sm:$0xff]  ;;  %v6799_v4 = vcombine.low %v2537_v56, %v2553_v57 }
 0x3fe   :  { %6108 = vmatprep.subr.bf16.mxu0 %v7122_v5  ;;  %v6805_v5 = vcombine.low %v2540_v58, %v2556_v59  ;;  %v6838_v7 = vcombine.high %v2572_v2, %v2588_v3  ;;  %v6837_v14 = vcombine.low %v2572_v2, %v2588_v3  ;;  %v6934_v58 = vcombine.high %v2668_v47, %v2684_v48  ;;  %v2697_v59 = vld [vmem:[%s9805_s5 + $0x848] sm:$0xff] }
 0x3ff   :  { %v2729_v3 = vld [vmem:[%s9805_s5 + $0x948] sm:$0xff] }
 0x400   :  { %5986 = vmatpush1.bf16.msra.mxu1 %v7115_v10  ;;  %v2604_v10 = vld [vmem:[%s9805_s5 + $0x560] sm:$0xff] }
 0x401   :  { %6109 = vmatpush1.bf16.msra.mxu0 %v7121_v11  ;;  %5987 = vmatprep.subr.bf16.mxu1 %v7148_v12  ;;  %v2620_v11 = vld [vmem:[%s9805_s5 + $0x5e0] sm:$0xff]  ;;  %v6831_v12 = vcombine.low %v2569_v0, %v2585_v1  ;;  %v6933_v0 = vcombine.low %v2668_v47, %v2684_v48  ;;  %v2873_v47 = vld [vmem:[%s9805_s5 + $0xdc8] sm:$0xff] }
 0x402   :  { %6110 = vmatprep.subr.bf16.mxu0 %v7154_v13  ;;  %v9137_v13 = vld [vmem:[%s9806_s6 + $0x8] sm:$0xff]  ;;  %v6870_v18 = vcombine.high %v2604_v10, %v2620_v11  ;;  %v2860_v48 = vld [vmem:[%s9805_s5 + $0xd60] sm:$0xff] }
 0x403   :  { %v2991_v26 = vrot.slane %v9137_v13, %v8006_v41 }
 0x404   :  { %5988 = vmatpush1.bf16.msra.mxu1 %v7147_v20  ;;  %v2649_v20 = vld [vmem:[%s9805_s5 + $0x6c8] sm:$0xff] }
 0x405   :  { %6111 = vmatpush1.bf16.msra.mxu0 %v7153_v21  ;;  %5989 = vmatprep.subr.bf16.mxu1 %v7180_v22  ;;  %v2963_v21 = vrot.slane %v8913_v36, %v8101_v28  ;;  %v2987_v22 = vrot.slane %v9137_v13, %v7998_v38 }
 0x406   :  { %6112 = vmatprep.subr.bf16.mxu0 %v7186_v23  ;;  %v2636_v23 = vld [vmem:[%s9805_s5 + $0x660] sm:$0xff] }
 0x407   :  { %v6902_v35 = vcombine.high %v2636_v23, %v2652_v24  ;;  %v6901_v56 = vcombine.low %v2636_v23, %v2652_v24  ;;  %v2809_v23 = vld [vmem:[%s9805_s5 + $0xbc8] sm:$0xff]  ;;  %v2796_v24 = vld [vmem:[%s9805_s5 + $0xb60] sm:$0xff] }
 0x408   :  { %5990 = vmatpush1.bf16.msra.mxu1 %v7179_v29  ;;  %v6869_v29 = vcombine.low %v2604_v10, %v2620_v11  ;;  %v2761_v11 = vld [vmem:[%s9805_s5 + $0xa48] sm:$0xff] }
 0x409   :  { %6113 = vmatpush1.bf16.msra.mxu0 %v7185_v30  ;;  %6041 = vmatprep.subr.bf16.mxu1 %v6704_v32  ;;  %v6896_v30 = vcombine.high %v2633_v19, %v2649_v20 }
 0x40a   :  { %6164 = vmatprep.subr.bf16.mxu0 %v6710_v34 }
 0x40b   :  { %5992 = vmatmul.mubr.bf16.vlgmr.msra.gmra.mrb[20].mxu1 %v8263_v16 }
 0x40c   :  { %6115 = vmatmul.mubr.bf16.vlgmr.msra.gmra.mrb[24].mxu0 %v8263_v16  ;;  %6042 = vmatpush1.bf16.msra.mxu1 %v6703_v40  ;;  %v2681_v40 = vld [vmem:[%s9805_s5 + $0x7c8] sm:$0xff] }
 0x40d   :  { %6073 = vmatprep.mubr.bf16.mxu1 %v8261_v15  ;;  %6165 = vmatpush1.bf16.msra.mxu0 %v6709_v45  ;;  %v6928_v57 = vcombine.high %v2665_v39, %v2681_v40 }
 0x40e   :  { %6196 = vmatprep.mubr.bf16.mxu0 %v8261_v15  ;;  %6043 = vmatprep.subr.bf16.mxu1 %v6736_v46 }
 0x40f   :  { %6166 = vmatprep.subr.bf16.mxu0 %v6742_v49 }
 0x410   :  { %6044 = vmatpush1.bf16.msra.mxu1 %v6735_v52 }
 0x411   :  { %6167 = vmatpush1.bf16.msra.mxu0 %v6741_v53  ;;  %6045 = vmatprep.subr.bf16.mxu1 %v6768_v54  ;;  %v6895_v53 = vcombine.low %v2633_v19, %v2649_v20 }
 0x412   :  { %6168 = vmatprep.subr.bf16.mxu0 %v6774_v55 }
 0x414   :  { %6046 = vmatpush1.bf16.msra.mxu1 %v6767_v60  ;;  %v2713_v60 = vld [vmem:[%s9805_s5 + $0x8c8] sm:$0xff] }
 0x415   :  { %6169 = vmatpush1.bf16.msra.mxu0 %v6773_v61  ;;  %6047 = vmatprep.subr.bf16.mxu1 %v6800_v62  ;;  %v2700_v61 = vld [vmem:[%s9805_s5 + $0x860] sm:$0xff]  ;;  %v6960_v1 = vcombine.high %v2697_v59, %v2713_v60 }
 0x416   :  { %6170 = vmatprep.subr.bf16.mxu0 %v6806_v63  ;;  %v2716_v62 = vld [vmem:[%s9805_s5 + $0x8e0] sm:$0xff]  ;;  %v6927_v63 = vcombine.low %v2665_v39, %v2681_v40 }
 0x417   :  { %v6966_v2 = vcombine.high %v2700_v61, %v2716_v62  ;;  %v6965_v8 = vcombine.low %v2700_v61, %v2716_v62  ;;  %v2844_v39 = vld [vmem:[%s9805_s5 + $0xce0] sm:$0xff]  ;;  %v2921_v62 = vld [vmem:[%s9805_s5 + $0xf48] sm:$0xff] }
 0x418   :  { %6048 = vmatpush1.bf16.msra.mxu1 %v6799_v4  ;;  %v2745_v4 = vld [vmem:[%s9805_s5 + $0x9c8] sm:$0xff] }
 0x419   :  { %6171 = vmatpush1.bf16.msra.mxu0 %v6805_v5  ;;  %6049 = vmatprep.subr.bf16.mxu1 %v6832_v6  ;;  %v2732_v5 = vld [vmem:[%s9805_s5 + $0x960] sm:$0xff]  ;;  %v6992_v9 = vcombine.high %v2729_v3, %v2745_v4 }
 0x41a   :  { %6172 = vmatprep.subr.bf16.mxu0 %v6838_v7  ;;  %v2748_v6 = vld [vmem:[%s9805_s5 + $0x9e0] sm:$0xff]  ;;  %v6959_v7 = vcombine.low %v2697_v59, %v2713_v60 }
 0x41b   :  { %v6998_v10 = vcombine.high %v2732_v5, %v2748_v6  ;;  %v6997_v19 = vcombine.low %v2732_v5, %v2748_v6  ;;  %v2443_v6 = vld [vmem:[%s9805_s5 + $0x58] sm:$0xff] }
 0x41c   :  { %6050 = vmatpush1.bf16.msra.mxu1 %v6831_v12  ;;  %v2777_v12 = vld [vmem:[%s9805_s5 + $0xac8] sm:$0xff] }
 0x41d   :  { %6173 = vmatpush1.bf16.msra.mxu0 %v6837_v14  ;;  %6051 = vmatprep.subr.bf16.mxu1 %v6864_v17  ;;  %v2764_v14 = vld [vmem:[%s9805_s5 + $0xa60] sm:$0xff]  ;;  %v7024_v20 = vcombine.high %v2761_v11, %v2777_v12 }
 0x41e   :  { %v5747_v32 = vpop.f32.mrb[8].mxu1  ;;  %v5870_v34 = vpop.f32.mrb[12].mxu0  ;;  %6174 = vmatprep.subr.bf16.mxu0 %v6870_v18  ;;  %v2780_v17 = vld [vmem:[%s9805_s5 + $0xae0] sm:$0xff]  ;;  %v6991_v18 = vcombine.low %v2729_v3, %v2745_v4 }
 0x41f   :  { %v5748_v43 = vadd.f32 %v5747_v32, %v2963_v21  ;;  %v5871_v44 = vadd.f32 %v5870_v34, %v2987_v22  ;;  %v5749_v45 = vpop.f32.mrb[9].mxu1  ;;  %v5872_v46 = vpop.f32.mrb[13].mxu0  ;;  %v7030_v21 = vcombine.high %v2764_v14, %v2780_v17  ;;  %v2793_v22 = vld [vmem:[%s9805_s5 + $0xb48] sm:$0xff] }
 0x420   :  { %v5750_v49 = vadd.f32 %v5749_v45, %v2967_v25  ;;  %v5873_v50 = vadd.f32 %v5872_v46, %v2991_v26  ;;  %v5751_v51 = vpop.f32.mrb[10].mxu1  ;;  %v5874_v52 = vpop.f32.mrb[14].mxu0  ;;  %6052 = vmatpush1.bf16.msra.mxu1 %v6863_v27  ;;  %v2812_v25 = vld [vmem:[%s9805_s5 + $0xbe0] sm:$0xff]  ;;  %v7023_v26 = vcombine.low %v2761_v11, %v2777_v12  ;;  %v7029_v27 = vcombine.low %v2764_v14, %v2780_v17  ;;  %v2825_v32 = vld [vmem:[%s9805_s5 + $0xc48] sm:$0xff]  ;;  %v2475_v17 = vld [vmem:[%s9805_s5 + $0x158] sm:$0xff] }
 0x421   :  { %6330 = vst [vmem:[%s9807_s7 + $0x10] sm:$0xff] %v5748_v43  ;;  %6336 = vst [vmem:[%s9807_s7 + $0x40] sm:$0xff] %v5871_v44  ;;  %6175 = vmatpush1.bf16.msra.mxu0 %v6869_v29  ;;  %v5752_v54 = vpop.f32.mrb[11].mxu1  ;;  %v5875_v55 = vpop.f32.mrb[15].mxu0  ;;  %6053 = vmatprep.subr.bf16.mxu1 %v6896_v30  ;;  %v7056_v29 = vcombine.high %v2793_v22, %v2809_v23  ;;  %v7062_v30 = vcombine.high %v2796_v24, %v2812_v25  ;;  %v2841_v34 = vld [vmem:[%s9805_s5 + $0xcc8] sm:$0xff] }
 0x422   :  { %6331 = vst [vmem:[%s9807_s7 + $0x18] sm:$0xff] %v5750_v49  ;;  %6337 = vst [vmem:[%s9807_s7 + $0x48] sm:$0xff] %v5873_v50  ;;  %6176 = vmatprep.subr.bf16.mxu0 %v6902_v35  ;;  %v2828_v35 = vld [vmem:[%s9805_s5 + $0xc60] sm:$0xff]  ;;  %v7055_v40 = vcombine.low %v2793_v22, %v2809_v23  ;;  %v7061_v43 = vcombine.low %v2796_v24, %v2812_v25  ;;  %v7088_v44 = vcombine.high %v2825_v32, %v2841_v34  ;;  %v2857_v46 = vld [vmem:[%s9805_s5 + $0xd48] sm:$0xff] }
 0x423   :  { %v7094_v45 = vcombine.high %v2828_v35, %v2844_v39  ;;  %v2876_v49 = vld [vmem:[%s9805_s5 + $0xde0] sm:$0xff]  ;;  %v7087_v50 = vcombine.low %v2825_v32, %v2841_v34  ;;  %v7093_v51 = vcombine.low %v2828_v35, %v2844_v39  ;;  %v7120_v52 = vcombine.high %v2857_v46, %v2873_v47  ;;  %v2889_v54 = vld [vmem:[%s9805_s5 + $0xe48] sm:$0xff]  ;;  %v2507_v24 = vld [vmem:[%s9805_s5 + $0x258] sm:$0xff] }
 0x424   :  { %6054 = vmatpush1.bf16.msra.mxu1 %v6895_v53  ;;  %v7126_v53 = vcombine.high %v2860_v48, %v2876_v49  ;;  %v2905_v55 = vld [vmem:[%s9805_s5 + $0xec8] sm:$0xff]  ;;  %v7125_v59 = vcombine.low %v2860_v48, %v2876_v49  ;;  %v2523_v25 = vld [vmem:[%s9805_s5 + $0x2d8] sm:$0xff] }
 0x425   :  { %6177 = vmatpush1.bf16.msra.mxu0 %v6901_v56  ;;  %6055 = vmatprep.subr.bf16.mxu1 %v6928_v57  ;;  %v2892_v56 = vld [vmem:[%s9805_s5 + $0xe60] sm:$0xff]  ;;  %v7152_v60 = vcombine.high %v2889_v54, %v2905_v55  ;;  %v6772_v34 = vcombine.high %v2507_v24, %v2523_v25  ;;  %v2539_v39 = vld [vmem:[%s9805_s5 + $0x358] sm:$0xff] }
 0x426   :  { %6178 = vmatprep.subr.bf16.mxu0 %v6934_v58  ;;  %v2908_v57 = vld [vmem:[%s9805_s5 + $0xee0] sm:$0xff]  ;;  %v7119_v58 = vcombine.low %v2857_v46, %v2873_v47  ;;  %v2571_v49 = vld [vmem:[%s9805_s5 + $0x458] sm:$0xff] }
 0x427   :  { %v7158_v61 = vcombine.high %v2892_v56, %v2908_v57  ;;  %v7157_v3 = vcombine.low %v2892_v56, %v2908_v57  ;;  %v2603_v57 = vld [vmem:[%s9805_s5 + $0x558] sm:$0xff] }
 0x428   :  { %6056 = vmatpush1.bf16.msra.mxu1 %v6927_v63  ;;  %v2937_v63 = vld [vmem:[%s9805_s5 + $0xfc8] sm:$0xff] }
 0x429   :  { %6179 = vmatpush1.bf16.msra.mxu0 %v6933_v0  ;;  %6057 = vmatprep.subr.bf16.mxu1 %v6960_v1  ;;  %v2924_v0 = vld [vmem:[%s9805_s5 + $0xf60] sm:$0xff]  ;;  %v7184_v4 = vcombine.high %v2921_v62, %v2937_v63 }
 0x42a   :  { %6180 = vmatprep.subr.bf16.mxu0 %v6966_v2  ;;  %v2940_v1 = vld [vmem:[%s9805_s5 + $0xfe0] sm:$0xff]  ;;  %v7151_v2 = vcombine.low %v2889_v54, %v2905_v55 }
 0x42b   :  { %v7190_v5 = vcombine.high %v2924_v0, %v2940_v1  ;;  %v7189_v11 = vcombine.low %v2924_v0, %v2940_v1 }
 0x42c   :  { %6058 = vmatpush1.bf16.msra.mxu1 %v6959_v7  ;;  %v2459_v7 = vld [vmem:[%s9805_s5 + $0xd8] sm:$0xff] }
 0x42d   :  { %6181 = vmatpush1.bf16.msra.mxu0 %v6965_v8  ;;  %6059 = vmatprep.subr.bf16.mxu1 %v6992_v9  ;;  %v2446_v8 = vld [vmem:[%s9805_s5 + $0x70] sm:$0xff]  ;;  %v6708_v12 = vcombine.high %v2443_v6, %v2459_v7 }
 0x42e   :  { %6182 = vmatprep.subr.bf16.mxu0 %v6998_v10  ;;  %v2462_v9 = vld [vmem:[%s9805_s5 + $0xf0] sm:$0xff]  ;;  %v7183_v10 = vcombine.low %v2921_v62, %v2937_v63  ;;  %v9359_v63 = vsub.s32 7, %v7989_v33 }
 0x42f   :  { %v6714_v14 = vcombine.high %v2446_v8, %v2462_v9  ;;  %v6713_v22 = vcombine.low %v2446_v8, %v2462_v9 }
 0x430   :  { %6060 = vmatpush1.bf16.msra.mxu1 %v6991_v18  ;;  %v2491_v18 = vld [vmem:[%s9805_s5 + $0x1d8] sm:$0xff]  ;;  %v2983_v8 = vrot.slane %v8913_v36, %v9359_v63 }
 0x431   :  { %6183 = vmatpush1.bf16.msra.mxu0 %v6997_v19  ;;  %6061 = vmatprep.subr.bf16.mxu1 %v7024_v20  ;;  %v6707_v19 = vcombine.low %v2443_v6, %v2459_v7  ;;  %v2478_v20 = vld [vmem:[%s9805_s5 + $0x170] sm:$0xff]  ;;  %v6740_v23 = vcombine.high %v2475_v17, %v2491_v18  ;;  %v3003_v7 = vrot.slane %v9137_v13, %v8902_v31 }
 0x432   :  { %6184 = vmatprep.subr.bf16.mxu0 %v7030_v21  ;;  %v2494_v21 = vld [vmem:[%s9805_s5 + $0x1f0] sm:$0xff] }
 0x433   :  { %v6745_v32 = vcombine.low %v2478_v20, %v2494_v21  ;;  %v2654_v6 = vld [vmem:[%s9805_s5 + $0x6f0] sm:$0xff] }
 0x434   :  { %6062 = vmatpush1.bf16.msra.mxu1 %v7023_v26  ;;  %v6746_v26 = vcombine.high %v2478_v20, %v2494_v21 }
 0x435   :  { %6185 = vmatpush1.bf16.msra.mxu0 %v7029_v27  ;;  %6063 = vmatprep.subr.bf16.mxu1 %v7056_v29  ;;  %v2510_v27 = vld [vmem:[%s9805_s5 + $0x270] sm:$0xff] }
 0x436   :  { %6186 = vmatprep.subr.bf16.mxu0 %v7062_v30  ;;  %v2526_v29 = vld [vmem:[%s9805_s5 + $0x2f0] sm:$0xff]  ;;  %v6739_v30 = vcombine.low %v2475_v17, %v2491_v18  ;;  %v2667_v18 = vld [vmem:[%s9805_s5 + $0x758] sm:$0xff] }
 0x437   :  { %v6778_v35 = vcombine.high %v2510_v27, %v2526_v29  ;;  %v6777_v46 = vcombine.low %v2510_v27, %v2526_v29 }
 0x438   :  { %6064 = vmatpush1.bf16.msra.mxu1 %v7055_v40  ;;  %v2555_v40 = vld [vmem:[%s9805_s5 + $0x3d8] sm:$0xff] }
 0x439   :  { %6187 = vmatpush1.bf16.msra.mxu0 %v7061_v43  ;;  %6065 = vmatprep.subr.bf16.mxu1 %v7088_v44  ;;  %v2542_v43 = vld [vmem:[%s9805_s5 + $0x370] sm:$0xff]  ;;  %v6804_v47 = vcombine.high %v2539_v39, %v2555_v40 }
 0x43a   :  { %6188 = vmatprep.subr.bf16.mxu0 %v7094_v45  ;;  %v2558_v44 = vld [vmem:[%s9805_s5 + $0x3f0] sm:$0xff]  ;;  %v6771_v45 = vcombine.low %v2507_v24, %v2523_v25 }
 0x43b   :  { %v6810_v48 = vcombine.high %v2542_v43, %v2558_v44  ;;  %v6809_v54 = vcombine.low %v2542_v43, %v2558_v44  ;;  %v2699_v44 = vld [vmem:[%s9805_s5 + $0x858] sm:$0xff] }
 0x43c   :  { %6066 = vmatpush1.bf16.msra.mxu1 %v7087_v50  ;;  %v2587_v50 = vld [vmem:[%s9805_s5 + $0x4d8] sm:$0xff] }
 0x43d   :  { %6189 = vmatpush1.bf16.msra.mxu0 %v7093_v51  ;;  %6067 = vmatprep.subr.bf16.mxu1 %v7120_v52  ;;  %v2574_v51 = vld [vmem:[%s9805_s5 + $0x470] sm:$0xff]  ;;  %v6836_v55 = vcombine.high %v2571_v49, %v2587_v50  ;;  %v6835_v62 = vcombine.low %v2571_v49, %v2587_v50 }
 0x43e   :  { %6190 = vmatprep.subr.bf16.mxu0 %v7126_v53  ;;  %v2590_v52 = vld [vmem:[%s9805_s5 + $0x4f0] sm:$0xff]  ;;  %v6803_v53 = vcombine.low %v2539_v39, %v2555_v40 }
 0x43f   :  { %v6842_v56 = vcombine.high %v2574_v51, %v2590_v52  ;;  %v6841_v0 = vcombine.low %v2574_v51, %v2590_v52  ;;  %v2731_v52 = vld [vmem:[%s9805_s5 + $0x958] sm:$0xff] }
 0x440   :  { %6068 = vmatpush1.bf16.msra.mxu1 %v7119_v58  ;;  %v2619_v58 = vld [vmem:[%s9805_s5 + $0x5d8] sm:$0xff] }
 0x441   :  { %6191 = vmatpush1.bf16.msra.mxu0 %v7125_v59  ;;  %6069 = vmatprep.subr.bf16.mxu1 %v7152_v60  ;;  %v9350_v59 = vsub.s32 6, %v7989_v33  ;;  %v2606_v60 = vld [vmem:[%s9805_s5 + $0x570] sm:$0xff]  ;;  %v6868_v1 = vcombine.high %v2603_v57, %v2619_v58  ;;  %v6867_v9 = vcombine.low %v2603_v57, %v2619_v58 }
 0x442   :  { %6192 = vmatprep.subr.bf16.mxu0 %v7158_v61  ;;  %v2622_v61 = vld [vmem:[%s9805_s5 + $0x5f0] sm:$0xff] }
 0x443   :  { %v2638_v33 = vld [vmem:[%s9805_s5 + $0x670] sm:$0xff] }
 0x444   :  { %6070 = vmatpush1.bf16.msra.mxu1 %v7151_v2  ;;  %v6874_v2 = vcombine.high %v2606_v60, %v2622_v61  ;;  %v6906_v17 = vcombine.high %v2638_v33, %v2654_v6 }
 0x445   :  { %6193 = vmatpush1.bf16.msra.mxu0 %v7157_v3  ;;  %6071 = vmatprep.subr.bf16.mxu1 %v7184_v4  ;;  %v2635_v3 = vld [vmem:[%s9805_s5 + $0x658] sm:$0xff] }
 0x446   :  { %6194 = vmatprep.subr.bf16.mxu0 %v7190_v5  ;;  %v2651_v4 = vld [vmem:[%s9805_s5 + $0x6d8] sm:$0xff]  ;;  %v2979_v5 = vrot.slane %v8913_v36, %v9350_v59 }
 0x447   :  { %v6899_v29 = vcombine.low %v2635_v3, %v2651_v4 }
 0x448   :  { %6072 = vmatpush1.bf16.msra.mxu1 %v7183_v10  ;;  %v3007_v10 = vrot.slane %v9137_v13, %v8916_v37 }
 0x449   :  { %6195 = vmatpush1.bf16.msra.mxu0 %v7189_v11  ;;  %6123 = vmatprep.subr.bf16.mxu1 %v6708_v12  ;;  %v6873_v11 = vcombine.low %v2606_v60, %v2622_v61  ;;  %v6900_v12 = vcombine.high %v2635_v3, %v2651_v4  ;;  %v2763_v61 = vld [vmem:[%s9805_s5 + $0xa58] sm:$0xff] }
 0x44a   :  { %6246 = vmatprep.subr.bf16.mxu0 %v6714_v14 }
 0x44b   :  { %6074 = vmatmul.mubr.bf16.vlgmr.msra.gmra.mrb[24].mxu1 %v8263_v16 }
 0x44c   :  { %6197 = vmatmul.mubr.bf16.vlgmr.msra.gmra.mrb[28].mxu0 %v8263_v16  ;;  %6124 = vmatpush1.bf16.msra.mxu1 %v6707_v19  ;;  %v2683_v19 = vld [vmem:[%s9805_s5 + $0x7d8] sm:$0xff] }
 0x44d   :  { %6155 = vmatprep.mubr.bf16.mxu1 %v8261_v15  ;;  %6247 = vmatpush1.bf16.msra.mxu0 %v6713_v22  ;;  %v2670_v22 = vld [vmem:[%s9805_s5 + $0x770] sm:$0xff]  ;;  %v6932_v39 = vcombine.high %v2667_v18, %v2683_v19 }
 0x44e   :  { %6278 = vmatprep.mubr.bf16.mxu0 %v8261_v15  ;;  %6125 = vmatprep.subr.bf16.mxu1 %v6740_v23  ;;  %v2686_v23 = vld [vmem:[%s9805_s5 + $0x7f0] sm:$0xff] }
 0x44f   :  { %6248 = vmatprep.subr.bf16.mxu0 %v6746_v26  ;;  %v6938_v43 = vcombine.high %v2670_v22, %v2686_v23  ;;  %v6937_v49 = vcombine.low %v2670_v22, %v2686_v23  ;;  %v2859_v23 = vld [vmem:[%s9805_s5 + $0xd58] sm:$0xff] }
 0x450   :  { %6126 = vmatpush1.bf16.msra.mxu1 %v6739_v30 }
 0x451   :  { %6249 = vmatpush1.bf16.msra.mxu0 %v6745_v32  ;;  %6127 = vmatprep.subr.bf16.mxu1 %v6772_v34 }
 0x452   :  { %6250 = vmatprep.subr.bf16.mxu0 %v6778_v35  ;;  %v6905_v35 = vcombine.low %v2638_v33, %v2654_v6  ;;  %v2795_v33 = vld [vmem:[%s9805_s5 + $0xb58] sm:$0xff] }
 0x453   :  { %v2811_v6 = vld [vmem:[%s9805_s5 + $0xbd8] sm:$0xff] }
 0x454   :  { %6128 = vmatpush1.bf16.msra.mxu1 %v6771_v45  ;;  %v2715_v45 = vld [vmem:[%s9805_s5 + $0x8d8] sm:$0xff] }
 0x455   :  { %6251 = vmatpush1.bf16.msra.mxu0 %v6777_v46  ;;  %6129 = vmatprep.subr.bf16.mxu1 %v6804_v47  ;;  %v2702_v46 = vld [vmem:[%s9805_s5 + $0x870] sm:$0xff]  ;;  %v6964_v50 = vcombine.high %v2699_v44, %v2715_v45 }
 0x456   :  { %6252 = vmatprep.subr.bf16.mxu0 %v6810_v48  ;;  %v2718_v47 = vld [vmem:[%s9805_s5 + $0x8f0] sm:$0xff]  ;;  %v6931_v48 = vcombine.low %v2667_v18, %v2683_v19 }
 0x457   :  { %v6970_v51 = vcombine.high %v2702_v46, %v2718_v47  ;;  %v6969_v57 = vcombine.low %v2702_v46, %v2718_v47  ;;  %v2830_v18 = vld [vmem:[%s9805_s5 + $0xc70] sm:$0xff]  ;;  %v2923_v47 = vld [vmem:[%s9805_s5 + $0xf58] sm:$0xff] }
 0x458   :  { %6130 = vmatpush1.bf16.msra.mxu1 %v6803_v53  ;;  %v2747_v53 = vld [vmem:[%s9805_s5 + $0x9d8] sm:$0xff]  ;;  %v2846_v19 = vld [vmem:[%s9805_s5 + $0xcf0] sm:$0xff] }
 0x459   :  { %6253 = vmatpush1.bf16.msra.mxu0 %v6809_v54  ;;  %6131 = vmatprep.subr.bf16.mxu1 %v6836_v55  ;;  %v2734_v54 = vld [vmem:[%s9805_s5 + $0x970] sm:$0xff]  ;;  %v6996_v58 = vcombine.high %v2731_v52, %v2747_v53  ;;  %v7098_v22 = vcombine.high %v2830_v18, %v2846_v19 }
 0x45a   :  { %6254 = vmatprep.subr.bf16.mxu0 %v6842_v56  ;;  %v2750_v55 = vld [vmem:[%s9805_s5 + $0x9f0] sm:$0xff]  ;;  %v6963_v56 = vcombine.low %v2699_v44, %v2715_v45 }
 0x45b   :  { %v7002_v60 = vcombine.high %v2734_v54, %v2750_v55  ;;  %v7001_v3 = vcombine.low %v2734_v54, %v2750_v55  ;;  %v2445_v55 = vld [vmem:[%s9805_s5 + $0x68] sm:$0xff] }
 0x45c   :  { %6132 = vmatpush1.bf16.msra.mxu1 %v6835_v62  ;;  %v2779_v62 = vld [vmem:[%s9805_s5 + $0xad8] sm:$0xff] }
 0x45d   :  { %6255 = vmatpush1.bf16.msra.mxu0 %v6841_v0  ;;  %6133 = vmatprep.subr.bf16.mxu1 %v6868_v1  ;;  %v2766_v0 = vld [vmem:[%s9805_s5 + $0xa70] sm:$0xff]  ;;  %v7028_v4 = vcombine.high %v2763_v61, %v2779_v62 }
 0x45e   :  { %v5829_v14 = vpop.f32.mrb[12].mxu1  ;;  %6256 = vmatprep.subr.bf16.mxu0 %v6874_v2  ;;  %v2782_v1 = vld [vmem:[%s9805_s5 + $0xaf0] sm:$0xff]  ;;  %v6995_v2 = vcombine.low %v2731_v52, %v2747_v53 }
 0x45f   :  { %v5830_v36 = vadd.f32 %v5829_v14, %v2979_v5  ;;  %v5952_v20 = vpop.f32.mrb[16].mxu0  ;;  %v5831_v21 = vpop.f32.mrb[13].mxu1  ;;  %v7034_v5 = vcombine.high %v2766_v0, %v2782_v1  ;;  %v2827_v14 = vld [vmem:[%s9805_s5 + $0xc58] sm:$0xff] }
 0x460   :  { %v5953_v24 = vadd.f32 %v5952_v20, %v3003_v7  ;;  %v5832_v25 = vadd.f32 %v5831_v21, %v2983_v8  ;;  %v5954_v26 = vpop.f32.mrb[17].mxu0  ;;  %v5833_v27 = vpop.f32.mrb[14].mxu1  ;;  %6134 = vmatpush1.bf16.msra.mxu1 %v6867_v9  ;;  %v2798_v7 = vld [vmem:[%s9805_s5 + $0xb70] sm:$0xff]  ;;  %v7027_v9 = vcombine.low %v2763_v61, %v2779_v62  ;;  %v2477_v61 = vld [vmem:[%s9805_s5 + $0x168] sm:$0xff] }
 0x461   :  { %6334 = vst [vmem:[%s9807_s7 + $0x30] sm:$0xff] %v5830_v36  ;;  %v5955_v30 = vadd.f32 %v5954_v26, %v3007_v10  ;;  %v5956_v32 = vpop.f32.mrb[18].mxu0  ;;  %6257 = vmatpush1.bf16.msra.mxu0 %v6873_v11  ;;  %v5834_v34 = vpop.f32.mrb[15].mxu1  ;;  %6135 = vmatprep.subr.bf16.mxu1 %v6900_v12  ;;  %v2814_v8 = vld [vmem:[%s9805_s5 + $0xbf0] sm:$0xff]  ;;  %v7033_v10 = vcombine.low %v2766_v0, %v2782_v1  ;;  %v2493_v62 = vld [vmem:[%s9805_s5 + $0x1e8] sm:$0xff] }
 0x462   :  { %6340 = vst [vmem:[%s9807_s7 + $0x60] sm:$0xff] %v5953_v24  ;;  %6335 = vst [vmem:[%s9807_s7 + $0x38] sm:$0xff] %v5832_v25  ;;  %v5957_v40 = vpop.f32.mrb[19].mxu0  ;;  %6258 = vmatprep.subr.bf16.mxu0 %v6906_v17  ;;  %v7060_v11 = vcombine.high %v2795_v33, %v2811_v6  ;;  %v7066_v12 = vcombine.high %v2798_v7, %v2814_v8  ;;  %v2843_v17 = vld [vmem:[%s9805_s5 + $0xcd8] sm:$0xff]  ;;  %v7059_v36 = vcombine.low %v2795_v33, %v2811_v6  ;;  %v2862_v25 = vld [vmem:[%s9805_s5 + $0xd70] sm:$0xff] }
 0x463   :  { %6341 = vst [vmem:[%s9807_s7 + $0x68] sm:$0xff] %v5955_v30  ;;  %v7065_v20 = vcombine.low %v2798_v7, %v2814_v8  ;;  %v7092_v21 = vcombine.high %v2827_v14, %v2843_v17  ;;  %v2875_v24 = vld [vmem:[%s9805_s5 + $0xdd8] sm:$0xff]  ;;  %v2878_v26 = vld [vmem:[%s9805_s5 + $0xdf0] sm:$0xff]  ;;  %v7091_v27 = vcombine.low %v2827_v14, %v2843_v17  ;;  %v6744_v1 = vcombine.high %v2477_v61, %v2493_v62  ;;  %v2541_v33 = vld [vmem:[%s9805_s5 + $0x368] sm:$0xff] }
 0x464   :  { %6136 = vmatpush1.bf16.msra.mxu1 %v6899_v29  ;;  %v7097_v29 = vcombine.low %v2830_v18, %v2846_v19  ;;  %v7124_v30 = vcombine.high %v2859_v23, %v2875_v24  ;;  %v7130_v32 = vcombine.high %v2862_v25, %v2878_v26  ;;  %v2891_v34 = vld [vmem:[%s9805_s5 + $0xe58] sm:$0xff]  ;;  %v2910_v40 = vld [vmem:[%s9805_s5 + $0xef0] sm:$0xff]  ;;  %v7129_v44 = vcombine.low %v2862_v25, %v2878_v26  ;;  %v2557_v6 = vld [vmem:[%s9805_s5 + $0x3e8] sm:$0xff] }
 0x465   :  { %6259 = vmatpush1.bf16.msra.mxu0 %v6905_v35  ;;  %6137 = vmatprep.subr.bf16.mxu1 %v6932_v39  ;;  %v2907_v35 = vld [vmem:[%s9805_s5 + $0xed8] sm:$0xff]  ;;  %v2894_v39 = vld [vmem:[%s9805_s5 + $0xe70] sm:$0xff]  ;;  %v6808_v8 = vcombine.high %v2541_v33, %v2557_v6  ;;  %v2605_v14 = vld [vmem:[%s9805_s5 + $0x568] sm:$0xff] }
 0x466   :  { %6260 = vmatprep.subr.bf16.mxu0 %v6938_v43  ;;  %v7123_v43 = vcombine.low %v2859_v23, %v2875_v24  ;;  %v7156_v45 = vcombine.high %v2891_v34, %v2907_v35  ;;  %v7162_v46 = vcombine.high %v2894_v39, %v2910_v40  ;;  %v7161_v52 = vcombine.low %v2894_v39, %v2910_v40  ;;  %v2621_v17 = vld [vmem:[%s9805_s5 + $0x5e8] sm:$0xff]  ;;  %v9543_v19 = vld [vmem:[%s9806_s6 + $0x10] sm:$0xff] }
 0x467   :  { %v3019_v23 = vrot.slane %v9543_v19, %v7998_v38  ;;  %v2999_v24 = vrot.slane %v9137_v13, %v8009_v42  ;;  %v6871_v25 = vcombine.low %v2605_v14, %v2621_v17  ;;  %v3023_v26 = vrot.slane %v9543_v19, %v8006_v41 }
 0x468   :  { %6138 = vmatpush1.bf16.msra.mxu1 %v6931_v48  ;;  %v2939_v48 = vld [vmem:[%s9805_s5 + $0xfd8] sm:$0xff] }
 0x469   :  { %6261 = vmatpush1.bf16.msra.mxu0 %v6937_v49  ;;  %6139 = vmatprep.subr.bf16.mxu1 %v6964_v50  ;;  %v2926_v49 = vld [vmem:[%s9805_s5 + $0xf70] sm:$0xff]  ;;  %v7188_v53 = vcombine.high %v2923_v47, %v2939_v48 }
 0x46a   :  { %6262 = vmatprep.subr.bf16.mxu0 %v6970_v51  ;;  %v2942_v50 = vld [vmem:[%s9805_s5 + $0xff0] sm:$0xff]  ;;  %v7155_v51 = vcombine.low %v2891_v34, %v2907_v35 }
 0x46b   :  { %v7194_v54 = vcombine.high %v2926_v49, %v2942_v50 }
 0x46c   :  { %6140 = vmatpush1.bf16.msra.mxu1 %v6963_v56  ;;  %v2461_v56 = vld [vmem:[%s9805_s5 + $0xe8] sm:$0xff] }
 0x46d   :  { %6263 = vmatpush1.bf16.msra.mxu0 %v6969_v57  ;;  %6141 = vmatprep.subr.bf16.mxu1 %v6996_v58  ;;  %v7187_v57 = vcombine.low %v2923_v47, %v2939_v48  ;;  %v7193_v58 = vcombine.low %v2926_v49, %v2942_v50  ;;  %v6711_v0 = vcombine.low %v2445_v55, %v2461_v56 }
 0x46e   :  { %6264 = vmatprep.subr.bf16.mxu0 %v7002_v60  ;;  %v6712_v60 = vcombine.high %v2445_v55, %v2461_v56  ;;  %v2733_v55 = vld [vmem:[%s9805_s5 + $0x968] sm:$0xff] }
 0x46f   :  { %v2749_v56 = vld [vmem:[%s9805_s5 + $0x9e8] sm:$0xff] }
 0x470   :  { %6142 = vmatpush1.bf16.msra.mxu1 %v6995_v2  ;;  %v2509_v2 = vld [vmem:[%s9805_s5 + $0x268] sm:$0xff] }
 0x471   :  { %6265 = vmatpush1.bf16.msra.mxu0 %v7001_v3  ;;  %6143 = vmatprep.subr.bf16.mxu1 %v7028_v4  ;;  %v2525_v3 = vld [vmem:[%s9805_s5 + $0x2e8] sm:$0xff]  ;;  %v6743_v4 = vcombine.low %v2477_v61, %v2493_v62  ;;  %v6999_v62 = vcombine.low %v2733_v55, %v2749_v56 }
 0x472   :  { %6266 = vmatprep.subr.bf16.mxu0 %v7034_v5  ;;  %v6776_v5 = vcombine.high %v2509_v2, %v2525_v3  ;;  %v6775_v7 = vcombine.low %v2509_v2, %v2525_v3  ;;  %v2781_v61 = vld [vmem:[%s9805_s5 + $0xae8] sm:$0xff] }
 0x473   :  { %v2813_v2 = vld [vmem:[%s9805_s5 + $0xbe8] sm:$0xff] }
 0x474   :  { %6144 = vmatpush1.bf16.msra.mxu1 %v7027_v9  ;;  %v2573_v9 = vld [vmem:[%s9805_s5 + $0x468] sm:$0xff] }
 0x475   :  { %6267 = vmatpush1.bf16.msra.mxu0 %v7033_v10  ;;  %6145 = vmatprep.subr.bf16.mxu1 %v7060_v11  ;;  %v2589_v10 = vld [vmem:[%s9805_s5 + $0x4e8] sm:$0xff]  ;;  %v6807_v11 = vcombine.low %v2541_v33, %v2557_v6 }
 0x476   :  { %6268 = vmatprep.subr.bf16.mxu0 %v7066_v12  ;;  %v6840_v12 = vcombine.high %v2573_v9, %v2589_v10  ;;  %v6839_v18 = vcombine.low %v2573_v9, %v2589_v10  ;;  %v2845_v33 = vld [vmem:[%s9805_s5 + $0xce8] sm:$0xff] }
 0x477   :  { %v2877_v9 = vld [vmem:[%s9805_s5 + $0xde8] sm:$0xff] }
 0x478   :  { %6146 = vmatpush1.bf16.msra.mxu1 %v7059_v36  ;;  %v6872_v36 = vcombine.high %v2605_v14, %v2621_v17  ;;  %v2909_v14 = vld [vmem:[%s9805_s5 + $0xee8] sm:$0xff] }
 0x479   :  { %6269 = vmatpush1.bf16.msra.mxu0 %v7065_v20  ;;  %6147 = vmatprep.subr.bf16.mxu1 %v7092_v21  ;;  %v2637_v20 = vld [vmem:[%s9805_s5 + $0x668] sm:$0xff] }
 0x47a   :  { %6270 = vmatprep.subr.bf16.mxu0 %v7098_v22  ;;  %v2653_v21 = vld [vmem:[%s9805_s5 + $0x6e8] sm:$0xff]  ;;  %v2995_v22 = vrot.slane %v9137_v13, %v8101_v28 }
 0x47c   :  { %6148 = vmatpush1.bf16.msra.mxu1 %v7091_v27  ;;  %v6904_v27 = vcombine.high %v2637_v20, %v2653_v21 }
 0x47d   :  { %6271 = vmatpush1.bf16.msra.mxu0 %v7097_v29  ;;  %6149 = vmatprep.subr.bf16.mxu1 %v7124_v30  ;;  %v2669_v30 = vld [vmem:[%s9805_s5 + $0x768] sm:$0xff] }
 0x47e   :  { %6272 = vmatprep.subr.bf16.mxu0 %v7130_v32  ;;  %v2685_v32 = vld [vmem:[%s9805_s5 + $0x7e8] sm:$0xff] }
 0x47f   :  { %v6936_v49 = vcombine.high %v2669_v30, %v2685_v32 }
 0x480   :  { %6150 = vmatpush1.bf16.msra.mxu1 %v7123_v43 }
 0x481   :  { %6273 = vmatpush1.bf16.msra.mxu0 %v7129_v44  ;;  %6151 = vmatprep.subr.bf16.mxu1 %v7156_v45  ;;  %v6903_v45 = vcombine.low %v2637_v20, %v2653_v21  ;;  %v2941_v20 = vld [vmem:[%s9805_s5 + $0xfe8] sm:$0xff] }
 0x482   :  { %6274 = vmatprep.subr.bf16.mxu0 %v7162_v46 }
 0x484   :  { %6152 = vmatpush1.bf16.msra.mxu1 %v7155_v51  ;;  %v2701_v51 = vld [vmem:[%s9805_s5 + $0x868] sm:$0xff] }
 0x485   :  { %6275 = vmatpush1.bf16.msra.mxu0 %v7161_v52  ;;  %6153 = vmatprep.subr.bf16.mxu1 %v7188_v53  ;;  %v2717_v52 = vld [vmem:[%s9805_s5 + $0x8e8] sm:$0xff]  ;;  %v6935_v53 = vcombine.low %v2669_v30, %v2685_v32 }
 0x486   :  { %6276 = vmatprep.subr.bf16.mxu0 %v7194_v54  ;;  %v6968_v54 = vcombine.high %v2701_v51, %v2717_v52 }
 0x488   :  { %6154 = vmatpush1.bf16.msra.mxu1 %v7187_v57  ;;  %v6967_v57 = vcombine.low %v2701_v51, %v2717_v52 }
 0x489   :  { %6277 = vmatpush1.bf16.msra.mxu0 %v7193_v58  ;;  %6205 = vmatprep.subr.bf16.mxu1 %v6712_v60  ;;  %v7000_v58 = vcombine.high %v2733_v55, %v2749_v56  ;;  %v2765_v60 = vld [vmem:[%s9805_s5 + $0xa68] sm:$0xff] }
 0x48a   :  { %v7031_v3 = vcombine.low %v2765_v60, %v2781_v61  ;;  %v7714_v55 = vld [vmem:[%s9806_s6 + $0x8] sm:$0xff] }
 0x48b   :  { %6156 = vmatmul.mubr.bf16.vlgmr.msra.gmra.mrb[28].mxu1 %v8263_v16  ;;  %v3011_v56 = vrot.slane %v7714_v55, %v9350_v59 }
 0x48c   :  { %6279 = vmatmul.mubr.bf16.vlgmr.msra.gmra.mrb[32].mxu0 %v8263_v16  ;;  %6206 = vmatpush1.bf16.msra.mxu1 %v6711_v0  ;;  %v7032_v0 = vcombine.high %v2765_v60, %v2781_v61  ;;  %v3039_v61 = vrot.slane %v9543_v19, %v8916_v37 }
 0x48d   :  { %6237 = vmatprep.mubr.bf16.mxu1 %v8261_v15  ;;  %6207 = vmatprep.subr.bf16.mxu1 %v6744_v1  ;;  %v2797_v1 = vld [vmem:[%s9805_s5 + $0xb68] sm:$0xff] }
 0x48e   :  { %v7063_v6 = vcombine.low %v2797_v1, %v2813_v2 }
 0x490   :  { %6208 = vmatpush1.bf16.msra.mxu1 %v6743_v4  ;;  %v7064_v4 = vcombine.high %v2797_v1, %v2813_v2  ;;  %v2671_v1 = vld [vmem:[%s9805_s5 + $0x778] sm:$0xff] }
 0x491   :  { %6209 = vmatprep.subr.bf16.mxu1 %v6776_v5  ;;  %v2829_v5 = vld [vmem:[%s9805_s5 + $0xc68] sm:$0xff]  ;;  %v2687_v2 = vld [vmem:[%s9805_s5 + $0x7f8] sm:$0xff] }
 0x492   :  { %v7095_v10 = vcombine.low %v2829_v5, %v2845_v33 }
 0x494   :  { %6210 = vmatpush1.bf16.msra.mxu1 %v6775_v7  ;;  %v7096_v7 = vcombine.high %v2829_v5, %v2845_v33 }
 0x495   :  { %6211 = vmatprep.subr.bf16.mxu1 %v6808_v8  ;;  %v2861_v8 = vld [vmem:[%s9805_s5 + $0xd68] sm:$0xff] }
 0x496   :  { %v7127_v17 = vcombine.low %v2861_v8, %v2877_v9 }
 0x498   :  { %6212 = vmatpush1.bf16.msra.mxu1 %v6807_v11  ;;  %v7128_v11 = vcombine.high %v2861_v8, %v2877_v9 }
 0x499   :  { %6213 = vmatprep.subr.bf16.mxu1 %v6840_v12  ;;  %v2893_v12 = vld [vmem:[%s9805_s5 + $0xe68] sm:$0xff] }
 0x49a   :  { %v7159_v21 = vcombine.low %v2893_v12, %v2909_v14 }
 0x49c   :  { %6214 = vmatpush1.bf16.msra.mxu1 %v6839_v18  ;;  %v7160_v18 = vcombine.high %v2893_v12, %v2909_v14  ;;  %v6940_v14 = vcombine.high %v2671_v1, %v2687_v2 }
 0x49d   :  { %6215 = vmatprep.subr.bf16.mxu1 %v6872_v36  ;;  %v2925_v36 = vld [vmem:[%s9805_s5 + $0xf68] sm:$0xff] }
 0x49e   :  { %v5911_v29 = vpop.f32.mrb[16].mxu1 }
 0x49f   :  { %v5912_v34 = vadd.f32 %v5911_v29, %v2995_v22  ;;  %v6034_v35 = vpop.f32.mrb[20].mxu0  ;;  %v5913_v39 = vpop.f32.mrb[17].mxu1  ;;  %v7192_v22 = vcombine.high %v2925_v36, %v2941_v20  ;;  %v2495_v29 = vld [vmem:[%s9805_s5 + $0x1f8] sm:$0xff] }
 0x4a0   :  { %v6035_v40 = vadd.f32 %v6034_v35, %v3019_v23  ;;  %v5914_v13 = vadd.f32 %v5913_v39, %v2999_v24  ;;  %v6036_v43 = vpop.f32.mrb[21].mxu0  ;;  %v5915_v44 = vpop.f32.mrb[18].mxu1  ;;  %6216 = vmatpush1.bf16.msra.mxu1 %v6871_v25  ;;  %v2447_v23 = vld [vmem:[%s9805_s5 + $0x78] sm:$0xff]  ;;  %v7191_v25 = vcombine.low %v2925_v36, %v2941_v20  ;;  %v6939_v20 = vcombine.low %v2671_v1, %v2687_v2 }
 0x4a1   :  { %6338 = vst [vmem:[%s9807_s7 + $0x50] sm:$0xff] %v5912_v34  ;;  %v6037_v46 = vadd.f32 %v6036_v43, %v3023_v26  ;;  %v6038_v47 = vpop.f32.mrb[22].mxu0  ;;  %v5916_v48 = vpop.f32.mrb[19].mxu1  ;;  %6217 = vmatprep.subr.bf16.mxu1 %v6904_v27  ;;  %v2463_v24 = vld [vmem:[%s9805_s5 + $0xf8] sm:$0xff] }
 0x4a2   :  { %6344 = vst [vmem:[%s9807_s7 + $0x80] sm:$0xff] %v6035_v40  ;;  %6339 = vst [vmem:[%s9807_s7 + $0x58] sm:$0xff] %v5914_v13  ;;  %v6039_v50 = vpop.f32.mrb[23].mxu0  ;;  %v6716_v26 = vcombine.high %v2447_v23, %v2463_v24  ;;  %v2479_v27 = vld [vmem:[%s9805_s5 + $0x178] sm:$0xff]  ;;  %v6715_v30 = vcombine.low %v2447_v23, %v2463_v24 }
 0x4a3   :  { %6345 = vst [vmem:[%s9807_s7 + $0x88] sm:$0xff] %v6037_v46  ;;  %v6748_v32 = vcombine.high %v2479_v27, %v2495_v29  ;;  %v2511_v34 = vld [vmem:[%s9805_s5 + $0x278] sm:$0xff]  ;;  %v6747_v39 = vcombine.low %v2479_v27, %v2495_v29 }
 0x4a4   :  { %6218 = vmatpush1.bf16.msra.mxu1 %v6903_v45  ;;  %v2527_v35 = vld [vmem:[%s9805_s5 + $0x2f8] sm:$0xff] }
 0x4a5   :  { %6219 = vmatprep.subr.bf16.mxu1 %v6936_v49  ;;  %v6780_v40 = vcombine.high %v2511_v34, %v2527_v35  ;;  %v2543_v13 = vld [vmem:[%s9805_s5 + $0x378] sm:$0xff]  ;;  %v6779_v44 = vcombine.low %v2511_v34, %v2527_v35 }
 0x4a6   :  { %v2559_v43 = vld [vmem:[%s9805_s5 + $0x3f8] sm:$0xff] }
 0x4a7   :  { %v6812_v45 = vcombine.high %v2543_v13, %v2559_v43  ;;  %v2575_v46 = vld [vmem:[%s9805_s5 + $0x478] sm:$0xff]  ;;  %v6811_v47 = vcombine.low %v2543_v13, %v2559_v43 }
 0x4a8   :  { %6220 = vmatpush1.bf16.msra.mxu1 %v6935_v53  ;;  %v2607_v49 = vld [vmem:[%s9805_s5 + $0x578] sm:$0xff] }
 0x4a9   :  { %6221 = vmatprep.subr.bf16.mxu1 %v6968_v54  ;;  %v2623_v50 = vld [vmem:[%s9805_s5 + $0x5f8] sm:$0xff] }
 0x4aa   :  { %v6876_v52 = vcombine.high %v2607_v49, %v2623_v50  ;;  %v2639_v53 = vld [vmem:[%s9805_s5 + $0x678] sm:$0xff]  ;;  %v6875_v60 = vcombine.low %v2607_v49, %v2623_v50 }
 0x4ab   :  { %v2655_v54 = vld [vmem:[%s9805_s5 + $0x6f8] sm:$0xff] }
 0x4ac   :  { %6222 = vmatpush1.bf16.msra.mxu1 %v6967_v57  ;;  %v3035_v57 = vrot.slane %v9543_v19, %v8902_v31  ;;  %v6907_v9 = vcombine.low %v2639_v53, %v2655_v54  ;;  %v2719_v36 = vld [vmem:[%s9805_s5 + $0x8f8] sm:$0xff] }
 0x4ad   :  { %6223 = vmatprep.subr.bf16.mxu1 %v7000_v58  ;;  %v3015_v58 = vrot.slane %v7714_v55, %v9359_v63  ;;  %v2751_v23 = vld [vmem:[%s9805_s5 + $0x9f8] sm:$0xff] }
 0x4ae   :  { %v2783_v27 = vld [vmem:[%s9805_s5 + $0xaf8] sm:$0xff] }
 0x4af   :  { %v2815_v34 = vld [vmem:[%s9805_s5 + $0xbf8] sm:$0xff] }
 0x4b0   :  { %6224 = vmatpush1.bf16.msra.mxu1 %v6999_v62  ;;  %v6908_v62 = vcombine.high %v2639_v53, %v2655_v54  ;;  %v2847_v13 = vld [vmem:[%s9805_s5 + $0xcf8] sm:$0xff] }
 0x4b1   :  { %6225 = vmatprep.subr.bf16.mxu1 %v7032_v0  ;;  %v2911_v49 = vld [vmem:[%s9805_s5 + $0xef8] sm:$0xff] }
 0x4b2   :  { %v2943_v53 = vld [vmem:[%s9805_s5 + $0xff8] sm:$0xff] }
 0x4b4   :  { %6226 = vmatpush1.bf16.msra.mxu1 %v7031_v3 }
 0x4b5   :  { %6227 = vmatprep.subr.bf16.mxu1 %v7064_v4 }
 0x4b8   :  { %6228 = vmatpush1.bf16.msra.mxu1 %v7063_v6 }
 0x4b9   :  { %6229 = vmatprep.subr.bf16.mxu1 %v7096_v7 }
 0x4bc   :  { %6230 = vmatpush1.bf16.msra.mxu1 %v7095_v10 }
 0x4bd   :  { %6231 = vmatprep.subr.bf16.mxu1 %v7128_v11 }
 0x4c0   :  { %6232 = vmatpush1.bf16.msra.mxu1 %v7127_v17 }
 0x4c1   :  { %6233 = vmatprep.subr.bf16.mxu1 %v7160_v18  ;;  %v2703_v18 = vld [vmem:[%s9805_s5 + $0x878] sm:$0xff] }
 0x4c2   :  { %v6971_v24 = vcombine.low %v2703_v18, %v2719_v36 }
 0x4c4   :  { %6234 = vmatpush1.bf16.msra.mxu1 %v7159_v21  ;;  %v6972_v21 = vcombine.high %v2703_v18, %v2719_v36 }
 0x4c5   :  { %6235 = vmatprep.subr.bf16.mxu1 %v7192_v22  ;;  %v2735_v22 = vld [vmem:[%s9805_s5 + $0x978] sm:$0xff] }
 0x4c6   :  { %v7003_v29 = vcombine.low %v2735_v22, %v2751_v23 }
 0x4c8   :  { %6236 = vmatpush1.bf16.msra.mxu1 %v7191_v25  ;;  %v7004_v25 = vcombine.high %v2735_v22, %v2751_v23 }
 0x4c9   :  { %6287 = vmatprep.subr.bf16.mxu1 %v6716_v26  ;;  %v2767_v26 = vld [vmem:[%s9805_s5 + $0xa78] sm:$0xff] }
 0x4ca   :  { %v7035_v35 = vcombine.low %v2767_v26, %v2783_v27 }
 0x4cb   :  { %6238 = vmatmul.mubr.bf16.vlgmr.msra.gmra.mrb[32].mxu1 %v8263_v16 }
 0x4cc   :  { %6288 = vmatpush1.bf16.msra.mxu1 %v6715_v30  ;;  %6319 = vmatprep.mubr.bf16.mxu1 %v8261_v15  ;;  %v2591_v15 = vld [vmem:[%s9805_s5 + $0x4f8] sm:$0xff]  ;;  %v7036_v30 = vcombine.high %v2767_v26, %v2783_v27 }
 0x4cd   :  { %6289 = vmatprep.subr.bf16.mxu1 %v6748_v32  ;;  %v6844_v48 = vcombine.high %v2575_v46, %v2591_v15  ;;  %v6843_v51 = vcombine.low %v2575_v46, %v2591_v15  ;;  %v2799_v32 = vld [vmem:[%s9805_s5 + $0xb78] sm:$0xff] }
 0x4ce   :  { %v7067_v43 = vcombine.low %v2799_v32, %v2815_v34  ;;  %v2879_v46 = vld [vmem:[%s9805_s5 + $0xdf8] sm:$0xff] }
 0x4d0   :  { %6290 = vmatpush1.bf16.msra.mxu1 %v6747_v39  ;;  %v7068_v39 = vcombine.high %v2799_v32, %v2815_v34 }
 0x4d1   :  { %6291 = vmatprep.subr.bf16.mxu1 %v6780_v40  ;;  %v2831_v40 = vld [vmem:[%s9805_s5 + $0xc78] sm:$0xff] }
 0x4d2   :  { %v7099_v15 = vcombine.low %v2831_v40, %v2847_v13 }
 0x4d4   :  { %6292 = vmatpush1.bf16.msra.mxu1 %v6779_v44  ;;  %v7100_v44 = vcombine.high %v2831_v40, %v2847_v13 }
 0x4d5   :  { %6293 = vmatprep.subr.bf16.mxu1 %v6812_v45  ;;  %v2863_v45 = vld [vmem:[%s9805_s5 + $0xd78] sm:$0xff] }
 0x4d6   :  { %v7131_v50 = vcombine.low %v2863_v45, %v2879_v46 }
 0x4d8   :  { %6294 = vmatpush1.bf16.msra.mxu1 %v6811_v47  ;;  %v7132_v47 = vcombine.high %v2863_v45, %v2879_v46 }
 0x4d9   :  { %6295 = vmatprep.subr.bf16.mxu1 %v6844_v48  ;;  %v2895_v48 = vld [vmem:[%s9805_s5 + $0xe78] sm:$0xff] }
 0x4da   :  { %v7163_v54 = vcombine.low %v2895_v48, %v2911_v49 }
 0x4dc   :  { %6296 = vmatpush1.bf16.msra.mxu1 %v6843_v51  ;;  %v7164_v51 = vcombine.high %v2895_v48, %v2911_v49 }
 0x4dd   :  { %6297 = vmatprep.subr.bf16.mxu1 %v6876_v52  ;;  %v2927_v52 = vld [vmem:[%s9805_s5 + $0xf78] sm:$0xff] }
 0x4de   :  { %v5993_v0 = vpop.f32.mrb[20].mxu1  ;;  %v7196_v55 = vcombine.high %v2927_v52, %v2943_v53 }
 0x4df   :  { %v5994_v3 = vadd.f32 %v5993_v0, %v3011_v56  ;;  %v6116_v4 = vpop.f32.mrb[24].mxu0  ;;  %v5995_v5 = vpop.f32.mrb[21].mxu1  ;;  %v7195_v56 = vcombine.low %v2927_v52, %v2943_v53 }
 0x4e0   :  { %v6117_v33 = vadd.f32 %v6116_v4, %v3035_v57  ;;  %v5996_v6 = vadd.f32 %v5995_v5, %v3015_v58  ;;  %v6118_v7 = vpop.f32.mrb[25].mxu0  ;;  %v5997_v8 = vpop.f32.mrb[22].mxu1  ;;  %6298 = vmatpush1.bf16.msra.mxu1 %v6875_v60  ;;  %v2947_v57 = vld [vmem:[%s9806_s6 + $0x18] sm:$0xff]  ;;  %v3027_v58 = vrot.slane %v9543_v19, %v8101_v28 }
 0x4e1   :  { %6342 = vst [vmem:[%s9807_s7 + $0x70] sm:$0xff] %v5994_v3  ;;  %v6119_v10 = vadd.f32 %v6118_v7, %v3039_v61  ;;  %v6120_v11 = vpop.f32.mrb[26].mxu0  ;;  %v5998_v12 = vpop.f32.mrb[23].mxu1  ;;  %6299 = vmatprep.subr.bf16.mxu1 %v6908_v62  ;;  %v3051_v60 = vrot.slane %v2947_v57, %v7998_v38  ;;  %v3031_v61 = vrot.slane %v9543_v19, %v8009_v42 }
 0x4e2   :  { %6348 = vst [vmem:[%s9807_s7 + $0xa0] sm:$0xff] %v6117_v33  ;;  %6343 = vst [vmem:[%s9807_s7 + $0x78] sm:$0xff] %v5996_v6  ;;  %v6121_v17 = vpop.f32.mrb[27].mxu0  ;;  %v3055_v62 = vrot.slane %v2947_v57, %v8006_v41  ;;  %v3043_v8 = vrot.slane %v9543_v19, %v9350_v59  ;;  %v3071_v11 = vrot.slane %v2947_v57, %v8916_v37 }
 0x4e3   :  { %6349 = vst [vmem:[%s9807_s7 + $0xa8] sm:$0xff] %v6119_v10  ;;  %v3047_v10 = vrot.slane %v9543_v19, %v9359_v63  ;;  %v3059_v19 = vrot.slane %v2947_v57, %v8101_v28  ;;  %v3079_v28 = vrot.slane %v2947_v57, %v9359_v63 }
 0x4e4   :  { %6300 = vmatpush1.bf16.msra.mxu1 %v6907_v9  ;;  %v3067_v9 = vrot.slane %v2947_v57, %v8902_v31 }
 0x4e5   :  { %6301 = vmatprep.subr.bf16.mxu1 %v6940_v14 }
 0x4e8   :  { %6302 = vmatpush1.bf16.msra.mxu1 %v6939_v20 }
 0x4e9   :  { %6303 = vmatprep.subr.bf16.mxu1 %v6972_v21 }
 0x4ec   :  { %6304 = vmatpush1.bf16.msra.mxu1 %v6971_v24 }
 0x4ed   :  { %6305 = vmatprep.subr.bf16.mxu1 %v7004_v25  ;;  %v3063_v25 = vrot.slane %v2947_v57, %v8009_v42 }
 0x4f0   :  { %6306 = vmatpush1.bf16.msra.mxu1 %v7003_v29 }
 0x4f1   :  { %6307 = vmatprep.subr.bf16.mxu1 %v7036_v30 }
 0x4f4   :  { %6308 = vmatpush1.bf16.msra.mxu1 %v7035_v35  ;;  %v3075_v35 = vrot.slane %v2947_v57, %v9350_v59 }
 0x4f5   :  { %6309 = vmatprep.subr.bf16.mxu1 %v7068_v39 }
 0x4f8   :  { %6310 = vmatpush1.bf16.msra.mxu1 %v7067_v43 }
 0x4f9   :  { %6311 = vmatprep.subr.bf16.mxu1 %v7100_v44 }
 0x4fc   :  { %6312 = vmatpush1.bf16.msra.mxu1 %v7099_v15 }
 0x4fd   :  { %6313 = vmatprep.subr.bf16.mxu1 %v7132_v47 }
 0x500   :  { %6314 = vmatpush1.bf16.msra.mxu1 %v7131_v50 }
 0x501   :  { %6315 = vmatprep.subr.bf16.mxu1 %v7164_v51 }
 0x504   :  { %6316 = vmatpush1.bf16.msra.mxu1 %v7163_v54 }
 0x505   :  { %6317 = vmatprep.subr.bf16.mxu1 %v7196_v55 }
 0x508   :  { %6318 = vmatpush1.bf16.msra.mxu1 %v7195_v56 }
 0x50b   :  { %6320 = vmatmul.mubr.bf16.vlgmr.msra.gmra.mrb[36].mxu1 %v8263_v16 }
 0x51e   :  { %v6075_v0 = vpop.f32.mrb[24].mxu1 }
 0x51f   :  { %v6076_v1 = vadd.f32 %v6075_v0, %v3027_v58  ;;  %v6198_v2 = vpop.f32.mrb[28].mxu0  ;;  %v6077_v3 = vpop.f32.mrb[25].mxu1 }
 0x520   :  { %v6199_v4 = vadd.f32 %v6198_v2, %v3051_v60  ;;  %v6078_v16 = vadd.f32 %v6077_v3, %v3031_v61  ;;  %v6200_v5 = vpop.f32.mrb[29].mxu0  ;;  %v6079_v33 = vpop.f32.mrb[26].mxu1 }
 0x521   :  { %6346 = vst [vmem:[%s9807_s7 + $0x90] sm:$0xff] %v6076_v1  ;;  %v6201_v6 = vadd.f32 %v6200_v5, %v3055_v62  ;;  %v6202_v7 = vpop.f32.mrb[30].mxu0  ;;  %v6080_v38 = vpop.f32.mrb[27].mxu1 }
 0x522   :  { %6352 = vst [vmem:[%s9807_s7 + $0xc0] sm:$0xff] %v6199_v4  ;;  %6347 = vst [vmem:[%s9807_s7 + $0x98] sm:$0xff] %v6078_v16  ;;  %v6203_v41 = vpop.f32.mrb[31].mxu0 }
 0x523   :  { %6353 = vst [vmem:[%s9807_s7 + $0xc8] sm:$0xff] %v6201_v6 }
 0x55e   :  { %v6157_v12 = vpop.f32.mrb[28].mxu1 }
 0x55f   :  { %v6158_v14 = vadd.f32 %v6157_v12, %v3043_v8  ;;  %v6280_v17 = vpop.f32.mrb[32].mxu0  ;;  %v6159_v18 = vpop.f32.mrb[29].mxu1 }
 0x560   :  { %v6281_v36 = vadd.f32 %v6280_v17, %v3067_v9  ;;  %v6160_v20 = vadd.f32 %v6159_v18, %v3047_v10  ;;  %v6282_v21 = vpop.f32.mrb[33].mxu0  ;;  %v6161_v22 = vpop.f32.mrb[30].mxu1 }
 0x561   :  { %6350 = vst [vmem:[%s9807_s7 + $0xb0] sm:$0xff] %v6158_v14  ;;  %v6283_v23 = vadd.f32 %v6282_v21, %v3071_v11  ;;  %v6284_v24 = vpop.f32.mrb[34].mxu0  ;;  %v6162_v31 = vpop.f32.mrb[31].mxu1 }
 0x562   :  { %6356 = vst [vmem:[%s9807_s7 + $0xe0] sm:$0xff] %v6281_v36  ;;  %6351 = vst [vmem:[%s9807_s7 + $0xb8] sm:$0xff] %v6160_v20  ;;  %v6285_v37 = vpop.f32.mrb[35].mxu0 }
 0x563   :  { %6357 = vst [vmem:[%s9807_s7 + $0xe8] sm:$0xff] %v6283_v23 }
 0x59e   :  { %v6239_v26 = vpop.f32.mrb[32].mxu1 }
 0x59f   :  { %v6240_v27 = vadd.f32 %v6239_v26, %v3059_v19  ;;  %v6241_v29 = vpop.f32.mrb[33].mxu1 }
 0x5a0   :  { %v6242_v30 = vadd.f32 %v6241_v29, %v3063_v25  ;;  %v6243_v32 = vpop.f32.mrb[34].mxu1 }
 0x5a1   :  { %6354 = vst [vmem:[%s9807_s7 + $0xd0] sm:$0xff] %v6240_v27  ;;  %v6244_v34 = vpop.f32.mrb[35].mxu1 }
 0x5a2   :  { %6355 = vst [vmem:[%s9807_s7 + $0xd8] sm:$0xff] %v6242_v30 }
 0x5de   :  { %v6321_v39 = vpop.f32.mrb[36].mxu1 }
 0x5df   :  { %v6322_v42 = vadd.f32 %v6321_v39, %v3075_v35  ;;  %v6323_v40 = vpop.f32.mrb[37].mxu1 }
 0x5e0   :  { %v6324_v13 = vadd.f32 %v6323_v40, %v3079_v28  ;;  %v6325_v43 = vpop.f32.mrb[38].mxu1 }
 0x5e1   :  { %6358 = vst [vmem:[%s9807_s7 + $0xf0] sm:$0xff] %v6322_v42  ;;  %v6326_v44 = vpop.f32.mrb[39].mxu1 }
 0x5e2   :  { %6359 = vst [vmem:[%s9807_s7 + $0xf8] sm:$0xff] %v6324_v13 }
 0x5e3   :  { %6364 = vsyncpa [#allocation3], 1 }

</bundles_post_ra>
